<compile_context>
chip_gen: v7x
topology: tpu7x:2x2x1
jax: 0.10.0
libtpu: 0.0.40
codegen_flags: <defaults>
</compile_context>

<pallas_src>
import functools

import jax
import jax.numpy as jnp
from jax.experimental import pallas as pl
from jax.experimental.pallas import tpu as pltpu


def _round_up(x, m):
    return (x + m - 1) // m * m


# ----------------------------------------------------------------------------
# Fused  Y = [relu](X @ W + b) [* mask]  Pallas kernel
# (used for conv-as-matmul, fc1 with fused dropout, and fc2)
# ----------------------------------------------------------------------------
def _linear_kernel(*refs, apply_relu, has_mask, nk):
    if has_mask:
        x_ref, w_ref, b_ref, m_ref, o_ref = refs
    else:
        x_ref, w_ref, b_ref, o_ref = refs
        m_ref = None

    def finalize(acc):
        y = acc + b_ref[...]
        if apply_relu:
            y = jnp.maximum(y, 0.0)
        if has_mask:
            y = y * m_ref[...]
        o_ref[...] = y

    if nk == 1:
        # Single K tile: no init/accumulate/finalize machinery needed.
        finalize(jnp.dot(x_ref[...], w_ref[...],
                         preferred_element_type=jnp.float32))
    else:
        k = pl.program_id(2)

        @pl.when(k == 0)
        def _():
            o_ref[...] = jnp.zeros_like(o_ref)

        # Accumulate directly into the (f32, k-resident) output block.
        o_ref[...] += jnp.dot(x_ref[...], w_ref[...],
                              preferred_element_type=jnp.float32)

        @pl.when(k == nk - 1)
        def _():
            finalize(o_ref[...])


def fused_linear(x, w, b, *, tm, tn, tk, relu, mask=None,
                 compute_dtype=jnp.float32):
    """x: [M, K]; w: [Kp, Np] pre-padded/cast; b: [1, Np].

    Returns the PADDED [Mp, Np] float32 output; callers slice what they need.
    Only the (small) activation is padded here; under jit this fuses with the
    producer.  If `mask` is given it is multiplied in after the ReLU
    (dropout fusion).
    """
    M, K = x.shape
    Kp, Np = w.shape
    assert Kp % tk == 0 and Np % tn == 0 and K <= Kp
    Mp = _round_up(M, tm)
    xp = jnp.pad(x, ((0, Mp - M), (0, Kp - K))).astype(compute_dtype)

    inputs = [xp, w, b]
    in_specs = [
        pl.BlockSpec((tm, tk), lambda i, j, k: (i, k)),
        pl.BlockSpec((tk, tn), lambda i, j, k: (k, j)),
        pl.BlockSpec((1, tn), lambda i, j, k: (0, j)),
    ]
    if mask is not None:
        mp = jnp.pad(mask.astype(jnp.float32),
                     ((0, Mp - mask.shape[0]), (0, Np - mask.shape[1])))
        inputs.append(mp)
        in_specs.append(pl.BlockSpec((tm, tn), lambda i, j, k: (i, j)))

    nk = Kp // tk
    grid = (Mp // tm, Np // tn, nk)

    return pl.pallas_call(
        functools.partial(_linear_kernel, apply_relu=relu,
                          has_mask=mask is not None, nk=nk),
        out_shape=jax.ShapeDtypeStruct((Mp, Np), jnp.float32),
        grid_spec=pltpu.PrefetchScalarGridSpec(
            num_scalar_prefetch=0,
            grid=grid,
            in_specs=in_specs,
            out_specs=pl.BlockSpec((tm, tn), lambda i, j, k: (i, j)),
        ),
        compiler_params=pltpu.CompilerParams(
            dimension_semantics=("parallel", "parallel", "arbitrary")),
    )(*inputs)


# ----------------------------------------------------------------------------
# One-time parameter preparation (run once at init, NOT per forward)
# ----------------------------------------------------------------------------
def prepare_params(params):
    p = {}
    # conv1: Conv2d(1, 64, (10, 1)) as a [10, 64] matmul weight (f32, K kept
    # at 10 -- no padding, single K tile).
    p["w1"] = params["w1"].reshape(64, 10).T.astype(jnp.float32)          # [10, 64]
    p["b1"] = params["b1"].reshape(1, 64).astype(jnp.float32)

    # conv2: Conv2d(64, 128, (5, 8)) as im2col matmul, rows in (kh, kw, c_in)
    # order; bf16 (MXU-native input dtype), f32 accumulation in-kernel.
    p["w2"] = (params["w2"].transpose(2, 3, 1, 0)
               .reshape(5 * 8 * 64, 128).astype(jnp.bfloat16))            # [2560, 128]
    p["b2"] = params["b2"].reshape(1, 128).astype(jnp.float32)

    # fc1: fold PyTorch's NCHW flatten order (c, h) into the weight so the
    # kernel consumes h2 in its natural (h, c) order (no runtime transpose);
    # pad N 500 -> 512; bf16 halves the HBM-bound 22 MB weight stream.
    fc1 = (params["fc1_w"].reshape(500, 128, 87).transpose(0, 2, 1)
           .reshape(500, 11136).T)                                        # [11136, 500]
    p["fc1_w"] = jnp.pad(fc1, ((0, 0), (0, 12))).astype(jnp.bfloat16)     # [11136, 512]
    p["fc1_b"] = jnp.pad(params["fc1_b"], (0, 12)).reshape(1, 512).astype(jnp.float32)

    # fc2: pad K 500 -> 512 (matches fc1's padded output) and N 5 -> 128.
    p["fc2_w"] = jnp.pad(params["fc2_w"].T,
                         ((0, 12), (0, 123))).astype(jnp.float32)         # [512, 128]
    p["fc2_b"] = jnp.pad(params["fc2_b"], (0, 123)).reshape(1, 128).astype(jnp.float32)
    return p


# ----------------------------------------------------------------------------
# Full forward pass (jit-compiled)
# ----------------------------------------------------------------------------
@functools.partial(jax.jit, static_argnames=("training",))
def cnn_forward(x, prepped, key, training=True):
    # x: NCHW [N, 1, 100, 8] float32
    N = x.shape[0]
    x0 = x[:, 0, :, :]                                                    # [N, 100, 8]

    # ---- conv1: Conv2d(1, 64, (10, 1)) + ReLU ----
    p1 = jnp.stack([x0[:, kh:kh + 91, :] for kh in range(10)], axis=-1)   # [N,91,8,10]
    p1 = p1.reshape(N * 91 * 8, 10)
    h1 = fused_linear(p1, prepped["w1"], prepped["b1"],
                      tm=256, tn=64, tk=10, relu=True)[:N * 91 * 8]
    h1 = h1.reshape(N, 91, 8, 64)                                         # NHWC

    # ---- conv2: Conv2d(64, 128, (5, 8)) + ReLU ----
    # Width kernel covers the full width, so each output row's patch is 5
    # shifted (kw, c)-slabs concatenated along the channel axis: (kh, kw, c).
    p2 = jnp.concatenate(
        [h1[:, kh:kh + 87, :, :].reshape(N, 87, 8 * 64) for kh in range(5)],
        axis=-1)                                                          # [N, 87, 2560]
    p2 = p2.reshape(N * 87, 5 * 8 * 64)
    h2 = fused_linear(p2, prepped["w2"], prepped["b2"],
                      tm=128, tn=128, tk=2560, relu=True,
                      compute_dtype=jnp.bfloat16)[:N * 87]                # [N*87, 128]

    # flatten in (h, c) order; the NCHW (c, h) permutation lives in fc1_w.
    h2 = h2.reshape(N, 87 * 128)                                          # [N, 11136]

    # ---- fc1 + ReLU + dropout (F.dropout default: p=0.5, training) ----
    # TODO(synk): dropout mask comes from jax.random, so it cannot bit-match
    # torch's RNG stream (semantics -- Bernoulli(0.5) keep + 2x scale -- match).
    if training:
        keep = jax.random.bernoulli(key, 0.5, (N, 500))
        mask = keep.astype(jnp.float32) * 2.0
    else:
        mask = None
    h3 = fused_linear(h2, prepped["fc1_w"], prepped["fc1_b"],
                      tm=16, tn=256, tk=3712, relu=True, mask=mask,
                      compute_dtype=jnp.bfloat16)                         # [Mp, 512] padded

    # ---- fc2 (single-tile matmul on the padded h3) ----
    out = fused_linear(h3, prepped["fc2_w"], prepped["fc2_b"],
                       tm=16, tn=128, tk=512, relu=False)
    return out[:N, :5]


def init_params(key):
    ks = jax.random.split(key, 8)
    return {
        "w1": jax.random.normal(ks[0], (64, 1, 10, 1), jnp.float32) * 0.1,
        "b1": jax.random.normal(ks[1], (64,), jnp.float32) * 0.1,
        "w2": jax.random.normal(ks[2], (128, 64, 5, 8), jnp.float32) * 0.02,
        "b2": jax.random.normal(ks[3], (128,), jnp.float32) * 0.02,
        "fc1_w": jax.random.normal(ks[4], (500, 11136), jnp.float32) * 0.01,
        "fc1_b": jax.random.normal(ks[5], (500,), jnp.float32) * 0.01,
        "fc2_w": jax.random.normal(ks[6], (5, 500), jnp.float32) * 0.05,
        "fc2_b": jax.random.normal(ks[7], (5,), jnp.float32) * 0.05,
    }


if __name__ == "__main__":
    key = jax.random.PRNGKey(0)
    k_x, k_p, k_drop = jax.random.split(key, 3)
    # Input shape is dictated by fc1.in_features == 11136 -> (H, W) = (100, 8).
    x = jax.random.normal(k_x, (2, 1, 100, 8), jnp.float32)
    params = init_params(k_p)
    prepped = prepare_params(params)          # one-time weight prep

    out = cnn_forward(x, prepped, k_drop)
    out = jax.block_until_ready(out)
    assert out.shape == (2, 5) and out.dtype == jnp.float32
    print("KERNEL_OK")
</pallas_src>

<mosaic_0001>
module attributes {stable_mosaic.version = 11 : i64} {
  func.func @_linear_kernel(%arg0: i32, %arg1: i32, %arg2: i32, %arg3: memref<256x10xf32, #tpu.memory_space<vmem>>, %arg4: memref<10x64xf32, #tpu.memory_space<vmem>>, %arg5: memref<1x64xf32, #tpu.memory_space<vmem>>, %arg6: memref<256x64xf32, #tpu.memory_space<vmem>>) attributes {dimension_semantics = [#tpu.dimension_semantics<parallel>, #tpu.dimension_semantics<parallel>, #tpu.dimension_semantics<arbitrary>], iteration_bounds = array<i64: 6, 1, 1>, scalar_prefetch = 0 : i64, scratch_operands = 0 : i64, tpu.core_type = #tpu.core_type<tc>, window_params = [{transform_indices = @transform_0, window_bounds = array<i64: 256, 10>}, {transform_indices = @transform_1, window_bounds = array<i64: 10, 64>}, {transform_indices = @transform_2, window_bounds = array<i64: 1, 64>}, {transform_indices = @transform_3, window_bounds = array<i64: 256, 64>}]} {
    %c0 = arith.constant 0 : index
    %c0_0 = arith.constant 0 : index
    %0 = vector.load %arg3[%c0, %c0_0] : memref<256x10xf32, #tpu.memory_space<vmem>>, vector<256x10xf32>
    %c0_1 = arith.constant 0 : index
    %c0_2 = arith.constant 0 : index
    %1 = vector.load %arg4[%c0_1, %c0_2] : memref<10x64xf32, #tpu.memory_space<vmem>>, vector<10x64xf32>
    %cst = arith.constant dense<0.000000e+00> : vector<256x64xf32>
    %2 = tpu.matmul %0, %1, %cst {dimension_numbers = #tpu.dot_dimension_numbers<[1], [0], [0], [1], [0, 0, 1, 1], [], []>} : vector<256x10xf32>, vector<10x64xf32>, vector<256x64xf32> -> vector<256x64xf32>
    %c0_3 = arith.constant 0 : index
    %c0_4 = arith.constant 0 : index
    %3 = vector.load %arg5[%c0_3, %c0_4] : memref<1x64xf32, #tpu.memory_space<vmem>>, vector<1x64xf32>
    %4 = vector.broadcast %3 : vector<1x64xf32> to vector<256x64xf32>
    %5 = arith.addf %2, %4 : vector<256x64xf32>
    %cst_5 = arith.constant 0.000000e+00 : f32
    %6 = vector.broadcast %cst_5 : f32 to vector<256x64xf32>
    %7 = arith.maximumf %5, %6 : vector<256x64xf32>
    %c0_6 = arith.constant 0 : index
    %c0_7 = arith.constant 0 : index
    %8 = vector.load %arg6[%c0_6, %c0_7] : memref<256x64xf32, #tpu.memory_space<vmem>>, vector<256x64xf32>
    tpu.vector_store %arg6[%c0_6, %c0_7], %7 {strides = array<i32>} : memref<256x64xf32, #tpu.memory_space<vmem>>, vector<256x64xf32>,
    return
  }
  func.func @transform_0(%arg0: i32, %arg1: i32, %arg2: i32) -> (i32, i32) {
    %c0_i32 = arith.constant 0 : i32
    return %arg0, %arg2 : i32, i32
  }
  func.func @transform_1(%arg0: i32, %arg1: i32, %arg2: i32) -> (i32, i32) {
    %c0_i32 = arith.constant 0 : i32
    return %arg2, %arg1 : i32, i32
  }
  func.func @transform_2(%arg0: i32, %arg1: i32, %arg2: i32) -> (i32, i32) {
    %c0_i32 = arith.constant 0 : i32
    %c0_i32_0 = arith.constant 0 : i32
    return %c0_i32, %arg1 : i32, i32
  }
  func.func @transform_3(%arg0: i32, %arg1: i32, %arg2: i32) -> (i32, i32) {
    %c0_i32 = arith.constant 0 : i32
    return %arg0, %arg1 : i32, i32
  }
}

module attributes {stable_mosaic.version = 11 : i64} {
  func.func @_linear_kernel(%arg0: i32, %arg1: i32, %arg2: i32, %arg3: memref<128x2560xbf16, #tpu.memory_space<vmem>>, %arg4: memref<2560x128xbf16, #tpu.memory_space<vmem>>, %arg5: memref<1x128xf32, #tpu.memory_space<vmem>>, %arg6: memref<128x128xf32, #tpu.memory_space<vmem>>) attributes {dimension_semantics = [#tpu.dimension_semantics<parallel>, #tpu.dimension_semantics<parallel>, #tpu.dimension_semantics<arbitrary>], iteration_bounds = array<i64: 2, 1, 1>, scalar_prefetch = 0 : i64, scratch_operands = 0 : i64, tpu.core_type = #tpu.core_type<tc>, window_params = [{transform_indices = @transform_0, window_bounds = array<i64: 128, 2560>}, {transform_indices = @transform_1, window_bounds = array<i64: 2560, 128>}, {transform_indices = @transform_2, window_bounds = array<i64: 1, 128>}, {transform_indices = @transform_3, window_bounds = array<i64: 128, 128>}]} {
    %c0 = arith.constant 0 : index
    %c0_0 = arith.constant 0 : index
    %0 = vector.load %arg3[%c0, %c0_0] : memref<128x2560xbf16, #tpu.memory_space<vmem>>, vector<128x2560xbf16>
    %c0_1 = arith.constant 0 : index
    %c0_2 = arith.constant 0 : index
    %1 = vector.load %arg4[%c0_1, %c0_2] : memref<2560x128xbf16, #tpu.memory_space<vmem>>, vector<2560x128xbf16>
    %cst = arith.constant dense<0.000000e+00> : vector<128x128xf32>
    %2 = tpu.matmul %0, %1, %cst {dimension_numbers = #tpu.dot_dimension_numbers<[1], [0], [0], [1], [0, 0, 1, 1], [], []>} : vector<128x2560xbf16>, vector<2560x128xbf16>, vector<128x128xf32> -> vector<128x128xf32>
    %c0_3 = arith.constant 0 : index
    %c0_4 = arith.constant 0 : index
    %3 = vector.load %arg5[%c0_3, %c0_4] : memref<1x128xf32, #tpu.memory_space<vmem>>, vector<1x128xf32>
    %4 = vector.broadcast %3 : vector<1x128xf32> to vector<128x128xf32>
    %5 = arith.addf %2, %4 : vector<128x128xf32>
    %cst_5 = arith.constant 0.000000e+00 : f32
    %6 = vector.broadcast %cst_5 : f32 to vector<128x128xf32>
    %7 = arith.maximumf %5, %6 : vector<128x128xf32>
    %c0_6 = arith.constant 0 : index
    %c0_7 = arith.constant 0 : index
    %8 = vector.load %arg6[%c0_6, %c0_7] : memref<128x128xf32, #tpu.memory_space<vmem>>, vector<128x128xf32>
    tpu.vector_store %arg6[%c0_6, %c0_7], %7 {strides = array<i32>} : memref<128x128xf32, #tpu.memory_space<vmem>>, vector<128x128xf32>,
    return
  }
  func.func @transform_0(%arg0: i32, %arg1: i32, %arg2: i32) -> (i32, i32) {
    %c0_i32 = arith.constant 0 : i32
    return %arg0, %arg2 : i32, i32
  }
  func.func @transform_1(%arg0: i32, %arg1: i32, %arg2: i32) -> (i32, i32) {
    %c0_i32 = arith.constant 0 : i32
    return %arg2, %arg1 : i32, i32
  }
  func.func @transform_2(%arg0: i32, %arg1: i32, %arg2: i32) -> (i32, i32) {
    %c0_i32 = arith.constant 0 : i32
    %c0_i32_0 = arith.constant 0 : i32
    return %c0_i32, %arg1 : i32, i32
  }
  func.func @transform_3(%arg0: i32, %arg1: i32, %arg2: i32) -> (i32, i32) {
    %c0_i32 = arith.constant 0 : i32
    return %arg0, %arg1 : i32, i32
  }
}

module attributes {stable_mosaic.version = 11 : i64} {
  func.func @_linear_kernel(%arg0: i32, %arg1: i32, %arg2: i32, %arg3: memref<16x3712xbf16, #tpu.memory_space<vmem>>, %arg4: memref<3712x256xbf16, #tpu.memory_space<vmem>>, %arg5: memref<1x256xf32, #tpu.memory_space<vmem>>, %arg6: memref<16x256xf32, #tpu.memory_space<vmem>>, %arg7: memref<16x256xf32, #tpu.memory_space<vmem>>) attributes {dimension_semantics = [#tpu.dimension_semantics<parallel>, #tpu.dimension_semantics<parallel>, #tpu.dimension_semantics<arbitrary>], iteration_bounds = array<i64: 1, 2, 3>, scalar_prefetch = 0 : i64, scratch_operands = 0 : i64, tpu.core_type = #tpu.core_type<tc>, window_params = [{transform_indices = @transform_0, window_bounds = array<i64: 16, 3712>}, {transform_indices = @transform_1, window_bounds = array<i64: 3712, 256>}, {transform_indices = @transform_2, window_bounds = array<i64: 1, 256>}, {transform_indices = @transform_3, window_bounds = array<i64: 16, 256>}, {transform_indices = @transform_4, window_bounds = array<i64: 16, 256>}]} {
    %c0_i32 = arith.constant 0 : i32
    %0 = arith.cmpi eq, %arg2, %c0_i32 : i32
    %1 = arith.extui %0 : i1 to i32
    %c0_i32_0 = arith.constant 0 : i32
    %2 = arith.cmpi ne, %1, %c0_i32_0 : i32
    scf.if %2 {
      %cst_9 = arith.constant 0.000000e+00 : f32
      %12 = vector.broadcast %cst_9 : f32 to vector<16x256xf32>
      %c0_10 = arith.constant 0 : index
      %c0_11 = arith.constant 0 : index
      %13 = vector.load %arg7[%c0_10, %c0_11] : memref<16x256xf32, #tpu.memory_space<vmem>>, vector<16x256xf32>
      tpu.vector_store %arg7[%c0_10, %c0_11], %12 {strides = array<i32>} : memref<16x256xf32, #tpu.memory_space<vmem>>, vector<16x256xf32>,
    } else {
    }
    %c0 = arith.constant 0 : index
    %c0_1 = arith.constant 0 : index
    %3 = vector.load %arg7[%c0, %c0_1] : memref<16x256xf32, #tpu.memory_space<vmem>>, vector<16x256xf32>
    %c0_2 = arith.constant 0 : index
    %c0_3 = arith.constant 0 : index
    %4 = vector.load %arg3[%c0_2, %c0_3] : memref<16x3712xbf16, #tpu.memory_space<vmem>>, vector<16x3712xbf16>
    %c0_4 = arith.constant 0 : index
    %c0_5 = arith.constant 0 : index
    %5 = vector.load %arg4[%c0_4, %c0_5] : memref<3712x256xbf16, #tpu.memory_space<vmem>>, vector<3712x256xbf16>
    %cst = arith.constant dense<0.000000e+00> : vector<16x256xf32>
    %6 = tpu.matmul %4, %5, %cst {dimension_numbers = #tpu.dot_dimension_numbers<[1], [0], [0], [1], [0, 0, 1, 1], [], []>} : vector<16x3712xbf16>, vector<3712x256xbf16>, vector<16x256xf32> -> vector<16x256xf32>
    %7 = arith.addf %3, %6 : vector<16x256xf32>
    %c0_6 = arith.constant 0 : index
    %c0_7 = arith.constant 0 : index
    %8 = vector.load %arg7[%c0_6, %c0_7] : memref<16x256xf32, #tpu.memory_space<vmem>>, vector<16x256xf32>
    tpu.vector_store %arg7[%c0_6, %c0_7], %7 {strides = array<i32>} : memref<16x256xf32, #tpu.memory_space<vmem>>, vector<16x256xf32>,
    %c2_i32 = arith.constant 2 : i32
    %9 = arith.cmpi eq, %arg2, %c2_i32 : i32
    %10 = arith.extui %9 : i1 to i32
    %c0_i32_8 = arith.constant 0 : i32
    %11 = arith.cmpi ne, %10, %c0_i32_8 : i32
    scf.if %11 {
      %c0_9 = arith.constant 0 : index
      %c0_10 = arith.constant 0 : index
      %12 = vector.load %arg7[%c0_9, %c0_10] : memref<16x256xf32, #tpu.memory_space<vmem>>, vector<16x256xf32>
      %c0_11 = arith.constant 0 : index
      %c0_12 = arith.constant 0 : index
      %13 = vector.load %arg5[%c0_11, %c0_12] : memref<1x256xf32, #tpu.memory_space<vmem>>, vector<1x256xf32>
      %14 = vector.broadcast %13 : vector<1x256xf32> to vector<16x256xf32>
      %15 = arith.addf %12, %14 : vector<16x256xf32>
      %cst_13 = arith.constant 0.000000e+00 : f32
      %16 = vector.broadcast %cst_13 : f32 to vector<16x256xf32>
      %17 = arith.maximumf %15, %16 : vector<16x256xf32>
      %c0_14 = arith.constant 0 : index
      %c0_15 = arith.constant 0 : index
      %18 = vector.load %arg6[%c0_14, %c0_15] : memref<16x256xf32, #tpu.memory_space<vmem>>, vector<16x256xf32>
      %19 = arith.mulf %17, %18 : vector<16x256xf32>
      %c0_16 = arith.constant 0 : index
      %c0_17 = arith.constant 0 : index
      %20 = vector.load %arg7[%c0_16, %c0_17] : memref<16x256xf32, #tpu.memory_space<vmem>>, vector<16x256xf32>
      tpu.vector_store %arg7[%c0_16, %c0_17], %19 {strides = array<i32>} : memref<16x256xf32, #tpu.memory_space<vmem>>, vector<16x256xf32>,
    } else {
    }
    return
  }
  func.func @transform_0(%arg0: i32, %arg1: i32, %arg2: i32) -> (i32, i32) {
    %c0_i32 = arith.constant 0 : i32
    return %arg0, %arg2 : i32, i32
  }
  func.func @transform_1(%arg0: i32, %arg1: i32, %arg2: i32) -> (i32, i32) {
    %c0_i32 = arith.constant 0 : i32
    return %arg2, %arg1 : i32, i32
  }
  func.func @transform_2(%arg0: i32, %arg1: i32, %arg2: i32) -> (i32, i32) {
    %c0_i32 = arith.constant 0 : i32
    %c0_i32_0 = arith.constant 0 : i32
    return %c0_i32, %arg1 : i32, i32
  }
  func.func @transform_3(%arg0: i32, %arg1: i32, %arg2: i32) -> (i32, i32) {
    %c0_i32 = arith.constant 0 : i32
    return %arg0, %arg1 : i32, i32
  }
  func.func @transform_4(%arg0: i32, %arg1: i32, %arg2: i32) -> (i32, i32) {
    %c0_i32 = arith.constant 0 : i32
    return %arg0, %arg1 : i32, i32
  }
}

module attributes {stable_mosaic.version = 11 : i64} {
  func.func @_linear_kernel(%arg0: i32, %arg1: i32, %arg2: i32, %arg3: memref<16x512xf32, #tpu.memory_space<vmem>>, %arg4: memref<512x128xf32, #tpu.memory_space<vmem>>, %arg5: memref<1x128xf32, #tpu.memory_space<vmem>>, %arg6: memref<16x128xf32, #tpu.memory_space<vmem>>) attributes {dimension_semantics = [#tpu.dimension_semantics<parallel>, #tpu.dimension_semantics<parallel>, #tpu.dimension_semantics<arbitrary>], iteration_bounds = array<i64: 1, 1, 1>, scalar_prefetch = 0 : i64, scratch_operands = 0 : i64, tpu.core_type = #tpu.core_type<tc>, window_params = [{transform_indices = @transform_0, window_bounds = array<i64: 16, 512>}, {transform_indices = @transform_1, window_bounds = array<i64: 512, 128>}, {transform_indices = @transform_2, window_bounds = array<i64: 1, 128>}, {transform_indices = @transform_3, window_bounds = array<i64: 16, 128>}]} {
    %c0 = arith.constant 0 : index
    %c0_0 = arith.constant 0 : index
    %0 = vector.load %arg3[%c0, %c0_0] : memref<16x512xf32, #tpu.memory_space<vmem>>, vector<16x512xf32>
    %c0_1 = arith.constant 0 : index
    %c0_2 = arith.constant 0 : index
    %1 = vector.load %arg4[%c0_1, %c0_2] : memref<512x128xf32, #tpu.memory_space<vmem>>, vector<512x128xf32>
    %cst = arith.constant dense<0.000000e+00> : vector<16x128xf32>
    %2 = tpu.matmul %0, %1, %cst {dimension_numbers = #tpu.dot_dimension_numbers<[1], [0], [0], [1], [0, 0, 1, 1], [], []>} : vector<16x512xf32>, vector<512x128xf32>, vector<16x128xf32> -> vector<16x128xf32>
    %c0_3 = arith.constant 0 : index
    %c0_4 = arith.constant 0 : index
    %3 = vector.load %arg5[%c0_3, %c0_4] : memref<1x128xf32, #tpu.memory_space<vmem>>, vector<1x128xf32>
    %4 = vector.broadcast %3 : vector<1x128xf32> to vector<16x128xf32>
    %5 = arith.addf %2, %4 : vector<16x128xf32>
    %c0_5 = arith.constant 0 : index
    %c0_6 = arith.constant 0 : index
    %6 = vector.load %arg6[%c0_5, %c0_6] : memref<16x128xf32, #tpu.memory_space<vmem>>, vector<16x128xf32>
    tpu.vector_store %arg6[%c0_5, %c0_6], %5 {strides = array<i32>} : memref<16x128xf32, #tpu.memory_space<vmem>>, vector<16x128xf32>,
    return
  }
  func.func @transform_0(%arg0: i32, %arg1: i32, %arg2: i32) -> (i32, i32) {
    %c0_i32 = arith.constant 0 : i32
    return %arg0, %arg2 : i32, i32
  }
  func.func @transform_1(%arg0: i32, %arg1: i32, %arg2: i32) -> (i32, i32) {
    %c0_i32 = arith.constant 0 : i32
    return %arg2, %arg1 : i32, i32
  }
  func.func @transform_2(%arg0: i32, %arg1: i32, %arg2: i32) -> (i32, i32) {
    %c0_i32 = arith.constant 0 : i32
    %c0_i32_0 = arith.constant 0 : i32
    return %c0_i32, %arg1 : i32, i32
  }
  func.func @transform_3(%arg0: i32, %arg1: i32, %arg2: i32) -> (i32, i32) {
    %c0_i32 = arith.constant 0 : i32
    return %arg0, %arg1 : i32, i32
  }
}

</mosaic_0001>

<bundles_post_ra>
// kernel: cnn_forward.4
= control target key start
LH: loop header
LB: loop body
LE: loop exit
PB: predicated region body
PF: predicated region fallthrough
CT: control target
= control target key end

     0   :  { %8 = vsyncpa [#allocation3], 0  ;;  %s1390_s0 = inlined_call_operand.vmem [shape: f32[1536,10], index: 0, kind: input, shape index: {}]   ;;  %s1391_s1 = inlined_call_operand.hbm [shape: f32[10,64], index: 1, kind: input, shape index: {}]   ;;  %s1392_s2 = inlined_call_operand.hbm [shape: f32[1,64], index: 2, kind: input, shape index: {}]   ;;  %s1393_s3 = inlined_call_operand.vmem [shape: f32[1536,64], index: 3, kind: output, shape index: {}]  }
   0x1   :  { %9 = vsyncpa [#allocation5], 0  ;;  %s1104_s12 = smov 0   ;;  %s1106_s13 = smov 0  }
   0x2   :  { %s1108_s14 = smov 0  }
   0x3 LB: > { %s800_s15 = sadd.s32 4294967295, %s1077_s14   ;;  %s34_s16 = sadd.s32 1, %s1073_s13  ;;  %s1077_s14 = sphi %s1108_s14, %s15_s14   ;;  %s1073_s13 = sphi %s1106_s13, %s1403_s13   ;;  %s1069_s12 = sphi %s1104_s12, %s1402_s12  }
   0x4   : > { %p36_p0 = scmp.ge.s32.totalorder %s34_s16, 6  ;;  %p802_p1 = scmp.ge.s32.totalorder %s1077_s14, 1 }
   0x5   : > { %p149_p2 = scmp.lt.s32.totalorder %s1077_s14, 7  ;;  %p1129_p4 = scmp.eq.s32.totalorder %s800_s15, 0 }
   0x6   : > { %s1405_s16 = smov (%p36_p0, %s34_s16), 0  ;;  %s1079_s19 = smov [#allocation2]  }
   0x7   : > { %p1125_p3 = pnand %p802_p1, %p149_p2  ;;  %s165_s20 = sshll.u32 %s1079_s19, 4  ;;  %s166_s20 = int_to_ptr.vmem [resolvable:$true] %s165_s20 }
   0x8   : > { %s1398_s18 = scalar_select %p1129_p4, 1, 0 }
   0x9   : > { %s1397_s17 = scalar_select %p1125_p3, 1, 0 }
   0xa   : > { %p951_p5 = pneg %p1125_p3  ;;  %s1080_s22 = smov [#allocation4]  }
   0xb   : > { %s181_s23 = sshll.u32 %s1080_s22, 4  ;;  %s991_s26 = scalar_lea.hbm %s1391_s1, 256  ;;  %s1141_s23 = int_to_ptr.vmem [resolvable:$true] %s181_s23 }
   0xc   : > { %p1137_p6 = pnand %p1129_p4, %p951_p5  ;;  %p992_p7 = scmp.ne.s32.totalorder %s1391_s1, %s991_s26 }
   0xd   : > { %p998_p11 = scmp.lt.u32.totalorder %s991_s26, %s1391_s1 }
   0xe   : > { %p993_p8 = pneg %p1137_p6 }
  0x10   : > { %p994_p9 = pnand %p993_p8, %p992_p7 }
  0x12   : > { %p995_p10 = pneg %p994_p9 }
  0x14   : > { %p1000_p12 = pnand %p998_p11, %p995_p10 }
  0x16   : > { %1003 = shalt.err (!%p1000_p12)
}
  0x17   : > { %s1004_s4 = scalar_lea.vmem %s166_s20, 256  ;;  %p1012_p2 = scmp.lt.s32.totalorder %s166_s20, %s166_s20 }
  0x18   : > { %p1005_p13 = scmp.ne.s32.totalorder %s166_s20, %s1004_s4  ;;  %p1013_p5 = scmp.lt.s32.totalorder %s1004_s4, %s1004_s4 }
  0x1a   : > { %p1007_p0 = pnand %p1005_p13, %p993_p8  ;;  %p1014_p4 = por %p1013_p5, %p1012_p2 }
  0x1c   : > { %p1008_p1 = pneg %p1007_p0 }
  0x1e   : > { %p1015_p3 = pnand %p1014_p4, %p1008_p1 }
  0x20   : > { %1018 = shalt.err (!%p1015_p3)
}
  0x21   : > { %s1081_s5 = smov 128   ;;  %s1082_s6 = smov 8  }
  0x22   : > { %954 = dma.hbm_to_vmem [thread:$0]  (!%p1137_p6), %s1391_s1, 256, %s166_s20, [#allocation3], %s1081_s5, %s1081_s5, %s1082_s6  }
  0x23   : > { %s1019_s11 = scalar_lea.hbm %s1392_s2, 16 }
  0x24   : > { %p1020_p7 = scmp.ne.s32.totalorder %s1392_s2, %s1019_s11  ;;  %p1026_p9 = scmp.lt.u32.totalorder %s1019_s11, %s1392_s2 }
  0x26   : > { %p1022_p3 = pnand %p1020_p7, %p993_p8 }
  0x28   : > { %p1023_p4 = pneg %p1022_p3 }
  0x2a   : > { %p1028_p10 = pnand %p1026_p9, %p1023_p4 }
  0x2c   : > { %1031 = shalt.err (!%p1028_p10)
}
  0x2d   : > { %s1032_s20 = scalar_lea.vmem %s1141_s23, 16  ;;  %s1039_s25 = scalar_lea.vmem %s1141_s23, 32 }
  0x2e   : > { %p1033_p11 = scmp.ne.s32.totalorder %s1141_s23, %s1032_s20  ;;  %p1040_p0 = scmp.lt.s32.totalorder %s1141_s23, %s1141_s23 }
  0x2f   : > { %p1041_p1 = scmp.lt.s32.totalorder %s1039_s25, %s1032_s20 }
  0x30   : > { %p1035_p12 = pnand %p1033_p11, %p993_p8 }
  0x31   : > { %p1042_p2 = por %p1041_p1, %p1040_p0 }
  0x32   : > { %p1036_p13 = pneg %p1035_p12 }
  0x34   : > { %p1043_p5 = pnand %p1042_p2, %p1036_p13 }
  0x36   : > { %1046 = shalt.err (!%p1043_p5)
}
  0x37   : > { %957 = dma.hbm_to_vmem [thread:$0]  (!%p1137_p6), %s1392_s2, 16, %s1141_s23, [#allocation5]  }
  0x38   : > { %p1400_p7 = scmp.ne.s32.totalorder %s1397_s17, 0 }
  0x39   : > { %p1401_p8 = scmp.ne.s32.totalorder (!%p1400_p7), %s1398_s18, 0 }
  0x3a   : > { %206 = sbr.rel (%p1400_p7) target bundleno = 323 (0x143), region = 32 }
  0x41   : > { %1060 = dma.done.wait (%p1401_p8), [#allocation3], 256  }
  0x42   : > { %1062 = vsyncadd (%p1401_p8), [#allocation3], 4294967040 }
  0x43   : > { %1064 = dma.done.wait (%p1401_p8), [#allocation5], 16  }
  0x44   : > { %1066 = vsyncadd (%p1401_p8), [#allocation5], 4294967280  ;;  %s809_s21 = sshll.u32 %s1069_s12, 5  ;;  %vm397_vm0 = vcmask 1041408   ;;  %vm300_vm1 = vcmask 80896   ;;  %vm1083_vm2 = vmmov 1  }
  0x45   : > { %p241_p3 = scmp.lt.s32.totalorder %s809_s21, 191  ;;  %vm936_vm3 = vmpackc.low %vm397_vm0, %vm1083_vm2  ;;  %v291_v0 = vld [vmem:[#allocation2] sm:$0xff]  ;;  %v292_v1 = vld [vmem:[#allocation2 + $0x8] sm:$0x3]  ;;  %vm658_vm4 = vcmask 523264  }
  0x46   : > { %v935_v3 = vpack.c.bf16 %v292_v1, %v291_v0  ;;  %v1276_v35 = vld [vmem:[#allocation4] ss:$0 sm:$0xff] }
  0x47   : > { %s1407_s21 = smov (!%p241_p3, %s809_s21), 191 }
  0x48   : > { %s810_s17 = sshll.u32 %s1407_s21, 3  ;;  %937 = vmatprep.subr.msk.bf16.mxu0 %vm936_vm3, %v935_v3  ;;  %941 = vmatprep.subr.msk.bf16.mxu1 %vm936_vm3, %v935_v3 }
  0x49   : > { %s1210_s29 = scalar_lea.vmem %s1390_s0, %s810_s17  ;;  %940 = vmatpush3.bf16.msk.msra.mxu0 %vm936_vm3, %v935_v3  ;;  %942 = vmatpush3.bf16.msk.msra.mxu1 %vm936_vm3, %v935_v3  ;;  %s1285_s30 = scalar_lea.vmem %s1393_s3, %s810_s17 }
  0x4a   : > { %v259_v2 = vld [vmem:[%s1210_s29] sm:$0xff]  ;;  %v260_v5 = vld [vmem:[%s1210_s29 + $0x8] sm:$0xff]  ;;  %v261_v7 = vld [vmem:[%s1210_s29 + $0x10] sm:$0xff] }
  0x4b   : > { %887 = vmatprep.mubr.msk.f32.mxu0 %vm300_vm1, %v259_v2  ;;  %v275_v4 = vld [vmem:[%s1210_s29 + $0x80] sm:$0xff]  ;;  %v276_v6 = vld [vmem:[%s1210_s29 + $0x88] sm:$0xff]  ;;  %v277_v8 = vld [vmem:[%s1210_s29 + $0x90] sm:$0xff] }
  0x4c   : > { %911 = vmatprep.mubr.msk.f32.mxu1 %vm300_vm1, %v275_v4  ;;  %888 = vmatmul.mubr.msk.f32.vlgmr.msra.gmra.mrb[0].mxu0 %vm300_vm1, %v260_v5  ;;  %v262_v9 = vld [vmem:[%s1210_s29 + $0x18] sm:$0xff]  ;;  %v263_v11 = vld [vmem:[%s1210_s29 + $0x20] sm:$0xff]  ;;  %v264_v13 = vld [vmem:[%s1210_s29 + $0x28] sm:$0xff] }
  0x4d   : > { %912 = vmatmul.mubr.msk.f32.vlgmr.msra.gmra.mrb[0].mxu1 %vm300_vm1, %v276_v6  ;;  %890 = vmatprep.mubr.msk.f32.mxu0 %vm300_vm1, %v261_v7  ;;  %v278_v10 = vld [vmem:[%s1210_s29 + $0x98] sm:$0xff]  ;;  %v279_v12 = vld [vmem:[%s1210_s29 + $0xa0] sm:$0xff]  ;;  %v280_v14 = vld [vmem:[%s1210_s29 + $0xa8] sm:$0xff] }
  0x4e   : > { %914 = vmatprep.mubr.msk.f32.mxu1 %vm300_vm1, %v277_v8  ;;  %v265_v15 = vld [vmem:[%s1210_s29 + $0x30] sm:$0xff]  ;;  %v266_v17 = vld [vmem:[%s1210_s29 + $0x38] sm:$0xff]  ;;  %v267_v19 = vld [vmem:[%s1210_s29 + $0x40] sm:$0xff] }
  0x4f   : > { %v281_v16 = vld [vmem:[%s1210_s29 + $0xb0] sm:$0xff]  ;;  %v282_v18 = vld [vmem:[%s1210_s29 + $0xb8] sm:$0xff]  ;;  %v283_v20 = vld [vmem:[%s1210_s29 + $0xc0] sm:$0xff] }
  0x50   : > { %891 = vmatmul.mubr.msk.f32.gmra.mrb[2].mxu0 %vm300_vm1, %v262_v9  ;;  %v268_v21 = vld [vmem:[%s1210_s29 + $0x48] sm:$0xff]  ;;  %v269_v23 = vld [vmem:[%s1210_s29 + $0x50] sm:$0xff]  ;;  %v270_v25 = vld [vmem:[%s1210_s29 + $0x58] sm:$0xff] }
  0x51   : > { %915 = vmatmul.mubr.msk.f32.gmra.mrb[2].mxu1 %vm300_vm1, %v278_v10  ;;  %893 = vmatprep.mubr.msk.f32.mxu0 %vm300_vm1, %v263_v11  ;;  %v284_v22 = vld [vmem:[%s1210_s29 + $0xc8] sm:$0xff]  ;;  %v285_v24 = vld [vmem:[%s1210_s29 + $0xd0] sm:$0xff]  ;;  %v286_v26 = vld [vmem:[%s1210_s29 + $0xd8] sm:$0xff] }
  0x52   : > { %917 = vmatprep.mubr.msk.f32.mxu1 %vm300_vm1, %v279_v12  ;;  %v271_v27 = vld [vmem:[%s1210_s29 + $0x60] sm:$0xff]  ;;  %v272_v29 = vld [vmem:[%s1210_s29 + $0x68] sm:$0xff]  ;;  %v273_v31 = vld [vmem:[%s1210_s29 + $0x70] sm:$0xff] }
  0x53   : > { %v287_v28 = vld [vmem:[%s1210_s29 + $0xe0] sm:$0xff]  ;;  %v288_v30 = vld [vmem:[%s1210_s29 + $0xe8] sm:$0xff]  ;;  %v289_v32 = vld [vmem:[%s1210_s29 + $0xf0] sm:$0xff] }
  0x54   : > { %894 = vmatmul.mubr.msk.f32.gmra.mrb[4].mxu0 %vm300_vm1, %v264_v13  ;;  %v274_v33 = vld [vmem:[%s1210_s29 + $0x78] sm:$0xff] }
  0x55   : > { %918 = vmatmul.mubr.msk.f32.gmra.mrb[4].mxu1 %vm300_vm1, %v280_v14  ;;  %896 = vmatprep.mubr.msk.f32.mxu0 %vm300_vm1, %v265_v15  ;;  %v290_v34 = vld [vmem:[%s1210_s29 + $0xf8] sm:$0xff] }
  0x56   : > { %920 = vmatprep.mubr.msk.f32.mxu1 %vm300_vm1, %v281_v16 }
  0x58   : > { %897 = vmatmul.mubr.msk.f32.gmra.mrb[6].mxu0 %vm300_vm1, %v266_v17 }
  0x59   : > { %921 = vmatmul.mubr.msk.f32.gmra.mrb[6].mxu1 %vm300_vm1, %v282_v18  ;;  %899 = vmatprep.mubr.msk.f32.mxu0 %vm300_vm1, %v267_v19 }
  0x5a   : > { %923 = vmatprep.mubr.msk.f32.mxu1 %vm300_vm1, %v283_v20 }
  0x5c   : > { %900 = vmatmul.mubr.msk.f32.gmra.mrb[8].mxu0 %vm300_vm1, %v268_v21 }
  0x5d   : > { %924 = vmatmul.mubr.msk.f32.gmra.mrb[8].mxu1 %vm300_vm1, %v284_v22  ;;  %902 = vmatprep.mubr.msk.f32.mxu0 %vm300_vm1, %v269_v23 }
  0x5e   : > { %926 = vmatprep.mubr.msk.f32.mxu1 %vm300_vm1, %v285_v24 }
  0x60   : > { %903 = vmatmul.mubr.msk.f32.gmra.mrb[10].mxu0 %vm300_vm1, %v270_v25 }
  0x61   : > { %927 = vmatmul.mubr.msk.f32.gmra.mrb[10].mxu1 %vm300_vm1, %v286_v26  ;;  %905 = vmatprep.mubr.msk.f32.mxu0 %vm300_vm1, %v271_v27 }
  0x62   : > { %929 = vmatprep.mubr.msk.f32.mxu1 %vm300_vm1, %v287_v28 }
  0x64   : > { %906 = vmatmul.mubr.msk.f32.gmra.mrb[12].mxu0 %vm300_vm1, %v272_v29 }
  0x65   : > { %930 = vmatmul.mubr.msk.f32.gmra.mrb[12].mxu1 %vm300_vm1, %v288_v30  ;;  %908 = vmatprep.mubr.msk.f32.mxu0 %vm300_vm1, %v273_v31 }
  0x66   : > { %932 = vmatprep.mubr.msk.f32.mxu1 %vm300_vm1, %v289_v32 }
  0x68   : > { %909 = vmatmul.mubr.msk.f32.gmra.mrb[14].mxu0 %vm300_vm1, %v274_v33 }
  0x69   : > { %933 = vmatmul.mubr.msk.f32.gmra.mrb[14].mxu1 %vm300_vm1, %v290_v34 }
 0x11f   : > { %v889_v36 = vpop.f32.mrb[0].mxu0 }
 0x120   : > { %v913_v37 = vpop.f32.mrb[0].mxu1  ;;  %v473_v38 = vadd.f32 %v889_v36, %v1276_v35  ;;  %v467_v40 = vpop.f32.mrb[1].mxu0 }
 0x121   : > { %v553_v39 = vadd.f32 %v913_v37, %v1276_v35  ;;  %v547_v41 = vpop.f32.mrb[1].mxu1  ;;  %v468_v42 = vadd.f32 %v1276_v35, %v467_v40 }
 0x122   : > { %v548_v43 = vadd.f32 %v1276_v35, %v547_v41  ;;  %v627_v44 = vmax.f32 %v473_v38, 0.0 }
 0x123   : > { %v643_v45 = vmax.f32 %v553_v39, 0.0  ;;  %v626_v46 = vmax.f32 %v468_v42, 0.0  ;;  %v892_v48 = vpop.f32.mrb[2].mxu0 }
 0x124   : > { %v642_v47 = vmax.f32 %v548_v43, 0.0  ;;  %v916_v49 = vpop.f32.mrb[2].mxu1  ;;  %660 = vst.msk [vmem:[%s1285_s30 + $0x8] sm:$0xff] %vm658_vm4, %v627_v44  ;;  %v483_v50 = vadd.f32 %v892_v48, %v1276_v35  ;;  %v477_v52 = vpop.f32.mrb[3].mxu0 }
 0x125   : > { %676 = vst.msk [vmem:[%s1285_s30 + $0x88] sm:$0xff] %vm658_vm4, %v643_v45  ;;  %v563_v51 = vadd.f32 %v916_v49, %v1276_v35  ;;  %v557_v53 = vpop.f32.mrb[3].mxu1  ;;  %659 = vst.msk [vmem:[%s1285_s30] sm:$0xff] %vm658_vm4, %v626_v46  ;;  %v478_v54 = vadd.f32 %v1276_v35, %v477_v52 }
 0x126   : > { %675 = vst.msk [vmem:[%s1285_s30 + $0x80] sm:$0xff] %vm658_vm4, %v642_v47  ;;  %v558_v55 = vadd.f32 %v1276_v35, %v557_v53  ;;  %v629_v56 = vmax.f32 %v483_v50, 0.0 }
 0x127   : > { %v645_v57 = vmax.f32 %v563_v51, 0.0  ;;  %v628_v58 = vmax.f32 %v478_v54, 0.0  ;;  %v895_v60 = vpop.f32.mrb[4].mxu0 }
 0x128   : > { %v644_v59 = vmax.f32 %v558_v55, 0.0  ;;  %v919_v61 = vpop.f32.mrb[4].mxu1  ;;  %662 = vst.msk [vmem:[%s1285_s30 + $0x18] sm:$0xff] %vm658_vm4, %v629_v56  ;;  %v493_v62 = vadd.f32 %v895_v60, %v1276_v35  ;;  %v487_v0 = vpop.f32.mrb[5].mxu0 }
 0x129   : > { %678 = vst.msk [vmem:[%s1285_s30 + $0x98] sm:$0xff] %vm658_vm4, %v645_v57  ;;  %v573_v63 = vadd.f32 %v919_v61, %v1276_v35  ;;  %v567_v1 = vpop.f32.mrb[5].mxu1  ;;  %661 = vst.msk [vmem:[%s1285_s30 + $0x10] sm:$0xff] %vm658_vm4, %v628_v58  ;;  %v488_v2 = vadd.f32 %v1276_v35, %v487_v0 }
 0x12a   : > { %677 = vst.msk [vmem:[%s1285_s30 + $0x90] sm:$0xff] %vm658_vm4, %v644_v59  ;;  %v568_v3 = vadd.f32 %v1276_v35, %v567_v1  ;;  %v631_v4 = vmax.f32 %v493_v62, 0.0 }
 0x12b   : > { %v647_v5 = vmax.f32 %v573_v63, 0.0  ;;  %v630_v6 = vmax.f32 %v488_v2, 0.0  ;;  %v898_v8 = vpop.f32.mrb[6].mxu0 }
 0x12c   : > { %v646_v7 = vmax.f32 %v568_v3, 0.0  ;;  %v922_v9 = vpop.f32.mrb[6].mxu1  ;;  %664 = vst.msk [vmem:[%s1285_s30 + $0x28] sm:$0xff] %vm658_vm4, %v631_v4  ;;  %v503_v10 = vadd.f32 %v898_v8, %v1276_v35  ;;  %v497_v12 = vpop.f32.mrb[7].mxu0 }
 0x12d   : > { %680 = vst.msk [vmem:[%s1285_s30 + $0xa8] sm:$0xff] %vm658_vm4, %v647_v5  ;;  %v583_v11 = vadd.f32 %v922_v9, %v1276_v35  ;;  %v577_v13 = vpop.f32.mrb[7].mxu1  ;;  %663 = vst.msk [vmem:[%s1285_s30 + $0x20] sm:$0xff] %vm658_vm4, %v630_v6  ;;  %v498_v14 = vadd.f32 %v1276_v35, %v497_v12 }
 0x12e   : > { %679 = vst.msk [vmem:[%s1285_s30 + $0xa0] sm:$0xff] %vm658_vm4, %v646_v7  ;;  %v578_v15 = vadd.f32 %v1276_v35, %v577_v13  ;;  %v633_v16 = vmax.f32 %v503_v10, 0.0 }
 0x12f   : > { %v649_v17 = vmax.f32 %v583_v11, 0.0  ;;  %v632_v18 = vmax.f32 %v498_v14, 0.0  ;;  %v901_v20 = vpop.f32.mrb[8].mxu0 }
 0x130   : > { %v648_v19 = vmax.f32 %v578_v15, 0.0  ;;  %v925_v21 = vpop.f32.mrb[8].mxu1  ;;  %666 = vst.msk [vmem:[%s1285_s30 + $0x38] sm:$0xff] %vm658_vm4, %v633_v16  ;;  %v513_v22 = vadd.f32 %v901_v20, %v1276_v35  ;;  %v507_v24 = vpop.f32.mrb[9].mxu0 }
 0x131   : > { %682 = vst.msk [vmem:[%s1285_s30 + $0xb8] sm:$0xff] %vm658_vm4, %v649_v17  ;;  %v593_v23 = vadd.f32 %v925_v21, %v1276_v35  ;;  %v587_v25 = vpop.f32.mrb[9].mxu1  ;;  %665 = vst.msk [vmem:[%s1285_s30 + $0x30] sm:$0xff] %vm658_vm4, %v632_v18  ;;  %v508_v26 = vadd.f32 %v1276_v35, %v507_v24 }
 0x132   : > { %681 = vst.msk [vmem:[%s1285_s30 + $0xb0] sm:$0xff] %vm658_vm4, %v648_v19  ;;  %v588_v27 = vadd.f32 %v1276_v35, %v587_v25  ;;  %v635_v28 = vmax.f32 %v513_v22, 0.0 }
 0x133   : > { %v651_v29 = vmax.f32 %v593_v23, 0.0  ;;  %v634_v30 = vmax.f32 %v508_v26, 0.0  ;;  %v904_v32 = vpop.f32.mrb[10].mxu0 }
 0x134   : > { %v650_v31 = vmax.f32 %v588_v27, 0.0  ;;  %v928_v33 = vpop.f32.mrb[10].mxu1  ;;  %668 = vst.msk [vmem:[%s1285_s30 + $0x48] sm:$0xff] %vm658_vm4, %v635_v28  ;;  %v523_v34 = vadd.f32 %v904_v32, %v1276_v35  ;;  %v517_v37 = vpop.f32.mrb[11].mxu0 }
 0x135   : > { %684 = vst.msk [vmem:[%s1285_s30 + $0xc8] sm:$0xff] %vm658_vm4, %v651_v29  ;;  %v603_v36 = vadd.f32 %v928_v33, %v1276_v35  ;;  %v597_v38 = vpop.f32.mrb[11].mxu1  ;;  %667 = vst.msk [vmem:[%s1285_s30 + $0x40] sm:$0xff] %vm658_vm4, %v634_v30  ;;  %v518_v39 = vadd.f32 %v1276_v35, %v517_v37 }
 0x136   : > { %683 = vst.msk [vmem:[%s1285_s30 + $0xc0] sm:$0xff] %vm658_vm4, %v650_v31  ;;  %v598_v40 = vadd.f32 %v1276_v35, %v597_v38  ;;  %v637_v41 = vmax.f32 %v523_v34, 0.0 }
 0x137   : > { %v653_v42 = vmax.f32 %v603_v36, 0.0  ;;  %v636_v43 = vmax.f32 %v518_v39, 0.0  ;;  %v907_v45 = vpop.f32.mrb[12].mxu0 }
 0x138   : > { %v652_v44 = vmax.f32 %v598_v40, 0.0  ;;  %v931_v46 = vpop.f32.mrb[12].mxu1  ;;  %670 = vst.msk [vmem:[%s1285_s30 + $0x58] sm:$0xff] %vm658_vm4, %v637_v41  ;;  %v533_v47 = vadd.f32 %v907_v45, %v1276_v35  ;;  %v527_v49 = vpop.f32.mrb[13].mxu0 }
 0x139   : > { %686 = vst.msk [vmem:[%s1285_s30 + $0xd8] sm:$0xff] %vm658_vm4, %v653_v42  ;;  %v613_v48 = vadd.f32 %v931_v46, %v1276_v35  ;;  %v607_v50 = vpop.f32.mrb[13].mxu1  ;;  %669 = vst.msk [vmem:[%s1285_s30 + $0x50] sm:$0xff] %vm658_vm4, %v636_v43  ;;  %v528_v51 = vadd.f32 %v1276_v35, %v527_v49 }
 0x13a   : > { %685 = vst.msk [vmem:[%s1285_s30 + $0xd0] sm:$0xff] %vm658_vm4, %v652_v44  ;;  %v608_v52 = vadd.f32 %v1276_v35, %v607_v50  ;;  %v639_v53 = vmax.f32 %v533_v47, 0.0 }
 0x13b   : > { %v655_v54 = vmax.f32 %v613_v48, 0.0  ;;  %v638_v55 = vmax.f32 %v528_v51, 0.0  ;;  %v910_v57 = vpop.f32.mrb[14].mxu0 }
 0x13c   : > { %v654_v56 = vmax.f32 %v608_v52, 0.0  ;;  %v934_v58 = vpop.f32.mrb[14].mxu1  ;;  %672 = vst.msk [vmem:[%s1285_s30 + $0x68] sm:$0xff] %vm658_vm4, %v639_v53  ;;  %v543_v59 = vadd.f32 %v910_v57, %v1276_v35  ;;  %v537_v61 = vpop.f32.mrb[15].mxu0 }
 0x13d   : > { %688 = vst.msk [vmem:[%s1285_s30 + $0xe8] sm:$0xff] %vm658_vm4, %v655_v54  ;;  %v623_v60 = vadd.f32 %v934_v58, %v1276_v35  ;;  %v617_v62 = vpop.f32.mrb[15].mxu1  ;;  %671 = vst.msk [vmem:[%s1285_s30 + $0x60] sm:$0xff] %vm658_vm4, %v638_v55  ;;  %v538_v63 = vadd.f32 %v1276_v35, %v537_v61 }
 0x13e   : > { %687 = vst.msk [vmem:[%s1285_s30 + $0xe0] sm:$0xff] %vm658_vm4, %v654_v56  ;;  %v618_v0 = vadd.f32 %v1276_v35, %v617_v62  ;;  %v641_v1 = vmax.f32 %v543_v59, 0.0 }
 0x13f   : > { %v657_v2 = vmax.f32 %v623_v60, 0.0  ;;  %v640_v3 = vmax.f32 %v538_v63, 0.0 }
 0x140   : > { %v656_v4 = vmax.f32 %v618_v0, 0.0  ;;  %674 = vst.msk [vmem:[%s1285_s30 + $0x78] sm:$0xff] %vm658_vm4, %v641_v1 }
 0x141   : > { %690 = vst.msk [vmem:[%s1285_s30 + $0xf8] sm:$0xff] %vm658_vm4, %v657_v2  ;;  %673 = vst.msk [vmem:[%s1285_s30 + $0x70] sm:$0xff] %vm658_vm4, %v640_v3 }
 0x142   : > { %689 = vst.msk [vmem:[%s1285_s30 + $0xf0] sm:$0xff] %vm658_vm4, %v656_v4 }
 0x143 PF: > { %s15_s14 = sadd.s32 1, %s1077_s14   ;;  %s1402_s12 = smov %s1073_s13 }
 0x144   : > { %p12_p6 = scmp.ge.s32.totalorder %s15_s14, 8   ;;  %s1403_s13 = smov %s1405_s16 }
 0x146   :  { %14 = sbr.rel (!%p12_p6) target bundleno = 3 (0x3), region = 73 }
 0x14d   :  { %719 = vsyncpa [#allocation3], 1 }
 0x14e   :  { %721 = vsyncpa [#allocation3 + $0x1], 1 }
 0x14f   :  { %722 = vsyncpa [#allocation5], 1 }

// kernel: cnn_forward.7
= control target key start
LH: loop header
LB: loop body
LE: loop exit
PB: predicated region body
PF: predicated region fallthrough
CT: control target
= control target key end

     0   :  { %s635_s1 = inlined_call_operand.vmem [shape: f32[512,128], index: 1, kind: input, shape index: {}]   ;;  %s636_s0 = inlined_call_operand.vmem [shape: f32[16,512], index: 0, kind: input, shape index: {}]   ;;  %s637_s2 = inlined_call_operand.vmem [shape: f32[1,128], index: 2, kind: input, shape index: {}]   ;;  %s638_s3 = inlined_call_operand.vmem [shape: f32[16,128], index: 3, kind: output, shape index: {}]  }
   0x1   :  { %v38_v0 = vld [vmem:[%s635_s1 + $0x80] sm:$0xff]  ;;  %v39_v1 = vld [vmem:[%s635_s1 + $0x88] sm:$0xff]  ;;  %v40_v11 = vld [vmem:[%s635_s1 + $0x90] sm:$0xff] }
   0x2   :  { %v22_v2 = vld [vmem:[%s635_s1] sm:$0xff]  ;;  %v326_v3 = vpack.c.bf16 %v39_v1, %v38_v0  ;;  %v23_v4 = vld [vmem:[%s635_s1 + $0x8] sm:$0xff]  ;;  %v41_v13 = vld [vmem:[%s635_s1 + $0x98] sm:$0xff] }
   0x3   :  { %v70_v5 = vld [vmem:[%s635_s1 + $0x180] sm:$0xff]  ;;  %v71_v6 = vld [vmem:[%s635_s1 + $0x188] sm:$0xff]  ;;  %v328_v7 = vpack.c.bf16 %v23_v4, %v22_v2  ;;  %v24_v14 = vld [vmem:[%s635_s1 + $0x10] sm:$0xff]  ;;  %v330_v16 = vpack.c.bf16 %v41_v13, %v40_v11 }
   0x4   :  { %v358_v8 = vpack.c.bf16 %v71_v6, %v70_v5  ;;  %v54_v9 = vld [vmem:[%s635_s1 + $0x100] sm:$0xff]  ;;  %v55_v10 = vld [vmem:[%s635_s1 + $0x108] sm:$0xff]  ;;  %327 = vmatprep.subr.bf16.mxu0 %v326_v3  ;;  %v25_v15 = vld [vmem:[%s635_s1 + $0x18] sm:$0xff] }
   0x5   :  { %v360_v12 = vpack.c.bf16 %v55_v10, %v54_v9  ;;  %329 = vmatpush3.bf16.msra.mxu0 %v328_v7  ;;  %v332_v17 = vpack.c.bf16 %v25_v15, %v24_v14  ;;  %v72_v18 = vld [vmem:[%s635_s1 + $0x190] sm:$0xff]  ;;  %v73_v19 = vld [vmem:[%s635_s1 + $0x198] sm:$0xff]  ;;  %v42_v23 = vld [vmem:[%s635_s1 + $0xa0] sm:$0xff] }
   0x6   :  { %359 = vmatprep.subr.bf16.mxu1 %v358_v8  ;;  %v56_v20 = vld [vmem:[%s635_s1 + $0x110] sm:$0xff]  ;;  %v362_v21 = vpack.c.bf16 %v73_v19, %v72_v18  ;;  %v57_v22 = vld [vmem:[%s635_s1 + $0x118] sm:$0xff]  ;;  %v43_v24 = vld [vmem:[%s635_s1 + $0xa8] sm:$0xff]  ;;  %331 = vmatprep.subr.bf16.mxu0 %v330_v16 }
   0x7   :  { %361 = vmatpush3.bf16.msra.mxu1 %v360_v12  ;;  %v364_v25 = vpack.c.bf16 %v57_v22, %v56_v20  ;;  %v334_v26 = vpack.c.bf16 %v43_v24, %v42_v23  ;;  %v26_v27 = vld [vmem:[%s635_s1 + $0x20] sm:$0xff]  ;;  %v27_v28 = vld [vmem:[%s635_s1 + $0x28] sm:$0xff]  ;;  %v44_v35 = vld [vmem:[%s635_s1 + $0xb0] sm:$0xff] }
   0x8   :  { %v74_v29 = vld [vmem:[%s635_s1 + $0x1a0] sm:$0xff]  ;;  %363 = vmatprep.subr.bf16.mxu1 %v362_v21  ;;  %v75_v30 = vld [vmem:[%s635_s1 + $0x1a8] sm:$0xff]  ;;  %v336_v33 = vpack.c.bf16 %v27_v28, %v26_v27  ;;  %v45_v36 = vld [vmem:[%s635_s1 + $0xb8] sm:$0xff] }
   0x9   :  { %v58_v31 = vld [vmem:[%s635_s1 + $0x120] sm:$0xff]  ;;  %v59_v32 = vld [vmem:[%s635_s1 + $0x128] sm:$0xff]  ;;  %333 = vmatpush3.bf16.msra.mxu0 %v332_v17  ;;  %v366_v34 = vpack.c.bf16 %v75_v30, %v74_v29  ;;  %v28_v37 = vld [vmem:[%s635_s1 + $0x30] sm:$0xff]  ;;  %v338_v39 = vpack.c.bf16 %v45_v36, %v44_v35 }
   0xa   :  { %335 = vmatprep.subr.bf16.mxu0 %v334_v26  ;;  %v368_v38 = vpack.c.bf16 %v59_v32, %v58_v31  ;;  %v29_v40 = vld [vmem:[%s635_s1 + $0x38] sm:$0xff]  ;;  %v76_v41 = vld [vmem:[%s635_s1 + $0x1b0] sm:$0xff]  ;;  %v46_v46 = vld [vmem:[%s635_s1 + $0xc0] sm:$0xff] }
   0xb   :  { %365 = vmatpush3.bf16.msra.mxu1 %v364_v25  ;;  %v77_v42 = vld [vmem:[%s635_s1 + $0x1b8] sm:$0xff]  ;;  %v60_v44 = vld [vmem:[%s635_s1 + $0x130] sm:$0xff]  ;;  %v47_v47 = vld [vmem:[%s635_s1 + $0xc8] sm:$0xff]  ;;  %v340_v48 = vpack.c.bf16 %v29_v40, %v28_v37 }
   0xc   :  { %367 = vmatprep.subr.bf16.mxu1 %v366_v34  ;;  %v370_v43 = vpack.c.bf16 %v77_v42, %v76_v41  ;;  %v61_v45 = vld [vmem:[%s635_s1 + $0x138] sm:$0xff]  ;;  %v78_v49 = vld [vmem:[%s635_s1 + $0x1c0] sm:$0xff]  ;;  %v79_v50 = vld [vmem:[%s635_s1 + $0x1c8] sm:$0xff]  ;;  %v342_v52 = vpack.c.bf16 %v47_v47, %v46_v46 }
   0xd   :  { %337 = vmatpush3.bf16.msra.mxu0 %v336_v33  ;;  %v372_v51 = vpack.c.bf16 %v61_v45, %v60_v44  ;;  %v30_v53 = vld [vmem:[%s635_s1 + $0x40] sm:$0xff]  ;;  %v31_v54 = vld [vmem:[%s635_s1 + $0x48] sm:$0xff]  ;;  %v374_v56 = vpack.c.bf16 %v79_v50, %v78_v49  ;;  %v48_v58 = vld [vmem:[%s635_s1 + $0xd0] sm:$0xff] }
   0xe   :  { %339 = vmatprep.subr.bf16.mxu0 %v338_v39  ;;  %v62_v55 = vld [vmem:[%s635_s1 + $0x140] sm:$0xff]  ;;  %v63_v57 = vld [vmem:[%s635_s1 + $0x148] sm:$0xff]  ;;  %v49_v59 = vld [vmem:[%s635_s1 + $0xd8] sm:$0xff]  ;;  %v344_v62 = vpack.c.bf16 %v31_v54, %v30_v53 }
   0xf   :  { %369 = vmatpush3.bf16.msra.mxu1 %v368_v38  ;;  %v80_v60 = vld [vmem:[%s635_s1 + $0x1d0] sm:$0xff]  ;;  %v81_v61 = vld [vmem:[%s635_s1 + $0x1d8] sm:$0xff]  ;;  %v376_v63 = vpack.c.bf16 %v63_v57, %v62_v55  ;;  %v346_v0 = vpack.c.bf16 %v49_v59, %v48_v58  ;;  %v50_v6 = vld [vmem:[%s635_s1 + $0xe0] sm:$0xff] }
  0x10   :  { %371 = vmatprep.subr.bf16.mxu1 %v370_v43  ;;  %v32_v1 = vld [vmem:[%s635_s1 + $0x50] sm:$0xff]  ;;  %v33_v2 = vld [vmem:[%s635_s1 + $0x58] sm:$0xff]  ;;  %v378_v4 = vpack.c.bf16 %v81_v61, %v80_v60  ;;  %v51_v7 = vld [vmem:[%s635_s1 + $0xe8] sm:$0xff] }
  0x11   :  { %341 = vmatpush3.bf16.msra.mxu0 %v340_v48  ;;  %v64_v3 = vld [vmem:[%s635_s1 + $0x150] sm:$0xff]  ;;  %v65_v5 = vld [vmem:[%s635_s1 + $0x158] sm:$0xff]  ;;  %v82_v8 = vld [vmem:[%s635_s1 + $0x1e0] sm:$0xff]  ;;  %v348_v10 = vpack.c.bf16 %v33_v2, %v32_v1  ;;  %v350_v14 = vpack.c.bf16 %v51_v7, %v50_v6 }
  0x12   :  { %343 = vmatprep.subr.bf16.mxu0 %v342_v52  ;;  %v83_v9 = vld [vmem:[%s635_s1 + $0x1e8] sm:$0xff]  ;;  %v34_v11 = vld [vmem:[%s635_s1 + $0x60] sm:$0xff]  ;;  %v380_v13 = vpack.c.bf16 %v65_v5, %v64_v3  ;;  %v52_v19 = vld [vmem:[%s635_s1 + $0xf0] sm:$0xff] }
  0x13   :  { %373 = vmatpush3.bf16.msra.mxu1 %v372_v51  ;;  %v35_v12 = vld [vmem:[%s635_s1 + $0x68] sm:$0xff]  ;;  %v66_v15 = vld [vmem:[%s635_s1 + $0x160] sm:$0xff]  ;;  %v382_v18 = vpack.c.bf16 %v83_v9, %v82_v8  ;;  %v53_v20 = vld [vmem:[%s635_s1 + $0xf8] sm:$0xff] }
  0x14   :  { %375 = vmatprep.subr.bf16.mxu1 %v374_v56  ;;  %v67_v16 = vld [vmem:[%s635_s1 + $0x168] sm:$0xff]  ;;  %v17_v21 = vld [vmem:[%s636_s0 + $0x18] sm:$0xff]  ;;  %v84_v22 = vld [vmem:[%s635_s1 + $0x1f0] sm:$0xff]  ;;  %v352_v24 = vpack.c.bf16 %v35_v12, %v34_v11  ;;  %v354_v26 = vpack.c.bf16 %v53_v20, %v52_v19 }
  0x15   :  { %345 = vmatpush3.bf16.msra.mxu0 %v344_v62  ;;  %v15_v17 = vld [vmem:[%s636_s0 + $0x8] sm:$0xff]  ;;  %v85_v23 = vld [vmem:[%s635_s1 + $0x1f8] sm:$0xff]  ;;  %232 = vmatprep.mubr.f32.mxu1 %v17_v21  ;;  %v384_v25 = vpack.c.bf16 %v67_v16, %v66_v15  ;;  %v36_v27 = vld [vmem:[%s635_s1 + $0x70] sm:$0xff] }
  0x16   :  { %347 = vmatprep.subr.bf16.mxu0 %v346_v0  ;;  %157 = vmatprep.mubr.f32.mxu0 %v15_v17  ;;  %v37_v28 = vld [vmem:[%s635_s1 + $0x78] sm:$0xff]  ;;  %v386_v29 = vpack.c.bf16 %v85_v23, %v84_v22  ;;  %v68_v30 = vld [vmem:[%s635_s1 + $0x170] sm:$0xff]  ;;  %v14_v34 = vld [vmem:[%s636_s0] sm:$0xff] }
  0x17   :  { %377 = vmatpush3.bf16.msra.mxu1 %v376_v63  ;;  %v69_v31 = vld [vmem:[%s635_s1 + $0x178] sm:$0xff]  ;;  %v356_v32 = vpack.c.bf16 %v37_v28, %v36_v27  ;;  %v16_v35 = vld [vmem:[%s636_s0 + $0x10] sm:$0xff]  ;;  %v19_v36 = vld [vmem:[%s636_s0 + $0x28] sm:$0xff] }
  0x18   :  { %379 = vmatprep.subr.bf16.mxu1 %v378_v4  ;;  %v388_v33 = vpack.c.bf16 %v69_v31, %v68_v30  ;;  %v21_v37 = vld [vmem:[%s636_s0 + $0x38] sm:$0xff]  ;;  %v18_v38 = vld [vmem:[%s636_s0 + $0x20] sm:$0xff]  ;;  %v20_v39 = vld [vmem:[%s636_s0 + $0x30] sm:$0xff] }
  0x19   :  { %349 = vmatpush3.bf16.msra.mxu0 %v348_v10  ;;  %v249_v41 = vld [vmem:[%s637_s2] ss:$0 sm:$0xff] }
  0x1a   :  { %351 = vmatprep.subr.bf16.mxu0 %v350_v14 }
  0x1b   :  { %381 = vmatpush3.bf16.msra.mxu1 %v380_v13 }
  0x1c   :  { %383 = vmatprep.subr.bf16.mxu1 %v382_v18 }
  0x1d   :  { %353 = vmatpush3.bf16.msra.mxu0 %v352_v24 }
  0x1e   :  { %355 = vmatprep.subr.bf16.mxu0 %v354_v26 }
  0x1f   :  { %385 = vmatpush3.bf16.msra.mxu1 %v384_v25 }
  0x20   :  { %387 = vmatprep.subr.bf16.mxu1 %v386_v29 }
  0x21   :  { %357 = vmatpush3.bf16.msra.mxu0 %v356_v32 }
  0x23   :  { %389 = vmatpush3.bf16.msra.mxu1 %v388_v33 }
  0x24   :  { %158 = vmatmul.mubr.f32.vlgmr.msra.gmra.mrb[0].mxu0 %v14_v34 }
  0x25   :  { %162 = vmatprep.mubr.f32.mxu0 %v19_v36 }
  0x26   :  { %233 = vmatmul.mubr.f32.vlgmr.msra.gmra.mrb[0].mxu1 %v16_v35 }
  0x27   :  { %237 = vmatprep.mubr.f32.mxu1 %v21_v37 }
  0x28   :  { %163 = vmatmul.mubr.f32.gmra.mrb[2].mxu0 %v18_v38 }
  0x2a   :  { %238 = vmatmul.mubr.f32.gmra.mrb[2].mxu1 %v20_v39 }
  0xf7   :  { %v282_v40 = vpop.f32.mrb[0].mxu0 }
  0xf8   :  { %v283_v42 = vpop.f32.mrb[1].mxu0 }
  0xf9   :  { %v320_v43 = vpop.f32.mrb[0].mxu1  ;;  %v284_v44 = vadd.f32 %v283_v42, %v282_v40 }
  0xfa   :  { %v321_v45 = vpop.f32.mrb[1].mxu1 }
  0xfb   :  { %v322_v46 = vadd.f32 %v321_v45, %v320_v43  ;;  %v160_v47 = vadd.f32 %v284_v44, %v249_v41  ;;  %v285_v48 = vpop.f32.mrb[2].mxu0 }
  0xfc   :  { %v286_v49 = vpop.f32.mrb[3].mxu0 }
  0xfd   :  { %v323_v50 = vpop.f32.mrb[2].mxu1  ;;  %v235_v51 = vadd.f32 %v322_v46, %v160_v47  ;;  %v287_v52 = vadd.f32 %v286_v49, %v285_v48 }
  0xfe   :  { %v324_v53 = vpop.f32.mrb[3].mxu1 }
  0xff   :  { %v325_v54 = vadd.f32 %v324_v53, %v323_v50  ;;  %243 = vst [vmem:[%s638_s3] sm:$0xff] %v235_v51  ;;  %v165_v55 = vadd.f32 %v287_v52, %v249_v41 }
 0x101   :  { %v240_v56 = vadd.f32 %v325_v54, %v165_v55 }
 0x103   :  { %244 = vst [vmem:[%s638_s3 + $0x8] sm:$0xff] %v240_v56 }

// kernel: cnn_forward.5
= control target key start
LH: loop header
LB: loop body
LE: loop exit
PB: predicated region body
PF: predicated region fallthrough
CT: control target
= control target key end

     0   :  { %s5074_s12 = smov 0   ;;  %s5076_s13 = smov 0   ;;  %s5987_s0 = inlined_call_operand.vmem [shape: bf16[256,2560], index: 0, kind: input, shape index: {}]   ;;  %s5988_s1 = inlined_call_operand.vmem [shape: bf16[2560,128], index: 1, kind: input, shape index: {}]   ;;  %s5989_s2 = inlined_call_operand.vmem [shape: f32[1,128], index: 2, kind: input, shape index: {}]   ;;  %s5990_s3 = inlined_call_operand.vmem [shape: f32[256,128], index: 3, kind: output, shape index: {}]  }
   0x1   :  { %s5078_s14 = smov 0  }
   0x2 LB: > { %s32_s15 = sadd.s32 1, %s5048_s13  ;;  %p3637_p0 = scmp.ge.s32.totalorder %s5052_s14, 1  ;;  %s5052_s14 = sphi %s5078_s14, %s13_s14   ;;  %s5048_s13 = sphi %s5076_s13, %s5992_s13   ;;  %s5044_s12 = sphi %s5074_s12, %s5991_s12  }
   0x3   : > { %p34_p1 = scmp.ge.s32.totalorder %s32_s15, 2  ;;  %p191_p2 = scmp.lt.s32.totalorder %s5052_s14, 3 }
   0x5   : > { %s5994_s15 = smov (%p34_p1, %s32_s15), 0  ;;  %p192_p3 = pnand %p3637_p0, %p191_p2 }
   0x6   : > { %v4630_v0 = vld [vmem:[%s5988_s1 + $0x40] sm:$0xff] (!%p192_p3)   ;;  %v4634_v4 = vld [vmem:[%s5988_s1 + $0x48] sm:$0xff] (!%p192_p3)   ;;  %v4638_v8 = vld [vmem:[%s5988_s1 + $0x50] sm:$0xff] (!%p192_p3)   ;;  %s3638_s23 = sshll.u32 (!%p192_p3), %s5044_s12, 4 }
   0x7   : > { %195 = sbr.rel (%p192_p3) target bundleno = 576 (0x240), region = 32  ;;  %v4631_v1 = vld [vmem:[%s5988_s1 + $0xc0] sm:$0xff] (!%p192_p3)   ;;  %3965 = vmatprep.subr.bf16.mxu0 (!%p192_p3), %v4630_v0  ;;  %v4635_v5 = vld [vmem:[%s5988_s1 + $0xc8] sm:$0xff] (!%p192_p3)   ;;  %v4639_v9 = vld [vmem:[%s5988_s1 + $0xd0] sm:$0xff] (!%p192_p3)   ;;  %p236_p4 = scmp.lt.s32.totalorder (!%p192_p3), %s3638_s23, 31 }
   0x8   : > { %v4632_v2 = vld [vmem:[%s5988_s1] sm:$0xff] (!%p192_p3)   ;;  %4029 = vmatprep.subr.bf16.mxu1 (!%p192_p3), %v4631_v1  ;;  %v4636_v6 = vld [vmem:[%s5988_s1 + $0x8] sm:$0xff] (!%p192_p3)   ;;  %v4640_v10 = vld [vmem:[%s5988_s1 + $0x10] sm:$0xff] (!%p192_p3)  }
   0x9   : > { %v4633_v3 = vld [vmem:[%s5988_s1 + $0x80] sm:$0xff] (!%p192_p3)   ;;  %3966 = vmatpush3.bf16.msra.mxu0 (!%p192_p3), %v4632_v2  ;;  %v4637_v7 = vld [vmem:[%s5988_s1 + $0x88] sm:$0xff] (!%p192_p3)   ;;  %v4641_v11 = vld [vmem:[%s5988_s1 + $0x90] sm:$0xff] (!%p192_p3)  }
   0xa   : > { %4030 = vmatpush3.bf16.msra.mxu1 (!%p192_p3), %v4633_v3  ;;  %3967 = vmatprep.subr.bf16.mxu0 (!%p192_p3), %v4634_v4  ;;  %v4642_v12 = vld [vmem:[%s5988_s1 + $0x58] sm:$0xff] (!%p192_p3)   ;;  %v4646_v16 = vld [vmem:[%s5988_s1 + $0x60] sm:$0xff] (!%p192_p3)   ;;  %v4650_v20 = vld [vmem:[%s5988_s1 + $0x68] sm:$0xff] (!%p192_p3)  }
   0xb   : > { %4031 = vmatprep.subr.bf16.mxu1 (!%p192_p3), %v4635_v5  ;;  %v4643_v13 = vld [vmem:[%s5988_s1 + $0xd8] sm:$0xff] (!%p192_p3)   ;;  %v4647_v17 = vld [vmem:[%s5988_s1 + $0xe0] sm:$0xff] (!%p192_p3)   ;;  %v4651_v21 = vld [vmem:[%s5988_s1 + $0xe8] sm:$0xff] (!%p192_p3)  }
   0xc   : > { %v4644_v14 = vld [vmem:[%s5988_s1 + $0x18] sm:$0xff] (!%p192_p3)   ;;  %v4648_v18 = vld [vmem:[%s5988_s1 + $0x20] sm:$0xff] (!%p192_p3)   ;;  %v4652_v22 = vld [vmem:[%s5988_s1 + $0x28] sm:$0xff] (!%p192_p3)  }
   0xd   : > { %3968 = vmatpush3.bf16.msra.mxu0 (!%p192_p3), %v4636_v6  ;;  %v4645_v15 = vld [vmem:[%s5988_s1 + $0x98] sm:$0xff] (!%p192_p3)   ;;  %v4649_v19 = vld [vmem:[%s5988_s1 + $0xa0] sm:$0xff] (!%p192_p3)   ;;  %v4653_v23 = vld [vmem:[%s5988_s1 + $0xa8] sm:$0xff] (!%p192_p3)  }
   0xe   : > { %4032 = vmatpush3.bf16.msra.mxu1 %v4637_v7  ;;  %3969 = vmatprep.subr.bf16.mxu0 %v4638_v8  ;;  %s5996_s23 = smov (!%p236_p4, %s3638_s23), 31  ;;  %v4654_v24 = vld [vmem:[%s5988_s1 + $0x70] sm:$0xff]   ;;  %v4658_v28 = vld [vmem:[%s5988_s1 + $0x78] sm:$0xff]   ;;  %v4668_v36 = vld [vmem:[%s5988_s1 + $0x140] sm:$0xff]  }
   0xf   : > { %4033 = vmatprep.subr.bf16.mxu1 %v4639_v9  ;;  %v4655_v25 = vld [vmem:[%s5988_s1 + $0xf0] sm:$0xff]   ;;  %s4605_s22 = smul.u32 80, %s5996_s23  ;;  %v4659_v29 = vld [vmem:[%s5988_s1 + $0xf8] sm:$0xff]   ;;  %v4669_v37 = vld [vmem:[%s5988_s1 + $0x100] sm:$0xff]  }
  0x10   : > { %v4656_v26 = vld [vmem:[%s5988_s1 + $0x30] sm:$0xff]   ;;  %v4660_v30 = vld [vmem:[%s5988_s1 + $0x38] sm:$0xff]   ;;  %v4670_v38 = vld [vmem:[%s5988_s1 + $0x1c0] sm:$0xff]  }
  0x11   : > { %3970 = vmatpush3.bf16.msra.mxu0 %v4640_v10  ;;  %v4657_v27 = vld [vmem:[%s5988_s1 + $0xb0] sm:$0xff]   ;;  %s5191_s6 = scalar_lea.vmem %s5987_s0, %s4605_s22  ;;  %v4661_v31 = vld [vmem:[%s5988_s1 + $0xb8] sm:$0xff]   ;;  %v4671_v39 = vld [vmem:[%s5988_s1 + $0x180] sm:$0xff]  }
  0x12   : > { %4034 = vmatpush3.bf16.msra.mxu1 %v4641_v11  ;;  %3971 = vmatprep.subr.bf16.mxu0 %v4642_v12  ;;  %v4662_v32 = vld [vmem:[%s5191_s6] ss:$80 sps:$4 sm:$0xff]   ;;  %v4664_v33 = vld [vmem:[%s5191_s6 + $0x4] ss:$80 sps:$4 sm:$0xff]   ;;  %v4665_v34 = vld [vmem:[%s5191_s6 + $0x8] ss:$80 sps:$4 sm:$0xff]  }
  0x13   : > { %4035 = vmatprep.subr.bf16.mxu1 %v4643_v13  ;;  %v4667_v35 = vld [vmem:[%s5191_s6 + $0xc] ss:$80 sps:$4 sm:$0xff]   ;;  %2547 = vmatprep.mubr.bf16.mxu0 %v4664_v33  ;;  %v4672_v40 = vld [vmem:[%s5191_s6 + $0xa4] ss:$80 sps:$4 sm:$0xff]   ;;  %v4676_v42 = vld [vmem:[%s5191_s6 + $0xa0] ss:$80 sps:$4 sm:$0xff]  }
  0x14   : > { %2644 = vmatprep.mubr.bf16.mxu1 %v4667_v35  ;;  %v4674_v41 = vld [vmem:[%s5191_s6 + $0xac] ss:$80 sps:$4 sm:$0xff]   ;;  %v4677_v43 = vld [vmem:[%s5191_s6 + $0xa8] ss:$80 sps:$4 sm:$0xff]   ;;  %v4682_v48 = vld [vmem:[%s5191_s6 + $0x144] ss:$80 sps:$4 sm:$0xff]  }
  0x15   : > { %3972 = vmatpush3.bf16.msra.mxu0 %v4644_v14  ;;  %v4678_v44 = vld [vmem:[%s5988_s1 + $0x148] sm:$0xff]   ;;  %v4686_v50 = vld [vmem:[%s5191_s6 + $0x140] ss:$80 sps:$4 sm:$0xff]   ;;  %v4692_v56 = vld [vmem:[%s5191_s6 + $0x1e4] ss:$80 sps:$4 sm:$0xff]  }
  0x16   : > { %4036 = vmatpush3.bf16.msra.mxu1 %v4645_v15  ;;  %3973 = vmatprep.subr.bf16.mxu0 %v4646_v16  ;;  %v4679_v45 = vld [vmem:[%s5988_s1 + $0x108] sm:$0xff]   ;;  %v4688_v52 = vld [vmem:[%s5988_s1 + $0x150] sm:$0xff]   ;;  %v4698_v60 = vld [vmem:[%s5988_s1 + $0x158] sm:$0xff]  }
  0x17   : > { %4037 = vmatprep.subr.bf16.mxu1 %v4647_v17  ;;  %v4680_v46 = vld [vmem:[%s5988_s1 + $0x1c8] sm:$0xff]   ;;  %v4689_v53 = vld [vmem:[%s5988_s1 + $0x110] sm:$0xff]   ;;  %v4699_v61 = vld [vmem:[%s5988_s1 + $0x118] sm:$0xff]  }
  0x18   : > { %v4681_v47 = vld [vmem:[%s5988_s1 + $0x188] sm:$0xff]   ;;  %v4690_v54 = vld [vmem:[%s5988_s1 + $0x1d0] sm:$0xff]   ;;  %v4700_v62 = vld [vmem:[%s5988_s1 + $0x1d8] sm:$0xff]  }
  0x19   : > { %3974 = vmatpush3.bf16.msra.mxu0 %v4648_v18  ;;  %v4684_v49 = vld [vmem:[%s5191_s6 + $0x14c] ss:$80 sps:$4 sm:$0xff]   ;;  %v4687_v51 = vld [vmem:[%s5191_s6 + $0x148] ss:$80 sps:$4 sm:$0xff]   ;;  %v4691_v55 = vld [vmem:[%s5988_s1 + $0x190] sm:$0xff]  }
  0x1a   : > { %4038 = vmatpush3.bf16.msra.mxu1 %v4649_v19  ;;  %3975 = vmatprep.subr.bf16.mxu0 %v4650_v20  ;;  %v4694_v57 = vld [vmem:[%s5191_s6 + $0x1ec] ss:$80 sps:$4 sm:$0xff]   ;;  %v4696_v58 = vld [vmem:[%s5191_s6 + $0x1e0] ss:$80 sps:$4 sm:$0xff]   ;;  %v4697_v59 = vld [vmem:[%s5191_s6 + $0x1e8] ss:$80 sps:$4 sm:$0xff]  }
  0x1b   : > { %4039 = vmatprep.subr.bf16.mxu1 %v4651_v21  ;;  %v4701_v63 = vld [vmem:[%s5988_s1 + $0x198] sm:$0xff]   ;;  %v4702_v0 = vld [vmem:[%s5191_s6 + $0x284] ss:$80 sps:$4 sm:$0xff]   ;;  %v4706_v2 = vld [vmem:[%s5191_s6 + $0x280] ss:$80 sps:$4 sm:$0xff]  }
  0x1c   : > { %v4704_v1 = vld [vmem:[%s5191_s6 + $0x28c] ss:$80 sps:$4 sm:$0xff]   ;;  %v4708_v3 = vld [vmem:[%s5988_s1 + $0x160] sm:$0xff]   ;;  %v4707_v4 = vld [vmem:[%s5191_s6 + $0x288] ss:$80 sps:$4 sm:$0xff]  }
  0x1d   : > { %3976 = vmatpush3.bf16.msra.mxu0 %v4652_v22  ;;  %v4709_v5 = vld [vmem:[%s5988_s1 + $0x120] sm:$0xff]   ;;  %v4714_v9 = vld [vmem:[%s5191_s6 + $0x32c] ss:$80 sps:$4 sm:$0xff]   ;;  %v4717_v15 = vld [vmem:[%s5191_s6 + $0x328] ss:$80 sps:$4 sm:$0xff]  }
  0x1e   : > { %4040 = vmatpush3.bf16.msra.mxu1 %v4653_v23  ;;  %3977 = vmatprep.subr.bf16.mxu0 %v4654_v24  ;;  %v4710_v6 = vld [vmem:[%s5988_s1 + $0x1e0] sm:$0xff]   ;;  %v4718_v10 = vld [vmem:[%s5988_s1 + $0x168] sm:$0xff]   ;;  %v4728_v18 = vld [vmem:[%s5988_s1 + $0x170] sm:$0xff]  }
  0x1f   : > { %4041 = vmatprep.subr.bf16.mxu1 %v4655_v25  ;;  %v4711_v7 = vld [vmem:[%s5988_s1 + $0x1a0] sm:$0xff]   ;;  %v4719_v11 = vld [vmem:[%s5988_s1 + $0x128] sm:$0xff]   ;;  %v4729_v19 = vld [vmem:[%s5988_s1 + $0x130] sm:$0xff]  }
  0x20   : > { %v4712_v8 = vld [vmem:[%s5191_s6 + $0x324] ss:$80 sps:$4 sm:$0xff]   ;;  %v4716_v12 = vld [vmem:[%s5191_s6 + $0x320] ss:$80 sps:$4 sm:$0xff]   ;;  %v4720_v13 = vld [vmem:[%s5988_s1 + $0x1e8] sm:$0xff]  }
  0x21   : > { %3978 = vmatpush3.bf16.msra.mxu0 %v4656_v26  ;;  %v4721_v14 = vld [vmem:[%s5988_s1 + $0x1a8] sm:$0xff]   ;;  %v4722_v16 = vld [vmem:[%s5191_s6 + $0x3c4] ss:$80 sps:$4 sm:$0xff]   ;;  %v4726_v22 = vld [vmem:[%s5191_s6 + $0x3c0] ss:$80 sps:$4 sm:$0xff]  }
  0x22   : > { %4042 = vmatpush3.bf16.msra.mxu1 %v4657_v27  ;;  %3979 = vmatprep.subr.bf16.mxu0 %v4658_v28  ;;  %v4724_v17 = vld [vmem:[%s5191_s6 + $0x3cc] ss:$80 sps:$4 sm:$0xff]   ;;  %v4730_v20 = vld [vmem:[%s5988_s1 + $0x1f0] sm:$0xff]   ;;  %v4727_v23 = vld [vmem:[%s5191_s6 + $0x3c8] ss:$80 sps:$4 sm:$0xff]  }
  0x23   : > { %4043 = vmatprep.subr.bf16.mxu1 %v4659_v29  ;;  %v4731_v21 = vld [vmem:[%s5988_s1 + $0x1b0] sm:$0xff]   ;;  %v4734_v25 = vld [vmem:[%s5191_s6 + $0x46c] ss:$80 sps:$4 sm:$0xff]   ;;  %v4748_v33 = vld [vmem:[%s5988_s1 + $0x240] sm:$0xff]  }
  0x24   : > { %v4732_v24 = vld [vmem:[%s5191_s6 + $0x464] ss:$80 sps:$4 sm:$0xff]   ;;  %v4738_v26 = vld [vmem:[%s5988_s1 + $0x178] sm:$0xff]  }
  0x25   : > { %3980 = vmatpush3.bf16.msra.mxu0 %v4660_v30  ;;  %v4739_v27 = vld [vmem:[%s5988_s1 + $0x138] sm:$0xff]   ;;  %v4736_v30 = vld [vmem:[%s5191_s6 + $0x460] ss:$80 sps:$4 sm:$0xff]  }
  0x26   : > { %4044 = vmatpush3.bf16.msra.mxu1 %v4661_v31  ;;  %4093 = vmatprep.subr.bf16.mxu0 %v4668_v36  ;;  %v4740_v28 = vld [vmem:[%s5988_s1 + $0x1f8] sm:$0xff]   ;;  %v4750_v35 = vld [vmem:[%s5988_s1 + $0x2c0] sm:$0xff]  }
  0x27   : > { %4157 = vmatprep.subr.bf16.mxu1 %v4670_v38  ;;  %v4741_v29 = vld [vmem:[%s5988_s1 + $0x1b8] sm:$0xff]   ;;  %v4742_v36 = vld [vmem:[%s5191_s6 + $0x10] ss:$80 sps:$4 sm:$0xff]  }
  0x28   : > { %2548 = vmatmul.mubr.bf16.vlgmr.msra.gmra.mrb[0].mxu0 %v4662_v32  ;;  %v4737_v31 = vld [vmem:[%s5191_s6 + $0x468] ss:$80 sps:$4 sm:$0xff]   ;;  %v4744_v32 = vld [vmem:[%s5191_s6 + $0x14] ss:$80 sps:$4 sm:$0xff]  }
  0x29   : > { %2645 = vmatmul.mubr.bf16.vlgmr.msra.gmra.mrb[0].mxu1 %v4665_v34  ;;  %4094 = vmatpush3.bf16.msra.mxu0 %v4669_v37  ;;  %v4747_v34 = vld [vmem:[%s5191_s6 + $0x1c] ss:$80 sps:$4 sm:$0xff]   ;;  %v4745_v37 = vld [vmem:[%s5191_s6 + $0x18] ss:$80 sps:$4 sm:$0xff]   ;;  %v4749_v38 = vld [vmem:[%s5988_s1 + $0x200] sm:$0xff]  }
  0x2a   : > { %4158 = vmatpush3.bf16.msra.mxu1 %v4671_v39  ;;  %2555 = vmatprep.mubr.bf16.mxu0 %v4672_v40  ;;  %v4751_v39 = vld [vmem:[%s5988_s1 + $0x280] sm:$0xff]  }
  0x2b   : > { %2652 = vmatprep.mubr.bf16.mxu1 %v4674_v41  ;;  %4095 = vmatprep.subr.bf16.mxu0 %v4678_v44  ;;  %v4752_v40 = vld [vmem:[%s5191_s6 + $0xb4] ss:$80 sps:$4 sm:$0xff]   ;;  %v4754_v41 = vld [vmem:[%s5191_s6 + $0xbc] ss:$80 sps:$4 sm:$0xff]  }
  0x2c   : > { %4159 = vmatprep.subr.bf16.mxu1 %v4680_v46  ;;  %v4760_v44 = vld [vmem:[%s5988_s1 + $0x2c8] sm:$0xff]   ;;  %v4756_v46 = vld [vmem:[%s5191_s6 + $0xb0] ss:$80 sps:$4 sm:$0xff]  }
  0x2d   : > { %4096 = vmatpush3.bf16.msra.mxu0 %v4679_v45  ;;  %v4761_v45 = vld [vmem:[%s5988_s1 + $0x288] sm:$0xff]  }
  0x2e   : > { %4160 = vmatpush3.bf16.msra.mxu1 %v4681_v47  ;;  %4097 = vmatprep.subr.bf16.mxu0 %v4688_v52  ;;  %v4768_v47 = vld [vmem:[%s5988_s1 + $0x250] sm:$0xff]  }
  0x2f   : > { %4161 = vmatprep.subr.bf16.mxu1 %v4690_v54  ;;  %v4769_v52 = vld [vmem:[%s5988_s1 + $0x210] sm:$0xff]   ;;  %v4778_v54 = vld [vmem:[%s5988_s1 + $0x258] sm:$0xff]  }
  0x30   : > { %2556 = vmatmul.mubr.bf16.gmra.mrb[4].mxu0 %v4676_v42  ;;  %v4758_v42 = vld [vmem:[%s5988_s1 + $0x248] sm:$0xff]  }
  0x31   : > { %2653 = vmatmul.mubr.bf16.gmra.mrb[4].mxu1 %v4677_v43  ;;  %2563 = vmatprep.mubr.bf16.mxu0 %v4682_v48  ;;  %v4759_v43 = vld [vmem:[%s5988_s1 + $0x208] sm:$0xff]  }
  0x32   : > { %2660 = vmatprep.mubr.bf16.mxu1 %v4684_v49  ;;  %4098 = vmatpush3.bf16.msra.mxu0 %v4689_v53  ;;  %v4757_v48 = vld [vmem:[%s5191_s6 + $0xb8] ss:$80 sps:$4 sm:$0xff]   ;;  %v4762_v49 = vld [vmem:[%s5191_s6 + $0x154] ss:$80 sps:$4 sm:$0xff]  }
  0x33   : > { %4162 = vmatpush3.bf16.msra.mxu1 %v4691_v55  ;;  %4099 = vmatprep.subr.bf16.mxu0 %v4698_v60  ;;  %v4771_v53 = vld [vmem:[%s5988_s1 + $0x290] sm:$0xff]   ;;  %v4779_v55 = vld [vmem:[%s5988_s1 + $0x218] sm:$0xff]  }
  0x34   : > { %4163 = vmatprep.subr.bf16.mxu1 %v4700_v62  ;;  %v4772_v60 = vld [vmem:[%s5191_s6 + $0x1f4] ss:$80 sps:$4 sm:$0xff]  }
  0x35   : > { %v4788_v62 = vld [vmem:[%s5988_s1 + $0x260] sm:$0xff]  }
  0x36   : > { %4100 = vmatpush3.bf16.msra.mxu0 %v4699_v61  ;;  %v4774_v61 = vld [vmem:[%s5191_s6 + $0x1fc] ss:$80 sps:$4 sm:$0xff]  }
  0x37   : > { %4164 = vmatpush3.bf16.msra.mxu1 %v4701_v63  ;;  %4101 = vmatprep.subr.bf16.mxu0 %v4708_v3  ;;  %v4789_v63 = vld [vmem:[%s5988_s1 + $0x220] sm:$0xff]   ;;  %v4777_v3 = vld [vmem:[%s5191_s6 + $0x1f8] ss:$80 sps:$4 sm:$0xff]  }
  0x38   : > { %2564 = vmatmul.mubr.bf16.gmra.mrb[8].mxu0 %v4686_v50  ;;  %4165 = vmatprep.subr.bf16.mxu1 %v4710_v6  ;;  %v4770_v50 = vld [vmem:[%s5988_s1 + $0x2d0] sm:$0xff]   ;;  %v4798_v6 = vld [vmem:[%s5988_s1 + $0x268] sm:$0xff]  }
  0x39   : > { %2661 = vmatmul.mubr.bf16.gmra.mrb[8].mxu1 %v4687_v51  ;;  %2571 = vmatprep.mubr.bf16.mxu0 %v4692_v56  ;;  %v4764_v51 = vld [vmem:[%s5191_s6 + $0x15c] ss:$80 sps:$4 sm:$0xff]   ;;  %v4766_v56 = vld [vmem:[%s5191_s6 + $0x150] ss:$80 sps:$4 sm:$0xff]  }
  0x3a   : > { %2668 = vmatprep.mubr.bf16.mxu1 %v4694_v57  ;;  %4102 = vmatpush3.bf16.msra.mxu0 %v4709_v5  ;;  %v4780_v57 = vld [vmem:[%s5988_s1 + $0x2d8] sm:$0xff]  }
  0x3b   : > { %4166 = vmatpush3.bf16.msra.mxu1 %v4711_v7  ;;  %4103 = vmatprep.subr.bf16.mxu0 %v4718_v10  ;;  %v4784_v5 = vld [vmem:[%s5191_s6 + $0x29c] ss:$80 sps:$4 sm:$0xff]   ;;  %v4786_v10 = vld [vmem:[%s5191_s6 + $0x290] ss:$80 sps:$4 sm:$0xff]  }
  0x3c   : > { %4167 = vmatprep.subr.bf16.mxu1 %v4720_v13  ;;  %v4799_v7 = vld [vmem:[%s5988_s1 + $0x228] sm:$0xff]  }
  0x3d   : > { %v4794_v13 = vld [vmem:[%s5191_s6 + $0x33c] ss:$80 sps:$4 sm:$0xff]  }
  0x3e   : > { %4104 = vmatpush3.bf16.msra.mxu0 %v4719_v11  ;;  %v4787_v11 = vld [vmem:[%s5191_s6 + $0x298] ss:$80 sps:$4 sm:$0xff]  }
  0x3f   : > { %4168 = vmatpush3.bf16.msra.mxu1 %v4721_v14  ;;  %4105 = vmatprep.subr.bf16.mxu0 %v4728_v18  ;;  %v4808_v14 = vld [vmem:[%s5988_s1 + $0x270] sm:$0xff]  }
  0x40   : > { %2572 = vmatmul.mubr.bf16.gmra.mrb[12].mxu0 %v4696_v58  ;;  %4169 = vmatprep.subr.bf16.mxu1 %v4730_v20  ;;  %v4781_v58 = vld [vmem:[%s5988_s1 + $0x298] sm:$0xff]   ;;  %v4796_v18 = vld [vmem:[%s5191_s6 + $0x330] ss:$80 sps:$4 sm:$0xff]   ;;  %v4802_v20 = vld [vmem:[%s5191_s6 + $0x3d4] ss:$80 sps:$4 sm:$0xff]  }
  0x41   : > { %2669 = vmatmul.mubr.bf16.gmra.mrb[12].mxu1 %v4697_v59  ;;  %2579 = vmatprep.mubr.bf16.mxu0 %v4702_v0  ;;  %v4767_v59 = vld [vmem:[%s5191_s6 + $0x158] ss:$80 sps:$4 sm:$0xff]   ;;  %v4790_v0 = vld [vmem:[%s5988_s1 + $0x2e0] sm:$0xff]  }
  0x42   : > { %2676 = vmatprep.mubr.bf16.mxu1 %v4704_v1  ;;  %4106 = vmatpush3.bf16.msra.mxu0 %v4729_v19  ;;  %v4791_v1 = vld [vmem:[%s5988_s1 + $0x2a0] sm:$0xff]   ;;  %v4797_v19 = vld [vmem:[%s5191_s6 + $0x338] ss:$80 sps:$4 sm:$0xff]  }
  0x43   : > { %4170 = vmatpush3.bf16.msra.mxu1 %v4731_v21  ;;  %4107 = vmatprep.subr.bf16.mxu0 %v4738_v26  ;;  %v4818_v21 = vld [vmem:[%s5988_s1 + $0x278] sm:$0xff]   ;;  %v4806_v26 = vld [vmem:[%s5191_s6 + $0x3d0] ss:$80 sps:$4 sm:$0xff]  }
  0x44   : > { %4171 = vmatprep.subr.bf16.mxu1 %v4740_v28  ;;  %v4807_v28 = vld [vmem:[%s5191_s6 + $0x3d8] ss:$80 sps:$4 sm:$0xff]  }
  0x46   : > { %4108 = vmatpush3.bf16.msra.mxu0 %v4739_v27  ;;  %v4828_v27 = vld [vmem:[%s5988_s1 + $0x340] sm:$0xff]  }
  0x47   : > { %4172 = vmatpush3.bf16.msra.mxu1 %v4741_v29  ;;  %4221 = vmatprep.subr.bf16.mxu0 %v4748_v33  ;;  %v4830_v29 = vld [vmem:[%s5988_s1 + $0x3c0] sm:$0xff]   ;;  %v4817_v33 = vld [vmem:[%s5191_s6 + $0x478] ss:$80 sps:$4 sm:$0xff]  }
  0x48   : > { %2580 = vmatmul.mubr.bf16.gmra.mrb[16].mxu0 %v4706_v2  ;;  %4285 = vmatprep.subr.bf16.mxu1 %v4750_v35  ;;  %v4776_v2 = vld [vmem:[%s5191_s6 + $0x1f0] ss:$80 sps:$4 sm:$0xff]   ;;  %v4827_v35 = vld [vmem:[%s5191_s6 + $0x2c] ss:$80 sps:$4 sm:$0xff]  }
  0x49   : > { %2677 = vmatmul.mubr.bf16.gmra.mrb[16].mxu1 %v4707_v4  ;;  %2587 = vmatprep.mubr.bf16.mxu0 %v4712_v8  ;;  %v4782_v4 = vld [vmem:[%s5191_s6 + $0x294] ss:$80 sps:$4 sm:$0xff]   ;;  %v4800_v8 = vld [vmem:[%s5988_s1 + $0x2e8] sm:$0xff]  }
  0x4a   : > { %2684 = vmatprep.mubr.bf16.mxu1 %v4714_v9  ;;  %v4801_v9 = vld [vmem:[%s5988_s1 + $0x2a8] sm:$0xff]  }
  0x50   : > { %2588 = vmatmul.mubr.bf16.gmra.mrb[20].mxu0 %v4716_v12  ;;  %v4792_v12 = vld [vmem:[%s5191_s6 + $0x334] ss:$80 sps:$4 sm:$0xff]  }
  0x51   : > { %2685 = vmatmul.mubr.bf16.gmra.mrb[20].mxu1 %v4717_v15  ;;  %2595 = vmatprep.mubr.bf16.mxu0 %v4722_v16  ;;  %v4809_v15 = vld [vmem:[%s5988_s1 + $0x230] sm:$0xff]  }
  0x52   : > { %2692 = vmatprep.mubr.bf16.mxu1 %v4724_v17  ;;  %v4810_v16 = vld [vmem:[%s5988_s1 + $0x2f0] sm:$0xff]  }
  0x53   : > { %v4811_v17 = vld [vmem:[%s5988_s1 + $0x2b0] sm:$0xff]  }
  0x58   : > { %2596 = vmatmul.mubr.bf16.gmra.mrb[24].mxu0 %v4726_v22  ;;  %v4804_v22 = vld [vmem:[%s5191_s6 + $0x3dc] ss:$80 sps:$4 sm:$0xff]  }
  0x59   : > { %2693 = vmatmul.mubr.bf16.gmra.mrb[24].mxu1 %v4727_v23  ;;  %2603 = vmatprep.mubr.bf16.mxu0 %v4732_v24  ;;  %v4819_v23 = vld [vmem:[%s5988_s1 + $0x238] sm:$0xff]  }
  0x5a   : > { %2700 = vmatprep.mubr.bf16.mxu1 %v4734_v25  ;;  %v4820_v24 = vld [vmem:[%s5988_s1 + $0x2f8] sm:$0xff]  }
  0x5b   : > { %v4821_v25 = vld [vmem:[%s5988_s1 + $0x2b8] sm:$0xff]  }
  0x60   : > { %2604 = vmatmul.mubr.bf16.gmra.mrb[28].mxu0 %v4736_v30  ;;  %v4812_v30 = vld [vmem:[%s5191_s6 + $0x474] ss:$80 sps:$4 sm:$0xff]  }
  0x61   : > { %2701 = vmatmul.mubr.bf16.gmra.mrb[28].mxu1 %v4737_v31  ;;  %2741 = vmatprep.mubr.bf16.mxu0 %v4744_v32  ;;  %v4814_v31 = vld [vmem:[%s5191_s6 + $0x47c] ss:$80 sps:$4 sm:$0xff]   ;;  %v4816_v32 = vld [vmem:[%s5191_s6 + $0x470] ss:$80 sps:$4 sm:$0xff]  }
  0x62   : > { %2838 = vmatprep.mubr.bf16.mxu1 %v4747_v34  ;;  %v4824_v34 = vld [vmem:[%s5191_s6 + $0x24] ss:$80 sps:$4 sm:$0xff]  }
  0x68   : > { %2742 = vmatmul.mubr.bf16.vlgmr.msra.gmra.mrb[32].mxu0 %v4742_v36  ;;  %v4822_v36 = vld [vmem:[%s5191_s6 + $0x20] ss:$80 sps:$4 sm:$0xff]  }
  0x69   : > { %2839 = vmatmul.mubr.bf16.vlgmr.msra.gmra.mrb[32].mxu1 %v4745_v37  ;;  %4222 = vmatpush3.bf16.msra.mxu0 %v4749_v38  ;;  %v4825_v37 = vld [vmem:[%s5191_s6 + $0x28] ss:$80 sps:$4 sm:$0xff]   ;;  %v4829_v38 = vld [vmem:[%s5988_s1 + $0x300] sm:$0xff]  }
  0x6a   : > { %4286 = vmatpush3.bf16.msra.mxu1 %v4751_v39  ;;  %2749 = vmatprep.mubr.bf16.mxu0 %v4752_v40  ;;  %v4831_v39 = vld [vmem:[%s5988_s1 + $0x380] sm:$0xff]  }
  0x6b   : > { %2846 = vmatprep.mubr.bf16.mxu1 %v4754_v41  ;;  %4223 = vmatprep.subr.bf16.mxu0 %v4758_v42  ;;  %v4832_v40 = vld [vmem:[%s5191_s6 + $0xc4] ss:$80 sps:$4 sm:$0xff]   ;;  %v4834_v41 = vld [vmem:[%s5191_s6 + $0xcc] ss:$80 sps:$4 sm:$0xff]  }
  0x6c   : > { %4287 = vmatprep.subr.bf16.mxu1 %v4760_v44  ;;  %v4838_v42 = vld [vmem:[%s5988_s1 + $0x348] sm:$0xff]  }
  0x6d   : > { %4224 = vmatpush3.bf16.msra.mxu0 %v4759_v43  ;;  %v4839_v43 = vld [vmem:[%s5988_s1 + $0x308] sm:$0xff]  }
  0x6e   : > { %4288 = vmatpush3.bf16.msra.mxu1 %v4761_v45  ;;  %4225 = vmatprep.subr.bf16.mxu0 %v4768_v47  ;;  %v4840_v44 = vld [vmem:[%s5988_s1 + $0x3c8] sm:$0xff]   ;;  %v4848_v47 = vld [vmem:[%s5988_s1 + $0x350] sm:$0xff]  }
  0x6f   : > { %4289 = vmatprep.subr.bf16.mxu1 %v4770_v50  ;;  %v4841_v45 = vld [vmem:[%s5988_s1 + $0x388] sm:$0xff]   ;;  %v4850_v50 = vld [vmem:[%s5988_s1 + $0x3d0] sm:$0xff]  }
  0x70   : > { %2750 = vmatmul.mubr.bf16.gmra.mrb[36].mxu0 %v4756_v46  ;;  %v4836_v46 = vld [vmem:[%s5191_s6 + $0xc0] ss:$80 sps:$4 sm:$0xff]  }
  0x71   : > { %2847 = vmatmul.mubr.bf16.gmra.mrb[36].mxu1 %v4757_v48  ;;  %2757 = vmatprep.mubr.bf16.mxu0 %v4762_v49  ;;  %v4837_v48 = vld [vmem:[%s5191_s6 + $0xc8] ss:$80 sps:$4 sm:$0xff]   ;;  %v4842_v49 = vld [vmem:[%s5191_s6 + $0x164] ss:$80 sps:$4 sm:$0xff]  }
  0x72   : > { %2854 = vmatprep.mubr.bf16.mxu1 %v4764_v51  ;;  %4226 = vmatpush3.bf16.msra.mxu0 %v4769_v52  ;;  %v4844_v51 = vld [vmem:[%s5191_s6 + $0x16c] ss:$80 sps:$4 sm:$0xff]   ;;  %v4849_v52 = vld [vmem:[%s5988_s1 + $0x310] sm:$0xff]  }
  0x73   : > { %4290 = vmatpush3.bf16.msra.mxu1 %v4771_v53  ;;  %4227 = vmatprep.subr.bf16.mxu0 %v4778_v54  ;;  %v4851_v53 = vld [vmem:[%s5988_s1 + $0x390] sm:$0xff]   ;;  %v4858_v54 = vld [vmem:[%s5988_s1 + $0x358] sm:$0xff]  }
  0x74   : > { %4291 = vmatprep.subr.bf16.mxu1 %v4780_v57  ;;  %v4859_v57 = vld [vmem:[%s5988_s1 + $0x318] sm:$0xff]  }
  0x76   : > { %4228 = vmatpush3.bf16.msra.mxu0 %v4779_v55  ;;  %v4860_v55 = vld [vmem:[%s5988_s1 + $0x3d8] sm:$0xff]  }
  0x77   : > { %4292 = vmatpush3.bf16.msra.mxu1 %v4781_v58  ;;  %4229 = vmatprep.subr.bf16.mxu0 %v4788_v62  ;;  %v4861_v58 = vld [vmem:[%s5988_s1 + $0x398] sm:$0xff]  }
  0x78   : > { %2758 = vmatmul.mubr.bf16.gmra.mrb[40].mxu0 %v4766_v56  ;;  %4293 = vmatprep.subr.bf16.mxu1 %v4790_v0  ;;  %v4846_v56 = vld [vmem:[%s5191_s6 + $0x160] ss:$80 sps:$4 sm:$0xff]   ;;  %v4854_v62 = vld [vmem:[%s5191_s6 + $0x20c] ss:$80 sps:$4 sm:$0xff]  }
  0x79   : > { %2855 = vmatmul.mubr.bf16.gmra.mrb[40].mxu1 %v4767_v59  ;;  %2765 = vmatprep.mubr.bf16.mxu0 %v4772_v60  ;;  %v4847_v59 = vld [vmem:[%s5191_s6 + $0x168] ss:$80 sps:$4 sm:$0xff]   ;;  %v4852_v60 = vld [vmem:[%s5191_s6 + $0x204] ss:$80 sps:$4 sm:$0xff]  }
  0x7a   : > { %2862 = vmatprep.mubr.bf16.mxu1 %v4774_v61  ;;  %4230 = vmatpush3.bf16.msra.mxu0 %v4789_v63  ;;  %v4868_v61 = vld [vmem:[%s5988_s1 + $0x360] sm:$0xff]  }
  0x7b   : > { %4294 = vmatpush3.bf16.msra.mxu1 %v4791_v1  ;;  %4231 = vmatprep.subr.bf16.mxu0 %v4798_v6  ;;  %v4870_v63 = vld [vmem:[%s5988_s1 + $0x3e0] sm:$0xff]   ;;  %v4881_v6 = vld [vmem:[%s5988_s1 + $0x3a8] sm:$0xff]  }
  0x7c   : > { %4295 = vmatprep.subr.bf16.mxu1 %v4800_v8  ;;  %v4869_v0 = vld [vmem:[%s5988_s1 + $0x320] sm:$0xff]  }
  0x7d   : > { %v4871_v1 = vld [vmem:[%s5988_s1 + $0x3a0] sm:$0xff]  }
  0x7e   : > { %4232 = vmatpush3.bf16.msra.mxu0 %v4799_v7  ;;  %v4857_v7 = vld [vmem:[%s5191_s6 + $0x208] ss:$80 sps:$4 sm:$0xff]   ;;  %v4862_v8 = vld [vmem:[%s5191_s6 + $0x2a4] ss:$80 sps:$4 sm:$0xff]  }
  0x7f   : > { %4296 = vmatpush3.bf16.msra.mxu1 %v4801_v9  ;;  %4233 = vmatprep.subr.bf16.mxu0 %v4808_v14  ;;  %v4888_v9 = vld [vmem:[%s5988_s1 + $0x370] sm:$0xff]   ;;  %v4898_v14 = vld [vmem:[%s5988_s1 + $0x378] sm:$0xff]  }
  0x80   : > { %2766 = vmatmul.mubr.bf16.gmra.mrb[44].mxu0 %v4776_v2  ;;  %4297 = vmatprep.subr.bf16.mxu1 %v4810_v16  ;;  %v4878_v2 = vld [vmem:[%s5988_s1 + $0x368] sm:$0xff]   ;;  %v4866_v16 = vld [vmem:[%s5191_s6 + $0x2a0] ss:$80 sps:$4 sm:$0xff]  }
  0x81   : > { %2863 = vmatmul.mubr.bf16.gmra.mrb[44].mxu1 %v4777_v3  ;;  %2773 = vmatprep.mubr.bf16.mxu0 %v4782_v4  ;;  %v4880_v3 = vld [vmem:[%s5988_s1 + $0x3e8] sm:$0xff]  }
  0x82   : > { %2870 = vmatprep.mubr.bf16.mxu1 %v4784_v5  ;;  %4234 = vmatpush3.bf16.msra.mxu0 %v4809_v15  ;;  %v4879_v4 = vld [vmem:[%s5988_s1 + $0x328] sm:$0xff]   ;;  %v4856_v5 = vld [vmem:[%s5191_s6 + $0x200] ss:$80 sps:$4 sm:$0xff]   ;;  %v4899_v15 = vld [vmem:[%s5988_s1 + $0x338] sm:$0xff]  }
  0x83   : > { %4298 = vmatpush3.bf16.msra.mxu1 %v4811_v17  ;;  %4235 = vmatprep.subr.bf16.mxu0 %v4818_v21  ;;  %v4900_v17 = vld [vmem:[%s5988_s1 + $0x3f8] sm:$0xff]  }
  0x84   : > { %4299 = vmatprep.subr.bf16.mxu1 %v4820_v24  ;;  %v4874_v21 = vld [vmem:[%s5191_s6 + $0x34c] ss:$80 sps:$4 sm:$0xff]   ;;  %v4876_v24 = vld [vmem:[%s5191_s6 + $0x340] ss:$80 sps:$4 sm:$0xff]  }
  0x86   : > { %4236 = vmatpush3.bf16.msra.mxu0 %v4819_v23  ;;  %v4910_v23 = vld [vmem:[%s5988_s1 + $0x4c0] sm:$0xff]  }
  0x87   : > { %4300 = vmatpush3.bf16.msra.mxu1 %v4821_v25  ;;  %4349 = vmatprep.subr.bf16.mxu0 %v4828_v27  ;;  %v4877_v25 = vld [vmem:[%s5191_s6 + $0x348] ss:$80 sps:$4 sm:$0xff]   ;;  %v4884_v27 = vld [vmem:[%s5191_s6 + $0x3ec] ss:$80 sps:$4 sm:$0xff]  }
  0x88   : > { %2774 = vmatmul.mubr.bf16.gmra.mrb[48].mxu0 %v4786_v10  ;;  %4413 = vmatprep.subr.bf16.mxu1 %v4830_v29  ;;  %v4890_v10 = vld [vmem:[%s5988_s1 + $0x3f0] sm:$0xff]   ;;  %v4887_v29 = vld [vmem:[%s5191_s6 + $0x3e8] ss:$80 sps:$4 sm:$0xff]  }
  0x89   : > { %2871 = vmatmul.mubr.bf16.gmra.mrb[48].mxu1 %v4787_v11  ;;  %2781 = vmatprep.mubr.bf16.mxu0 %v4792_v12  ;;  %v4864_v11 = vld [vmem:[%s5191_s6 + $0x2ac] ss:$80 sps:$4 sm:$0xff]   ;;  %v4889_v12 = vld [vmem:[%s5988_s1 + $0x330] sm:$0xff]  }
  0x8a   : > { %2878 = vmatprep.mubr.bf16.mxu1 %v4794_v13  ;;  %v4891_v13 = vld [vmem:[%s5988_s1 + $0x3b0] sm:$0xff]  }
  0x90   : > { %2782 = vmatmul.mubr.bf16.gmra.mrb[52].mxu0 %v4796_v18  ;;  %v4901_v18 = vld [vmem:[%s5988_s1 + $0x3b8] sm:$0xff]  }
  0x91   : > { %2879 = vmatmul.mubr.bf16.gmra.mrb[52].mxu1 %v4797_v19  ;;  %2789 = vmatprep.mubr.bf16.mxu0 %v4802_v20  ;;  %v4867_v19 = vld [vmem:[%s5191_s6 + $0x2a8] ss:$80 sps:$4 sm:$0xff]   ;;  %v4872_v20 = vld [vmem:[%s5191_s6 + $0x344] ss:$80 sps:$4 sm:$0xff]  }
  0x92   : > { %2886 = vmatprep.mubr.bf16.mxu1 %v4804_v22  ;;  %v4908_v22 = vld [vmem:[%s5988_s1 + $0x440] sm:$0xff]  }
  0x98   : > { %2790 = vmatmul.mubr.bf16.gmra.mrb[56].mxu0 %v4806_v26  ;;  %v4882_v26 = vld [vmem:[%s5191_s6 + $0x3e4] ss:$80 sps:$4 sm:$0xff]  }
  0x99   : > { %2887 = vmatmul.mubr.bf16.gmra.mrb[56].mxu1 %v4807_v28  ;;  %2797 = vmatprep.mubr.bf16.mxu0 %v4812_v30  ;;  %v4886_v28 = vld [vmem:[%s5191_s6 + $0x3e0] ss:$80 sps:$4 sm:$0xff]   ;;  %v4892_v30 = vld [vmem:[%s5191_s6 + $0x484] ss:$80 sps:$4 sm:$0xff]  }
  0x9a   : > { %2894 = vmatprep.mubr.bf16.mxu1 %v4814_v31  ;;  %v4894_v31 = vld [vmem:[%s5191_s6 + $0x48c] ss:$80 sps:$4 sm:$0xff]  }
  0xa0   : > { %2798 = vmatmul.mubr.bf16.gmra.mrb[60].mxu0 %v4816_v32  ;;  %v4896_v32 = vld [vmem:[%s5191_s6 + $0x480] ss:$80 sps:$4 sm:$0xff]  }
  0xa1   : > { %2895 = vmatmul.mubr.bf16.gmra.mrb[60].mxu1 %v4817_v33  ;;  %2935 = vmatprep.mubr.bf16.mxu0 %v4824_v34  ;;  %v4897_v33 = vld [vmem:[%s5191_s6 + $0x488] ss:$80 sps:$4 sm:$0xff]   ;;  %v4904_v34 = vld [vmem:[%s5191_s6 + $0x34] ss:$80 sps:$4 sm:$0xff]  }
  0xa2   : > { %3032 = vmatprep.mubr.bf16.mxu1 %v4827_v35  ;;  %v4907_v35 = vld [vmem:[%s5191_s6 + $0x3c] ss:$80 sps:$4 sm:$0xff]  }
  0xa8   : > { %2936 = vmatmul.mubr.bf16.vlgmr.msra.gmra.mrb[64].mxu0 %v4822_v36  ;;  %v4902_v36 = vld [vmem:[%s5191_s6 + $0x30] ss:$80 sps:$4 sm:$0xff]  }
  0xa9   : > { %3033 = vmatmul.mubr.bf16.vlgmr.msra.gmra.mrb[64].mxu1 %v4825_v37  ;;  %4350 = vmatpush3.bf16.msra.mxu0 %v4829_v38  ;;  %v4905_v37 = vld [vmem:[%s5191_s6 + $0x38] ss:$80 sps:$4 sm:$0xff]   ;;  %v4909_v38 = vld [vmem:[%s5988_s1 + $0x400] sm:$0xff]  }
  0xaa   : > { %4414 = vmatpush3.bf16.msra.mxu1 %v4831_v39  ;;  %2943 = vmatprep.mubr.bf16.mxu0 %v4832_v40  ;;  %v4911_v39 = vld [vmem:[%s5988_s1 + $0x480] sm:$0xff]  }
  0xab   : > { %3040 = vmatprep.mubr.bf16.mxu1 %v4834_v41  ;;  %4351 = vmatprep.subr.bf16.mxu0 %v4838_v42  ;;  %v4912_v40 = vld [vmem:[%s5191_s6 + $0xd4] ss:$80 sps:$4 sm:$0xff]   ;;  %v4914_v41 = vld [vmem:[%s5191_s6 + $0xdc] ss:$80 sps:$4 sm:$0xff]  }
  0xac   : > { %4415 = vmatprep.subr.bf16.mxu1 %v4840_v44  ;;  %v4918_v42 = vld [vmem:[%s5988_s1 + $0x448] sm:$0xff]  }
  0xad   : > { %4352 = vmatpush3.bf16.msra.mxu0 %v4839_v43  ;;  %v4919_v43 = vld [vmem:[%s5988_s1 + $0x408] sm:$0xff]  }
  0xae   : > { %4416 = vmatpush3.bf16.msra.mxu1 %v4841_v45  ;;  %4353 = vmatprep.subr.bf16.mxu0 %v4848_v47  ;;  %v4920_v44 = vld [vmem:[%s5988_s1 + $0x4c8] sm:$0xff]   ;;  %v4928_v47 = vld [vmem:[%s5988_s1 + $0x450] sm:$0xff]  }
  0xaf   : > { %4417 = vmatprep.subr.bf16.mxu1 %v4850_v50  ;;  %v4921_v45 = vld [vmem:[%s5988_s1 + $0x488] sm:$0xff]   ;;  %v4922_v50 = vld [vmem:[%s5191_s6 + $0x174] ss:$80 sps:$4 sm:$0xff]  }
  0xb0   : > { %2944 = vmatmul.mubr.bf16.gmra.mrb[68].mxu0 %v4836_v46  ;;  %v4916_v46 = vld [vmem:[%s5191_s6 + $0xd0] ss:$80 sps:$4 sm:$0xff]  }
  0xb1   : > { %3041 = vmatmul.mubr.bf16.gmra.mrb[68].mxu1 %v4837_v48  ;;  %2951 = vmatprep.mubr.bf16.mxu0 %v4842_v49  ;;  %v4930_v48 = vld [vmem:[%s5988_s1 + $0x4d0] sm:$0xff]   ;;  %v4917_v49 = vld [vmem:[%s5191_s6 + $0xd8] ss:$80 sps:$4 sm:$0xff]  }
  0xb2   : > { %3048 = vmatprep.mubr.bf16.mxu1 %v4844_v51  ;;  %4354 = vmatpush3.bf16.msra.mxu0 %v4849_v52  ;;  %v4924_v51 = vld [vmem:[%s5191_s6 + $0x17c] ss:$80 sps:$4 sm:$0xff]   ;;  %v4929_v52 = vld [vmem:[%s5988_s1 + $0x410] sm:$0xff]  }
  0xb3   : > { %4418 = vmatpush3.bf16.msra.mxu1 %v4851_v53  ;;  %4355 = vmatprep.subr.bf16.mxu0 %v4858_v54  ;;  %v4931_v53 = vld [vmem:[%s5988_s1 + $0x490] sm:$0xff]   ;;  %v4938_v54 = vld [vmem:[%s5988_s1 + $0x458] sm:$0xff]  }
  0xb4   : > { %4419 = vmatprep.subr.bf16.mxu1 %v4860_v55  ;;  %v4940_v55 = vld [vmem:[%s5988_s1 + $0x4d8] sm:$0xff]  }
  0xb6   : > { %4356 = vmatpush3.bf16.msra.mxu0 %v4859_v57  ;;  %v4926_v57 = vld [vmem:[%s5191_s6 + $0x170] ss:$80 sps:$4 sm:$0xff]  }
  0xb7   : > { %4420 = vmatpush3.bf16.msra.mxu1 %v4861_v58  ;;  %4357 = vmatprep.subr.bf16.mxu0 %v4868_v61  ;;  %v4941_v58 = vld [vmem:[%s5988_s1 + $0x498] sm:$0xff]   ;;  %v4948_v61 = vld [vmem:[%s5988_s1 + $0x460] sm:$0xff]  }
  0xb8   : > { %2952 = vmatmul.mubr.bf16.gmra.mrb[72].mxu0 %v4846_v56  ;;  %4421 = vmatprep.subr.bf16.mxu1 %v4870_v63  ;;  %v4939_v56 = vld [vmem:[%s5988_s1 + $0x418] sm:$0xff]  }
  0xb9   : > { %3049 = vmatmul.mubr.bf16.gmra.mrb[72].mxu1 %v4847_v59  ;;  %2959 = vmatprep.mubr.bf16.mxu0 %v4852_v60  ;;  %v4927_v59 = vld [vmem:[%s5191_s6 + $0x178] ss:$80 sps:$4 sm:$0xff]   ;;  %v4932_v60 = vld [vmem:[%s5191_s6 + $0x214] ss:$80 sps:$4 sm:$0xff]   ;;  %v4934_v63 = vld [vmem:[%s5191_s6 + $0x21c] ss:$80 sps:$4 sm:$0xff]  }
  0xba   : > { %3056 = vmatprep.mubr.bf16.mxu1 %v4854_v62  ;;  %4358 = vmatpush3.bf16.msra.mxu0 %v4869_v0  ;;  %v4950_v62 = vld [vmem:[%s5988_s1 + $0x4e0] sm:$0xff]  }
  0xbb   : > { %4422 = vmatpush3.bf16.msra.mxu1 %v4871_v1  ;;  %4359 = vmatprep.subr.bf16.mxu0 %v4878_v2  ;;  %v4949_v0 = vld [vmem:[%s5988_s1 + $0x420] sm:$0xff]   ;;  %v4958_v2 = vld [vmem:[%s5988_s1 + $0x468] sm:$0xff]  }
  0xbc   : > { %4423 = vmatprep.subr.bf16.mxu1 %v4880_v3  ;;  %v4951_v1 = vld [vmem:[%s5988_s1 + $0x4a0] sm:$0xff]   ;;  %v4960_v3 = vld [vmem:[%s5988_s1 + $0x4e8] sm:$0xff]  }
  0xbe   : > { %4360 = vmatpush3.bf16.msra.mxu0 %v4879_v4  ;;  %v5666_v4 = vld [vmem:[%s5989_s2] ss:$0 sm:$0xff] }
  0xbf   : > { %4424 = vmatpush3.bf16.msra.mxu1 %v4881_v6  ;;  %4361 = vmatprep.subr.bf16.mxu0 %v4888_v9  ;;  %v4959_v6 = vld [vmem:[%s5988_s1 + $0x428] sm:$0xff]  }
  0xc0   : > { %2960 = vmatmul.mubr.bf16.gmra.mrb[76].mxu0 %v4856_v5  ;;  %4425 = vmatprep.subr.bf16.mxu1 %v4890_v10  ;;  %v4936_v5 = vld [vmem:[%s5191_s6 + $0x210] ss:$80 sps:$4 sm:$0xff]   ;;  %v4937_v9 = vld [vmem:[%s5191_s6 + $0x218] ss:$80 sps:$4 sm:$0xff]  }
  0xc1   : > { %3057 = vmatmul.mubr.bf16.gmra.mrb[76].mxu1 %v4857_v7  ;;  %2967 = vmatprep.mubr.bf16.mxu0 %v4862_v8  ;;  %v4961_v7 = vld [vmem:[%s5988_s1 + $0x4a8] sm:$0xff]   ;;  %v4968_v10 = vld [vmem:[%s5988_s1 + $0x470] sm:$0xff]  }
  0xc2   : > { %3064 = vmatprep.mubr.bf16.mxu1 %v4864_v11  ;;  %4362 = vmatpush3.bf16.msra.mxu0 %v4889_v12 }
  0xc3   : > { %4426 = vmatpush3.bf16.msra.mxu1 %v4891_v13  ;;  %4363 = vmatprep.subr.bf16.mxu0 %v4898_v14  ;;  %v4970_v13 = vld [vmem:[%s5988_s1 + $0x4f0] sm:$0xff]  }
  0xc4   : > { %4427 = vmatprep.subr.bf16.mxu1 %v4900_v17  ;;  %v4942_v17 = vld [vmem:[%s5191_s6 + $0x2b4] ss:$80 sps:$4 sm:$0xff]  }
  0xc6   : > { %4364 = vmatpush3.bf16.msra.mxu0 %v4899_v15 }
  0xc7   : > { %4428 = vmatpush3.bf16.msra.mxu1 %v4901_v18  ;;  %4477 = vmatprep.subr.bf16.mxu0 %v4908_v22  ;;  %v4969_v22 = vld [vmem:[%s5988_s1 + $0x430] sm:$0xff]  }
  0xc8   : > { %2968 = vmatmul.mubr.bf16.gmra.mrb[80].mxu0 %v4866_v16  ;;  %4541 = vmatprep.subr.bf16.mxu1 %v4910_v23  ;;  %v4971_v23 = vld [vmem:[%s5988_s1 + $0x4b0] sm:$0xff]  }
  0xc9   : > { %3065 = vmatmul.mubr.bf16.gmra.mrb[80].mxu1 %v4867_v19  ;;  %2975 = vmatprep.mubr.bf16.mxu0 %v4872_v20 }
  0xca   : > { %3072 = vmatprep.mubr.bf16.mxu1 %v4874_v21  ;;  %v4944_v21 = vld [vmem:[%s5191_s6 + $0x2bc] ss:$80 sps:$4 sm:$0xff]  }
  0xd0   : > { %2976 = vmatmul.mubr.bf16.gmra.mrb[84].mxu0 %v4876_v24 }
  0xd1   : > { %3073 = vmatmul.mubr.bf16.gmra.mrb[84].mxu1 %v4877_v25  ;;  %2983 = vmatprep.mubr.bf16.mxu0 %v4882_v26 }
  0xd2   : > { %3080 = vmatprep.mubr.bf16.mxu1 %v4884_v27  ;;  %v4978_v27 = vld [vmem:[%s5988_s1 + $0x478] sm:$0xff]  }
  0xd8   : > { %2984 = vmatmul.mubr.bf16.gmra.mrb[88].mxu0 %v4886_v28 }
  0xd9   : > { %3081 = vmatmul.mubr.bf16.gmra.mrb[88].mxu1 %v4887_v29  ;;  %2991 = vmatprep.mubr.bf16.mxu0 %v4892_v30  ;;  %v4980_v29 = vld [vmem:[%s5988_s1 + $0x4f8] sm:$0xff]  }
  0xda   : > { %3088 = vmatprep.mubr.bf16.mxu1 %v4894_v31 }
  0xe0   : > { %2992 = vmatmul.mubr.bf16.gmra.mrb[92].mxu0 %v4896_v32  ;;  %v4979_v32 = vld [vmem:[%s5988_s1 + $0x438] sm:$0xff]  }
  0xe1   : > { %3089 = vmatmul.mubr.bf16.gmra.mrb[92].mxu1 %v4897_v33  ;;  %3129 = vmatprep.mubr.bf16.mxu0 %v4904_v34 }
  0xe2   : > { %3226 = vmatprep.mubr.bf16.mxu1 %v4907_v35  ;;  %v4981_v35 = vld [vmem:[%s5988_s1 + $0x4b8] sm:$0xff]  }
  0xe8   : > { %3130 = vmatmul.mubr.bf16.vlgmr.msra.gmra.mrb[96].mxu0 %v4902_v36 }
  0xe9   : > { %3227 = vmatmul.mubr.bf16.vlgmr.msra.gmra.mrb[96].mxu1 %v4905_v37  ;;  %4478 = vmatpush3.bf16.msra.mxu0 %v4909_v38  ;;  %v4946_v38 = vld [vmem:[%s5191_s6 + $0x2b0] ss:$80 sps:$4 sm:$0xff]  }
  0xea   : > { %4542 = vmatpush3.bf16.msra.mxu1 %v4911_v39  ;;  %3137 = vmatprep.mubr.bf16.mxu0 %v4912_v40  ;;  %v4947_v39 = vld [vmem:[%s5191_s6 + $0x2b8] ss:$80 sps:$4 sm:$0xff]  }
  0xeb   : > { %3234 = vmatprep.mubr.bf16.mxu1 %v4914_v41  ;;  %4479 = vmatprep.subr.bf16.mxu0 %v4918_v42 }
  0xec   : > { %4543 = vmatprep.subr.bf16.mxu1 %v4920_v44 }
  0xed   : > { %4480 = vmatpush3.bf16.msra.mxu0 %v4919_v43  ;;  %v4952_v43 = vld [vmem:[%s5191_s6 + $0x354] ss:$80 sps:$4 sm:$0xff]  }
  0xee   : > { %4544 = vmatpush3.bf16.msra.mxu1 %v4921_v45  ;;  %4481 = vmatprep.subr.bf16.mxu0 %v4928_v47  ;;  %v4954_v47 = vld [vmem:[%s5191_s6 + $0x35c] ss:$80 sps:$4 sm:$0xff]  }
  0xef   : > { %4545 = vmatprep.subr.bf16.mxu1 %v4930_v48 }
  0xf0   : > { %3138 = vmatmul.mubr.bf16.gmra.mrb[100].mxu0 %v4916_v46 }
  0xf1   : > { %3235 = vmatmul.mubr.bf16.gmra.mrb[100].mxu1 %v4917_v49  ;;  %3145 = vmatprep.mubr.bf16.mxu0 %v4922_v50 }
  0xf2   : > { %3242 = vmatprep.mubr.bf16.mxu1 %v4924_v51  ;;  %4482 = vmatpush3.bf16.msra.mxu0 %v4929_v52 }
  0xf3   : > { %4546 = vmatpush3.bf16.msra.mxu1 %v4931_v53  ;;  %4483 = vmatprep.subr.bf16.mxu0 %v4938_v54 }
  0xf4   : > { %4547 = vmatprep.subr.bf16.mxu1 %v4940_v55 }
  0xf6   : > { %4484 = vmatpush3.bf16.msra.mxu0 %v4939_v56 }
  0xf7   : > { %4548 = vmatpush3.bf16.msra.mxu1 %v4941_v58  ;;  %4485 = vmatprep.subr.bf16.mxu0 %v4948_v61  ;;  %v4956_v58 = vld [vmem:[%s5191_s6 + $0x350] ss:$80 sps:$4 sm:$0xff]  }
  0xf8   : > { %3146 = vmatmul.mubr.bf16.gmra.mrb[104].mxu0 %v4926_v57  ;;  %4549 = vmatprep.subr.bf16.mxu1 %v4950_v62 }
  0xf9   : > { %3243 = vmatmul.mubr.bf16.gmra.mrb[104].mxu1 %v4927_v59  ;;  %3153 = vmatprep.mubr.bf16.mxu0 %v4932_v60  ;;  %v4957_v59 = vld [vmem:[%s5191_s6 + $0x358] ss:$80 sps:$4 sm:$0xff]  }
  0xfa   : > { %3250 = vmatprep.mubr.bf16.mxu1 %v4934_v63  ;;  %4486 = vmatpush3.bf16.msra.mxu0 %v4949_v0  ;;  %v4962_v63 = vld [vmem:[%s5191_s6 + $0x3f4] ss:$80 sps:$4 sm:$0xff]  }
  0xfb   : > { %v3981_v8 = vpop.f32.mrb[0].mxu0  ;;  %4550 = vmatpush3.bf16.msra.mxu1 %v4951_v1  ;;  %4487 = vmatprep.subr.bf16.mxu0 %v4958_v2 }
  0xfc   : > { %v4045_v11 = vpop.f32.mrb[0].mxu1  ;;  %v3982_v12 = vpop.f32.mrb[1].mxu0  ;;  %4551 = vmatprep.subr.bf16.mxu1 %v4960_v3  ;;  %v4964_v3 = vld [vmem:[%s5191_s6 + $0x3fc] ss:$80 sps:$4 sm:$0xff]  }
  0xfd   : > { %v3983_v14 = vadd.f32 %v3982_v12, %v3981_v8  ;;  %v4046_v15 = vpop.f32.mrb[1].mxu1  ;;  %v3984_v16 = vpop.f32.mrb[2].mxu0 }
  0xfe   : > { %v4047_v18 = vadd.f32 %v4046_v15, %v4045_v11  ;;  %v4048_v19 = vpop.f32.mrb[2].mxu1  ;;  %v3985_v20 = vpop.f32.mrb[3].mxu0  ;;  %4488 = vmatpush3.bf16.msra.mxu0 %v4959_v6  ;;  %v4966_v15 = vld [vmem:[%s5191_s6 + $0x3f0] ss:$80 sps:$4 sm:$0xff]  }
  0xff   : > { %v2550_v24 = vadd.f32 %v3983_v14, %v5666_v4  ;;  %v3986_v25 = vadd.f32 %v3985_v20, %v3984_v16  ;;  %v4049_v26 = vpop.f32.mrb[3].mxu1  ;;  %4552 = vmatpush3.bf16.msra.mxu1 %v4961_v7  ;;  %4489 = vmatprep.subr.bf16.mxu0 %v4968_v10  ;;  %v4972_v20 = vld [vmem:[%s5191_s6 + $0x494] ss:$80 sps:$4 sm:$0xff]  }
 0x100   : > { %v4050_v28 = vadd.f32 %v4049_v26, %v4048_v19  ;;  %3154 = vmatmul.mubr.bf16.gmra.mrb[108].mxu0 %v4936_v5  ;;  %4553 = vmatprep.subr.bf16.mxu1 %v4970_v13  ;;  %v4967_v19 = vld [vmem:[%s5191_s6 + $0x3f8] ss:$80 sps:$4 sm:$0xff]  }
 0x101   : > { %v5697_v30 = vadd.f32 %v4047_v18, %v2550_v24  ;;  %v2553_v31 = vadd.f32 %v3986_v25, %v5666_v4  ;;  %3251 = vmatmul.mubr.bf16.gmra.mrb[108].mxu1 %v4937_v9  ;;  %3161 = vmatprep.mubr.bf16.mxu0 %v4942_v17  ;;  %v4974_v24 = vld [vmem:[%s5191_s6 + $0x49c] ss:$80 sps:$4 sm:$0xff]  }
 0x102   : > { %3258 = vmatprep.mubr.bf16.mxu1 %v4944_v21  ;;  %4490 = vmatpush3.bf16.msra.mxu0 %v4969_v22 }
 0x103   : > { %v5703_v33 = vadd.f32 %v4050_v28, %v2553_v31  ;;  %v3987_v34 = vpop.f32.mrb[4].mxu0  ;;  %4554 = vmatpush3.bf16.msra.mxu1 %v4971_v23  ;;  %4491 = vmatprep.subr.bf16.mxu0 %v4978_v27 }
 0x104   : > { %v4051_v36 = vpop.f32.mrb[4].mxu1  ;;  %v3988_v37 = vpop.f32.mrb[5].mxu0  ;;  %4555 = vmatprep.subr.bf16.mxu1 %v4980_v29 }
 0x105   : > { %v3989_v40 = vadd.f32 %v3988_v37, %v3987_v34  ;;  %v4052_v41 = vpop.f32.mrb[5].mxu1  ;;  %v3990_v42 = vpop.f32.mrb[6].mxu0  ;;  %v4976_v37 = vld [vmem:[%s5191_s6 + $0x490] ss:$80 sps:$4 sm:$0xff]  }
 0x106   : > { %v4053_v44 = vadd.f32 %v4052_v41, %v4051_v36  ;;  %v4054_v45 = vpop.f32.mrb[6].mxu1  ;;  %v3991_v46 = vpop.f32.mrb[7].mxu0  ;;  %4492 = vmatpush3.bf16.msra.mxu0 %v4979_v32  ;;  %v4977_v41 = vld [vmem:[%s5191_s6 + $0x498] ss:$80 sps:$4 sm:$0xff]  }
 0x107   : > { %v2558_v48 = vadd.f32 %v3989_v40, %v5666_v4  ;;  %v3992_v49 = vadd.f32 %v3991_v46, %v3990_v42  ;;  %v4055_v50 = vpop.f32.mrb[7].mxu1  ;;  %4556 = vmatpush3.bf16.msra.mxu1 %v4981_v35  ;;  %v4984_v42 = vld [vmem:[%s5191_s6 + $0x44] ss:$80 sps:$4 sm:$0xff]   ;;  %v4987_v46 = vld [vmem:[%s5191_s6 + $0x4c] ss:$80 sps:$4 sm:$0xff]  }
 0x108   : > { %v4056_v51 = vadd.f32 %v4055_v50, %v4054_v45  ;;  %3162 = vmatmul.mubr.bf16.gmra.mrb[112].mxu0 %v4946_v38 }
 0x109   : > { %v5713_v52 = vadd.f32 %v4053_v44, %v2558_v48  ;;  %v2561_v53 = vadd.f32 %v3992_v49, %v5666_v4  ;;  %3259 = vmatmul.mubr.bf16.gmra.mrb[112].mxu1 %v4947_v39  ;;  %3169 = vmatprep.mubr.bf16.mxu0 %v4952_v43 }
 0x10a   : > { %3266 = vmatprep.mubr.bf16.mxu1 %v4954_v47 }
 0x10b   : > { %v5716_v54 = vadd.f32 %v4056_v51, %v2561_v53  ;;  %v3993_v55 = vpop.f32.mrb[8].mxu0 }
 0x10c   : > { %v4057_v56 = vpop.f32.mrb[8].mxu1  ;;  %v3994_v57 = vpop.f32.mrb[9].mxu0 }
 0x10d   : > { %v3995_v60 = vadd.f32 %v3994_v57, %v3993_v55  ;;  %v4058_v61 = vpop.f32.mrb[9].mxu1  ;;  %v3996_v62 = vpop.f32.mrb[10].mxu0 }
 0x10e   : > { %v4059_v0 = vadd.f32 %v4058_v61, %v4057_v56  ;;  %v4060_v1 = vpop.f32.mrb[10].mxu1  ;;  %v3997_v2 = vpop.f32.mrb[11].mxu0 }
 0x10f   : > { %v2566_v5 = vadd.f32 %v3995_v60, %v5666_v4  ;;  %v3998_v6 = vadd.f32 %v3997_v2, %v3996_v62  ;;  %v4061_v7 = vpop.f32.mrb[11].mxu1 }
 0x110   : > { %v4062_v8 = vadd.f32 %v4061_v7, %v4060_v1  ;;  %3170 = vmatmul.mubr.bf16.gmra.mrb[116].mxu0 %v4956_v58 }
 0x111   : > { %v5723_v9 = vadd.f32 %v4059_v0, %v2566_v5  ;;  %v2569_v10 = vadd.f32 %v3998_v6, %v5666_v4  ;;  %3267 = vmatmul.mubr.bf16.gmra.mrb[116].mxu1 %v4957_v59  ;;  %3177 = vmatprep.mubr.bf16.mxu0 %v4962_v63  ;;  %v4982_v59 = vld [vmem:[%s5191_s6 + $0x40] ss:$80 sps:$4 sm:$0xff]   ;;  %v4985_v63 = vld [vmem:[%s5191_s6 + $0x48] ss:$80 sps:$4 sm:$0xff]   ;;  %v4988_v0 = vld [vmem:[%s5191_s6 + $0xe4] ss:$80 sps:$4 sm:$0xff]  }
 0x112   : > { %3274 = vmatprep.mubr.bf16.mxu1 %v4964_v3  ;;  %v4990_v5 = vld [vmem:[%s5191_s6 + $0xec] ss:$80 sps:$4 sm:$0xff]  }
 0x113   : > { %v5726_v11 = vadd.f32 %v4062_v8, %v2569_v10  ;;  %v3999_v12 = vpop.f32.mrb[12].mxu0 }
 0x114   : > { %v4063_v13 = vpop.f32.mrb[12].mxu1  ;;  %v4000_v14 = vpop.f32.mrb[13].mxu0 }
 0x115   : > { %v4001_v16 = vadd.f32 %v4000_v14, %v3999_v12  ;;  %v4064_v17 = vpop.f32.mrb[13].mxu1  ;;  %v4002_v18 = vpop.f32.mrb[14].mxu0 }
 0x116   : > { %v4065_v21 = vadd.f32 %v4064_v17, %v4063_v13  ;;  %v4066_v22 = vpop.f32.mrb[14].mxu1  ;;  %v4003_v23 = vpop.f32.mrb[15].mxu0 }
 0x117   : > { %v2574_v25 = vadd.f32 %v4001_v16, %v5666_v4  ;;  %v4004_v26 = vadd.f32 %v4003_v23, %v4002_v18  ;;  %v4067_v27 = vpop.f32.mrb[15].mxu1  ;;  %v4992_v18 = vld [vmem:[%s5191_s6 + $0xe0] ss:$80 sps:$4 sm:$0xff]   ;;  %v4994_v23 = vld [vmem:[%s5191_s6 + $0x184] ss:$80 sps:$4 sm:$0xff]  }
 0x118   : > { %v4068_v28 = vadd.f32 %v4067_v27, %v4066_v22  ;;  %3178 = vmatmul.mubr.bf16.gmra.mrb[120].mxu0 %v4966_v15  ;;  %v4993_v22 = vld [vmem:[%s5191_s6 + $0xe8] ss:$80 sps:$4 sm:$0xff]   ;;  %v4996_v27 = vld [vmem:[%s5191_s6 + $0x18c] ss:$80 sps:$4 sm:$0xff]  }
 0x119   : > { %v5733_v29 = vadd.f32 %v4065_v21, %v2574_v25  ;;  %v2577_v31 = vadd.f32 %v4004_v26, %v5666_v4  ;;  %3275 = vmatmul.mubr.bf16.gmra.mrb[120].mxu1 %v4967_v19  ;;  %3185 = vmatprep.mubr.bf16.mxu0 %v4972_v20 }
 0x11a   : > { %3282 = vmatprep.mubr.bf16.mxu1 %v4974_v24 }
 0x11b   : > { %v5736_v32 = vadd.f32 %v4068_v28, %v2577_v31  ;;  %v4005_v34 = vpop.f32.mrb[16].mxu0 }
 0x11c   : > { %v4069_v35 = vpop.f32.mrb[16].mxu1  ;;  %v4006_v36 = vpop.f32.mrb[17].mxu0 }
 0x11d   : > { %v4007_v38 = vadd.f32 %v4006_v36, %v4005_v34  ;;  %v4070_v39 = vpop.f32.mrb[17].mxu1  ;;  %v4008_v40 = vpop.f32.mrb[18].mxu0 }
 0x11e   : > { %v4071_v43 = vadd.f32 %v4070_v39, %v4069_v35  ;;  %v4072_v44 = vpop.f32.mrb[18].mxu1  ;;  %v4009_v45 = vpop.f32.mrb[19].mxu0 }
 0x11f   : > { %v2582_v47 = vadd.f32 %v4007_v38, %v5666_v4  ;;  %v4010_v48 = vadd.f32 %v4009_v45, %v4008_v40  ;;  %v4073_v49 = vpop.f32.mrb[19].mxu1 }
 0x120   : > { %v4074_v50 = vadd.f32 %v4073_v49, %v4072_v44  ;;  %3186 = vmatmul.mubr.bf16.gmra.mrb[124].mxu0 %v4976_v37 }
 0x121   : > { %v5743_v51 = vadd.f32 %v4071_v43, %v2582_v47  ;;  %v2585_v53 = vadd.f32 %v4010_v48, %v5666_v4  ;;  %3283 = vmatmul.mubr.bf16.gmra.mrb[124].mxu1 %v4977_v41  ;;  %3323 = vmatprep.mubr.bf16.mxu0 %v4984_v42  ;;  %v4998_v42 = vld [vmem:[%s5191_s6 + $0x180] ss:$80 sps:$4 sm:$0xff]   ;;  %v5000_v47 = vld [vmem:[%s5191_s6 + $0x224] ss:$80 sps:$4 sm:$0xff]  }
 0x122   : > { %3420 = vmatprep.mubr.bf16.mxu1 %v4987_v46  ;;  %v4999_v46 = vld [vmem:[%s5191_s6 + $0x188] ss:$80 sps:$4 sm:$0xff]  }
 0x123   : > { %v5746_v55 = vadd.f32 %v4074_v50, %v2585_v53  ;;  %v4011_v56 = vpop.f32.mrb[20].mxu0  ;;  %v5002_v53 = vld [vmem:[%s5191_s6 + $0x22c] ss:$80 sps:$4 sm:$0xff]  }
 0x124   : > { %v4075_v57 = vpop.f32.mrb[20].mxu1  ;;  %v4012_v58 = vpop.f32.mrb[21].mxu0 }
 0x125   : > { %v4013_v60 = vadd.f32 %v4012_v58, %v4011_v56  ;;  %v4076_v61 = vpop.f32.mrb[21].mxu1  ;;  %v4014_v62 = vpop.f32.mrb[22].mxu0 }
 0x126   : > { %v4077_v1 = vadd.f32 %v4076_v61, %v4075_v57  ;;  %v4078_v2 = vpop.f32.mrb[22].mxu1  ;;  %v4015_v3 = vpop.f32.mrb[23].mxu0 }
 0x127   : > { %v2590_v6 = vadd.f32 %v4013_v60, %v5666_v4  ;;  %v4016_v7 = vadd.f32 %v4015_v3, %v4014_v62  ;;  %v4079_v8 = vpop.f32.mrb[23].mxu1 }
 0x128   : > { %v4080_v10 = vadd.f32 %v4079_v8, %v4078_v2  ;;  %3324 = vmatmul.mubr.bf16.vlgmr.msra.gmra.mrb[128].mxu0 %v4982_v59  ;;  %v5004_v2 = vld [vmem:[%s5191_s6 + $0x220] ss:$80 sps:$4 sm:$0xff]   ;;  %v5006_v8 = vld [vmem:[%s5191_s6 + $0x2c4] ss:$80 sps:$4 sm:$0xff]  }
 0x129   : > { %v5753_v12 = vadd.f32 %v4077_v1, %v2590_v6  ;;  %v2593_v13 = vadd.f32 %v4016_v7, %v5666_v4  ;;  %3421 = vmatmul.mubr.bf16.vlgmr.msra.gmra.mrb[128].mxu1 %v4985_v63  ;;  %3331 = vmatprep.mubr.bf16.mxu0 %v4988_v0  ;;  %v5005_v7 = vld [vmem:[%s5191_s6 + $0x228] ss:$80 sps:$4 sm:$0xff]  }
 0x12a   : > { %3428 = vmatprep.mubr.bf16.mxu1 %v4990_v5 }
 0x12b   : > { %v5756_v14 = vadd.f32 %v4080_v10, %v2593_v13  ;;  %v4017_v15 = vpop.f32.mrb[24].mxu0 }
 0x12c   : > { %v4081_v16 = vpop.f32.mrb[24].mxu1  ;;  %v4018_v17 = vpop.f32.mrb[25].mxu0 }
 0x12d   : > { %v4019_v19 = vadd.f32 %v4018_v17, %v4017_v15  ;;  %v4082_v20 = vpop.f32.mrb[25].mxu1  ;;  %v4020_v21 = vpop.f32.mrb[26].mxu0 }
 0x12e   : > { %v4083_v24 = vadd.f32 %v4082_v20, %v4081_v16  ;;  %v4084_v25 = vpop.f32.mrb[26].mxu1  ;;  %v4021_v26 = vpop.f32.mrb[27].mxu0 }
 0x12f   : > { %v2598_v28 = vadd.f32 %v4019_v19, %v5666_v4  ;;  %v4022_v31 = vadd.f32 %v4021_v26, %v4020_v21  ;;  %v4085_v34 = vpop.f32.mrb[27].mxu1 }
 0x130   : > { %v4086_v35 = vadd.f32 %v4085_v34, %v4084_v25  ;;  %3332 = vmatmul.mubr.bf16.gmra.mrb[132].mxu0 %v4992_v18  ;;  %v5012_v34 = vld [vmem:[%s5191_s6 + $0x364] ss:$80 sps:$4 sm:$0xff]  }
 0x131   : > { %v5763_v36 = vadd.f32 %v4083_v24, %v2598_v28  ;;  %v2601_v37 = vadd.f32 %v4022_v31, %v5666_v4  ;;  %3429 = vmatmul.mubr.bf16.gmra.mrb[132].mxu1 %v4993_v22  ;;  %3339 = vmatprep.mubr.bf16.mxu0 %v4994_v23  ;;  %v5011_v31 = vld [vmem:[%s5191_s6 + $0x2c8] ss:$80 sps:$4 sm:$0xff]  }
 0x132   : > { %3436 = vmatprep.mubr.bf16.mxu1 %v4996_v27 }
 0x133   : > { %v5766_v38 = vadd.f32 %v4086_v35, %v2601_v37  ;;  %v4023_v39 = vpop.f32.mrb[28].mxu0 }
 0x134   : > { %v4087_v40 = vpop.f32.mrb[28].mxu1  ;;  %v4024_v41 = vpop.f32.mrb[29].mxu0 }
 0x135   : > { %v4025_v43 = vadd.f32 %v4024_v41, %v4023_v39  ;;  %v4088_v44 = vpop.f32.mrb[29].mxu1  ;;  %v4026_v45 = vpop.f32.mrb[30].mxu0 }
 0x136   : > { %v4089_v48 = vadd.f32 %v4088_v44, %v4087_v40  ;;  %v4090_v49 = vpop.f32.mrb[30].mxu1  ;;  %v4027_v50 = vpop.f32.mrb[31].mxu0 }
 0x137   : > { %v2606_v56 = vadd.f32 %v4025_v43, %v5666_v4  ;;  %v4028_v57 = vadd.f32 %v4027_v50, %v4026_v45  ;;  %v4091_v58 = vpop.f32.mrb[31].mxu1 }
 0x138   : > { %v4092_v59 = vadd.f32 %v4091_v58, %v4090_v49  ;;  %3340 = vmatmul.mubr.bf16.gmra.mrb[136].mxu0 %v4998_v42  ;;  %v5018_v58 = vld [vmem:[%s5191_s6 + $0x404] ss:$80 sps:$4 sm:$0xff]  }
 0x139   : > { %v5773_v60 = vadd.f32 %v4089_v48, %v2606_v56  ;;  %v2609_v61 = vadd.f32 %v4028_v57, %v5666_v4  ;;  %3437 = vmatmul.mubr.bf16.gmra.mrb[136].mxu1 %v4999_v46  ;;  %3347 = vmatprep.mubr.bf16.mxu0 %v5000_v47  ;;  %v5008_v4 = vld [vmem:[%s5191_s6 + $0x2cc] ss:$80 sps:$4 sm:$0xff]   ;;  %v5017_v57 = vld [vmem:[%s5191_s6 + $0x368] ss:$80 sps:$4 sm:$0xff]  }
 0x13a   : > { %3444 = vmatprep.mubr.bf16.mxu1 %v5002_v53 }
 0x13b   : > { %v5776_v62 = vadd.f32 %v4092_v59, %v2609_v61  ;;  %v4109_v63 = vpop.f32.mrb[32].mxu0 }
 0x13c   : > { %v4173_v0 = vpop.f32.mrb[32].mxu1  ;;  %v4110_v1 = vpop.f32.mrb[33].mxu0 }
 0x13d   : > { %v4111_v3 = vadd.f32 %v4110_v1, %v4109_v63  ;;  %v4174_v5 = vpop.f32.mrb[33].mxu1  ;;  %v4112_v6 = vpop.f32.mrb[34].mxu0 }
 0x13e   : > { %v4175_v10 = vadd.f32 %v4174_v5, %v4173_v0  ;;  %v4176_v13 = vpop.f32.mrb[34].mxu1  ;;  %v4113_v15 = vpop.f32.mrb[35].mxu0 }
 0x13f   : > { %v2744_v16 = vadd.f32 %v4111_v3, %v5697_v30  ;;  %v4114_v17 = vadd.f32 %v4113_v15, %v4112_v6  ;;  %v4177_v18 = vpop.f32.mrb[35].mxu1  ;;  %v5010_v30 = vld [vmem:[%s5191_s6 + $0x2c0] ss:$80 sps:$4 sm:$0xff]  }
 0x140   : > { %v4178_v19 = vadd.f32 %v4177_v18, %v4176_v13  ;;  %3348 = vmatmul.mubr.bf16.gmra.mrb[140].mxu0 %v5004_v2  ;;  %v5024_v18 = vld [vmem:[%s5191_s6 + $0x4a4] ss:$80 sps:$4 sm:$0xff]  }
 0x141   : > { %v5783_v20 = vadd.f32 %v4175_v10, %v2744_v16  ;;  %v2747_v21 = vadd.f32 %v4114_v17, %v5703_v33  ;;  %3445 = vmatmul.mubr.bf16.gmra.mrb[140].mxu1 %v5005_v7  ;;  %3355 = vmatprep.mubr.bf16.mxu0 %v5006_v8  ;;  %v5014_v33 = vld [vmem:[%s5191_s6 + $0x36c] ss:$80 sps:$4 sm:$0xff]   ;;  %v5023_v17 = vld [vmem:[%s5191_s6 + $0x408] ss:$80 sps:$4 sm:$0xff]  }
 0x142   : > { %3452 = vmatprep.mubr.bf16.mxu1 %v5008_v4 }
 0x143   : > { %v5786_v22 = vadd.f32 %v4178_v19, %v2747_v21  ;;  %v4115_v23 = vpop.f32.mrb[36].mxu0 }
 0x144   : > { %v4179_v24 = vpop.f32.mrb[36].mxu1  ;;  %v4116_v25 = vpop.f32.mrb[37].mxu0 }
 0x145   : > { %v4117_v26 = vadd.f32 %v4116_v25, %v4115_v23  ;;  %v4180_v27 = vpop.f32.mrb[37].mxu1  ;;  %v4118_v28 = vpop.f32.mrb[38].mxu0 }
 0x146   : > { %v4181_v35 = vadd.f32 %v4180_v27, %v4179_v24  ;;  %v4182_v37 = vpop.f32.mrb[38].mxu1  ;;  %v4119_v39 = vpop.f32.mrb[39].mxu0 }
 0x147   : > { %v2752_v40 = vadd.f32 %v4117_v26, %v5713_v52  ;;  %v4120_v41 = vadd.f32 %v4119_v39, %v4118_v28  ;;  %v4183_v42 = vpop.f32.mrb[39].mxu1  ;;  %v5016_v52 = vld [vmem:[%s5191_s6 + $0x360] ss:$80 sps:$4 sm:$0xff]  }
 0x148   : > { %v4184_v43 = vadd.f32 %v4183_v42, %v4182_v37  ;;  %3356 = vmatmul.mubr.bf16.gmra.mrb[144].mxu0 %v5010_v30  ;;  %v5028_v39 = vld [vmem:[%s5191_s6 + $0x4a0] ss:$80 sps:$4 sm:$0xff]  }
 0x149   : > { %v5793_v44 = vadd.f32 %v4181_v35, %v2752_v40  ;;  %v2755_v45 = vadd.f32 %v4120_v41, %v5716_v54  ;;  %3453 = vmatmul.mubr.bf16.gmra.mrb[144].mxu1 %v5011_v31  ;;  %3363 = vmatprep.mubr.bf16.mxu0 %v5012_v34  ;;  %v5020_v54 = vld [vmem:[%s5191_s6 + $0x40c] ss:$80 sps:$4 sm:$0xff]   ;;  %v5029_v41 = vld [vmem:[%s5191_s6 + $0x4a8] ss:$80 sps:$4 sm:$0xff]  }
 0x14a   : > { %3460 = vmatprep.mubr.bf16.mxu1 %v5014_v33 }
 0x14b   : > { %v5796_v46 = vadd.f32 %v4184_v43, %v2755_v45  ;;  %v4121_v47 = vpop.f32.mrb[40].mxu0 }
 0x14c   : > { %v4185_v48 = vpop.f32.mrb[40].mxu1  ;;  %v4122_v49 = vpop.f32.mrb[41].mxu0 }
 0x14d   : > { %v4123_v50 = vadd.f32 %v4122_v49, %v4121_v47  ;;  %v4186_v53 = vpop.f32.mrb[41].mxu1  ;;  %v4124_v56 = vpop.f32.mrb[42].mxu0 }
 0x14e   : > { %v4187_v59 = vadd.f32 %v4186_v53, %v4185_v48  ;;  %v4188_v61 = vpop.f32.mrb[42].mxu1  ;;  %v4125_v63 = vpop.f32.mrb[43].mxu0 }
 0x14f   : > { %v2760_v0 = vadd.f32 %v4123_v50, %v5723_v9  ;;  %v4126_v1 = vadd.f32 %v4125_v63, %v4124_v56  ;;  %v4189_v2 = vpop.f32.mrb[43].mxu1  ;;  %v5022_v9 = vld [vmem:[%s5191_s6 + $0x400] ss:$80 sps:$4 sm:$0xff]  }
 0x150   : > { %v4190_v3 = vadd.f32 %v4189_v2, %v4188_v61  ;;  %3364 = vmatmul.mubr.bf16.gmra.mrb[148].mxu0 %v5016_v52 }
 0x151   : > { %v5803_v5 = vadd.f32 %v4187_v59, %v2760_v0  ;;  %v2763_v6 = vadd.f32 %v4126_v1, %v5726_v11  ;;  %3461 = vmatmul.mubr.bf16.gmra.mrb[148].mxu1 %v5017_v57  ;;  %3371 = vmatprep.mubr.bf16.mxu0 %v5018_v58  ;;  %v5026_v11 = vld [vmem:[%s5191_s6 + $0x4ac] ss:$80 sps:$4 sm:$0xff]   ;;  %s3641_s6 = sshll.u32 %s5996_s23, 3 }
 0x152   : > { %3468 = vmatprep.mubr.bf16.mxu1 %v5020_v54  ;;  %s5946_s7 = scalar_lea.vmem %s5990_s3, %s3641_s6 }
 0x153   : > { %v5806_v7 = vadd.f32 %v4190_v3, %v2763_v6  ;;  %v4127_v8 = vpop.f32.mrb[44].mxu0 }
 0x154   : > { %v4191_v10 = vpop.f32.mrb[44].mxu1  ;;  %v4128_v13 = vpop.f32.mrb[45].mxu0 }
 0x155   : > { %v4129_v15 = vadd.f32 %v4128_v13, %v4127_v8  ;;  %v4192_v4 = vpop.f32.mrb[45].mxu1  ;;  %v4130_v16 = vpop.f32.mrb[46].mxu0 }
 0x156   : > { %v4193_v19 = vadd.f32 %v4192_v4, %v4191_v10  ;;  %v4194_v21 = vpop.f32.mrb[46].mxu1  ;;  %v4131_v23 = vpop.f32.mrb[47].mxu0 }
 0x157   : > { %v2768_v24 = vadd.f32 %v4129_v15, %v5733_v29  ;;  %v4132_v25 = vadd.f32 %v4131_v23, %v4130_v16  ;;  %v4195_v30 = vpop.f32.mrb[47].mxu1 }
 0x158   : > { %v4196_v26 = vadd.f32 %v4195_v30, %v4194_v21  ;;  %3372 = vmatmul.mubr.bf16.gmra.mrb[152].mxu0 %v5022_v9 }
 0x159   : > { %v5813_v27 = vadd.f32 %v4193_v19, %v2768_v24  ;;  %v2771_v28 = vadd.f32 %v4132_v25, %v5736_v32  ;;  %3469 = vmatmul.mubr.bf16.gmra.mrb[152].mxu1 %v5023_v17  ;;  %3379 = vmatprep.mubr.bf16.mxu0 %v5024_v18 }
 0x15a   : > { %3476 = vmatprep.mubr.bf16.mxu1 %v5026_v11 }
 0x15b   : > { %v5816_v31 = vadd.f32 %v4196_v26, %v2771_v28  ;;  %v4133_v34 = vpop.f32.mrb[48].mxu0 }
 0x15c   : > { %v4197_v35 = vpop.f32.mrb[48].mxu1  ;;  %v4134_v37 = vpop.f32.mrb[49].mxu0 }
 0x15d   : > { %v4135_v33 = vadd.f32 %v4134_v37, %v4133_v34  ;;  %v4198_v29 = vpop.f32.mrb[49].mxu1  ;;  %v4136_v40 = vpop.f32.mrb[50].mxu0 }
 0x15e   : > { %v4199_v42 = vadd.f32 %v4198_v29, %v4197_v35  ;;  %v4200_v43 = vpop.f32.mrb[50].mxu1  ;;  %v4137_v45 = vpop.f32.mrb[51].mxu0 }
 0x15f   : > { %v2776_v47 = vadd.f32 %v4135_v33, %v5743_v51  ;;  %v4138_v48 = vadd.f32 %v4137_v45, %v4136_v40  ;;  %v4201_v32 = vpop.f32.mrb[51].mxu1 }
 0x160   : > { %v4202_v49 = vadd.f32 %v4201_v32, %v4200_v43  ;;  %3380 = vmatmul.mubr.bf16.gmra.mrb[156].mxu0 %v5028_v39 }
 0x161   : > { %v5821_v52 = vadd.f32 %v4199_v42, %v2776_v47  ;;  %v2779_v50 = vadd.f32 %v4138_v48, %v5746_v55  ;;  %3477 = vmatmul.mubr.bf16.gmra.mrb[156].mxu1 %v5029_v41 }
 0x163   : > { %v5824_v53 = vadd.f32 %v4202_v49, %v2779_v50  ;;  %v4139_v56 = vpop.f32.mrb[52].mxu0 }
 0x164   : > { %v4203_v57 = vpop.f32.mrb[52].mxu1  ;;  %v4140_v58 = vpop.f32.mrb[53].mxu0 }
 0x165   : > { %v4141_v59 = vadd.f32 %v4140_v58, %v4139_v56  ;;  %v4204_v61 = vpop.f32.mrb[53].mxu1  ;;  %v4142_v63 = vpop.f32.mrb[54].mxu0 }
 0x166   : > { %v4205_v54 = vadd.f32 %v4204_v61, %v4203_v57  ;;  %v4206_v0 = vpop.f32.mrb[54].mxu1  ;;  %v4143_v51 = vpop.f32.mrb[55].mxu0 }
 0x167   : > { %v2784_v1 = vadd.f32 %v4141_v59, %v5753_v12  ;;  %v4144_v2 = vadd.f32 %v4143_v51, %v4142_v63  ;;  %v4207_v3 = vpop.f32.mrb[55].mxu1 }
 0x168   : > { %v4208_v6 = vadd.f32 %v4207_v3, %v4206_v0 }
 0x169   : > { %v5827_v8 = vadd.f32 %v4205_v54, %v2784_v1  ;;  %v2787_v55 = vadd.f32 %v4144_v2, %v5756_v14 }
 0x16b   : > { %v5830_v10 = vadd.f32 %v4208_v6, %v2787_v55  ;;  %v4145_v13 = vpop.f32.mrb[56].mxu0 }
 0x16c   : > { %v4209_v9 = vpop.f32.mrb[56].mxu1  ;;  %v4146_v15 = vpop.f32.mrb[57].mxu0 }
 0x16d   : > { %v4147_v4 = vadd.f32 %v4146_v15, %v4145_v13  ;;  %v4210_v16 = vpop.f32.mrb[57].mxu1  ;;  %v4148_v17 = vpop.f32.mrb[58].mxu0 }
 0x16e   : > { %v4211_v18 = vadd.f32 %v4210_v16, %v4209_v9  ;;  %v4212_v19 = vpop.f32.mrb[58].mxu1  ;;  %v4149_v21 = vpop.f32.mrb[59].mxu0 }
 0x16f   : > { %v2792_v12 = vadd.f32 %v4147_v4, %v5763_v36  ;;  %v4150_v23 = vadd.f32 %v4149_v21, %v4148_v17  ;;  %v4213_v11 = vpop.f32.mrb[59].mxu1 }
 0x170   : > { %v4214_v24 = vadd.f32 %v4213_v11, %v4212_v19 }
 0x171   : > { %v5833_v25 = vadd.f32 %v4211_v18, %v2792_v12  ;;  %v2795_v14 = vadd.f32 %v4150_v23, %v5766_v38 }
 0x173   : > { %v5836_v30 = vadd.f32 %v4214_v24, %v2795_v14  ;;  %v4151_v26 = vpop.f32.mrb[60].mxu0 }
 0x174   : > { %v4215_v28 = vpop.f32.mrb[60].mxu1  ;;  %v4152_v34 = vpop.f32.mrb[61].mxu0 }
 0x175   : > { %v4153_v35 = vadd.f32 %v4152_v34, %v4151_v26  ;;  %v4216_v37 = vpop.f32.mrb[61].mxu1  ;;  %v4154_v39 = vpop.f32.mrb[62].mxu0 }
 0x176   : > { %v4217_v33 = vadd.f32 %v4216_v37, %v4215_v28  ;;  %v4218_v29 = vpop.f32.mrb[62].mxu1  ;;  %v4155_v40 = vpop.f32.mrb[63].mxu0 }
 0x177   : > { %v2800_v36 = vadd.f32 %v4153_v35, %v5773_v60  ;;  %v4156_v41 = vadd.f32 %v4155_v40, %v4154_v39  ;;  %v4219_v42 = vpop.f32.mrb[63].mxu1 }
 0x178   : > { %v4220_v43 = vadd.f32 %v4219_v42, %v4218_v29 }
 0x179   : > { %v5839_v45 = vadd.f32 %v4217_v33, %v2800_v36  ;;  %v2803_v38 = vadd.f32 %v4156_v41, %v5776_v62 }
 0x17b   : > { %v5842_v47 = vadd.f32 %v4220_v43, %v2803_v38  ;;  %v4237_v48 = vpop.f32.mrb[64].mxu0 }
 0x17c   : > { %v4301_v32 = vpop.f32.mrb[64].mxu1  ;;  %v4238_v49 = vpop.f32.mrb[65].mxu0 }
 0x17d   : > { %v4239_v50 = vadd.f32 %v4238_v49, %v4237_v48  ;;  %v4302_v56 = vpop.f32.mrb[65].mxu1  ;;  %v4240_v57 = vpop.f32.mrb[66].mxu0 }
 0x17e   : > { %v4303_v58 = vadd.f32 %v4302_v56, %v4301_v32  ;;  %v4304_v59 = vpop.f32.mrb[66].mxu1  ;;  %v4241_v61 = vpop.f32.mrb[67].mxu0 }
 0x17f   : > { %v2938_v60 = vadd.f32 %v4239_v50, %v5783_v20  ;;  %v4242_v63 = vadd.f32 %v4241_v61, %v4240_v57  ;;  %v4305_v54 = vpop.f32.mrb[67].mxu1 }
 0x180   : > { %v4306_v0 = vadd.f32 %v4305_v54, %v4304_v59 }
 0x181   : > { %v5845_v51 = vadd.f32 %v4303_v58, %v2938_v60  ;;  %v2941_v62 = vadd.f32 %v4242_v63, %v5786_v22 }
 0x183   : > { %v5848_v1 = vadd.f32 %v4306_v0, %v2941_v62  ;;  %v4243_v2 = vpop.f32.mrb[68].mxu0 }
 0x184   : > { %v4307_v3 = vpop.f32.mrb[68].mxu1  ;;  %v4244_v6 = vpop.f32.mrb[69].mxu0 }
 0x185   : > { %v4245_v55 = vadd.f32 %v4244_v6, %v4243_v2  ;;  %v4308_v13 = vpop.f32.mrb[69].mxu1  ;;  %v4246_v9 = vpop.f32.mrb[70].mxu0 }
 0x186   : > { %v4309_v15 = vadd.f32 %v4308_v13, %v4307_v3  ;;  %v4310_v4 = vpop.f32.mrb[70].mxu1  ;;  %v4247_v16 = vpop.f32.mrb[71].mxu0 }
 0x187   : > { %v2946_v20 = vadd.f32 %v4245_v55, %v5793_v44  ;;  %v4248_v17 = vadd.f32 %v4247_v16, %v4246_v9  ;;  %v4311_v18 = vpop.f32.mrb[71].mxu1 }
 0x188   : > { %v4312_v19 = vadd.f32 %v4311_v18, %v4310_v4 }
 0x189   : > { %v5851_v21 = vadd.f32 %v4309_v15, %v2946_v20  ;;  %v2949_v22 = vadd.f32 %v4248_v17, %v5796_v46 }
 0x18b   : > { %v5854_v12 = vadd.f32 %v4312_v19, %v2949_v22  ;;  %v4249_v23 = vpop.f32.mrb[72].mxu0 }
 0x18c   : > { %v4313_v11 = vpop.f32.mrb[72].mxu1  ;;  %v4250_v24 = vpop.f32.mrb[73].mxu0 }
 0x18d   : > { %v4251_v14 = vadd.f32 %v4250_v24, %v4249_v23  ;;  %v4314_v26 = vpop.f32.mrb[73].mxu1  ;;  %v4252_v28 = vpop.f32.mrb[74].mxu0 }
 0x18e   : > { %v4315_v34 = vadd.f32 %v4314_v26, %v4313_v11  ;;  %v4316_v35 = vpop.f32.mrb[74].mxu1  ;;  %v4253_v37 = vpop.f32.mrb[75].mxu0 }
 0x18f   : > { %v2954_v44 = vadd.f32 %v4251_v14, %v5803_v5  ;;  %v4254_v39 = vadd.f32 %v4253_v37, %v4252_v28  ;;  %v4317_v33 = vpop.f32.mrb[75].mxu1 }
 0x190   : > { %v4318_v29 = vadd.f32 %v4317_v33, %v4316_v35 }
 0x191   : > { %v5857_v40 = vadd.f32 %v4315_v34, %v2954_v44  ;;  %v2957_v46 = vadd.f32 %v4254_v39, %v5806_v7 }
 0x193   : > { %v5860_v36 = vadd.f32 %v4318_v29, %v2957_v46  ;;  %v4255_v41 = vpop.f32.mrb[76].mxu0 }
 0x194   : > { %v4319_v42 = vpop.f32.mrb[76].mxu1  ;;  %v4256_v43 = vpop.f32.mrb[77].mxu0 }
 0x195   : > { %v4257_v38 = vadd.f32 %v4256_v43, %v4255_v41  ;;  %v4320_v48 = vpop.f32.mrb[77].mxu1  ;;  %v4258_v32 = vpop.f32.mrb[78].mxu0 }
 0x196   : > { %v4321_v49 = vadd.f32 %v4320_v48, %v4319_v42  ;;  %v4322_v50 = vpop.f32.mrb[78].mxu1  ;;  %v4259_v56 = vpop.f32.mrb[79].mxu0 }
 0x197   : > { %v2962_v5 = vadd.f32 %v4257_v38, %v5813_v27  ;;  %v4260_v57 = vadd.f32 %v4259_v56, %v4258_v32  ;;  %v4323_v58 = vpop.f32.mrb[79].mxu1 }
 0x198   : > { %v4324_v59 = vadd.f32 %v4323_v58, %v4322_v50 }
 0x199   : > { %v5863_v61 = vadd.f32 %v4321_v49, %v2962_v5  ;;  %v2965_v7 = vadd.f32 %v4260_v57, %v5816_v31 }
 0x19b   : > { %v5866_v60 = vadd.f32 %v4324_v59, %v2965_v7  ;;  %v4261_v63 = vpop.f32.mrb[80].mxu0 }
 0x19c   : > { %v4325_v54 = vpop.f32.mrb[80].mxu1  ;;  %v4262_v0 = vpop.f32.mrb[81].mxu0 }
 0x19d   : > { %v4263_v62 = vadd.f32 %v4262_v0, %v4261_v63  ;;  %v4326_v2 = vpop.f32.mrb[81].mxu1  ;;  %v4264_v3 = vpop.f32.mrb[82].mxu0 }
 0x19e   : > { %v4327_v6 = vadd.f32 %v4326_v2, %v4325_v54  ;;  %v4328_v55 = vpop.f32.mrb[82].mxu1  ;;  %v4265_v13 = vpop.f32.mrb[83].mxu0 }
 0x19f   : > { %v2970_v27 = vadd.f32 %v4263_v62, %v5821_v52  ;;  %v4266_v9 = vadd.f32 %v4265_v13, %v4264_v3  ;;  %v4329_v15 = vpop.f32.mrb[83].mxu1 }
 0x1a0   : > { %v4330_v4 = vadd.f32 %v4329_v15, %v4328_v55 }
 0x1a1   : > { %v5869_v16 = vadd.f32 %v4327_v6, %v2970_v27  ;;  %v2973_v31 = vadd.f32 %v4266_v9, %v5824_v53 }
 0x1a3   : > { %v5872_v20 = vadd.f32 %v4330_v4, %v2973_v31  ;;  %v4267_v17 = vpop.f32.mrb[84].mxu0 }
 0x1a4   : > { %v4331_v18 = vpop.f32.mrb[84].mxu1  ;;  %v4268_v19 = vpop.f32.mrb[85].mxu0 }
 0x1a5   : > { %v4269_v22 = vadd.f32 %v4268_v19, %v4267_v17  ;;  %v4332_v23 = vpop.f32.mrb[85].mxu1  ;;  %v4270_v11 = vpop.f32.mrb[86].mxu0 }
 0x1a6   : > { %v4333_v24 = vadd.f32 %v4332_v23, %v4331_v18  ;;  %v4334_v14 = vpop.f32.mrb[86].mxu1  ;;  %v4271_v26 = vpop.f32.mrb[87].mxu0 }
 0x1a7   : > { %v2978_v52 = vadd.f32 %v4269_v22, %v5827_v8  ;;  %v4272_v28 = vadd.f32 %v4271_v26, %v4270_v11  ;;  %v4335_v34 = vpop.f32.mrb[87].mxu1 }
 0x1a8   : > { %v4336_v35 = vadd.f32 %v4335_v34, %v4334_v14 }
 0x1a9   : > { %v5875_v37 = vadd.f32 %v4333_v24, %v2978_v52  ;;  %v2981_v53 = vadd.f32 %v4272_v28, %v5830_v10 }
 0x1ab   : > { %v5878_v44 = vadd.f32 %v4336_v35, %v2981_v53  ;;  %v4273_v39 = vpop.f32.mrb[88].mxu0 }
 0x1ac   : > { %v4337_v33 = vpop.f32.mrb[88].mxu1  ;;  %v4274_v29 = vpop.f32.mrb[89].mxu0 }
 0x1ad   : > { %v4275_v46 = vadd.f32 %v4274_v29, %v4273_v39  ;;  %v4338_v41 = vpop.f32.mrb[89].mxu1  ;;  %v4276_v42 = vpop.f32.mrb[90].mxu0 }
 0x1ae   : > { %v4339_v43 = vadd.f32 %v4338_v41, %v4337_v33  ;;  %v4340_v38 = vpop.f32.mrb[90].mxu1  ;;  %v4277_v48 = vpop.f32.mrb[91].mxu0 }
 0x1af   : > { %v2986_v8 = vadd.f32 %v4275_v46, %v5833_v25  ;;  %v4278_v32 = vadd.f32 %v4277_v48, %v4276_v42  ;;  %v4341_v49 = vpop.f32.mrb[91].mxu1 }
 0x1b0   : > { %v4342_v50 = vadd.f32 %v4341_v49, %v4340_v38 }
 0x1b1   : > { %v5881_v56 = vadd.f32 %v4339_v43, %v2986_v8  ;;  %v2989_v10 = vadd.f32 %v4278_v32, %v5836_v30 }
 0x1b3   : > { %v5884_v5 = vadd.f32 %v4342_v50, %v2989_v10  ;;  %v4279_v57 = vpop.f32.mrb[92].mxu0 }
 0x1b4   : > { %v4343_v58 = vpop.f32.mrb[92].mxu1  ;;  %v4280_v59 = vpop.f32.mrb[93].mxu0 }
 0x1b5   : > { %v4281_v7 = vadd.f32 %v4280_v59, %v4279_v57  ;;  %v4344_v63 = vpop.f32.mrb[93].mxu1  ;;  %v4282_v54 = vpop.f32.mrb[94].mxu0 }
 0x1b6   : > { %v4345_v0 = vadd.f32 %v4344_v63, %v4343_v58  ;;  %v4346_v62 = vpop.f32.mrb[94].mxu1  ;;  %v4283_v2 = vpop.f32.mrb[95].mxu0 }
 0x1b7   : > { %v2994_v25 = vadd.f32 %v4281_v7, %v5839_v45  ;;  %v4284_v3 = vadd.f32 %v4283_v2, %v4282_v54  ;;  %v4347_v6 = vpop.f32.mrb[95].mxu1 }
 0x1b8   : > { %v4348_v55 = vadd.f32 %v4347_v6, %v4346_v62 }
 0x1b9   : > { %v5887_v13 = vadd.f32 %v4345_v0, %v2994_v25  ;;  %v2997_v30 = vadd.f32 %v4284_v3, %v5842_v47 }
 0x1bb   : > { %v5890_v27 = vadd.f32 %v4348_v55, %v2997_v30  ;;  %v4365_v9 = vpop.f32.mrb[96].mxu0 }
 0x1bc   : > { %v4429_v15 = vpop.f32.mrb[96].mxu1  ;;  %v4366_v4 = vpop.f32.mrb[97].mxu0 }
 0x1bd   : > { %v4367_v31 = vadd.f32 %v4366_v4, %v4365_v9  ;;  %v4430_v17 = vpop.f32.mrb[97].mxu1  ;;  %v4368_v18 = vpop.f32.mrb[98].mxu0 }
 0x1be   : > { %v4431_v19 = vadd.f32 %v4430_v17, %v4429_v15  ;;  %v4432_v22 = vpop.f32.mrb[98].mxu1  ;;  %v4369_v23 = vpop.f32.mrb[99].mxu0 }
 0x1bf   : > { %v3132_v45 = vadd.f32 %v4367_v31, %v5845_v51  ;;  %v4370_v11 = vadd.f32 %v4369_v23, %v4368_v18  ;;  %v4433_v24 = vpop.f32.mrb[99].mxu1 }
 0x1c0   : > { %v4434_v14 = vadd.f32 %v4433_v24, %v4432_v22 }
 0x1c1   : > { %v5893_v26 = vadd.f32 %v4431_v19, %v3132_v45  ;;  %v3135_v47 = vadd.f32 %v4370_v11, %v5848_v1 }
 0x1c3   : > { %v5896_v52 = vadd.f32 %v4434_v14, %v3135_v47  ;;  %v4371_v28 = vpop.f32.mrb[100].mxu0 }
 0x1c4   : > { %v4435_v34 = vpop.f32.mrb[100].mxu1  ;;  %v4372_v35 = vpop.f32.mrb[101].mxu0 }
 0x1c5   : > { %v4373_v53 = vadd.f32 %v4372_v35, %v4371_v28  ;;  %v4436_v39 = vpop.f32.mrb[101].mxu1  ;;  %v4374_v33 = vpop.f32.mrb[102].mxu0 }
 0x1c6   : > { %v4437_v29 = vadd.f32 %v4436_v39, %v4435_v34  ;;  %v4438_v46 = vpop.f32.mrb[102].mxu1  ;;  %v4375_v41 = vpop.f32.mrb[103].mxu0 }
 0x1c7   : > { %v3140_v51 = vadd.f32 %v4373_v53, %v5851_v21  ;;  %v4376_v42 = vadd.f32 %v4375_v41, %v4374_v33  ;;  %v4439_v43 = vpop.f32.mrb[103].mxu1 }
 0x1c8   : > { %v4440_v38 = vadd.f32 %v4439_v43, %v4438_v46 }
 0x1c9   : > { %v5899_v48 = vadd.f32 %v4437_v29, %v3140_v51  ;;  %v3143_v1 = vadd.f32 %v4376_v42, %v5854_v12 }
 0x1cb   : > { %v5902_v8 = vadd.f32 %v4440_v38, %v3143_v1  ;;  %v4377_v32 = vpop.f32.mrb[104].mxu0 }
 0x1cc   : > { %v4441_v49 = vpop.f32.mrb[104].mxu1  ;;  %v4378_v50 = vpop.f32.mrb[105].mxu0 }
 0x1cd   : > { %v4379_v10 = vadd.f32 %v4378_v50, %v4377_v32  ;;  %v4442_v57 = vpop.f32.mrb[105].mxu1  ;;  %v4380_v58 = vpop.f32.mrb[106].mxu0 }
 0x1ce   : > { %v4443_v59 = vadd.f32 %v4442_v57, %v4441_v49  ;;  %v4444_v7 = vpop.f32.mrb[106].mxu1  ;;  %v4381_v63 = vpop.f32.mrb[107].mxu0 }
 0x1cf   : > { %v3148_v21 = vadd.f32 %v4379_v10, %v5857_v40  ;;  %v4382_v54 = vadd.f32 %v4381_v63, %v4380_v58  ;;  %v4445_v0 = vpop.f32.mrb[107].mxu1 }
 0x1d0   : > { %v4446_v62 = vadd.f32 %v4445_v0, %v4444_v7 }
 0x1d1   : > { %v5905_v2 = vadd.f32 %v4443_v59, %v3148_v21  ;;  %v3151_v12 = vadd.f32 %v4382_v54, %v5860_v36 }
 0x1d3   : > { %v5908_v25 = vadd.f32 %v4446_v62, %v3151_v12  ;;  %v4383_v3 = vpop.f32.mrb[108].mxu0 }
 0x1d4   : > { %v4447_v6 = vpop.f32.mrb[108].mxu1  ;;  %v4384_v55 = vpop.f32.mrb[109].mxu0 }
 0x1d5   : > { %v4385_v30 = vadd.f32 %v4384_v55, %v4383_v3  ;;  %v4448_v9 = vpop.f32.mrb[109].mxu1  ;;  %v4386_v15 = vpop.f32.mrb[110].mxu0 }
 0x1d6   : > { %v4449_v4 = vadd.f32 %v4448_v9, %v4447_v6  ;;  %v4450_v31 = vpop.f32.mrb[110].mxu1  ;;  %v4387_v17 = vpop.f32.mrb[111].mxu0 }
 0x1d7   : > { %v3156_v40 = vadd.f32 %v4385_v30, %v5863_v61  ;;  %v4388_v18 = vadd.f32 %v4387_v17, %v4386_v15  ;;  %v4451_v19 = vpop.f32.mrb[111].mxu1 }
 0x1d8   : > { %v4452_v22 = vadd.f32 %v4451_v19, %v4450_v31 }
 0x1d9   : > { %v5911_v23 = vadd.f32 %v4449_v4, %v3156_v40  ;;  %v3159_v36 = vadd.f32 %v4388_v18, %v5866_v60 }
 0x1db   : > { %v5914_v45 = vadd.f32 %v4452_v22, %v3159_v36  ;;  %v4389_v11 = vpop.f32.mrb[112].mxu0 }
 0x1dc   : > { %v4453_v24 = vpop.f32.mrb[112].mxu1  ;;  %v4390_v14 = vpop.f32.mrb[113].mxu0 }
 0x1dd   : > { %v4391_v47 = vadd.f32 %v4390_v14, %v4389_v11  ;;  %v4454_v28 = vpop.f32.mrb[113].mxu1  ;;  %v4392_v34 = vpop.f32.mrb[114].mxu0 }
 0x1de   : > { %v4455_v35 = vadd.f32 %v4454_v28, %v4453_v24  ;;  %v4456_v53 = vpop.f32.mrb[114].mxu1  ;;  %v4393_v39 = vpop.f32.mrb[115].mxu0 }
 0x1df   : > { %v3164_v61 = vadd.f32 %v4391_v47, %v5869_v16  ;;  %v4394_v33 = vadd.f32 %v4393_v39, %v4392_v34  ;;  %v4457_v29 = vpop.f32.mrb[115].mxu1 }
 0x1e0   : > { %v4458_v46 = vadd.f32 %v4457_v29, %v4456_v53 }
 0x1e1   : > { %v5917_v41 = vadd.f32 %v4455_v35, %v3164_v61  ;;  %v3167_v60 = vadd.f32 %v4394_v33, %v5872_v20 }
 0x1e3   : > { %v5920_v51 = vadd.f32 %v4458_v46, %v3167_v60  ;;  %v4395_v42 = vpop.f32.mrb[116].mxu0 }
 0x1e4   : > { %v4459_v43 = vpop.f32.mrb[116].mxu1  ;;  %v4396_v38 = vpop.f32.mrb[117].mxu0 }
 0x1e5   : > { %v4397_v1 = vadd.f32 %v4396_v38, %v4395_v42  ;;  %v4460_v32 = vpop.f32.mrb[117].mxu1  ;;  %v4398_v49 = vpop.f32.mrb[118].mxu0 }
 0x1e6   : > { %v4461_v50 = vadd.f32 %v4460_v32, %v4459_v43  ;;  %v4462_v10 = vpop.f32.mrb[118].mxu1  ;;  %v4399_v57 = vpop.f32.mrb[119].mxu0 }
 0x1e7   : > { %v3172_v16 = vadd.f32 %v4397_v1, %v5875_v37  ;;  %v4400_v58 = vadd.f32 %v4399_v57, %v4398_v49  ;;  %v4463_v59 = vpop.f32.mrb[119].mxu1 }
 0x1e8   : > { %v4464_v7 = vadd.f32 %v4463_v59, %v4462_v10 }
 0x1e9   : > { %v5923_v63 = vadd.f32 %v4461_v50, %v3172_v16  ;;  %v3175_v20 = vadd.f32 %v4400_v58, %v5878_v44 }
 0x1eb   : > { %v5926_v21 = vadd.f32 %v4464_v7, %v3175_v20  ;;  %v4401_v54 = vpop.f32.mrb[120].mxu0 }
 0x1ec   : > { %v4465_v0 = vpop.f32.mrb[120].mxu1  ;;  %v4402_v62 = vpop.f32.mrb[121].mxu0 }
 0x1ed   : > { %v4403_v12 = vadd.f32 %v4402_v62, %v4401_v54  ;;  %v4466_v3 = vpop.f32.mrb[121].mxu1  ;;  %v4404_v6 = vpop.f32.mrb[122].mxu0 }
 0x1ee   : > { %v4467_v55 = vadd.f32 %v4466_v3, %v4465_v0  ;;  %v4468_v30 = vpop.f32.mrb[122].mxu1  ;;  %v4405_v9 = vpop.f32.mrb[123].mxu0 }
 0x1ef   : > { %v3180_v37 = vadd.f32 %v4403_v12, %v5881_v56  ;;  %v4406_v15 = vadd.f32 %v4405_v9, %v4404_v6  ;;  %v4469_v4 = vpop.f32.mrb[123].mxu1 }
 0x1f0   : > { %v4470_v31 = vadd.f32 %v4469_v4, %v4468_v30 }
 0x1f1   : > { %v5929_v17 = vadd.f32 %v4467_v55, %v3180_v37  ;;  %v3183_v44 = vadd.f32 %v4406_v15, %v5884_v5 }
 0x1f3   : > { %v5932_v40 = vadd.f32 %v4470_v31, %v3183_v44  ;;  %v4407_v18 = vpop.f32.mrb[124].mxu0 }
 0x1f4   : > { %v4471_v19 = vpop.f32.mrb[124].mxu1  ;;  %v4408_v22 = vpop.f32.mrb[125].mxu0 }
 0x1f5   : > { %v4409_v36 = vadd.f32 %v4408_v22, %v4407_v18  ;;  %v4472_v11 = vpop.f32.mrb[125].mxu1  ;;  %v4410_v24 = vpop.f32.mrb[126].mxu0 }
 0x1f6   : > { %v4473_v14 = vadd.f32 %v4472_v11, %v4471_v19  ;;  %v4474_v47 = vpop.f32.mrb[126].mxu1  ;;  %v4411_v28 = vpop.f32.mrb[127].mxu0 }
 0x1f7   : > { %v3188_v56 = vadd.f32 %v4409_v36, %v5887_v13  ;;  %v4412_v34 = vadd.f32 %v4411_v28, %v4410_v24  ;;  %v4475_v35 = vpop.f32.mrb[127].mxu1 }
 0x1f8   : > { %v4476_v53 = vadd.f32 %v4475_v35, %v4474_v47 }
 0x1f9   : > { %v5935_v39 = vadd.f32 %v4473_v14, %v3188_v56  ;;  %v3191_v5 = vadd.f32 %v4412_v34, %v5890_v27 }
 0x1fb   : > { %v5938_v61 = vadd.f32 %v4476_v53, %v3191_v5  ;;  %v4493_v33 = vpop.f32.mrb[128].mxu0 }
 0x1fc   : > { %v4557_v29 = vpop.f32.mrb[128].mxu1  ;;  %v4494_v46 = vpop.f32.mrb[129].mxu0 }
 0x1fd   : > { %v4495_v60 = vadd.f32 %v4494_v46, %v4493_v33  ;;  %v4558_v42 = vpop.f32.mrb[129].mxu1  ;;  %v4496_v43 = vpop.f32.mrb[130].mxu0 }
 0x1fe   : > { %v4559_v38 = vadd.f32 %v4558_v42, %v4557_v29  ;;  %v4560_v1 = vpop.f32.mrb[130].mxu1  ;;  %v4497_v32 = vpop.f32.mrb[131].mxu0 }
 0x1ff   : > { %v3326_v13 = vadd.f32 %v4495_v60, %v5893_v26  ;;  %v4498_v49 = vadd.f32 %v4497_v32, %v4496_v43  ;;  %v4561_v50 = vpop.f32.mrb[131].mxu1 }
 0x200   : > { %v4562_v10 = vadd.f32 %v4561_v50, %v4560_v1 }
 0x201   : > { %v3423_v57 = vadd.f32 %v4559_v38, %v3326_v13  ;;  %v3329_v27 = vadd.f32 %v4498_v49, %v5896_v52 }
 0x203   : > { %v3485_v16 = vmax.f32 %v3423_v57, 0.0  ;;  %v3426_v58 = vadd.f32 %v4562_v10, %v3329_v27  ;;  %v4499_v59 = vpop.f32.mrb[132].mxu0 }
 0x204   : > { %v4563_v7 = vpop.f32.mrb[132].mxu1  ;;  %v4500_v20 = vpop.f32.mrb[133].mxu0 }
 0x205   : > { %3501 = vst [vmem:[%s5946_s7] sm:$0xff] %v3485_v16  ;;  %v3486_v26 = vmax.f32 %v3426_v58, 0.0  ;;  %v4501_v54 = vadd.f32 %v4500_v20, %v4499_v59  ;;  %v4564_v0 = vpop.f32.mrb[133].mxu1  ;;  %v4502_v62 = vpop.f32.mrb[134].mxu0 }
 0x206   : > { %v4565_v12 = vadd.f32 %v4564_v0, %v4563_v7  ;;  %v4566_v52 = vpop.f32.mrb[134].mxu1  ;;  %v4503_v3 = vpop.f32.mrb[135].mxu0 }
 0x207   : > { %3502 = vst [vmem:[%s5946_s7 + $0x8] sm:$0xff] %v3486_v26  ;;  %v3334_v6 = vadd.f32 %v4501_v54, %v5899_v48  ;;  %v4504_v55 = vadd.f32 %v4503_v3, %v4502_v62  ;;  %v4567_v30 = vpop.f32.mrb[135].mxu1 }
 0x208   : > { %v4568_v9 = vadd.f32 %v4567_v30, %v4566_v52 }
 0x209   : > { %v3431_v37 = vadd.f32 %v4565_v12, %v3334_v6  ;;  %v3337_v15 = vadd.f32 %v4504_v55, %v5902_v8 }
 0x20b   : > { %v3487_v4 = vmax.f32 %v3431_v37, 0.0  ;;  %v3434_v31 = vadd.f32 %v4568_v9, %v3337_v15  ;;  %v4505_v44 = vpop.f32.mrb[136].mxu0 }
 0x20c   : > { %v4569_v18 = vpop.f32.mrb[136].mxu1  ;;  %v4506_v19 = vpop.f32.mrb[137].mxu0 }
 0x20d   : > { %3503 = vst [vmem:[%s5946_s7 + $0x10] sm:$0xff] %v3487_v4  ;;  %v3488_v22 = vmax.f32 %v3434_v31, 0.0  ;;  %v4507_v36 = vadd.f32 %v4506_v19, %v4505_v44  ;;  %v4570_v11 = vpop.f32.mrb[137].mxu1  ;;  %v4508_v24 = vpop.f32.mrb[138].mxu0 }
 0x20e   : > { %v4571_v14 = vadd.f32 %v4570_v11, %v4569_v18  ;;  %v4572_v48 = vpop.f32.mrb[138].mxu1  ;;  %v4509_v47 = vpop.f32.mrb[139].mxu0 }
 0x20f   : > { %3504 = vst [vmem:[%s5946_s7 + $0x18] sm:$0xff] %v3488_v22  ;;  %v3342_v28 = vadd.f32 %v4507_v36, %v5905_v2  ;;  %v4510_v56 = vadd.f32 %v4509_v47, %v4508_v24  ;;  %v4573_v34 = vpop.f32.mrb[139].mxu1 }
 0x210   : > { %v4574_v8 = vadd.f32 %v4573_v34, %v4572_v48 }
 0x211   : > { %v3439_v35 = vadd.f32 %v4571_v14, %v3342_v28  ;;  %v3345_v53 = vadd.f32 %v4510_v56, %v5908_v25 }
 0x213   : > { %v3489_v5 = vmax.f32 %v3439_v35, 0.0  ;;  %v3442_v33 = vadd.f32 %v4574_v8, %v3345_v53  ;;  %v4511_v29 = vpop.f32.mrb[140].mxu0 }
 0x214   : > { %v4575_v46 = vpop.f32.mrb[140].mxu1  ;;  %v4512_v60 = vpop.f32.mrb[141].mxu0 }
 0x215   : > { %3505 = vst [vmem:[%s5946_s7 + $0x20] sm:$0xff] %v3489_v5  ;;  %v3490_v42 = vmax.f32 %v3442_v33, 0.0  ;;  %v4513_v43 = vadd.f32 %v4512_v60, %v4511_v29  ;;  %v4576_v38 = vpop.f32.mrb[141].mxu1  ;;  %v4514_v1 = vpop.f32.mrb[142].mxu0 }
 0x216   : > { %v4577_v32 = vadd.f32 %v4576_v38, %v4575_v46  ;;  %v4578_v2 = vpop.f32.mrb[142].mxu1  ;;  %v4515_v13 = vpop.f32.mrb[143].mxu0 }
 0x217   : > { %3506 = vst [vmem:[%s5946_s7 + $0x28] sm:$0xff] %v3490_v42  ;;  %v3350_v49 = vadd.f32 %v4513_v43, %v5911_v23  ;;  %v4516_v50 = vadd.f32 %v4515_v13, %v4514_v1  ;;  %v4579_v10 = vpop.f32.mrb[143].mxu1 }
 0x218   : > { %v4580_v25 = vadd.f32 %v4579_v10, %v4578_v2 }
 0x219   : > { %v3447_v57 = vadd.f32 %v4577_v32, %v3350_v49  ;;  %v3353_v27 = vadd.f32 %v4516_v50, %v5914_v45 }
 0x21b   : > { %v3491_v16 = vmax.f32 %v3447_v57, 0.0  ;;  %v3450_v58 = vadd.f32 %v4580_v25, %v3353_v27  ;;  %v4517_v59 = vpop.f32.mrb[144].mxu0 }
 0x21c   : > { %v4581_v7 = vpop.f32.mrb[144].mxu1  ;;  %v4518_v20 = vpop.f32.mrb[145].mxu0 }
 0x21d   : > { %3507 = vst [vmem:[%s5946_s7 + $0x30] sm:$0xff] %v3491_v16  ;;  %v3492_v26 = vmax.f32 %v3450_v58, 0.0  ;;  %v4519_v54 = vadd.f32 %v4518_v20, %v4517_v59  ;;  %v4582_v0 = vpop.f32.mrb[145].mxu1  ;;  %v4520_v62 = vpop.f32.mrb[146].mxu0 }
 0x21e   : > { %v4583_v12 = vadd.f32 %v4582_v0, %v4581_v7  ;;  %v4584_v23 = vpop.f32.mrb[146].mxu1  ;;  %v4521_v52 = vpop.f32.mrb[147].mxu0 }
 0x21f   : > { %3508 = vst [vmem:[%s5946_s7 + $0x38] sm:$0xff] %v3492_v26  ;;  %v3358_v3 = vadd.f32 %v4519_v54, %v5917_v41  ;;  %v4522_v6 = vadd.f32 %v4521_v52, %v4520_v62  ;;  %v4585_v55 = vpop.f32.mrb[147].mxu1 }
 0x220   : > { %v4586_v45 = vadd.f32 %v4585_v55, %v4584_v23 }
 0x221   : > { %v3455_v30 = vadd.f32 %v4583_v12, %v3358_v3  ;;  %v3361_v9 = vadd.f32 %v4522_v6, %v5920_v51 }
 0x223   : > { %v3493_v37 = vmax.f32 %v3455_v30, 0.0  ;;  %v3458_v15 = vadd.f32 %v4586_v45, %v3361_v9  ;;  %v4523_v4 = vpop.f32.mrb[148].mxu0 }
 0x224   : > { %v4587_v31 = vpop.f32.mrb[148].mxu1  ;;  %v4524_v44 = vpop.f32.mrb[149].mxu0 }
 0x225   : > { %3509 = vst [vmem:[%s5946_s7 + $0x40] sm:$0xff] %v3493_v37  ;;  %v3494_v18 = vmax.f32 %v3458_v15, 0.0  ;;  %v4525_v19 = vadd.f32 %v4524_v44, %v4523_v4  ;;  %v4588_v22 = vpop.f32.mrb[149].mxu1  ;;  %v4526_v36 = vpop.f32.mrb[150].mxu0 }
 0x226   : > { %v4589_v11 = vadd.f32 %v4588_v22, %v4587_v31  ;;  %v4590_v41 = vpop.f32.mrb[150].mxu1  ;;  %v4527_v24 = vpop.f32.mrb[151].mxu0 }
 0x227   : > { %3510 = vst [vmem:[%s5946_s7 + $0x48] sm:$0xff] %v3494_v18  ;;  %v3366_v14 = vadd.f32 %v4525_v19, %v5923_v63  ;;  %v4528_v48 = vadd.f32 %v4527_v24, %v4526_v36  ;;  %v4591_v47 = vpop.f32.mrb[151].mxu1 }
 0x228   : > { %v4592_v51 = vadd.f32 %v4591_v47, %v4590_v41 }
 0x229   : > { %v3463_v28 = vadd.f32 %v4589_v11, %v3366_v14  ;;  %v3369_v56 = vadd.f32 %v4528_v48, %v5926_v21 }
 0x22b   : > { %v3495_v34 = vmax.f32 %v3463_v28, 0.0  ;;  %v3466_v8 = vadd.f32 %v4592_v51, %v3369_v56  ;;  %v4529_v35 = vpop.f32.mrb[152].mxu0 }
 0x22c   : > { %v4593_v53 = vpop.f32.mrb[152].mxu1  ;;  %v4530_v5 = vpop.f32.mrb[153].mxu0 }
 0x22d   : > { %3511 = vst [vmem:[%s5946_s7 + $0x50] sm:$0xff] %v3495_v34  ;;  %v3496_v33 = vmax.f32 %v3466_v8, 0.0  ;;  %v4531_v29 = vadd.f32 %v4530_v5, %v4529_v35  ;;  %v4594_v46 = vpop.f32.mrb[153].mxu1  ;;  %v4532_v60 = vpop.f32.mrb[154].mxu0 }
 0x22e   : > { %v4595_v42 = vadd.f32 %v4594_v46, %v4593_v53  ;;  %v4596_v63 = vpop.f32.mrb[154].mxu1  ;;  %v4533_v43 = vpop.f32.mrb[155].mxu0 }
 0x22f   : > { %3512 = vst [vmem:[%s5946_s7 + $0x58] sm:$0xff] %v3496_v33  ;;  %v3374_v38 = vadd.f32 %v4531_v29, %v5929_v17  ;;  %v4534_v1 = vadd.f32 %v4533_v43, %v4532_v60  ;;  %v4597_v32 = vpop.f32.mrb[155].mxu1 }
 0x230   : > { %v4598_v21 = vadd.f32 %v4597_v32, %v4596_v63 }
 0x231   : > { %v3471_v2 = vadd.f32 %v4595_v42, %v3374_v38  ;;  %v3377_v13 = vadd.f32 %v4534_v1, %v5932_v40 }
 0x233   : > { %v3497_v49 = vmax.f32 %v3471_v2, 0.0  ;;  %v3474_v50 = vadd.f32 %v4598_v21, %v3377_v13  ;;  %v4535_v10 = vpop.f32.mrb[156].mxu0 }
 0x234   : > { %v4599_v25 = vpop.f32.mrb[156].mxu1  ;;  %v4536_v57 = vpop.f32.mrb[157].mxu0 }
 0x235   : > { %3513 = vst [vmem:[%s5946_s7 + $0x60] sm:$0xff] %v3497_v49  ;;  %v3498_v27 = vmax.f32 %v3474_v50, 0.0  ;;  %v4537_v16 = vadd.f32 %v4536_v57, %v4535_v10  ;;  %v4600_v58 = vpop.f32.mrb[157].mxu1  ;;  %v4538_v59 = vpop.f32.mrb[158].mxu0 }
 0x236   : > { %v4601_v17 = vadd.f32 %v4600_v58, %v4599_v25  ;;  %v4602_v7 = vpop.f32.mrb[158].mxu1  ;;  %v4539_v20 = vpop.f32.mrb[159].mxu0 }
 0x237   : > { %3514 = vst [vmem:[%s5946_s7 + $0x68] sm:$0xff] %v3498_v27  ;;  %v3382_v26 = vadd.f32 %v4537_v16, %v5935_v39  ;;  %v4540_v54 = vadd.f32 %v4539_v20, %v4538_v59  ;;  %v4603_v40 = vpop.f32.mrb[159].mxu1 }
 0x238   : > { %v4604_v0 = vadd.f32 %v4603_v40, %v4602_v7 }
 0x239   : > { %v3479_v62 = vadd.f32 %v4601_v17, %v3382_v26  ;;  %v3385_v12 = vadd.f32 %v4540_v54, %v5938_v61 }
 0x23b   : > { %v3499_v23 = vmax.f32 %v3479_v62, 0.0  ;;  %v3482_v52 = vadd.f32 %v4604_v0, %v3385_v12 }
 0x23d   : > { %3515 = vst [vmem:[%s5946_s7 + $0x70] sm:$0xff] %v3499_v23  ;;  %v3500_v3 = vmax.f32 %v3482_v52, 0.0 }
 0x23f   : > { %3516 = vst [vmem:[%s5946_s7 + $0x78] sm:$0xff] %v3500_v3 }
 0x240 PF: > { %s13_s14 = sadd.s32 1, %s5052_s14   ;;  %s5991_s12 = smov %s5048_s13 }
 0x241   : > { %p10_p5 = scmp.ge.s32.totalorder %s13_s14, 4   ;;  %s5992_s13 = smov %s5994_s15 }
 0x243   :  { %12 = sbr.rel (!%p10_p5) target bundleno = 2 (0x2), region = 68 }

// kernel: cnn_forward.6
= control target key start
LH: loop header
LB: loop body
LE: loop exit
PB: predicated region body
PF: predicated region fallthrough
CT: control target
= control target key end

     0   :  { %s9370_s0 = inlined_call_operand.vmem [shape: bf16[16,11136], index: 0, kind: input, shape index: {}]   ;;  %s9371_s1 = inlined_call_operand.vmem [shape: bf16[11136,512], index: 1, kind: input, shape index: {}]   ;;  %s9372_s2 = inlined_call_operand.vmem [shape: f32[1,512], index: 2, kind: input, shape index: {}]   ;;  %s9373_s3 = inlined_call_operand.vmem [shape: f32[16,512], index: 3, kind: input, shape index: {}]   ;;  %s9374_s4 = inlined_call_operand.vmem [shape: f32[16,512], index: 4, kind: output, shape index: {}]  }
   0x1   :  { %9377 = sst [smem:[#allocation8_spill]] %s9370_s0 }
   0x2   :  { %9378 = sst [smem:[#allocation9_spill]] %s9371_s1 }
   0x3   :  { %s7656_s15 = smov 0   ;;  %s7658_s16 = smov 0  }
   0x4   :  { %s7660_s17 = smov 0   ;;  %s7662_s18 = smov 0  }
   0x5   :  { %s7664_s19 = smov 0   ;;  %s7666_s20 = smov 0  }
   0x6   :  { %s7668_s21 = smov 0   ;;  %s7670_s22 = smov 0  }
   0x7   :  { %s7672_s23 = smov 0   ;;  %s7674_s24 = smov 0  }
   0x8   :  { %s7676_s25 = smov 0  }
   0x9 LB: > { %s6129_s26 = sadd.s32 4294967295, %s7627_s25   ;;  %s26_s27 = sadd.s32 1, %s7619_s23  ;;  %s7627_s25 = sphi %s7676_s25, %s14_s25   ;;  %s7623_s24 = sphi %s7674_s24, %s9398_s24   ;;  %s7619_s23 = sphi %s7672_s23, %s9397_s23   ;;  %s7615_s22 = sphi %s7670_s22, %s9396_s22   ;;  %s7611_s21 = sphi %s7668_s21, %s9395_s21   ;;  %s7607_s20 = sphi %s7666_s20, %s9394_s20   ;;  %s7603_s19 = sphi %s7664_s19, %s9393_s19   ;;  %s7599_s18 = sphi %s7662_s18, %s9392_s18   ;;  %s7595_s17 = sphi %s7660_s17, %s9391_s17   ;;  %s7591_s16 = sphi %s7658_s16, %s9390_s16   ;;  %s7587_s15 = sphi %s7656_s15, %s9389_s15  }
   0xa   : > { %p27_p0 = scmp.ge.s32.totalorder %s26_s27, 3  ;;  %s29_s28 = sadd.s32 1, %s7623_s24 }
   0xb   : > { %s42_s29 = sadd.s32 1, %s7607_s20  ;;  %p49_p1 = scmp.ne.s32.totalorder %s7607_s20, %s7603_s19 }
   0xc   : > { %s9400_s27 = smov (%p27_p0, %s26_s27), 0  ;;  %s9402_s28 = smov (!%p27_p0, %s29_s28), %s7623_s24 }
   0xd   : > { %9379 = sst [smem:[#allocation6_spill]] %s9400_s27  ;;  %s38_s30 = ssub.s32 %s7619_s23, %s9400_s27 }
   0xe   : > { %p50_p2 = scmp.eq.s32.totalorder %s7627_s25, 0  ;;  %p31_p3 = scmp.ge.s32.totalorder %s9402_s28, 2 }
   0xf   : > { %p40_p4 = scmp.eq.s32.totalorder %s38_s30, 0  ;;  %s70_s6 = sadd.s32 1, %s7599_s18 }
  0x10   : > { %p7725_p5 = por %p50_p2, %p49_p1  ;;  %s9404_s28 = smov (%p31_p3, %s9402_s28), 0 }
  0x11   : > { %9381 = sst [smem:[#allocation7_spill]] %s9404_s28  ;;  %s66_s8 = ssub.s32 %s7623_s24, %s9404_s28 }
  0x12   : > { %s7733_s7 = scalar_select %p40_p4, %s7607_s20, %s42_s29  }
  0x13   : > { %p77_p6 = scmp.ne.s32.totalorder %s7599_s18, %s7595_s17  ;;  %s67_s9 = sor.u32 %s66_s8, %s38_s30 }
  0x14   : > { %p122_p7 = scmp.eq.s32.totalorder %s66_s8, 0  ;;  %p68_p8 = scmp.eq.s32.totalorder %s67_s9, 0 }
  0x15   : > { %p7741_p9 = por %p77_p6, %p50_p2  ;;  %s124_s11 = sadd.s32 1, %s7591_s16 }
  0x16   : > { %p131_p10 = scmp.ne.s32.totalorder %s7591_s16, %s7587_s15  ;;  %p163_p12 = scmp.eq.s32.totalorder %s6129_s26, 5 }
  0x17   : > { %s7749_s12 = scalar_select %p68_p8, %s7599_s18, %s70_s6  }
  0x18   : > { %s7752_s13 = scalar_select %p122_p7, %s7591_s16, %s124_s11  }
  0x19   : > { %p7756_p11 = por %p131_p10, %p50_p2  ;;  %p7760_p13 = por %p163_p12, %p131_p10 }
  0x1a   : > { %p6132_p0 = scmp.ge.s32.totalorder %s7627_s25, 6 }
  0x1c   : > { %185 = sbr.rel (%p6132_p0) target bundleno = 308 (0x134), region = 16 }
  0x23   : > { %188 = sbr.rel (!%p7725_p5) target bundleno = 59 (0x3b), region = 20  ;;  %s190_s30 = sand.u32 (%p7725_p5), 1, %s7607_s20  }
  0x24   : > { %s6648_s6 = smul.u32 (%p7725_p5), 116, %s7619_s23  ;;  %s9385_s0 = sld [smem:[#allocation8_spill]] (%p7725_p5) }
  0x25   : > { %s6708_s8 = smul.u32 (%p7725_p5), 232, %s190_s30 }
  0x27   : > { %s7777_s26 = scalar_lea.vmem (%p7725_p5), [#allocation2], %s6708_s8 }
  0x2a   : > { %s7772_s28 = scalar_lea.vmem %s9385_s0, %s6648_s6 }
  0x2b   : > { %v213_v0 = vld [vmem:[%s7772_s28] sm:$0xff]  ;;  %v215_v1 = vld [vmem:[%s7772_s28 + $0x8] sm:$0xff]  ;;  %v217_v2 = vld [vmem:[%s7772_s28 + $0x10] sm:$0xff] }
  0x2c   : > { %214 = vst [vmem:[%s7777_s26] sm:$0xff] %v213_v0  ;;  %216 = vst [vmem:[%s7777_s26 + $0x8] sm:$0xff] %v215_v1  ;;  %v219_v3 = vld [vmem:[%s7772_s28 + $0x18] sm:$0xff]  ;;  %v221_v4 = vld [vmem:[%s7772_s28 + $0x20] sm:$0xff] }
  0x2d   : > { %218 = vst [vmem:[%s7777_s26 + $0x10] sm:$0xff] %v217_v2  ;;  %v223_v5 = vld [vmem:[%s7772_s28 + $0x28] sm:$0xff]  ;;  %220 = vst [vmem:[%s7777_s26 + $0x18] sm:$0xff] %v219_v3  ;;  %v225_v6 = vld [vmem:[%s7772_s28 + $0x30] sm:$0xff] }
  0x2e   : > { %222 = vst [vmem:[%s7777_s26 + $0x20] sm:$0xff] %v221_v4  ;;  %224 = vst [vmem:[%s7777_s26 + $0x28] sm:$0xff] %v223_v5  ;;  %v227_v7 = vld [vmem:[%s7772_s28 + $0x38] sm:$0xff]  ;;  %v229_v8 = vld [vmem:[%s7772_s28 + $0x40] sm:$0xff] }
  0x2f   : > { %226 = vst [vmem:[%s7777_s26 + $0x30] sm:$0xff] %v225_v6  ;;  %228 = vst [vmem:[%s7777_s26 + $0x38] sm:$0xff] %v227_v7  ;;  %v231_v9 = vld [vmem:[%s7772_s28 + $0x48] sm:$0xff]  ;;  %v233_v10 = vld [vmem:[%s7772_s28 + $0x50] sm:$0xff] }
  0x30   : > { %230 = vst [vmem:[%s7777_s26 + $0x40] sm:$0xff] %v229_v8  ;;  %v235_v11 = vld [vmem:[%s7772_s28 + $0x58] sm:$0xff]  ;;  %232 = vst [vmem:[%s7777_s26 + $0x48] sm:$0xff] %v231_v9  ;;  %v237_v12 = vld [vmem:[%s7772_s28 + $0x60] sm:$0xff] }
  0x31   : > { %234 = vst [vmem:[%s7777_s26 + $0x50] sm:$0xff] %v233_v10  ;;  %236 = vst [vmem:[%s7777_s26 + $0x58] sm:$0xff] %v235_v11  ;;  %v239_v13 = vld [vmem:[%s7772_s28 + $0x68] sm:$0xff]  ;;  %v241_v14 = vld [vmem:[%s7772_s28 + $0x15c] sm:$0xff] }
  0x32   : > { %238 = vst [vmem:[%s7777_s26 + $0x60] sm:$0xff] %v237_v12  ;;  %240 = vst [vmem:[%s7777_s26 + $0x68] sm:$0xff] %v239_v13  ;;  %v243_v15 = vld [vmem:[%s7772_s28 + $0x164] sm:$0xff]  ;;  %v245_v16 = vld [vmem:[%s7772_s28 + $0x16c] sm:$0xff] }
  0x33   : > { %242 = vst [vmem:[%s7777_s26 + $0x74] sm:$0xff] %v241_v14  ;;  %v247_v17 = vld [vmem:[%s7772_s28 + $0x174] sm:$0xff]  ;;  %244 = vst [vmem:[%s7777_s26 + $0x7c] sm:$0xff] %v243_v15  ;;  %v249_v18 = vld [vmem:[%s7772_s28 + $0x17c] sm:$0xff] }
  0x34   : > { %246 = vst [vmem:[%s7777_s26 + $0x84] sm:$0xff] %v245_v16  ;;  %248 = vst [vmem:[%s7777_s26 + $0x8c] sm:$0xff] %v247_v17  ;;  %v251_v19 = vld [vmem:[%s7772_s28 + $0x184] sm:$0xff]  ;;  %v253_v20 = vld [vmem:[%s7772_s28 + $0x18c] sm:$0xff] }
  0x35   : > { %250 = vst [vmem:[%s7777_s26 + $0x94] sm:$0xff] %v249_v18  ;;  %252 = vst [vmem:[%s7777_s26 + $0x9c] sm:$0xff] %v251_v19  ;;  %v255_v21 = vld [vmem:[%s7772_s28 + $0x194] sm:$0xff]  ;;  %v257_v22 = vld [vmem:[%s7772_s28 + $0x19c] sm:$0xff] }
  0x36   : > { %254 = vst [vmem:[%s7777_s26 + $0xa4] sm:$0xff] %v253_v20  ;;  %v259_v23 = vld [vmem:[%s7772_s28 + $0x1a4] sm:$0xff]  ;;  %256 = vst [vmem:[%s7777_s26 + $0xac] sm:$0xff] %v255_v21  ;;  %v261_v24 = vld [vmem:[%s7772_s28 + $0x1ac] sm:$0xff] }
  0x37   : > { %258 = vst [vmem:[%s7777_s26 + $0xb4] sm:$0xff] %v257_v22  ;;  %260 = vst [vmem:[%s7777_s26 + $0xbc] sm:$0xff] %v259_v23  ;;  %v263_v25 = vld [vmem:[%s7772_s28 + $0x1b4] sm:$0xff]  ;;  %v265_v26 = vld [vmem:[%s7772_s28 + $0x1bc] sm:$0xff] }
  0x38   : > { %262 = vst [vmem:[%s7777_s26 + $0xc4] sm:$0xff] %v261_v24  ;;  %264 = vst [vmem:[%s7777_s26 + $0xcc] sm:$0xff] %v263_v25  ;;  %v267_v27 = vld [vmem:[%s7772_s28 + $0x1c4] sm:$0xff]  ;;  %v6134_v28 = vld [vmem:[%s7772_s28 + $0x70] sm:$0xf] }
  0x39   : > { %266 = vst [vmem:[%s7777_s26 + $0xd4] sm:$0xff] %v265_v26  ;;  %v6136_v29 = vld [vmem:[%s7772_s28 + $0x1cc] sm:$0xf]  ;;  %268 = vst [vmem:[%s7777_s26 + $0xdc] sm:$0xff] %v267_v27 }
  0x3a   : > { %6135 = vst [vmem:[%s7777_s26 + $0x70] sm:$0xf] %v6134_v28  ;;  %6137 = vst [vmem:[%s7777_s26 + $0xe4] sm:$0xf] %v6136_v29 }
  0x3b PF: > { %285 = sbr.rel (!%p7741_p9) target bundleno = 301 (0x12d), region = 46  ;;  %s287_s5 = sand.u32 (%p7741_p9), 1, %s7599_s18  }
  0x3c   : > { %s6709_s30 = smul.u32 (%p7741_p9), 3712, %s287_s5  ;;  %s6138_s6 = sshll.u32 (%p7741_p9), %s7623_s24, 1 }
  0x3d   : > { %s6649_s8 = smul.u32 (%p7741_p9), 1856, %s7619_s23  ;;  %s9386_s1 = sld [smem:[#allocation9_spill]] (%p7741_p9) }
  0x3e   : > { %s7849_s10 = scalar_lea.vmem (%p7741_p9), [#allocation3], %s6709_s30 }
  0x3f   : > { %s293_s9 = sadd.s32 (%p7741_p9), %s6649_s8, %s6138_s6 }
  0x40   : > { %s6140_s11 = sshll.u32 (%p7741_p9), %s293_s9, 2 }
  0x43   : > { %s7844_s28 = scalar_lea.vmem %s9386_s1, %s6140_s11 }
  0x44   : > { %v1249_v30 = vld [vmem:[%s7844_s28] sm:$0xff]  ;;  %v1251_v31 = vld [vmem:[%s7844_s28 + $0x10] sm:$0xff] }
  0x45   : > { %v1253_v32 = vld [vmem:[%s7844_s28 + $0x20] sm:$0xff]  ;;  %1250 = vst [vmem:[%s7849_s10] sm:$0xff] %v1249_v30  ;;  %1252 = vst [vmem:[%s7849_s10 + $0x8] sm:$0xff] %v1251_v31  ;;  %v1255_v33 = vld [vmem:[%s7844_s28 + $0x30] sm:$0xff] }
  0x46   : > { %1254 = vst [vmem:[%s7849_s10 + $0x10] sm:$0xff] %v1253_v32  ;;  %v1257_v34 = vld [vmem:[%s7844_s28 + $0x40] sm:$0xff]  ;;  %v1259_v35 = vld [vmem:[%s7844_s28 + $0x50] sm:$0xff]  ;;  %1256 = vst [vmem:[%s7849_s10 + $0x18] sm:$0xff] %v1255_v33 }
  0x47   : > { %1258 = vst [vmem:[%s7849_s10 + $0x20] sm:$0xff] %v1257_v34  ;;  %1260 = vst [vmem:[%s7849_s10 + $0x28] sm:$0xff] %v1259_v35  ;;  %v1261_v36 = vld [vmem:[%s7844_s28 + $0x60] sm:$0xff]  ;;  %v1263_v37 = vld [vmem:[%s7844_s28 + $0x70] sm:$0xff] }
  0x48   : > { %v1265_v38 = vld [vmem:[%s7844_s28 + $0x80] sm:$0xff]  ;;  %1262 = vst [vmem:[%s7849_s10 + $0x30] sm:$0xff] %v1261_v36  ;;  %1264 = vst [vmem:[%s7849_s10 + $0x38] sm:$0xff] %v1263_v37  ;;  %v1267_v39 = vld [vmem:[%s7844_s28 + $0x90] sm:$0xff] }
  0x49   : > { %1266 = vst [vmem:[%s7849_s10 + $0x40] sm:$0xff] %v1265_v38  ;;  %v1269_v40 = vld [vmem:[%s7844_s28 + $0xa0] sm:$0xff]  ;;  %v1271_v41 = vld [vmem:[%s7844_s28 + $0xb0] sm:$0xff]  ;;  %1268 = vst [vmem:[%s7849_s10 + $0x48] sm:$0xff] %v1267_v39 }
  0x4a   : > { %1270 = vst [vmem:[%s7849_s10 + $0x50] sm:$0xff] %v1269_v40  ;;  %1272 = vst [vmem:[%s7849_s10 + $0x58] sm:$0xff] %v1271_v41  ;;  %v1273_v42 = vld [vmem:[%s7844_s28 + $0xc0] sm:$0xff]  ;;  %v1275_v43 = vld [vmem:[%s7844_s28 + $0xd0] sm:$0xff] }
  0x4b   : > { %v1277_v44 = vld [vmem:[%s7844_s28 + $0xe0] sm:$0xff]  ;;  %1274 = vst [vmem:[%s7849_s10 + $0x60] sm:$0xff] %v1273_v42  ;;  %1276 = vst [vmem:[%s7849_s10 + $0x68] sm:$0xff] %v1275_v43  ;;  %v1279_v45 = vld [vmem:[%s7844_s28 + $0xf0] sm:$0xff] }
  0x4c   : > { %1278 = vst [vmem:[%s7849_s10 + $0x70] sm:$0xff] %v1277_v44  ;;  %v1281_v46 = vld [vmem:[%s7844_s28 + $0x100] sm:$0xff]  ;;  %v1283_v47 = vld [vmem:[%s7844_s28 + $0x110] sm:$0xff]  ;;  %1280 = vst [vmem:[%s7849_s10 + $0x78] sm:$0xff] %v1279_v45 }
  0x4d   : > { %1282 = vst [vmem:[%s7849_s10 + $0x80] sm:$0xff] %v1281_v46  ;;  %1284 = vst [vmem:[%s7849_s10 + $0x88] sm:$0xff] %v1283_v47  ;;  %v1285_v48 = vld [vmem:[%s7844_s28 + $0x120] sm:$0xff]  ;;  %v1287_v49 = vld [vmem:[%s7844_s28 + $0x130] sm:$0xff] }
  0x4e   : > { %v1289_v50 = vld [vmem:[%s7844_s28 + $0x140] sm:$0xff]  ;;  %1286 = vst [vmem:[%s7849_s10 + $0x90] sm:$0xff] %v1285_v48  ;;  %1288 = vst [vmem:[%s7849_s10 + $0x98] sm:$0xff] %v1287_v49  ;;  %v1291_v51 = vld [vmem:[%s7844_s28 + $0x150] sm:$0xff] }
  0x4f   : > { %1290 = vst [vmem:[%s7849_s10 + $0xa0] sm:$0xff] %v1289_v50  ;;  %v1293_v52 = vld [vmem:[%s7844_s28 + $0x160] sm:$0xff]  ;;  %v1295_v53 = vld [vmem:[%s7844_s28 + $0x170] sm:$0xff]  ;;  %1292 = vst [vmem:[%s7849_s10 + $0xa8] sm:$0xff] %v1291_v51 }
  0x50   : > { %1294 = vst [vmem:[%s7849_s10 + $0xb0] sm:$0xff] %v1293_v52  ;;  %1296 = vst [vmem:[%s7849_s10 + $0xb8] sm:$0xff] %v1295_v53  ;;  %v1297_v54 = vld [vmem:[%s7844_s28 + $0x180] sm:$0xff]  ;;  %v1299_v55 = vld [vmem:[%s7844_s28 + $0x190] sm:$0xff] }
  0x51   : > { %v1301_v56 = vld [vmem:[%s7844_s28 + $0x1a0] sm:$0xff]  ;;  %1298 = vst [vmem:[%s7849_s10 + $0xc0] sm:$0xff] %v1297_v54  ;;  %1300 = vst [vmem:[%s7849_s10 + $0xc8] sm:$0xff] %v1299_v55  ;;  %v1303_v57 = vld [vmem:[%s7844_s28 + $0x1b0] sm:$0xff] }
  0x52   : > { %1302 = vst [vmem:[%s7849_s10 + $0xd0] sm:$0xff] %v1301_v56  ;;  %v1305_v58 = vld [vmem:[%s7844_s28 + $0x1c0] sm:$0xff]  ;;  %v1307_v59 = vld [vmem:[%s7844_s28 + $0x1d0] sm:$0xff]  ;;  %1304 = vst [vmem:[%s7849_s10 + $0xd8] sm:$0xff] %v1303_v57 }
  0x53   : > { %1306 = vst [vmem:[%s7849_s10 + $0xe0] sm:$0xff] %v1305_v58  ;;  %1308 = vst [vmem:[%s7849_s10 + $0xe8] sm:$0xff] %v1307_v59  ;;  %v1309_v60 = vld [vmem:[%s7844_s28 + $0x1e0] sm:$0xff]  ;;  %v1311_v61 = vld [vmem:[%s7844_s28 + $0x1f0] sm:$0xff] }
  0x54   : > { %v1313_v62 = vld [vmem:[%s7844_s28 + $0x200] sm:$0xff]  ;;  %1310 = vst [vmem:[%s7849_s10 + $0xf0] sm:$0xff] %v1309_v60  ;;  %1312 = vst [vmem:[%s7849_s10 + $0xf8] sm:$0xff] %v1311_v61  ;;  %v1315_v63 = vld [vmem:[%s7844_s28 + $0x210] sm:$0xff] }
  0x55   : > { %1314 = vst [vmem:[%s7849_s10 + $0x100] sm:$0xff] %v1313_v62  ;;  %v1317_v0 = vld [vmem:[%s7844_s28 + $0x220] sm:$0xff]  ;;  %v1319_v1 = vld [vmem:[%s7844_s28 + $0x230] sm:$0xff]  ;;  %1316 = vst [vmem:[%s7849_s10 + $0x108] sm:$0xff] %v1315_v63 }
  0x56   : > { %1318 = vst [vmem:[%s7849_s10 + $0x110] sm:$0xff] %v1317_v0  ;;  %1320 = vst [vmem:[%s7849_s10 + $0x118] sm:$0xff] %v1319_v1  ;;  %v1321_v2 = vld [vmem:[%s7844_s28 + $0x240] sm:$0xff]  ;;  %v1323_v3 = vld [vmem:[%s7844_s28 + $0x250] sm:$0xff] }
  0x57   : > { %v1325_v4 = vld [vmem:[%s7844_s28 + $0x260] sm:$0xff]  ;;  %1322 = vst [vmem:[%s7849_s10 + $0x120] sm:$0xff] %v1321_v2  ;;  %1324 = vst [vmem:[%s7849_s10 + $0x128] sm:$0xff] %v1323_v3  ;;  %v1327_v5 = vld [vmem:[%s7844_s28 + $0x270] sm:$0xff] }
  0x58   : > { %1326 = vst [vmem:[%s7849_s10 + $0x130] sm:$0xff] %v1325_v4  ;;  %v1329_v6 = vld [vmem:[%s7844_s28 + $0x280] sm:$0xff]  ;;  %v1331_v7 = vld [vmem:[%s7844_s28 + $0x290] sm:$0xff]  ;;  %1328 = vst [vmem:[%s7849_s10 + $0x138] sm:$0xff] %v1327_v5 }
  0x59   : > { %1330 = vst [vmem:[%s7849_s10 + $0x140] sm:$0xff] %v1329_v6  ;;  %1332 = vst [vmem:[%s7849_s10 + $0x148] sm:$0xff] %v1331_v7  ;;  %v1333_v8 = vld [vmem:[%s7844_s28 + $0x2a0] sm:$0xff]  ;;  %v1335_v9 = vld [vmem:[%s7844_s28 + $0x2b0] sm:$0xff] }
  0x5a   : > { %v1337_v10 = vld [vmem:[%s7844_s28 + $0x2c0] sm:$0xff]  ;;  %1334 = vst [vmem:[%s7849_s10 + $0x150] sm:$0xff] %v1333_v8  ;;  %1336 = vst [vmem:[%s7849_s10 + $0x158] sm:$0xff] %v1335_v9  ;;  %v1339_v11 = vld [vmem:[%s7844_s28 + $0x2d0] sm:$0xff] }
  0x5b   : > { %1338 = vst [vmem:[%s7849_s10 + $0x160] sm:$0xff] %v1337_v10  ;;  %v1341_v12 = vld [vmem:[%s7844_s28 + $0x2e0] sm:$0xff]  ;;  %v1343_v13 = vld [vmem:[%s7844_s28 + $0x2f0] sm:$0xff]  ;;  %1340 = vst [vmem:[%s7849_s10 + $0x168] sm:$0xff] %v1339_v11 }
  0x5c   : > { %1342 = vst [vmem:[%s7849_s10 + $0x170] sm:$0xff] %v1341_v12  ;;  %1344 = vst [vmem:[%s7849_s10 + $0x178] sm:$0xff] %v1343_v13  ;;  %v1345_v14 = vld [vmem:[%s7844_s28 + $0x300] sm:$0xff]  ;;  %v1347_v15 = vld [vmem:[%s7844_s28 + $0x310] sm:$0xff] }
  0x5d   : > { %v1349_v16 = vld [vmem:[%s7844_s28 + $0x320] sm:$0xff]  ;;  %1346 = vst [vmem:[%s7849_s10 + $0x180] sm:$0xff] %v1345_v14  ;;  %1348 = vst [vmem:[%s7849_s10 + $0x188] sm:$0xff] %v1347_v15  ;;  %v1351_v17 = vld [vmem:[%s7844_s28 + $0x330] sm:$0xff] }
  0x5e   : > { %1350 = vst [vmem:[%s7849_s10 + $0x190] sm:$0xff] %v1349_v16  ;;  %v1353_v18 = vld [vmem:[%s7844_s28 + $0x340] sm:$0xff]  ;;  %v1355_v19 = vld [vmem:[%s7844_s28 + $0x350] sm:$0xff]  ;;  %1352 = vst [vmem:[%s7849_s10 + $0x198] sm:$0xff] %v1351_v17 }
  0x5f   : > { %1354 = vst [vmem:[%s7849_s10 + $0x1a0] sm:$0xff] %v1353_v18  ;;  %1356 = vst [vmem:[%s7849_s10 + $0x1a8] sm:$0xff] %v1355_v19  ;;  %v1357_v20 = vld [vmem:[%s7844_s28 + $0x360] sm:$0xff]  ;;  %v1359_v21 = vld [vmem:[%s7844_s28 + $0x370] sm:$0xff] }
  0x60   : > { %v1361_v22 = vld [vmem:[%s7844_s28 + $0x380] sm:$0xff]  ;;  %1358 = vst [vmem:[%s7849_s10 + $0x1b0] sm:$0xff] %v1357_v20  ;;  %1360 = vst [vmem:[%s7849_s10 + $0x1b8] sm:$0xff] %v1359_v21  ;;  %v1363_v23 = vld [vmem:[%s7844_s28 + $0x390] sm:$0xff] }
  0x61   : > { %1362 = vst [vmem:[%s7849_s10 + $0x1c0] sm:$0xff] %v1361_v22  ;;  %v1365_v24 = vld [vmem:[%s7844_s28 + $0x3a0] sm:$0xff]  ;;  %v1367_v25 = vld [vmem:[%s7844_s28 + $0x3b0] sm:$0xff]  ;;  %1364 = vst [vmem:[%s7849_s10 + $0x1c8] sm:$0xff] %v1363_v23 }
  0x62   : > { %1366 = vst [vmem:[%s7849_s10 + $0x1d0] sm:$0xff] %v1365_v24  ;;  %1368 = vst [vmem:[%s7849_s10 + $0x1d8] sm:$0xff] %v1367_v25  ;;  %v1369_v26 = vld [vmem:[%s7844_s28 + $0x3c0] sm:$0xff]  ;;  %v1371_v27 = vld [vmem:[%s7844_s28 + $0x3d0] sm:$0xff] }
  0x63   : > { %v1373_v28 = vld [vmem:[%s7844_s28 + $0x3e0] sm:$0xff]  ;;  %1370 = vst [vmem:[%s7849_s10 + $0x1e0] sm:$0xff] %v1369_v26  ;;  %1372 = vst [vmem:[%s7849_s10 + $0x1e8] sm:$0xff] %v1371_v27  ;;  %v1375_v29 = vld [vmem:[%s7844_s28 + $0x3f0] sm:$0xff] }
  0x64   : > { %1374 = vst [vmem:[%s7849_s10 + $0x1f0] sm:$0xff] %v1373_v28  ;;  %v1377_v30 = vld [vmem:[%s7844_s28 + $0x400] sm:$0xff]  ;;  %v1379_v31 = vld [vmem:[%s7844_s28 + $0x410] sm:$0xff]  ;;  %1376 = vst [vmem:[%s7849_s10 + $0x1f8] sm:$0xff] %v1375_v29 }
  0x65   : > { %1378 = vst [vmem:[%s7849_s10 + $0x200] sm:$0xff] %v1377_v30  ;;  %1380 = vst [vmem:[%s7849_s10 + $0x208] sm:$0xff] %v1379_v31  ;;  %v1381_v32 = vld [vmem:[%s7844_s28 + $0x420] sm:$0xff]  ;;  %v1383_v33 = vld [vmem:[%s7844_s28 + $0x430] sm:$0xff] }
  0x66   : > { %v1385_v34 = vld [vmem:[%s7844_s28 + $0x440] sm:$0xff]  ;;  %1382 = vst [vmem:[%s7849_s10 + $0x210] sm:$0xff] %v1381_v32  ;;  %1384 = vst [vmem:[%s7849_s10 + $0x218] sm:$0xff] %v1383_v33  ;;  %v1387_v35 = vld [vmem:[%s7844_s28 + $0x450] sm:$0xff] }
  0x67   : > { %1386 = vst [vmem:[%s7849_s10 + $0x220] sm:$0xff] %v1385_v34  ;;  %v1389_v36 = vld [vmem:[%s7844_s28 + $0x460] sm:$0xff]  ;;  %v1391_v37 = vld [vmem:[%s7844_s28 + $0x470] sm:$0xff]  ;;  %1388 = vst [vmem:[%s7849_s10 + $0x228] sm:$0xff] %v1387_v35 }
  0x68   : > { %1390 = vst [vmem:[%s7849_s10 + $0x230] sm:$0xff] %v1389_v36  ;;  %1392 = vst [vmem:[%s7849_s10 + $0x238] sm:$0xff] %v1391_v37  ;;  %v1393_v38 = vld [vmem:[%s7844_s28 + $0x480] sm:$0xff]  ;;  %v1395_v39 = vld [vmem:[%s7844_s28 + $0x490] sm:$0xff] }
  0x69   : > { %v1397_v40 = vld [vmem:[%s7844_s28 + $0x4a0] sm:$0xff]  ;;  %1394 = vst [vmem:[%s7849_s10 + $0x240] sm:$0xff] %v1393_v38  ;;  %1396 = vst [vmem:[%s7849_s10 + $0x248] sm:$0xff] %v1395_v39  ;;  %v1399_v41 = vld [vmem:[%s7844_s28 + $0x4b0] sm:$0xff] }
  0x6a   : > { %1398 = vst [vmem:[%s7849_s10 + $0x250] sm:$0xff] %v1397_v40  ;;  %v1401_v42 = vld [vmem:[%s7844_s28 + $0x4c0] sm:$0xff]  ;;  %v1403_v43 = vld [vmem:[%s7844_s28 + $0x4d0] sm:$0xff]  ;;  %1400 = vst [vmem:[%s7849_s10 + $0x258] sm:$0xff] %v1399_v41 }
  0x6b   : > { %1402 = vst [vmem:[%s7849_s10 + $0x260] sm:$0xff] %v1401_v42  ;;  %1404 = vst [vmem:[%s7849_s10 + $0x268] sm:$0xff] %v1403_v43  ;;  %v1405_v44 = vld [vmem:[%s7844_s28 + $0x4e0] sm:$0xff]  ;;  %v1407_v45 = vld [vmem:[%s7844_s28 + $0x4f0] sm:$0xff] }
  0x6c   : > { %v1409_v46 = vld [vmem:[%s7844_s28 + $0x500] sm:$0xff]  ;;  %1406 = vst [vmem:[%s7849_s10 + $0x270] sm:$0xff] %v1405_v44  ;;  %1408 = vst [vmem:[%s7849_s10 + $0x278] sm:$0xff] %v1407_v45  ;;  %v1411_v47 = vld [vmem:[%s7844_s28 + $0x510] sm:$0xff] }
  0x6d   : > { %1410 = vst [vmem:[%s7849_s10 + $0x280] sm:$0xff] %v1409_v46  ;;  %v1413_v48 = vld [vmem:[%s7844_s28 + $0x520] sm:$0xff]  ;;  %v1415_v49 = vld [vmem:[%s7844_s28 + $0x530] sm:$0xff]  ;;  %1412 = vst [vmem:[%s7849_s10 + $0x288] sm:$0xff] %v1411_v47 }
  0x6e   : > { %1414 = vst [vmem:[%s7849_s10 + $0x290] sm:$0xff] %v1413_v48  ;;  %1416 = vst [vmem:[%s7849_s10 + $0x298] sm:$0xff] %v1415_v49  ;;  %v1417_v50 = vld [vmem:[%s7844_s28 + $0x540] sm:$0xff]  ;;  %v1419_v51 = vld [vmem:[%s7844_s28 + $0x550] sm:$0xff] }
  0x6f   : > { %v1421_v52 = vld [vmem:[%s7844_s28 + $0x560] sm:$0xff]  ;;  %1418 = vst [vmem:[%s7849_s10 + $0x2a0] sm:$0xff] %v1417_v50  ;;  %1420 = vst [vmem:[%s7849_s10 + $0x2a8] sm:$0xff] %v1419_v51  ;;  %v1423_v53 = vld [vmem:[%s7844_s28 + $0x570] sm:$0xff] }
  0x70   : > { %1422 = vst [vmem:[%s7849_s10 + $0x2b0] sm:$0xff] %v1421_v52  ;;  %v1425_v54 = vld [vmem:[%s7844_s28 + $0x580] sm:$0xff]  ;;  %v1427_v55 = vld [vmem:[%s7844_s28 + $0x590] sm:$0xff]  ;;  %1424 = vst [vmem:[%s7849_s10 + $0x2b8] sm:$0xff] %v1423_v53 }
  0x71   : > { %1426 = vst [vmem:[%s7849_s10 + $0x2c0] sm:$0xff] %v1425_v54  ;;  %1428 = vst [vmem:[%s7849_s10 + $0x2c8] sm:$0xff] %v1427_v55  ;;  %v1429_v56 = vld [vmem:[%s7844_s28 + $0x5a0] sm:$0xff]  ;;  %v1431_v57 = vld [vmem:[%s7844_s28 + $0x5b0] sm:$0xff] }
  0x72   : > { %v1433_v58 = vld [vmem:[%s7844_s28 + $0x5c0] sm:$0xff]  ;;  %1430 = vst [vmem:[%s7849_s10 + $0x2d0] sm:$0xff] %v1429_v56  ;;  %1432 = vst [vmem:[%s7849_s10 + $0x2d8] sm:$0xff] %v1431_v57  ;;  %v1435_v59 = vld [vmem:[%s7844_s28 + $0x5d0] sm:$0xff] }
  0x73   : > { %1434 = vst [vmem:[%s7849_s10 + $0x2e0] sm:$0xff] %v1433_v58  ;;  %v1437_v60 = vld [vmem:[%s7844_s28 + $0x5e0] sm:$0xff]  ;;  %v1439_v61 = vld [vmem:[%s7844_s28 + $0x5f0] sm:$0xff]  ;;  %1436 = vst [vmem:[%s7849_s10 + $0x2e8] sm:$0xff] %v1435_v59 }
  0x74   : > { %1438 = vst [vmem:[%s7849_s10 + $0x2f0] sm:$0xff] %v1437_v60  ;;  %1440 = vst [vmem:[%s7849_s10 + $0x2f8] sm:$0xff] %v1439_v61  ;;  %v1441_v62 = vld [vmem:[%s7844_s28 + $0x600] sm:$0xff]  ;;  %v1443_v63 = vld [vmem:[%s7844_s28 + $0x610] sm:$0xff] }
  0x75   : > { %v1445_v0 = vld [vmem:[%s7844_s28 + $0x620] sm:$0xff]  ;;  %1442 = vst [vmem:[%s7849_s10 + $0x300] sm:$0xff] %v1441_v62  ;;  %1444 = vst [vmem:[%s7849_s10 + $0x308] sm:$0xff] %v1443_v63  ;;  %v1447_v1 = vld [vmem:[%s7844_s28 + $0x630] sm:$0xff] }
  0x76   : > { %1446 = vst [vmem:[%s7849_s10 + $0x310] sm:$0xff] %v1445_v0  ;;  %v1449_v2 = vld [vmem:[%s7844_s28 + $0x640] sm:$0xff]  ;;  %v1451_v3 = vld [vmem:[%s7844_s28 + $0x650] sm:$0xff]  ;;  %1448 = vst [vmem:[%s7849_s10 + $0x318] sm:$0xff] %v1447_v1 }
  0x77   : > { %1450 = vst [vmem:[%s7849_s10 + $0x320] sm:$0xff] %v1449_v2  ;;  %1452 = vst [vmem:[%s7849_s10 + $0x328] sm:$0xff] %v1451_v3  ;;  %v1453_v4 = vld [vmem:[%s7844_s28 + $0x660] sm:$0xff]  ;;  %v1455_v5 = vld [vmem:[%s7844_s28 + $0x670] sm:$0xff] }
  0x78   : > { %v1457_v6 = vld [vmem:[%s7844_s28 + $0x680] sm:$0xff]  ;;  %1454 = vst [vmem:[%s7849_s10 + $0x330] sm:$0xff] %v1453_v4  ;;  %1456 = vst [vmem:[%s7849_s10 + $0x338] sm:$0xff] %v1455_v5  ;;  %v1459_v7 = vld [vmem:[%s7844_s28 + $0x690] sm:$0xff] }
  0x79   : > { %1458 = vst [vmem:[%s7849_s10 + $0x340] sm:$0xff] %v1457_v6  ;;  %v1461_v8 = vld [vmem:[%s7844_s28 + $0x6a0] sm:$0xff]  ;;  %v1463_v9 = vld [vmem:[%s7844_s28 + $0x6b0] sm:$0xff]  ;;  %1460 = vst [vmem:[%s7849_s10 + $0x348] sm:$0xff] %v1459_v7 }
  0x7a   : > { %1462 = vst [vmem:[%s7849_s10 + $0x350] sm:$0xff] %v1461_v8  ;;  %1464 = vst [vmem:[%s7849_s10 + $0x358] sm:$0xff] %v1463_v9  ;;  %v1465_v10 = vld [vmem:[%s7844_s28 + $0x6c0] sm:$0xff]  ;;  %v1467_v11 = vld [vmem:[%s7844_s28 + $0x6d0] sm:$0xff] }
  0x7b   : > { %v1469_v12 = vld [vmem:[%s7844_s28 + $0x6e0] sm:$0xff]  ;;  %1466 = vst [vmem:[%s7849_s10 + $0x360] sm:$0xff] %v1465_v10  ;;  %1468 = vst [vmem:[%s7849_s10 + $0x368] sm:$0xff] %v1467_v11  ;;  %v1471_v13 = vld [vmem:[%s7844_s28 + $0x6f0] sm:$0xff] }
  0x7c   : > { %1470 = vst [vmem:[%s7849_s10 + $0x370] sm:$0xff] %v1469_v12  ;;  %v1473_v14 = vld [vmem:[%s7844_s28 + $0x700] sm:$0xff]  ;;  %v1475_v15 = vld [vmem:[%s7844_s28 + $0x710] sm:$0xff]  ;;  %1472 = vst [vmem:[%s7849_s10 + $0x378] sm:$0xff] %v1471_v13 }
  0x7d   : > { %1474 = vst [vmem:[%s7849_s10 + $0x380] sm:$0xff] %v1473_v14  ;;  %1476 = vst [vmem:[%s7849_s10 + $0x388] sm:$0xff] %v1475_v15  ;;  %v1477_v16 = vld [vmem:[%s7844_s28 + $0x720] sm:$0xff]  ;;  %v1479_v17 = vld [vmem:[%s7844_s28 + $0x730] sm:$0xff] }
  0x7e   : > { %v1481_v18 = vld [vmem:[%s7844_s28 + $0x740] sm:$0xff]  ;;  %1478 = vst [vmem:[%s7849_s10 + $0x390] sm:$0xff] %v1477_v16  ;;  %1480 = vst [vmem:[%s7849_s10 + $0x398] sm:$0xff] %v1479_v17  ;;  %v1483_v19 = vld [vmem:[%s7844_s28 + $0x750] sm:$0xff] }
  0x7f   : > { %1482 = vst [vmem:[%s7849_s10 + $0x3a0] sm:$0xff] %v1481_v18  ;;  %v1485_v20 = vld [vmem:[%s7844_s28 + $0x760] sm:$0xff]  ;;  %v1487_v21 = vld [vmem:[%s7844_s28 + $0x770] sm:$0xff]  ;;  %1484 = vst [vmem:[%s7849_s10 + $0x3a8] sm:$0xff] %v1483_v19 }
  0x80   : > { %1486 = vst [vmem:[%s7849_s10 + $0x3b0] sm:$0xff] %v1485_v20  ;;  %1488 = vst [vmem:[%s7849_s10 + $0x3b8] sm:$0xff] %v1487_v21  ;;  %v1489_v22 = vld [vmem:[%s7844_s28 + $0x780] sm:$0xff]  ;;  %v1491_v23 = vld [vmem:[%s7844_s28 + $0x790] sm:$0xff] }
  0x81   : > { %v1493_v24 = vld [vmem:[%s7844_s28 + $0x7a0] sm:$0xff]  ;;  %1490 = vst [vmem:[%s7849_s10 + $0x3c0] sm:$0xff] %v1489_v22  ;;  %1492 = vst [vmem:[%s7849_s10 + $0x3c8] sm:$0xff] %v1491_v23  ;;  %v1495_v25 = vld [vmem:[%s7844_s28 + $0x7b0] sm:$0xff] }
  0x82   : > { %1494 = vst [vmem:[%s7849_s10 + $0x3d0] sm:$0xff] %v1493_v24  ;;  %v1497_v26 = vld [vmem:[%s7844_s28 + $0x7c0] sm:$0xff]  ;;  %v1499_v27 = vld [vmem:[%s7844_s28 + $0x7d0] sm:$0xff]  ;;  %1496 = vst [vmem:[%s7849_s10 + $0x3d8] sm:$0xff] %v1495_v25 }
  0x83   : > { %1498 = vst [vmem:[%s7849_s10 + $0x3e0] sm:$0xff] %v1497_v26  ;;  %1500 = vst [vmem:[%s7849_s10 + $0x3e8] sm:$0xff] %v1499_v27  ;;  %v1501_v28 = vld [vmem:[%s7844_s28 + $0x7e0] sm:$0xff]  ;;  %v1503_v29 = vld [vmem:[%s7844_s28 + $0x7f0] sm:$0xff] }
  0x84   : > { %v1505_v30 = vld [vmem:[%s7844_s28 + $0x800] sm:$0xff]  ;;  %1502 = vst [vmem:[%s7849_s10 + $0x3f0] sm:$0xff] %v1501_v28  ;;  %1504 = vst [vmem:[%s7849_s10 + $0x3f8] sm:$0xff] %v1503_v29  ;;  %v1507_v31 = vld [vmem:[%s7844_s28 + $0x810] sm:$0xff] }
  0x85   : > { %1506 = vst [vmem:[%s7849_s10 + $0x400] sm:$0xff] %v1505_v30  ;;  %v1509_v32 = vld [vmem:[%s7844_s28 + $0x820] sm:$0xff]  ;;  %v1511_v33 = vld [vmem:[%s7844_s28 + $0x830] sm:$0xff]  ;;  %1508 = vst [vmem:[%s7849_s10 + $0x408] sm:$0xff] %v1507_v31 }
  0x86   : > { %1510 = vst [vmem:[%s7849_s10 + $0x410] sm:$0xff] %v1509_v32  ;;  %1512 = vst [vmem:[%s7849_s10 + $0x418] sm:$0xff] %v1511_v33  ;;  %v1513_v34 = vld [vmem:[%s7844_s28 + $0x840] sm:$0xff]  ;;  %v1515_v35 = vld [vmem:[%s7844_s28 + $0x850] sm:$0xff] }
  0x87   : > { %v1517_v36 = vld [vmem:[%s7844_s28 + $0x860] sm:$0xff]  ;;  %1514 = vst [vmem:[%s7849_s10 + $0x420] sm:$0xff] %v1513_v34  ;;  %1516 = vst [vmem:[%s7849_s10 + $0x428] sm:$0xff] %v1515_v35  ;;  %v1519_v37 = vld [vmem:[%s7844_s28 + $0x870] sm:$0xff] }
  0x88   : > { %1518 = vst [vmem:[%s7849_s10 + $0x430] sm:$0xff] %v1517_v36  ;;  %v1521_v38 = vld [vmem:[%s7844_s28 + $0x880] sm:$0xff]  ;;  %v1523_v39 = vld [vmem:[%s7844_s28 + $0x890] sm:$0xff]  ;;  %1520 = vst [vmem:[%s7849_s10 + $0x438] sm:$0xff] %v1519_v37 }
  0x89   : > { %1522 = vst [vmem:[%s7849_s10 + $0x440] sm:$0xff] %v1521_v38  ;;  %1524 = vst [vmem:[%s7849_s10 + $0x448] sm:$0xff] %v1523_v39  ;;  %v1525_v40 = vld [vmem:[%s7844_s28 + $0x8a0] sm:$0xff]  ;;  %v1527_v41 = vld [vmem:[%s7844_s28 + $0x8b0] sm:$0xff] }
  0x8a   : > { %v1529_v42 = vld [vmem:[%s7844_s28 + $0x8c0] sm:$0xff]  ;;  %1526 = vst [vmem:[%s7849_s10 + $0x450] sm:$0xff] %v1525_v40  ;;  %1528 = vst [vmem:[%s7849_s10 + $0x458] sm:$0xff] %v1527_v41  ;;  %v1531_v43 = vld [vmem:[%s7844_s28 + $0x8d0] sm:$0xff] }
  0x8b   : > { %1530 = vst [vmem:[%s7849_s10 + $0x460] sm:$0xff] %v1529_v42  ;;  %v1533_v44 = vld [vmem:[%s7844_s28 + $0x8e0] sm:$0xff]  ;;  %v1535_v45 = vld [vmem:[%s7844_s28 + $0x8f0] sm:$0xff]  ;;  %1532 = vst [vmem:[%s7849_s10 + $0x468] sm:$0xff] %v1531_v43 }
  0x8c   : > { %1534 = vst [vmem:[%s7849_s10 + $0x470] sm:$0xff] %v1533_v44  ;;  %1536 = vst [vmem:[%s7849_s10 + $0x478] sm:$0xff] %v1535_v45  ;;  %v1537_v46 = vld [vmem:[%s7844_s28 + $0x900] sm:$0xff]  ;;  %v1539_v47 = vld [vmem:[%s7844_s28 + $0x910] sm:$0xff] }
  0x8d   : > { %v1541_v48 = vld [vmem:[%s7844_s28 + $0x920] sm:$0xff]  ;;  %1538 = vst [vmem:[%s7849_s10 + $0x480] sm:$0xff] %v1537_v46  ;;  %1540 = vst [vmem:[%s7849_s10 + $0x488] sm:$0xff] %v1539_v47  ;;  %v1543_v49 = vld [vmem:[%s7844_s28 + $0x930] sm:$0xff] }
  0x8e   : > { %1542 = vst [vmem:[%s7849_s10 + $0x490] sm:$0xff] %v1541_v48  ;;  %v1545_v50 = vld [vmem:[%s7844_s28 + $0x940] sm:$0xff]  ;;  %v1547_v51 = vld [vmem:[%s7844_s28 + $0x950] sm:$0xff]  ;;  %1544 = vst [vmem:[%s7849_s10 + $0x498] sm:$0xff] %v1543_v49 }
  0x8f   : > { %1546 = vst [vmem:[%s7849_s10 + $0x4a0] sm:$0xff] %v1545_v50  ;;  %1548 = vst [vmem:[%s7849_s10 + $0x4a8] sm:$0xff] %v1547_v51  ;;  %v1549_v52 = vld [vmem:[%s7844_s28 + $0x960] sm:$0xff]  ;;  %v1551_v53 = vld [vmem:[%s7844_s28 + $0x970] sm:$0xff] }
  0x90   : > { %v1553_v54 = vld [vmem:[%s7844_s28 + $0x980] sm:$0xff]  ;;  %1550 = vst [vmem:[%s7849_s10 + $0x4b0] sm:$0xff] %v1549_v52  ;;  %1552 = vst [vmem:[%s7849_s10 + $0x4b8] sm:$0xff] %v1551_v53  ;;  %v1555_v55 = vld [vmem:[%s7844_s28 + $0x990] sm:$0xff] }
  0x91   : > { %1554 = vst [vmem:[%s7849_s10 + $0x4c0] sm:$0xff] %v1553_v54  ;;  %v1557_v56 = vld [vmem:[%s7844_s28 + $0x9a0] sm:$0xff]  ;;  %v1559_v57 = vld [vmem:[%s7844_s28 + $0x9b0] sm:$0xff]  ;;  %1556 = vst [vmem:[%s7849_s10 + $0x4c8] sm:$0xff] %v1555_v55 }
  0x92   : > { %1558 = vst [vmem:[%s7849_s10 + $0x4d0] sm:$0xff] %v1557_v56  ;;  %1560 = vst [vmem:[%s7849_s10 + $0x4d8] sm:$0xff] %v1559_v57  ;;  %v1561_v58 = vld [vmem:[%s7844_s28 + $0x9c0] sm:$0xff]  ;;  %v1563_v59 = vld [vmem:[%s7844_s28 + $0x9d0] sm:$0xff] }
  0x93   : > { %v1565_v60 = vld [vmem:[%s7844_s28 + $0x9e0] sm:$0xff]  ;;  %1562 = vst [vmem:[%s7849_s10 + $0x4e0] sm:$0xff] %v1561_v58  ;;  %1564 = vst [vmem:[%s7849_s10 + $0x4e8] sm:$0xff] %v1563_v59  ;;  %v1567_v61 = vld [vmem:[%s7844_s28 + $0x9f0] sm:$0xff] }
  0x94   : > { %1566 = vst [vmem:[%s7849_s10 + $0x4f0] sm:$0xff] %v1565_v60  ;;  %v1569_v62 = vld [vmem:[%s7844_s28 + $0xa00] sm:$0xff]  ;;  %v1571_v63 = vld [vmem:[%s7844_s28 + $0xa10] sm:$0xff]  ;;  %1568 = vst [vmem:[%s7849_s10 + $0x4f8] sm:$0xff] %v1567_v61 }
  0x95   : > { %1570 = vst [vmem:[%s7849_s10 + $0x500] sm:$0xff] %v1569_v62  ;;  %1572 = vst [vmem:[%s7849_s10 + $0x508] sm:$0xff] %v1571_v63  ;;  %v1573_v0 = vld [vmem:[%s7844_s28 + $0xa20] sm:$0xff]  ;;  %v1575_v1 = vld [vmem:[%s7844_s28 + $0xa30] sm:$0xff] }
  0x96   : > { %v1577_v2 = vld [vmem:[%s7844_s28 + $0xa40] sm:$0xff]  ;;  %1574 = vst [vmem:[%s7849_s10 + $0x510] sm:$0xff] %v1573_v0  ;;  %1576 = vst [vmem:[%s7849_s10 + $0x518] sm:$0xff] %v1575_v1  ;;  %v1579_v3 = vld [vmem:[%s7844_s28 + $0xa50] sm:$0xff] }
  0x97   : > { %1578 = vst [vmem:[%s7849_s10 + $0x520] sm:$0xff] %v1577_v2  ;;  %v1581_v4 = vld [vmem:[%s7844_s28 + $0xa60] sm:$0xff]  ;;  %v1583_v5 = vld [vmem:[%s7844_s28 + $0xa70] sm:$0xff]  ;;  %1580 = vst [vmem:[%s7849_s10 + $0x528] sm:$0xff] %v1579_v3 }
  0x98   : > { %1582 = vst [vmem:[%s7849_s10 + $0x530] sm:$0xff] %v1581_v4  ;;  %1584 = vst [vmem:[%s7849_s10 + $0x538] sm:$0xff] %v1583_v5  ;;  %v1585_v6 = vld [vmem:[%s7844_s28 + $0xa80] sm:$0xff]  ;;  %v1587_v7 = vld [vmem:[%s7844_s28 + $0xa90] sm:$0xff] }
  0x99   : > { %v1589_v8 = vld [vmem:[%s7844_s28 + $0xaa0] sm:$0xff]  ;;  %1586 = vst [vmem:[%s7849_s10 + $0x540] sm:$0xff] %v1585_v6  ;;  %1588 = vst [vmem:[%s7849_s10 + $0x548] sm:$0xff] %v1587_v7  ;;  %v1591_v9 = vld [vmem:[%s7844_s28 + $0xab0] sm:$0xff] }
  0x9a   : > { %1590 = vst [vmem:[%s7849_s10 + $0x550] sm:$0xff] %v1589_v8  ;;  %v1593_v10 = vld [vmem:[%s7844_s28 + $0xac0] sm:$0xff]  ;;  %v1595_v11 = vld [vmem:[%s7844_s28 + $0xad0] sm:$0xff]  ;;  %1592 = vst [vmem:[%s7849_s10 + $0x558] sm:$0xff] %v1591_v9 }
  0x9b   : > { %1594 = vst [vmem:[%s7849_s10 + $0x560] sm:$0xff] %v1593_v10  ;;  %1596 = vst [vmem:[%s7849_s10 + $0x568] sm:$0xff] %v1595_v11  ;;  %v1597_v12 = vld [vmem:[%s7844_s28 + $0xae0] sm:$0xff]  ;;  %v1599_v13 = vld [vmem:[%s7844_s28 + $0xaf0] sm:$0xff] }
  0x9c   : > { %v1601_v14 = vld [vmem:[%s7844_s28 + $0xb00] sm:$0xff]  ;;  %1598 = vst [vmem:[%s7849_s10 + $0x570] sm:$0xff] %v1597_v12  ;;  %1600 = vst [vmem:[%s7849_s10 + $0x578] sm:$0xff] %v1599_v13  ;;  %v1603_v15 = vld [vmem:[%s7844_s28 + $0xb10] sm:$0xff] }
  0x9d   : > { %1602 = vst [vmem:[%s7849_s10 + $0x580] sm:$0xff] %v1601_v14  ;;  %v1605_v16 = vld [vmem:[%s7844_s28 + $0xb20] sm:$0xff]  ;;  %v1607_v17 = vld [vmem:[%s7844_s28 + $0xb30] sm:$0xff]  ;;  %1604 = vst [vmem:[%s7849_s10 + $0x588] sm:$0xff] %v1603_v15 }
  0x9e   : > { %1606 = vst [vmem:[%s7849_s10 + $0x590] sm:$0xff] %v1605_v16  ;;  %1608 = vst [vmem:[%s7849_s10 + $0x598] sm:$0xff] %v1607_v17  ;;  %v1609_v18 = vld [vmem:[%s7844_s28 + $0xb40] sm:$0xff]  ;;  %v1611_v19 = vld [vmem:[%s7844_s28 + $0xb50] sm:$0xff] }
  0x9f   : > { %v1613_v20 = vld [vmem:[%s7844_s28 + $0xb60] sm:$0xff]  ;;  %1610 = vst [vmem:[%s7849_s10 + $0x5a0] sm:$0xff] %v1609_v18  ;;  %1612 = vst [vmem:[%s7849_s10 + $0x5a8] sm:$0xff] %v1611_v19  ;;  %v1615_v21 = vld [vmem:[%s7844_s28 + $0xb70] sm:$0xff] }
  0xa0   : > { %1614 = vst [vmem:[%s7849_s10 + $0x5b0] sm:$0xff] %v1613_v20  ;;  %v1617_v22 = vld [vmem:[%s7844_s28 + $0xb80] sm:$0xff]  ;;  %v1619_v23 = vld [vmem:[%s7844_s28 + $0xb90] sm:$0xff]  ;;  %1616 = vst [vmem:[%s7849_s10 + $0x5b8] sm:$0xff] %v1615_v21 }
  0xa1   : > { %1618 = vst [vmem:[%s7849_s10 + $0x5c0] sm:$0xff] %v1617_v22  ;;  %1620 = vst [vmem:[%s7849_s10 + $0x5c8] sm:$0xff] %v1619_v23  ;;  %v1621_v24 = vld [vmem:[%s7844_s28 + $0xba0] sm:$0xff]  ;;  %v1623_v25 = vld [vmem:[%s7844_s28 + $0xbb0] sm:$0xff] }
  0xa2   : > { %v1625_v26 = vld [vmem:[%s7844_s28 + $0xbc0] sm:$0xff]  ;;  %1622 = vst [vmem:[%s7849_s10 + $0x5d0] sm:$0xff] %v1621_v24  ;;  %1624 = vst [vmem:[%s7849_s10 + $0x5d8] sm:$0xff] %v1623_v25  ;;  %v1627_v27 = vld [vmem:[%s7844_s28 + $0xbd0] sm:$0xff] }
  0xa3   : > { %1626 = vst [vmem:[%s7849_s10 + $0x5e0] sm:$0xff] %v1625_v26  ;;  %v1629_v28 = vld [vmem:[%s7844_s28 + $0xbe0] sm:$0xff]  ;;  %v1631_v29 = vld [vmem:[%s7844_s28 + $0xbf0] sm:$0xff]  ;;  %1628 = vst [vmem:[%s7849_s10 + $0x5e8] sm:$0xff] %v1627_v27 }
  0xa4   : > { %1630 = vst [vmem:[%s7849_s10 + $0x5f0] sm:$0xff] %v1629_v28  ;;  %1632 = vst [vmem:[%s7849_s10 + $0x5f8] sm:$0xff] %v1631_v29  ;;  %v1633_v30 = vld [vmem:[%s7844_s28 + $0xc00] sm:$0xff]  ;;  %v1635_v31 = vld [vmem:[%s7844_s28 + $0xc10] sm:$0xff] }
  0xa5   : > { %v1637_v32 = vld [vmem:[%s7844_s28 + $0xc20] sm:$0xff]  ;;  %1634 = vst [vmem:[%s7849_s10 + $0x600] sm:$0xff] %v1633_v30  ;;  %1636 = vst [vmem:[%s7849_s10 + $0x608] sm:$0xff] %v1635_v31  ;;  %v1639_v33 = vld [vmem:[%s7844_s28 + $0xc30] sm:$0xff] }
  0xa6   : > { %1638 = vst [vmem:[%s7849_s10 + $0x610] sm:$0xff] %v1637_v32  ;;  %v1641_v34 = vld [vmem:[%s7844_s28 + $0xc40] sm:$0xff]  ;;  %v1643_v35 = vld [vmem:[%s7844_s28 + $0xc50] sm:$0xff]  ;;  %1640 = vst [vmem:[%s7849_s10 + $0x618] sm:$0xff] %v1639_v33 }
  0xa7   : > { %1642 = vst [vmem:[%s7849_s10 + $0x620] sm:$0xff] %v1641_v34  ;;  %1644 = vst [vmem:[%s7849_s10 + $0x628] sm:$0xff] %v1643_v35  ;;  %v1645_v36 = vld [vmem:[%s7844_s28 + $0xc60] sm:$0xff]  ;;  %v1647_v37 = vld [vmem:[%s7844_s28 + $0xc70] sm:$0xff] }
  0xa8   : > { %v1649_v38 = vld [vmem:[%s7844_s28 + $0xc80] sm:$0xff]  ;;  %1646 = vst [vmem:[%s7849_s10 + $0x630] sm:$0xff] %v1645_v36  ;;  %1648 = vst [vmem:[%s7849_s10 + $0x638] sm:$0xff] %v1647_v37  ;;  %v1651_v39 = vld [vmem:[%s7844_s28 + $0xc90] sm:$0xff] }
  0xa9   : > { %1650 = vst [vmem:[%s7849_s10 + $0x640] sm:$0xff] %v1649_v38  ;;  %v1653_v40 = vld [vmem:[%s7844_s28 + $0xca0] sm:$0xff]  ;;  %v1655_v41 = vld [vmem:[%s7844_s28 + $0xcb0] sm:$0xff]  ;;  %1652 = vst [vmem:[%s7849_s10 + $0x648] sm:$0xff] %v1651_v39 }
  0xaa   : > { %1654 = vst [vmem:[%s7849_s10 + $0x650] sm:$0xff] %v1653_v40  ;;  %1656 = vst [vmem:[%s7849_s10 + $0x658] sm:$0xff] %v1655_v41  ;;  %v1657_v42 = vld [vmem:[%s7844_s28 + $0xcc0] sm:$0xff]  ;;  %v1659_v43 = vld [vmem:[%s7844_s28 + $0xcd0] sm:$0xff] }
  0xab   : > { %v1661_v44 = vld [vmem:[%s7844_s28 + $0xce0] sm:$0xff]  ;;  %1658 = vst [vmem:[%s7849_s10 + $0x660] sm:$0xff] %v1657_v42  ;;  %1660 = vst [vmem:[%s7849_s10 + $0x668] sm:$0xff] %v1659_v43  ;;  %v1663_v45 = vld [vmem:[%s7844_s28 + $0xcf0] sm:$0xff] }
  0xac   : > { %1662 = vst [vmem:[%s7849_s10 + $0x670] sm:$0xff] %v1661_v44  ;;  %v1665_v46 = vld [vmem:[%s7844_s28 + $0xd00] sm:$0xff]  ;;  %v1667_v47 = vld [vmem:[%s7844_s28 + $0xd10] sm:$0xff]  ;;  %1664 = vst [vmem:[%s7849_s10 + $0x678] sm:$0xff] %v1663_v45 }
  0xad   : > { %1666 = vst [vmem:[%s7849_s10 + $0x680] sm:$0xff] %v1665_v46  ;;  %1668 = vst [vmem:[%s7849_s10 + $0x688] sm:$0xff] %v1667_v47  ;;  %v1669_v48 = vld [vmem:[%s7844_s28 + $0xd20] sm:$0xff]  ;;  %v1671_v49 = vld [vmem:[%s7844_s28 + $0xd30] sm:$0xff] }
  0xae   : > { %v1673_v50 = vld [vmem:[%s7844_s28 + $0xd40] sm:$0xff]  ;;  %1670 = vst [vmem:[%s7849_s10 + $0x690] sm:$0xff] %v1669_v48  ;;  %1672 = vst [vmem:[%s7849_s10 + $0x698] sm:$0xff] %v1671_v49  ;;  %v1675_v51 = vld [vmem:[%s7844_s28 + $0xd50] sm:$0xff] }
  0xaf   : > { %1674 = vst [vmem:[%s7849_s10 + $0x6a0] sm:$0xff] %v1673_v50  ;;  %v1677_v52 = vld [vmem:[%s7844_s28 + $0xd60] sm:$0xff]  ;;  %v1679_v53 = vld [vmem:[%s7844_s28 + $0xd70] sm:$0xff]  ;;  %1676 = vst [vmem:[%s7849_s10 + $0x6a8] sm:$0xff] %v1675_v51 }
  0xb0   : > { %1678 = vst [vmem:[%s7849_s10 + $0x6b0] sm:$0xff] %v1677_v52  ;;  %1680 = vst [vmem:[%s7849_s10 + $0x6b8] sm:$0xff] %v1679_v53  ;;  %v1681_v54 = vld [vmem:[%s7844_s28 + $0xd80] sm:$0xff]  ;;  %v1683_v55 = vld [vmem:[%s7844_s28 + $0xd90] sm:$0xff] }
  0xb1   : > { %v1685_v56 = vld [vmem:[%s7844_s28 + $0xda0] sm:$0xff]  ;;  %1682 = vst [vmem:[%s7849_s10 + $0x6c0] sm:$0xff] %v1681_v54  ;;  %1684 = vst [vmem:[%s7849_s10 + $0x6c8] sm:$0xff] %v1683_v55  ;;  %v1687_v57 = vld [vmem:[%s7844_s28 + $0xdb0] sm:$0xff] }
  0xb2   : > { %1686 = vst [vmem:[%s7849_s10 + $0x6d0] sm:$0xff] %v1685_v56  ;;  %v1689_v58 = vld [vmem:[%s7844_s28 + $0xdc0] sm:$0xff]  ;;  %v1691_v59 = vld [vmem:[%s7844_s28 + $0xdd0] sm:$0xff]  ;;  %1688 = vst [vmem:[%s7849_s10 + $0x6d8] sm:$0xff] %v1687_v57 }
  0xb3   : > { %1690 = vst [vmem:[%s7849_s10 + $0x6e0] sm:$0xff] %v1689_v58  ;;  %1692 = vst [vmem:[%s7849_s10 + $0x6e8] sm:$0xff] %v1691_v59  ;;  %v1693_v60 = vld [vmem:[%s7844_s28 + $0xde0] sm:$0xff]  ;;  %v1695_v61 = vld [vmem:[%s7844_s28 + $0xdf0] sm:$0xff] }
  0xb4   : > { %v1697_v62 = vld [vmem:[%s7844_s28 + $0xe00] sm:$0xff]  ;;  %1694 = vst [vmem:[%s7849_s10 + $0x6f0] sm:$0xff] %v1693_v60  ;;  %1696 = vst [vmem:[%s7849_s10 + $0x6f8] sm:$0xff] %v1695_v61  ;;  %v1699_v63 = vld [vmem:[%s7844_s28 + $0xe10] sm:$0xff] }
  0xb5   : > { %1698 = vst [vmem:[%s7849_s10 + $0x700] sm:$0xff] %v1697_v62  ;;  %v1701_v0 = vld [vmem:[%s7844_s28 + $0xe20] sm:$0xff]  ;;  %v1703_v1 = vld [vmem:[%s7844_s28 + $0xe30] sm:$0xff]  ;;  %1700 = vst [vmem:[%s7849_s10 + $0x708] sm:$0xff] %v1699_v63 }
  0xb6   : > { %1702 = vst [vmem:[%s7849_s10 + $0x710] sm:$0xff] %v1701_v0  ;;  %1704 = vst [vmem:[%s7849_s10 + $0x718] sm:$0xff] %v1703_v1  ;;  %v1705_v2 = vld [vmem:[%s7844_s28 + $0xe40] sm:$0xff]  ;;  %v1707_v3 = vld [vmem:[%s7844_s28 + $0xe50] sm:$0xff] }
  0xb7   : > { %v1709_v4 = vld [vmem:[%s7844_s28 + $0xe60] sm:$0xff]  ;;  %1706 = vst [vmem:[%s7849_s10 + $0x720] sm:$0xff] %v1705_v2  ;;  %1708 = vst [vmem:[%s7849_s10 + $0x728] sm:$0xff] %v1707_v3  ;;  %v1711_v5 = vld [vmem:[%s7844_s28 + $0xe70] sm:$0xff] }
  0xb8   : > { %1710 = vst [vmem:[%s7849_s10 + $0x730] sm:$0xff] %v1709_v4  ;;  %v1713_v6 = vld [vmem:[%s7844_s28 + $0xe80] sm:$0xff]  ;;  %v1715_v7 = vld [vmem:[%s7844_s28 + $0xe90] sm:$0xff]  ;;  %1712 = vst [vmem:[%s7849_s10 + $0x738] sm:$0xff] %v1711_v5 }
  0xb9   : > { %1714 = vst [vmem:[%s7849_s10 + $0x740] sm:$0xff] %v1713_v6  ;;  %1716 = vst [vmem:[%s7849_s10 + $0x748] sm:$0xff] %v1715_v7  ;;  %v1717_v8 = vld [vmem:[%s7844_s28 + $0xea0] sm:$0xff]  ;;  %v1719_v9 = vld [vmem:[%s7844_s28 + $0xeb0] sm:$0xff] }
  0xba   : > { %v1721_v10 = vld [vmem:[%s7844_s28 + $0xec0] sm:$0xff]  ;;  %1718 = vst [vmem:[%s7849_s10 + $0x750] sm:$0xff] %v1717_v8  ;;  %1720 = vst [vmem:[%s7849_s10 + $0x758] sm:$0xff] %v1719_v9  ;;  %v1723_v11 = vld [vmem:[%s7844_s28 + $0xed0] sm:$0xff] }
  0xbb   : > { %1722 = vst [vmem:[%s7849_s10 + $0x760] sm:$0xff] %v1721_v10  ;;  %v1725_v12 = vld [vmem:[%s7844_s28 + $0xee0] sm:$0xff]  ;;  %v1727_v13 = vld [vmem:[%s7844_s28 + $0xef0] sm:$0xff]  ;;  %1724 = vst [vmem:[%s7849_s10 + $0x768] sm:$0xff] %v1723_v11 }
  0xbc   : > { %1726 = vst [vmem:[%s7849_s10 + $0x770] sm:$0xff] %v1725_v12  ;;  %1728 = vst [vmem:[%s7849_s10 + $0x778] sm:$0xff] %v1727_v13  ;;  %v1729_v14 = vld [vmem:[%s7844_s28 + $0xf00] sm:$0xff]  ;;  %v1731_v15 = vld [vmem:[%s7844_s28 + $0xf10] sm:$0xff] }
  0xbd   : > { %v1733_v16 = vld [vmem:[%s7844_s28 + $0xf20] sm:$0xff]  ;;  %1730 = vst [vmem:[%s7849_s10 + $0x780] sm:$0xff] %v1729_v14  ;;  %1732 = vst [vmem:[%s7849_s10 + $0x788] sm:$0xff] %v1731_v15  ;;  %v1735_v17 = vld [vmem:[%s7844_s28 + $0xf30] sm:$0xff] }
  0xbe   : > { %1734 = vst [vmem:[%s7849_s10 + $0x790] sm:$0xff] %v1733_v16  ;;  %v1737_v18 = vld [vmem:[%s7844_s28 + $0xf40] sm:$0xff]  ;;  %v1739_v19 = vld [vmem:[%s7844_s28 + $0xf50] sm:$0xff]  ;;  %1736 = vst [vmem:[%s7849_s10 + $0x798] sm:$0xff] %v1735_v17 }
  0xbf   : > { %1738 = vst [vmem:[%s7849_s10 + $0x7a0] sm:$0xff] %v1737_v18  ;;  %1740 = vst [vmem:[%s7849_s10 + $0x7a8] sm:$0xff] %v1739_v19  ;;  %v1741_v20 = vld [vmem:[%s7844_s28 + $0xf60] sm:$0xff]  ;;  %v1743_v21 = vld [vmem:[%s7844_s28 + $0xf70] sm:$0xff] }
  0xc0   : > { %v1745_v22 = vld [vmem:[%s7844_s28 + $0xf80] sm:$0xff]  ;;  %1742 = vst [vmem:[%s7849_s10 + $0x7b0] sm:$0xff] %v1741_v20  ;;  %1744 = vst [vmem:[%s7849_s10 + $0x7b8] sm:$0xff] %v1743_v21  ;;  %v1747_v23 = vld [vmem:[%s7844_s28 + $0xf90] sm:$0xff] }
  0xc1   : > { %1746 = vst [vmem:[%s7849_s10 + $0x7c0] sm:$0xff] %v1745_v22  ;;  %v1749_v24 = vld [vmem:[%s7844_s28 + $0xfa0] sm:$0xff]  ;;  %v1751_v25 = vld [vmem:[%s7844_s28 + $0xfb0] sm:$0xff]  ;;  %1748 = vst [vmem:[%s7849_s10 + $0x7c8] sm:$0xff] %v1747_v23 }
  0xc2   : > { %1750 = vst [vmem:[%s7849_s10 + $0x7d0] sm:$0xff] %v1749_v24  ;;  %1752 = vst [vmem:[%s7849_s10 + $0x7d8] sm:$0xff] %v1751_v25  ;;  %v1753_v26 = vld [vmem:[%s7844_s28 + $0xfc0] sm:$0xff]  ;;  %v1755_v27 = vld [vmem:[%s7844_s28 + $0xfd0] sm:$0xff] }
  0xc3   : > { %v1757_v28 = vld [vmem:[%s7844_s28 + $0xfe0] sm:$0xff]  ;;  %1754 = vst [vmem:[%s7849_s10 + $0x7e0] sm:$0xff] %v1753_v26  ;;  %1756 = vst [vmem:[%s7849_s10 + $0x7e8] sm:$0xff] %v1755_v27  ;;  %v1759_v29 = vld [vmem:[%s7844_s28 + $0xff0] sm:$0xff] }
  0xc4   : > { %1758 = vst [vmem:[%s7849_s10 + $0x7f0] sm:$0xff] %v1757_v28  ;;  %v1761_v30 = vld [vmem:[%s7844_s28 + $0x1000] sm:$0xff]  ;;  %v1763_v31 = vld [vmem:[%s7844_s28 + $0x1010] sm:$0xff]  ;;  %1760 = vst [vmem:[%s7849_s10 + $0x7f8] sm:$0xff] %v1759_v29 }
  0xc5   : > { %1762 = vst [vmem:[%s7849_s10 + $0x800] sm:$0xff] %v1761_v30  ;;  %1764 = vst [vmem:[%s7849_s10 + $0x808] sm:$0xff] %v1763_v31  ;;  %v1765_v32 = vld [vmem:[%s7844_s28 + $0x1020] sm:$0xff]  ;;  %v1767_v33 = vld [vmem:[%s7844_s28 + $0x1030] sm:$0xff] }
  0xc6   : > { %v1769_v34 = vld [vmem:[%s7844_s28 + $0x1040] sm:$0xff]  ;;  %1766 = vst [vmem:[%s7849_s10 + $0x810] sm:$0xff] %v1765_v32  ;;  %1768 = vst [vmem:[%s7849_s10 + $0x818] sm:$0xff] %v1767_v33  ;;  %v1771_v35 = vld [vmem:[%s7844_s28 + $0x1050] sm:$0xff] }
  0xc7   : > { %1770 = vst [vmem:[%s7849_s10 + $0x820] sm:$0xff] %v1769_v34  ;;  %v1773_v36 = vld [vmem:[%s7844_s28 + $0x1060] sm:$0xff]  ;;  %v1775_v37 = vld [vmem:[%s7844_s28 + $0x1070] sm:$0xff]  ;;  %1772 = vst [vmem:[%s7849_s10 + $0x828] sm:$0xff] %v1771_v35 }
  0xc8   : > { %1774 = vst [vmem:[%s7849_s10 + $0x830] sm:$0xff] %v1773_v36  ;;  %1776 = vst [vmem:[%s7849_s10 + $0x838] sm:$0xff] %v1775_v37  ;;  %v1777_v38 = vld [vmem:[%s7844_s28 + $0x1080] sm:$0xff]  ;;  %v1779_v39 = vld [vmem:[%s7844_s28 + $0x1090] sm:$0xff] }
  0xc9   : > { %v1781_v40 = vld [vmem:[%s7844_s28 + $0x10a0] sm:$0xff]  ;;  %1778 = vst [vmem:[%s7849_s10 + $0x840] sm:$0xff] %v1777_v38  ;;  %1780 = vst [vmem:[%s7849_s10 + $0x848] sm:$0xff] %v1779_v39  ;;  %v1783_v41 = vld [vmem:[%s7844_s28 + $0x10b0] sm:$0xff] }
  0xca   : > { %1782 = vst [vmem:[%s7849_s10 + $0x850] sm:$0xff] %v1781_v40  ;;  %v1785_v42 = vld [vmem:[%s7844_s28 + $0x10c0] sm:$0xff]  ;;  %v1787_v43 = vld [vmem:[%s7844_s28 + $0x10d0] sm:$0xff]  ;;  %1784 = vst [vmem:[%s7849_s10 + $0x858] sm:$0xff] %v1783_v41 }
  0xcb   : > { %1786 = vst [vmem:[%s7849_s10 + $0x860] sm:$0xff] %v1785_v42  ;;  %1788 = vst [vmem:[%s7849_s10 + $0x868] sm:$0xff] %v1787_v43  ;;  %v1789_v44 = vld [vmem:[%s7844_s28 + $0x10e0] sm:$0xff]  ;;  %v1791_v45 = vld [vmem:[%s7844_s28 + $0x10f0] sm:$0xff] }
  0xcc   : > { %v1793_v46 = vld [vmem:[%s7844_s28 + $0x1100] sm:$0xff]  ;;  %1790 = vst [vmem:[%s7849_s10 + $0x870] sm:$0xff] %v1789_v44  ;;  %1792 = vst [vmem:[%s7849_s10 + $0x878] sm:$0xff] %v1791_v45  ;;  %v1795_v47 = vld [vmem:[%s7844_s28 + $0x1110] sm:$0xff] }
  0xcd   : > { %1794 = vst [vmem:[%s7849_s10 + $0x880] sm:$0xff] %v1793_v46  ;;  %v1797_v48 = vld [vmem:[%s7844_s28 + $0x1120] sm:$0xff]  ;;  %v1799_v49 = vld [vmem:[%s7844_s28 + $0x1130] sm:$0xff]  ;;  %1796 = vst [vmem:[%s7849_s10 + $0x888] sm:$0xff] %v1795_v47 }
  0xce   : > { %1798 = vst [vmem:[%s7849_s10 + $0x890] sm:$0xff] %v1797_v48  ;;  %1800 = vst [vmem:[%s7849_s10 + $0x898] sm:$0xff] %v1799_v49  ;;  %v1801_v50 = vld [vmem:[%s7844_s28 + $0x1140] sm:$0xff]  ;;  %v1803_v51 = vld [vmem:[%s7844_s28 + $0x1150] sm:$0xff] }
  0xcf   : > { %v1805_v52 = vld [vmem:[%s7844_s28 + $0x1160] sm:$0xff]  ;;  %1802 = vst [vmem:[%s7849_s10 + $0x8a0] sm:$0xff] %v1801_v50  ;;  %1804 = vst [vmem:[%s7849_s10 + $0x8a8] sm:$0xff] %v1803_v51  ;;  %v1807_v53 = vld [vmem:[%s7844_s28 + $0x1170] sm:$0xff] }
  0xd0   : > { %1806 = vst [vmem:[%s7849_s10 + $0x8b0] sm:$0xff] %v1805_v52  ;;  %v1809_v54 = vld [vmem:[%s7844_s28 + $0x1180] sm:$0xff]  ;;  %v1811_v55 = vld [vmem:[%s7844_s28 + $0x1190] sm:$0xff]  ;;  %1808 = vst [vmem:[%s7849_s10 + $0x8b8] sm:$0xff] %v1807_v53 }
  0xd1   : > { %1810 = vst [vmem:[%s7849_s10 + $0x8c0] sm:$0xff] %v1809_v54  ;;  %1812 = vst [vmem:[%s7849_s10 + $0x8c8] sm:$0xff] %v1811_v55  ;;  %v1813_v56 = vld [vmem:[%s7844_s28 + $0x11a0] sm:$0xff]  ;;  %v1815_v57 = vld [vmem:[%s7844_s28 + $0x11b0] sm:$0xff] }
  0xd2   : > { %v1817_v58 = vld [vmem:[%s7844_s28 + $0x11c0] sm:$0xff]  ;;  %1814 = vst [vmem:[%s7849_s10 + $0x8d0] sm:$0xff] %v1813_v56  ;;  %1816 = vst [vmem:[%s7849_s10 + $0x8d8] sm:$0xff] %v1815_v57  ;;  %v1819_v59 = vld [vmem:[%s7844_s28 + $0x11d0] sm:$0xff] }
  0xd3   : > { %1818 = vst [vmem:[%s7849_s10 + $0x8e0] sm:$0xff] %v1817_v58  ;;  %v1821_v60 = vld [vmem:[%s7844_s28 + $0x11e0] sm:$0xff]  ;;  %v1823_v61 = vld [vmem:[%s7844_s28 + $0x11f0] sm:$0xff]  ;;  %1820 = vst [vmem:[%s7849_s10 + $0x8e8] sm:$0xff] %v1819_v59 }
  0xd4   : > { %1822 = vst [vmem:[%s7849_s10 + $0x8f0] sm:$0xff] %v1821_v60  ;;  %1824 = vst [vmem:[%s7849_s10 + $0x8f8] sm:$0xff] %v1823_v61  ;;  %v1825_v62 = vld [vmem:[%s7844_s28 + $0x1200] sm:$0xff]  ;;  %v1827_v63 = vld [vmem:[%s7844_s28 + $0x1210] sm:$0xff] }
  0xd5   : > { %v1829_v0 = vld [vmem:[%s7844_s28 + $0x1220] sm:$0xff]  ;;  %1826 = vst [vmem:[%s7849_s10 + $0x900] sm:$0xff] %v1825_v62  ;;  %1828 = vst [vmem:[%s7849_s10 + $0x908] sm:$0xff] %v1827_v63  ;;  %v1831_v1 = vld [vmem:[%s7844_s28 + $0x1230] sm:$0xff] }
  0xd6   : > { %1830 = vst [vmem:[%s7849_s10 + $0x910] sm:$0xff] %v1829_v0  ;;  %v1833_v2 = vld [vmem:[%s7844_s28 + $0x1240] sm:$0xff]  ;;  %v1835_v3 = vld [vmem:[%s7844_s28 + $0x1250] sm:$0xff]  ;;  %1832 = vst [vmem:[%s7849_s10 + $0x918] sm:$0xff] %v1831_v1 }
  0xd7   : > { %1834 = vst [vmem:[%s7849_s10 + $0x920] sm:$0xff] %v1833_v2  ;;  %1836 = vst [vmem:[%s7849_s10 + $0x928] sm:$0xff] %v1835_v3  ;;  %v1837_v4 = vld [vmem:[%s7844_s28 + $0x1260] sm:$0xff]  ;;  %v1839_v5 = vld [vmem:[%s7844_s28 + $0x1270] sm:$0xff] }
  0xd8   : > { %v1841_v6 = vld [vmem:[%s7844_s28 + $0x1280] sm:$0xff]  ;;  %1838 = vst [vmem:[%s7849_s10 + $0x930] sm:$0xff] %v1837_v4  ;;  %1840 = vst [vmem:[%s7849_s10 + $0x938] sm:$0xff] %v1839_v5  ;;  %v1843_v7 = vld [vmem:[%s7844_s28 + $0x1290] sm:$0xff] }
  0xd9   : > { %1842 = vst [vmem:[%s7849_s10 + $0x940] sm:$0xff] %v1841_v6  ;;  %v1845_v8 = vld [vmem:[%s7844_s28 + $0x12a0] sm:$0xff]  ;;  %v1847_v9 = vld [vmem:[%s7844_s28 + $0x12b0] sm:$0xff]  ;;  %1844 = vst [vmem:[%s7849_s10 + $0x948] sm:$0xff] %v1843_v7 }
  0xda   : > { %1846 = vst [vmem:[%s7849_s10 + $0x950] sm:$0xff] %v1845_v8  ;;  %1848 = vst [vmem:[%s7849_s10 + $0x958] sm:$0xff] %v1847_v9  ;;  %v1849_v10 = vld [vmem:[%s7844_s28 + $0x12c0] sm:$0xff]  ;;  %v1851_v11 = vld [vmem:[%s7844_s28 + $0x12d0] sm:$0xff] }
  0xdb   : > { %v1853_v12 = vld [vmem:[%s7844_s28 + $0x12e0] sm:$0xff]  ;;  %1850 = vst [vmem:[%s7849_s10 + $0x960] sm:$0xff] %v1849_v10  ;;  %1852 = vst [vmem:[%s7849_s10 + $0x968] sm:$0xff] %v1851_v11  ;;  %v1855_v13 = vld [vmem:[%s7844_s28 + $0x12f0] sm:$0xff] }
  0xdc   : > { %1854 = vst [vmem:[%s7849_s10 + $0x970] sm:$0xff] %v1853_v12  ;;  %v1857_v14 = vld [vmem:[%s7844_s28 + $0x1300] sm:$0xff]  ;;  %v1859_v15 = vld [vmem:[%s7844_s28 + $0x1310] sm:$0xff]  ;;  %1856 = vst [vmem:[%s7849_s10 + $0x978] sm:$0xff] %v1855_v13 }
  0xdd   : > { %1858 = vst [vmem:[%s7849_s10 + $0x980] sm:$0xff] %v1857_v14  ;;  %1860 = vst [vmem:[%s7849_s10 + $0x988] sm:$0xff] %v1859_v15  ;;  %v1861_v16 = vld [vmem:[%s7844_s28 + $0x1320] sm:$0xff]  ;;  %v1863_v17 = vld [vmem:[%s7844_s28 + $0x1330] sm:$0xff] }
  0xde   : > { %v1865_v18 = vld [vmem:[%s7844_s28 + $0x1340] sm:$0xff]  ;;  %1862 = vst [vmem:[%s7849_s10 + $0x990] sm:$0xff] %v1861_v16  ;;  %1864 = vst [vmem:[%s7849_s10 + $0x998] sm:$0xff] %v1863_v17  ;;  %v1867_v19 = vld [vmem:[%s7844_s28 + $0x1350] sm:$0xff] }
  0xdf   : > { %1866 = vst [vmem:[%s7849_s10 + $0x9a0] sm:$0xff] %v1865_v18  ;;  %v1869_v20 = vld [vmem:[%s7844_s28 + $0x1360] sm:$0xff]  ;;  %v1871_v21 = vld [vmem:[%s7844_s28 + $0x1370] sm:$0xff]  ;;  %1868 = vst [vmem:[%s7849_s10 + $0x9a8] sm:$0xff] %v1867_v19 }
  0xe0   : > { %1870 = vst [vmem:[%s7849_s10 + $0x9b0] sm:$0xff] %v1869_v20  ;;  %1872 = vst [vmem:[%s7849_s10 + $0x9b8] sm:$0xff] %v1871_v21  ;;  %v1873_v22 = vld [vmem:[%s7844_s28 + $0x1380] sm:$0xff]  ;;  %v1875_v23 = vld [vmem:[%s7844_s28 + $0x1390] sm:$0xff] }
  0xe1   : > { %v1877_v24 = vld [vmem:[%s7844_s28 + $0x13a0] sm:$0xff]  ;;  %1874 = vst [vmem:[%s7849_s10 + $0x9c0] sm:$0xff] %v1873_v22  ;;  %1876 = vst [vmem:[%s7849_s10 + $0x9c8] sm:$0xff] %v1875_v23  ;;  %v1879_v25 = vld [vmem:[%s7844_s28 + $0x13b0] sm:$0xff] }
  0xe2   : > { %1878 = vst [vmem:[%s7849_s10 + $0x9d0] sm:$0xff] %v1877_v24  ;;  %v1881_v26 = vld [vmem:[%s7844_s28 + $0x13c0] sm:$0xff]  ;;  %v1883_v27 = vld [vmem:[%s7844_s28 + $0x13d0] sm:$0xff]  ;;  %1880 = vst [vmem:[%s7849_s10 + $0x9d8] sm:$0xff] %v1879_v25 }
  0xe3   : > { %1882 = vst [vmem:[%s7849_s10 + $0x9e0] sm:$0xff] %v1881_v26  ;;  %1884 = vst [vmem:[%s7849_s10 + $0x9e8] sm:$0xff] %v1883_v27  ;;  %v1885_v28 = vld [vmem:[%s7844_s28 + $0x13e0] sm:$0xff]  ;;  %v1887_v29 = vld [vmem:[%s7844_s28 + $0x13f0] sm:$0xff] }
  0xe4   : > { %v1889_v30 = vld [vmem:[%s7844_s28 + $0x1400] sm:$0xff]  ;;  %1886 = vst [vmem:[%s7849_s10 + $0x9f0] sm:$0xff] %v1885_v28  ;;  %1888 = vst [vmem:[%s7849_s10 + $0x9f8] sm:$0xff] %v1887_v29  ;;  %v1891_v31 = vld [vmem:[%s7844_s28 + $0x1410] sm:$0xff] }
  0xe5   : > { %1890 = vst [vmem:[%s7849_s10 + $0xa00] sm:$0xff] %v1889_v30  ;;  %v1893_v32 = vld [vmem:[%s7844_s28 + $0x1420] sm:$0xff]  ;;  %v1895_v33 = vld [vmem:[%s7844_s28 + $0x1430] sm:$0xff]  ;;  %1892 = vst [vmem:[%s7849_s10 + $0xa08] sm:$0xff] %v1891_v31 }
  0xe6   : > { %1894 = vst [vmem:[%s7849_s10 + $0xa10] sm:$0xff] %v1893_v32  ;;  %1896 = vst [vmem:[%s7849_s10 + $0xa18] sm:$0xff] %v1895_v33  ;;  %v1897_v34 = vld [vmem:[%s7844_s28 + $0x1440] sm:$0xff]  ;;  %v1899_v35 = vld [vmem:[%s7844_s28 + $0x1450] sm:$0xff] }
  0xe7   : > { %v1901_v36 = vld [vmem:[%s7844_s28 + $0x1460] sm:$0xff]  ;;  %1898 = vst [vmem:[%s7849_s10 + $0xa20] sm:$0xff] %v1897_v34  ;;  %1900 = vst [vmem:[%s7849_s10 + $0xa28] sm:$0xff] %v1899_v35  ;;  %v1903_v37 = vld [vmem:[%s7844_s28 + $0x1470] sm:$0xff] }
  0xe8   : > { %1902 = vst [vmem:[%s7849_s10 + $0xa30] sm:$0xff] %v1901_v36  ;;  %v1905_v38 = vld [vmem:[%s7844_s28 + $0x1480] sm:$0xff]  ;;  %v1907_v39 = vld [vmem:[%s7844_s28 + $0x1490] sm:$0xff]  ;;  %1904 = vst [vmem:[%s7849_s10 + $0xa38] sm:$0xff] %v1903_v37 }
  0xe9   : > { %1906 = vst [vmem:[%s7849_s10 + $0xa40] sm:$0xff] %v1905_v38  ;;  %1908 = vst [vmem:[%s7849_s10 + $0xa48] sm:$0xff] %v1907_v39  ;;  %v1909_v40 = vld [vmem:[%s7844_s28 + $0x14a0] sm:$0xff]  ;;  %v1911_v41 = vld [vmem:[%s7844_s28 + $0x14b0] sm:$0xff] }
  0xea   : > { %v1913_v42 = vld [vmem:[%s7844_s28 + $0x14c0] sm:$0xff]  ;;  %1910 = vst [vmem:[%s7849_s10 + $0xa50] sm:$0xff] %v1909_v40  ;;  %1912 = vst [vmem:[%s7849_s10 + $0xa58] sm:$0xff] %v1911_v41  ;;  %v1915_v43 = vld [vmem:[%s7844_s28 + $0x14d0] sm:$0xff] }
  0xeb   : > { %1914 = vst [vmem:[%s7849_s10 + $0xa60] sm:$0xff] %v1913_v42  ;;  %v1917_v44 = vld [vmem:[%s7844_s28 + $0x14e0] sm:$0xff]  ;;  %v1919_v45 = vld [vmem:[%s7844_s28 + $0x14f0] sm:$0xff]  ;;  %1916 = vst [vmem:[%s7849_s10 + $0xa68] sm:$0xff] %v1915_v43 }
  0xec   : > { %1918 = vst [vmem:[%s7849_s10 + $0xa70] sm:$0xff] %v1917_v44  ;;  %1920 = vst [vmem:[%s7849_s10 + $0xa78] sm:$0xff] %v1919_v45  ;;  %v1921_v46 = vld [vmem:[%s7844_s28 + $0x1500] sm:$0xff]  ;;  %v1923_v47 = vld [vmem:[%s7844_s28 + $0x1510] sm:$0xff] }
  0xed   : > { %v1925_v48 = vld [vmem:[%s7844_s28 + $0x1520] sm:$0xff]  ;;  %1922 = vst [vmem:[%s7849_s10 + $0xa80] sm:$0xff] %v1921_v46  ;;  %1924 = vst [vmem:[%s7849_s10 + $0xa88] sm:$0xff] %v1923_v47  ;;  %v1927_v49 = vld [vmem:[%s7844_s28 + $0x1530] sm:$0xff] }
  0xee   : > { %1926 = vst [vmem:[%s7849_s10 + $0xa90] sm:$0xff] %v1925_v48  ;;  %v1929_v50 = vld [vmem:[%s7844_s28 + $0x1540] sm:$0xff]  ;;  %v1931_v51 = vld [vmem:[%s7844_s28 + $0x1550] sm:$0xff]  ;;  %1928 = vst [vmem:[%s7849_s10 + $0xa98] sm:$0xff] %v1927_v49 }
  0xef   : > { %1930 = vst [vmem:[%s7849_s10 + $0xaa0] sm:$0xff] %v1929_v50  ;;  %1932 = vst [vmem:[%s7849_s10 + $0xaa8] sm:$0xff] %v1931_v51  ;;  %v1933_v52 = vld [vmem:[%s7844_s28 + $0x1560] sm:$0xff]  ;;  %v1935_v53 = vld [vmem:[%s7844_s28 + $0x1570] sm:$0xff] }
  0xf0   : > { %v1937_v54 = vld [vmem:[%s7844_s28 + $0x1580] sm:$0xff]  ;;  %1934 = vst [vmem:[%s7849_s10 + $0xab0] sm:$0xff] %v1933_v52  ;;  %1936 = vst [vmem:[%s7849_s10 + $0xab8] sm:$0xff] %v1935_v53  ;;  %v1939_v55 = vld [vmem:[%s7844_s28 + $0x1590] sm:$0xff] }
  0xf1   : > { %1938 = vst [vmem:[%s7849_s10 + $0xac0] sm:$0xff] %v1937_v54  ;;  %v1941_v56 = vld [vmem:[%s7844_s28 + $0x15a0] sm:$0xff]  ;;  %v1943_v57 = vld [vmem:[%s7844_s28 + $0x15b0] sm:$0xff]  ;;  %1940 = vst [vmem:[%s7849_s10 + $0xac8] sm:$0xff] %v1939_v55 }
  0xf2   : > { %1942 = vst [vmem:[%s7849_s10 + $0xad0] sm:$0xff] %v1941_v56  ;;  %1944 = vst [vmem:[%s7849_s10 + $0xad8] sm:$0xff] %v1943_v57  ;;  %v1945_v58 = vld [vmem:[%s7844_s28 + $0x15c0] sm:$0xff]  ;;  %v1947_v59 = vld [vmem:[%s7844_s28 + $0x15d0] sm:$0xff] }
  0xf3   : > { %v1949_v60 = vld [vmem:[%s7844_s28 + $0x15e0] sm:$0xff]  ;;  %1946 = vst [vmem:[%s7849_s10 + $0xae0] sm:$0xff] %v1945_v58  ;;  %1948 = vst [vmem:[%s7849_s10 + $0xae8] sm:$0xff] %v1947_v59  ;;  %v1951_v61 = vld [vmem:[%s7844_s28 + $0x15f0] sm:$0xff] }
  0xf4   : > { %1950 = vst [vmem:[%s7849_s10 + $0xaf0] sm:$0xff] %v1949_v60  ;;  %v1953_v62 = vld [vmem:[%s7844_s28 + $0x1600] sm:$0xff]  ;;  %v1955_v63 = vld [vmem:[%s7844_s28 + $0x1610] sm:$0xff]  ;;  %1952 = vst [vmem:[%s7849_s10 + $0xaf8] sm:$0xff] %v1951_v61 }
  0xf5   : > { %1954 = vst [vmem:[%s7849_s10 + $0xb00] sm:$0xff] %v1953_v62  ;;  %1956 = vst [vmem:[%s7849_s10 + $0xb08] sm:$0xff] %v1955_v63  ;;  %v1957_v0 = vld [vmem:[%s7844_s28 + $0x1620] sm:$0xff]  ;;  %v1959_v1 = vld [vmem:[%s7844_s28 + $0x1630] sm:$0xff] }
  0xf6   : > { %v1961_v2 = vld [vmem:[%s7844_s28 + $0x1640] sm:$0xff]  ;;  %1958 = vst [vmem:[%s7849_s10 + $0xb10] sm:$0xff] %v1957_v0  ;;  %1960 = vst [vmem:[%s7849_s10 + $0xb18] sm:$0xff] %v1959_v1  ;;  %v1963_v3 = vld [vmem:[%s7844_s28 + $0x1650] sm:$0xff] }
  0xf7   : > { %1962 = vst [vmem:[%s7849_s10 + $0xb20] sm:$0xff] %v1961_v2  ;;  %v1965_v4 = vld [vmem:[%s7844_s28 + $0x1660] sm:$0xff]  ;;  %v1967_v5 = vld [vmem:[%s7844_s28 + $0x1670] sm:$0xff]  ;;  %1964 = vst [vmem:[%s7849_s10 + $0xb28] sm:$0xff] %v1963_v3 }
  0xf8   : > { %1966 = vst [vmem:[%s7849_s10 + $0xb30] sm:$0xff] %v1965_v4  ;;  %1968 = vst [vmem:[%s7849_s10 + $0xb38] sm:$0xff] %v1967_v5  ;;  %v1969_v6 = vld [vmem:[%s7844_s28 + $0x1680] sm:$0xff]  ;;  %v1971_v7 = vld [vmem:[%s7844_s28 + $0x1690] sm:$0xff] }
  0xf9   : > { %v1973_v8 = vld [vmem:[%s7844_s28 + $0x16a0] sm:$0xff]  ;;  %1970 = vst [vmem:[%s7849_s10 + $0xb40] sm:$0xff] %v1969_v6  ;;  %1972 = vst [vmem:[%s7849_s10 + $0xb48] sm:$0xff] %v1971_v7  ;;  %v1975_v9 = vld [vmem:[%s7844_s28 + $0x16b0] sm:$0xff] }
  0xfa   : > { %1974 = vst [vmem:[%s7849_s10 + $0xb50] sm:$0xff] %v1973_v8  ;;  %v1977_v10 = vld [vmem:[%s7844_s28 + $0x16c0] sm:$0xff]  ;;  %v1979_v11 = vld [vmem:[%s7844_s28 + $0x16d0] sm:$0xff]  ;;  %1976 = vst [vmem:[%s7849_s10 + $0xb58] sm:$0xff] %v1975_v9 }
  0xfb   : > { %1978 = vst [vmem:[%s7849_s10 + $0xb60] sm:$0xff] %v1977_v10  ;;  %1980 = vst [vmem:[%s7849_s10 + $0xb68] sm:$0xff] %v1979_v11  ;;  %v1981_v12 = vld [vmem:[%s7844_s28 + $0x16e0] sm:$0xff]  ;;  %v1983_v13 = vld [vmem:[%s7844_s28 + $0x16f0] sm:$0xff] }
  0xfc   : > { %v1985_v14 = vld [vmem:[%s7844_s28 + $0x1700] sm:$0xff]  ;;  %1982 = vst [vmem:[%s7849_s10 + $0xb70] sm:$0xff] %v1981_v12  ;;  %1984 = vst [vmem:[%s7849_s10 + $0xb78] sm:$0xff] %v1983_v13  ;;  %v1987_v15 = vld [vmem:[%s7844_s28 + $0x1710] sm:$0xff] }
  0xfd   : > { %1986 = vst [vmem:[%s7849_s10 + $0xb80] sm:$0xff] %v1985_v14  ;;  %v1989_v16 = vld [vmem:[%s7844_s28 + $0x1720] sm:$0xff]  ;;  %v1991_v17 = vld [vmem:[%s7844_s28 + $0x1730] sm:$0xff]  ;;  %1988 = vst [vmem:[%s7849_s10 + $0xb88] sm:$0xff] %v1987_v15 }
  0xfe   : > { %1990 = vst [vmem:[%s7849_s10 + $0xb90] sm:$0xff] %v1989_v16  ;;  %1992 = vst [vmem:[%s7849_s10 + $0xb98] sm:$0xff] %v1991_v17  ;;  %v1993_v18 = vld [vmem:[%s7844_s28 + $0x1740] sm:$0xff]  ;;  %v1995_v19 = vld [vmem:[%s7844_s28 + $0x1750] sm:$0xff] }
  0xff   : > { %v1997_v20 = vld [vmem:[%s7844_s28 + $0x1760] sm:$0xff]  ;;  %1994 = vst [vmem:[%s7849_s10 + $0xba0] sm:$0xff] %v1993_v18  ;;  %1996 = vst [vmem:[%s7849_s10 + $0xba8] sm:$0xff] %v1995_v19  ;;  %v1999_v21 = vld [vmem:[%s7844_s28 + $0x1770] sm:$0xff] }
 0x100   : > { %1998 = vst [vmem:[%s7849_s10 + $0xbb0] sm:$0xff] %v1997_v20  ;;  %v2001_v22 = vld [vmem:[%s7844_s28 + $0x1780] sm:$0xff]  ;;  %v2003_v23 = vld [vmem:[%s7844_s28 + $0x1790] sm:$0xff]  ;;  %2000 = vst [vmem:[%s7849_s10 + $0xbb8] sm:$0xff] %v1999_v21 }
 0x101   : > { %2002 = vst [vmem:[%s7849_s10 + $0xbc0] sm:$0xff] %v2001_v22  ;;  %2004 = vst [vmem:[%s7849_s10 + $0xbc8] sm:$0xff] %v2003_v23  ;;  %v2005_v24 = vld [vmem:[%s7844_s28 + $0x17a0] sm:$0xff]  ;;  %v2007_v25 = vld [vmem:[%s7844_s28 + $0x17b0] sm:$0xff] }
 0x102   : > { %v2009_v26 = vld [vmem:[%s7844_s28 + $0x17c0] sm:$0xff]  ;;  %2006 = vst [vmem:[%s7849_s10 + $0xbd0] sm:$0xff] %v2005_v24  ;;  %2008 = vst [vmem:[%s7849_s10 + $0xbd8] sm:$0xff] %v2007_v25  ;;  %v2011_v27 = vld [vmem:[%s7844_s28 + $0x17d0] sm:$0xff] }
 0x103   : > { %2010 = vst [vmem:[%s7849_s10 + $0xbe0] sm:$0xff] %v2009_v26  ;;  %v2013_v28 = vld [vmem:[%s7844_s28 + $0x17e0] sm:$0xff]  ;;  %v2015_v29 = vld [vmem:[%s7844_s28 + $0x17f0] sm:$0xff]  ;;  %2012 = vst [vmem:[%s7849_s10 + $0xbe8] sm:$0xff] %v2011_v27 }
 0x104   : > { %2014 = vst [vmem:[%s7849_s10 + $0xbf0] sm:$0xff] %v2013_v28  ;;  %2016 = vst [vmem:[%s7849_s10 + $0xbf8] sm:$0xff] %v2015_v29  ;;  %v2017_v30 = vld [vmem:[%s7844_s28 + $0x1800] sm:$0xff]  ;;  %v2019_v31 = vld [vmem:[%s7844_s28 + $0x1810] sm:$0xff] }
 0x105   : > { %v2021_v32 = vld [vmem:[%s7844_s28 + $0x1820] sm:$0xff]  ;;  %2018 = vst [vmem:[%s7849_s10 + $0xc00] sm:$0xff] %v2017_v30  ;;  %2020 = vst [vmem:[%s7849_s10 + $0xc08] sm:$0xff] %v2019_v31  ;;  %v2023_v33 = vld [vmem:[%s7844_s28 + $0x1830] sm:$0xff] }
 0x106   : > { %2022 = vst [vmem:[%s7849_s10 + $0xc10] sm:$0xff] %v2021_v32  ;;  %v2025_v34 = vld [vmem:[%s7844_s28 + $0x1840] sm:$0xff]  ;;  %v2027_v35 = vld [vmem:[%s7844_s28 + $0x1850] sm:$0xff]  ;;  %2024 = vst [vmem:[%s7849_s10 + $0xc18] sm:$0xff] %v2023_v33 }
 0x107   : > { %2026 = vst [vmem:[%s7849_s10 + $0xc20] sm:$0xff] %v2025_v34  ;;  %2028 = vst [vmem:[%s7849_s10 + $0xc28] sm:$0xff] %v2027_v35  ;;  %v2029_v36 = vld [vmem:[%s7844_s28 + $0x1860] sm:$0xff]  ;;  %v2031_v37 = vld [vmem:[%s7844_s28 + $0x1870] sm:$0xff] }
 0x108   : > { %v2033_v38 = vld [vmem:[%s7844_s28 + $0x1880] sm:$0xff]  ;;  %2030 = vst [vmem:[%s7849_s10 + $0xc30] sm:$0xff] %v2029_v36  ;;  %2032 = vst [vmem:[%s7849_s10 + $0xc38] sm:$0xff] %v2031_v37  ;;  %v2035_v39 = vld [vmem:[%s7844_s28 + $0x1890] sm:$0xff] }
 0x109   : > { %2034 = vst [vmem:[%s7849_s10 + $0xc40] sm:$0xff] %v2033_v38  ;;  %v2037_v40 = vld [vmem:[%s7844_s28 + $0x18a0] sm:$0xff]  ;;  %v2039_v41 = vld [vmem:[%s7844_s28 + $0x18b0] sm:$0xff]  ;;  %2036 = vst [vmem:[%s7849_s10 + $0xc48] sm:$0xff] %v2035_v39 }
 0x10a   : > { %2038 = vst [vmem:[%s7849_s10 + $0xc50] sm:$0xff] %v2037_v40  ;;  %2040 = vst [vmem:[%s7849_s10 + $0xc58] sm:$0xff] %v2039_v41  ;;  %v2041_v42 = vld [vmem:[%s7844_s28 + $0x18c0] sm:$0xff]  ;;  %v2043_v43 = vld [vmem:[%s7844_s28 + $0x18d0] sm:$0xff] }
 0x10b   : > { %v2045_v44 = vld [vmem:[%s7844_s28 + $0x18e0] sm:$0xff]  ;;  %2042 = vst [vmem:[%s7849_s10 + $0xc60] sm:$0xff] %v2041_v42  ;;  %2044 = vst [vmem:[%s7849_s10 + $0xc68] sm:$0xff] %v2043_v43  ;;  %v2047_v45 = vld [vmem:[%s7844_s28 + $0x18f0] sm:$0xff] }
 0x10c   : > { %2046 = vst [vmem:[%s7849_s10 + $0xc70] sm:$0xff] %v2045_v44  ;;  %v2049_v46 = vld [vmem:[%s7844_s28 + $0x1900] sm:$0xff]  ;;  %v2051_v47 = vld [vmem:[%s7844_s28 + $0x1910] sm:$0xff]  ;;  %2048 = vst [vmem:[%s7849_s10 + $0xc78] sm:$0xff] %v2047_v45 }
 0x10d   : > { %2050 = vst [vmem:[%s7849_s10 + $0xc80] sm:$0xff] %v2049_v46  ;;  %2052 = vst [vmem:[%s7849_s10 + $0xc88] sm:$0xff] %v2051_v47  ;;  %v2053_v48 = vld [vmem:[%s7844_s28 + $0x1920] sm:$0xff]  ;;  %v2055_v49 = vld [vmem:[%s7844_s28 + $0x1930] sm:$0xff] }
 0x10e   : > { %v2057_v50 = vld [vmem:[%s7844_s28 + $0x1940] sm:$0xff]  ;;  %2054 = vst [vmem:[%s7849_s10 + $0xc90] sm:$0xff] %v2053_v48  ;;  %2056 = vst [vmem:[%s7849_s10 + $0xc98] sm:$0xff] %v2055_v49  ;;  %v2059_v51 = vld [vmem:[%s7844_s28 + $0x1950] sm:$0xff] }
 0x10f   : > { %2058 = vst [vmem:[%s7849_s10 + $0xca0] sm:$0xff] %v2057_v50  ;;  %v2061_v52 = vld [vmem:[%s7844_s28 + $0x1960] sm:$0xff]  ;;  %v2063_v53 = vld [vmem:[%s7844_s28 + $0x1970] sm:$0xff]  ;;  %2060 = vst [vmem:[%s7849_s10 + $0xca8] sm:$0xff] %v2059_v51 }
 0x110   : > { %2062 = vst [vmem:[%s7849_s10 + $0xcb0] sm:$0xff] %v2061_v52  ;;  %2064 = vst [vmem:[%s7849_s10 + $0xcb8] sm:$0xff] %v2063_v53  ;;  %v2065_v54 = vld [vmem:[%s7844_s28 + $0x1980] sm:$0xff]  ;;  %v2067_v55 = vld [vmem:[%s7844_s28 + $0x1990] sm:$0xff] }
 0x111   : > { %v2069_v56 = vld [vmem:[%s7844_s28 + $0x19a0] sm:$0xff]  ;;  %2066 = vst [vmem:[%s7849_s10 + $0xcc0] sm:$0xff] %v2065_v54  ;;  %2068 = vst [vmem:[%s7849_s10 + $0xcc8] sm:$0xff] %v2067_v55  ;;  %v2071_v57 = vld [vmem:[%s7844_s28 + $0x19b0] sm:$0xff] }
 0x112   : > { %2070 = vst [vmem:[%s7849_s10 + $0xcd0] sm:$0xff] %v2069_v56  ;;  %v2073_v58 = vld [vmem:[%s7844_s28 + $0x19c0] sm:$0xff]  ;;  %v2075_v59 = vld [vmem:[%s7844_s28 + $0x19d0] sm:$0xff]  ;;  %2072 = vst [vmem:[%s7849_s10 + $0xcd8] sm:$0xff] %v2071_v57 }
 0x113   : > { %2074 = vst [vmem:[%s7849_s10 + $0xce0] sm:$0xff] %v2073_v58  ;;  %2076 = vst [vmem:[%s7849_s10 + $0xce8] sm:$0xff] %v2075_v59  ;;  %v2077_v60 = vld [vmem:[%s7844_s28 + $0x19e0] sm:$0xff]  ;;  %v2079_v61 = vld [vmem:[%s7844_s28 + $0x19f0] sm:$0xff] }
 0x114   : > { %v2081_v62 = vld [vmem:[%s7844_s28 + $0x1a00] sm:$0xff]  ;;  %2078 = vst [vmem:[%s7849_s10 + $0xcf0] sm:$0xff] %v2077_v60  ;;  %2080 = vst [vmem:[%s7849_s10 + $0xcf8] sm:$0xff] %v2079_v61  ;;  %v2083_v63 = vld [vmem:[%s7844_s28 + $0x1a10] sm:$0xff] }
 0x115   : > { %2082 = vst [vmem:[%s7849_s10 + $0xd00] sm:$0xff] %v2081_v62  ;;  %v2085_v0 = vld [vmem:[%s7844_s28 + $0x1a20] sm:$0xff]  ;;  %v2087_v1 = vld [vmem:[%s7844_s28 + $0x1a30] sm:$0xff]  ;;  %2084 = vst [vmem:[%s7849_s10 + $0xd08] sm:$0xff] %v2083_v63 }
 0x116   : > { %2086 = vst [vmem:[%s7849_s10 + $0xd10] sm:$0xff] %v2085_v0  ;;  %2088 = vst [vmem:[%s7849_s10 + $0xd18] sm:$0xff] %v2087_v1  ;;  %v2089_v2 = vld [vmem:[%s7844_s28 + $0x1a40] sm:$0xff]  ;;  %v2091_v3 = vld [vmem:[%s7844_s28 + $0x1a50] sm:$0xff] }
 0x117   : > { %v2093_v4 = vld [vmem:[%s7844_s28 + $0x1a60] sm:$0xff]  ;;  %2090 = vst [vmem:[%s7849_s10 + $0xd20] sm:$0xff] %v2089_v2  ;;  %2092 = vst [vmem:[%s7849_s10 + $0xd28] sm:$0xff] %v2091_v3  ;;  %v2095_v5 = vld [vmem:[%s7844_s28 + $0x1a70] sm:$0xff] }
 0x118   : > { %2094 = vst [vmem:[%s7849_s10 + $0xd30] sm:$0xff] %v2093_v4  ;;  %v2097_v6 = vld [vmem:[%s7844_s28 + $0x1a80] sm:$0xff]  ;;  %v2099_v7 = vld [vmem:[%s7844_s28 + $0x1a90] sm:$0xff]  ;;  %2096 = vst [vmem:[%s7849_s10 + $0xd38] sm:$0xff] %v2095_v5 }
 0x119   : > { %2098 = vst [vmem:[%s7849_s10 + $0xd40] sm:$0xff] %v2097_v6  ;;  %2100 = vst [vmem:[%s7849_s10 + $0xd48] sm:$0xff] %v2099_v7  ;;  %v2101_v8 = vld [vmem:[%s7844_s28 + $0x1aa0] sm:$0xff]  ;;  %v2103_v9 = vld [vmem:[%s7844_s28 + $0x1ab0] sm:$0xff] }
 0x11a   : > { %v2105_v10 = vld [vmem:[%s7844_s28 + $0x1ac0] sm:$0xff]  ;;  %2102 = vst [vmem:[%s7849_s10 + $0xd50] sm:$0xff] %v2101_v8  ;;  %2104 = vst [vmem:[%s7849_s10 + $0xd58] sm:$0xff] %v2103_v9  ;;  %v2107_v11 = vld [vmem:[%s7844_s28 + $0x1ad0] sm:$0xff] }
 0x11b   : > { %2106 = vst [vmem:[%s7849_s10 + $0xd60] sm:$0xff] %v2105_v10  ;;  %v2109_v12 = vld [vmem:[%s7844_s28 + $0x1ae0] sm:$0xff]  ;;  %v2111_v13 = vld [vmem:[%s7844_s28 + $0x1af0] sm:$0xff]  ;;  %2108 = vst [vmem:[%s7849_s10 + $0xd68] sm:$0xff] %v2107_v11 }
 0x11c   : > { %2110 = vst [vmem:[%s7849_s10 + $0xd70] sm:$0xff] %v2109_v12  ;;  %2112 = vst [vmem:[%s7849_s10 + $0xd78] sm:$0xff] %v2111_v13  ;;  %v2113_v14 = vld [vmem:[%s7844_s28 + $0x1b00] sm:$0xff]  ;;  %v2115_v15 = vld [vmem:[%s7844_s28 + $0x1b10] sm:$0xff] }
 0x11d   : > { %v2117_v16 = vld [vmem:[%s7844_s28 + $0x1b20] sm:$0xff]  ;;  %2114 = vst [vmem:[%s7849_s10 + $0xd80] sm:$0xff] %v2113_v14  ;;  %2116 = vst [vmem:[%s7849_s10 + $0xd88] sm:$0xff] %v2115_v15  ;;  %v2119_v17 = vld [vmem:[%s7844_s28 + $0x1b30] sm:$0xff] }
 0x11e   : > { %2118 = vst [vmem:[%s7849_s10 + $0xd90] sm:$0xff] %v2117_v16  ;;  %v2121_v18 = vld [vmem:[%s7844_s28 + $0x1b40] sm:$0xff]  ;;  %v2123_v19 = vld [vmem:[%s7844_s28 + $0x1b50] sm:$0xff]  ;;  %2120 = vst [vmem:[%s7849_s10 + $0xd98] sm:$0xff] %v2119_v17 }
 0x11f   : > { %2122 = vst [vmem:[%s7849_s10 + $0xda0] sm:$0xff] %v2121_v18  ;;  %2124 = vst [vmem:[%s7849_s10 + $0xda8] sm:$0xff] %v2123_v19  ;;  %v2125_v20 = vld [vmem:[%s7844_s28 + $0x1b60] sm:$0xff]  ;;  %v2127_v21 = vld [vmem:[%s7844_s28 + $0x1b70] sm:$0xff] }
 0x120   : > { %v2129_v22 = vld [vmem:[%s7844_s28 + $0x1b80] sm:$0xff]  ;;  %2126 = vst [vmem:[%s7849_s10 + $0xdb0] sm:$0xff] %v2125_v20  ;;  %2128 = vst [vmem:[%s7849_s10 + $0xdb8] sm:$0xff] %v2127_v21  ;;  %v2131_v23 = vld [vmem:[%s7844_s28 + $0x1b90] sm:$0xff] }
 0x121   : > { %2130 = vst [vmem:[%s7849_s10 + $0xdc0] sm:$0xff] %v2129_v22  ;;  %v2133_v24 = vld [vmem:[%s7844_s28 + $0x1ba0] sm:$0xff]  ;;  %v2135_v25 = vld [vmem:[%s7844_s28 + $0x1bb0] sm:$0xff]  ;;  %2132 = vst [vmem:[%s7849_s10 + $0xdc8] sm:$0xff] %v2131_v23 }
 0x122   : > { %2134 = vst [vmem:[%s7849_s10 + $0xdd0] sm:$0xff] %v2133_v24  ;;  %2136 = vst [vmem:[%s7849_s10 + $0xdd8] sm:$0xff] %v2135_v25  ;;  %v2137_v26 = vld [vmem:[%s7844_s28 + $0x1bc0] sm:$0xff]  ;;  %v2139_v27 = vld [vmem:[%s7844_s28 + $0x1bd0] sm:$0xff] }
 0x123   : > { %v2141_v28 = vld [vmem:[%s7844_s28 + $0x1be0] sm:$0xff]  ;;  %2138 = vst [vmem:[%s7849_s10 + $0xde0] sm:$0xff] %v2137_v26  ;;  %2140 = vst [vmem:[%s7849_s10 + $0xde8] sm:$0xff] %v2139_v27  ;;  %v2143_v29 = vld [vmem:[%s7844_s28 + $0x1bf0] sm:$0xff] }
 0x124   : > { %2142 = vst [vmem:[%s7849_s10 + $0xdf0] sm:$0xff] %v2141_v28  ;;  %v2145_v30 = vld [vmem:[%s7844_s28 + $0x1c00] sm:$0xff]  ;;  %v2147_v31 = vld [vmem:[%s7844_s28 + $0x1c10] sm:$0xff]  ;;  %2144 = vst [vmem:[%s7849_s10 + $0xdf8] sm:$0xff] %v2143_v29 }
 0x125   : > { %2146 = vst [vmem:[%s7849_s10 + $0xe00] sm:$0xff] %v2145_v30  ;;  %2148 = vst [vmem:[%s7849_s10 + $0xe08] sm:$0xff] %v2147_v31  ;;  %v2149_v32 = vld [vmem:[%s7844_s28 + $0x1c20] sm:$0xff]  ;;  %v2151_v33 = vld [vmem:[%s7844_s28 + $0x1c30] sm:$0xff] }
 0x126   : > { %v2153_v34 = vld [vmem:[%s7844_s28 + $0x1c40] sm:$0xff]  ;;  %2150 = vst [vmem:[%s7849_s10 + $0xe10] sm:$0xff] %v2149_v32  ;;  %2152 = vst [vmem:[%s7849_s10 + $0xe18] sm:$0xff] %v2151_v33  ;;  %v2155_v35 = vld [vmem:[%s7844_s28 + $0x1c50] sm:$0xff] }
 0x127   : > { %2154 = vst [vmem:[%s7849_s10 + $0xe20] sm:$0xff] %v2153_v34  ;;  %v2157_v36 = vld [vmem:[%s7844_s28 + $0x1c60] sm:$0xff]  ;;  %v2159_v37 = vld [vmem:[%s7844_s28 + $0x1c70] sm:$0xff]  ;;  %2156 = vst [vmem:[%s7849_s10 + $0xe28] sm:$0xff] %v2155_v35 }
 0x128   : > { %2158 = vst [vmem:[%s7849_s10 + $0xe30] sm:$0xff] %v2157_v36  ;;  %2160 = vst [vmem:[%s7849_s10 + $0xe38] sm:$0xff] %v2159_v37  ;;  %v2161_v38 = vld [vmem:[%s7844_s28 + $0x1c80] sm:$0xff]  ;;  %v2163_v39 = vld [vmem:[%s7844_s28 + $0x1c90] sm:$0xff] }
 0x129   : > { %v2165_v40 = vld [vmem:[%s7844_s28 + $0x1ca0] sm:$0xff]  ;;  %2162 = vst [vmem:[%s7849_s10 + $0xe40] sm:$0xff] %v2161_v38  ;;  %2164 = vst [vmem:[%s7849_s10 + $0xe48] sm:$0xff] %v2163_v39  ;;  %v2167_v41 = vld [vmem:[%s7844_s28 + $0x1cb0] sm:$0xff] }
 0x12a   : > { %2166 = vst [vmem:[%s7849_s10 + $0xe50] sm:$0xff] %v2165_v40  ;;  %v2169_v42 = vld [vmem:[%s7844_s28 + $0x1cc0] sm:$0xff]  ;;  %v2171_v43 = vld [vmem:[%s7844_s28 + $0x1cd0] sm:$0xff]  ;;  %2168 = vst [vmem:[%s7849_s10 + $0xe58] sm:$0xff] %v2167_v41 }
 0x12b   : > { %2170 = vst [vmem:[%s7849_s10 + $0xe60] sm:$0xff] %v2169_v42  ;;  %2172 = vst [vmem:[%s7849_s10 + $0xe68] sm:$0xff] %v2171_v43  ;;  %v2173_v44 = vld [vmem:[%s7844_s28 + $0x1ce0] sm:$0xff]  ;;  %v2175_v45 = vld [vmem:[%s7844_s28 + $0x1cf0] sm:$0xff] }
 0x12c   : > { %2174 = vst [vmem:[%s7849_s10 + $0xe70] sm:$0xff] %v2173_v44  ;;  %2176 = vst [vmem:[%s7849_s10 + $0xe78] sm:$0xff] %v2175_v45 }
 0x12d PF: > { %2190 = sbr.rel (!%p7756_p11) target bundleno = 308 (0x134), region = 88  ;;  %s2192_s0 = sand.u32 (%p7756_p11), 1, %s7591_s16  }
 0x12e   : > { %s6650_s27 = sshll.u32 (%p7756_p11), %s7623_s24, 4  ;;  %s6141_s26 = sshll.u32 (%p7756_p11), %s2192_s0, 5 }
 0x12f   : > { %s2200_s6 = scalar_lea.vmem (%p7756_p11), %s9373_s3, %s6650_s27  ;;  %s2194_s8 = scalar_lea.vmem (%p7756_p11), [#allocation4], %s6141_s26 }
 0x130   : > { %v2213_v46 = vld [vmem:[%s2200_s6] sm:$0xff] (%p7756_p11)  ;;  %v2215_v47 = vld [vmem:[%s2200_s6 + $0x8] sm:$0xff] (%p7756_p11) }
 0x131   : > { %v2217_v48 = vld [vmem:[%s2200_s6 + $0x20] sm:$0xff] (%p7756_p11)  ;;  %2214 = vst [vmem:[%s2194_s8] sm:$0xff] (%p7756_p11), %v2213_v46  ;;  %2216 = vst [vmem:[%s2194_s8 + $0x8] sm:$0xff] (%p7756_p11), %v2215_v47  ;;  %v2219_v49 = vld [vmem:[%s2200_s6 + $0x28] sm:$0xff] (%p7756_p11) }
 0x132   : > { %2218 = vst [vmem:[%s2194_s8 + $0x10] sm:$0xff] (%p7756_p11), %v2217_v48  ;;  %2220 = vst [vmem:[%s2194_s8 + $0x18] sm:$0xff] (%p7756_p11), %v2219_v49 }
 0x134 PF: > { %p6144_p1 = scmp.ge.s32.totalorder %s7627_s25, 1  ;;  %p2225_p2 = scmp.lt.s32.totalorder %s7627_s25, 7 }
 0x136   : > { %p2226_p3 = pnand %p6144_p1, %p2225_p2 }
 0x137   : > { %s2232_s14 = sand.u32 (!%p2226_p3), 1, %s7603_s19   ;;  %s2239_s9 = sand.u32 (!%p2226_p3), 1, %s7595_s17  }
 0x138   : > { %2229 = sbr.rel (%p2226_p3) target bundleno = 1050 (0x41a), region = 111  ;;  %s2246_s28 = sand.u32 (!%p2226_p3), 1, %s7587_s15  }
 0x139   : > { %s6710_s11 = smul.u32 (!%p2226_p3), 232, %s2232_s14  ;;  %s6145_s0 = sshll.u32 (!%p2226_p3), %s2246_s28, 5 }
 0x13a   : > { %s6711_s10 = smul.u32 (!%p2226_p3), 3712, %s2239_s9  ;;  %s6147_s27 = sshll.u32 (!%p2226_p3), %s7615_s22, 1 }
 0x13b   : > { %p2287_p4 = scmp.lt.s32.totalorder (!%p2226_p3), %s6147_s27, 3  ;;  %s8795_s6 = scalar_lea.vmem (!%p2226_p3), [#allocation2], %s6710_s11 }
 0x13c   : > { %s8797_s8 = scalar_lea.vmem (!%p2226_p3), [#allocation3], %s6711_s10  ;;  %s8799_s1 = scalar_lea.vmem (!%p2226_p3), [#allocation4], %s6145_s0 }
 0x13d   : > { %s8801_s17 = scalar_lea.vmem (!%p2226_p3), [#allocation5], %s6145_s0  ;;  %p6148_p5 = scmp.ne.s32.totalorder (!%p2226_p3), %s7611_s21, 0 }
 0x13f   : > { %s9406_s27 = smov (!%p2287_p4, %s6147_s27), 3  ;;  %2299 = sbr.rel (%p6148_p5) target bundleno = 326 (0x146), region = 127 }
 0x140   : > { %s2289_s30 = scalar_lea.vmem %s9372_s2, %s9406_s27  ;;  %v7629_v50 = vmov (!%p6148_p5), 0.0  }
 0x141   : > { %2300 = vst [vmem:[%s8801_s17] sm:$0xff] (!%p6148_p5), %v7629_v50  ;;  %2301 = vst [vmem:[%s8801_s17 + $0x8] sm:$0xff] (!%p6148_p5), %v7629_v50 }
 0x142   : > { %2302 = vst [vmem:[%s8801_s17 + $0x10] sm:$0xff] (!%p6148_p5), %v7629_v50  ;;  %2303 = vst [vmem:[%s8801_s17 + $0x18] sm:$0xff] (!%p6148_p5), %v7629_v50 }
 0x146 PF: > { %v6802_v51 = vld [vmem:[%s8797_s8 + $0x4] ss:$8 sps:$4 sm:$0xff]   ;;  %v6806_v53 = vld [vmem:[%s8797_s8] ss:$8 sps:$4 sm:$0xff]   ;;  %v6808_v55 = vld [vmem:[%s8797_s8 + $0x14] ss:$8 sps:$4 sm:$0xff]  }
 0x147   : > { %v6804_v52 = vld [vmem:[%s8797_s8 + $0x704] ss:$8 sps:$4 sm:$0xff]   ;;  %5268 = vmatprep.subr.bf16.mxu1 %v6802_v51  ;;  %v6807_v54 = vld [vmem:[%s8797_s8 + $0x700] ss:$8 sps:$4 sm:$0xff]   ;;  %v6810_v56 = vld [vmem:[%s8797_s8 + $0x714] ss:$8 sps:$4 sm:$0xff]  }
 0x148   : > { %5569 = vmatprep.subr.bf16.mxu0 %v6804_v52  ;;  %5269 = vmatpush1.bf16.msra.mxu1 %v6806_v53  ;;  %v6812_v57 = vld [vmem:[%s8797_s8 + $0x10] ss:$8 sps:$4 sm:$0xff]   ;;  %v6814_v59 = vld [vmem:[%s8797_s8 + $0x24] ss:$8 sps:$4 sm:$0xff]   ;;  %v6818_v61 = vld [vmem:[%s8797_s8 + $0x20] ss:$8 sps:$4 sm:$0xff]  }
 0x149   : > { %5570 = vmatpush1.bf16.msra.mxu0 %v6807_v54  ;;  %5270 = vmatprep.subr.bf16.mxu1 %v6808_v55  ;;  %v6813_v58 = vld [vmem:[%s8797_s8 + $0x710] ss:$8 sps:$4 sm:$0xff]   ;;  %v6816_v60 = vld [vmem:[%s8797_s8 + $0x724] ss:$8 sps:$4 sm:$0xff]   ;;  %v6819_v62 = vld [vmem:[%s8797_s8 + $0x720] ss:$8 sps:$4 sm:$0xff]  }
 0x14a   : > { %5571 = vmatprep.subr.bf16.mxu0 %v6810_v56  ;;  %v6820_v63 = vld [vmem:[%s8797_s8 + $0x34] ss:$8 sps:$4 sm:$0xff]   ;;  %v6824_v1 = vld [vmem:[%s8797_s8 + $0x30] ss:$8 sps:$4 sm:$0xff]   ;;  %v6826_v3 = vld [vmem:[%s8797_s8 + $0x44] ss:$8 sps:$4 sm:$0xff]  }
 0x14b   : > { %v6822_v0 = vld [vmem:[%s8797_s8 + $0x734] ss:$8 sps:$4 sm:$0xff]   ;;  %v6825_v2 = vld [vmem:[%s8797_s8 + $0x730] ss:$8 sps:$4 sm:$0xff]   ;;  %v6828_v4 = vld [vmem:[%s8797_s8 + $0x744] ss:$8 sps:$4 sm:$0xff]  }
 0x14c   : > { %5271 = vmatpush1.bf16.msra.mxu1 %v6812_v57  ;;  %v6830_v5 = vld [vmem:[%s8797_s8 + $0x40] ss:$8 sps:$4 sm:$0xff]   ;;  %v6832_v7 = vld [vmem:[%s8797_s8 + $0x54] ss:$8 sps:$4 sm:$0xff]   ;;  %v6836_v9 = vld [vmem:[%s8797_s8 + $0x50] ss:$8 sps:$4 sm:$0xff]  }
 0x14d   : > { %5572 = vmatpush1.bf16.msra.mxu0 %v6813_v58  ;;  %5272 = vmatprep.subr.bf16.mxu1 %v6814_v59  ;;  %v6831_v6 = vld [vmem:[%s8797_s8 + $0x740] ss:$8 sps:$4 sm:$0xff]   ;;  %v6834_v8 = vld [vmem:[%s8797_s8 + $0x754] ss:$8 sps:$4 sm:$0xff]   ;;  %v6837_v10 = vld [vmem:[%s8797_s8 + $0x750] ss:$8 sps:$4 sm:$0xff]  }
 0x14e   : > { %5573 = vmatprep.subr.bf16.mxu0 %v6816_v60  ;;  %v6838_v11 = vld [vmem:[%s8797_s8 + $0x64] ss:$8 sps:$4 sm:$0xff]   ;;  %v6842_v13 = vld [vmem:[%s8797_s8 + $0x60] ss:$8 sps:$4 sm:$0xff]   ;;  %v6844_v15 = vld [vmem:[%s8797_s8 + $0x74] ss:$8 sps:$4 sm:$0xff]  }
 0x14f   : > { %v6840_v12 = vld [vmem:[%s8797_s8 + $0x764] ss:$8 sps:$4 sm:$0xff]   ;;  %v6843_v14 = vld [vmem:[%s8797_s8 + $0x760] ss:$8 sps:$4 sm:$0xff]   ;;  %v6846_v16 = vld [vmem:[%s8797_s8 + $0x774] ss:$8 sps:$4 sm:$0xff]  }
 0x150   : > { %5273 = vmatpush1.bf16.msra.mxu1 %v6818_v61  ;;  %v6848_v17 = vld [vmem:[%s8797_s8 + $0x70] ss:$8 sps:$4 sm:$0xff]   ;;  %v6850_v19 = vld [vmem:[%s8797_s8 + $0x84] ss:$8 sps:$4 sm:$0xff]   ;;  %v6854_v21 = vld [vmem:[%s8797_s8 + $0x80] ss:$8 sps:$4 sm:$0xff]  }
 0x151   : > { %5574 = vmatpush1.bf16.msra.mxu0 %v6819_v62  ;;  %5274 = vmatprep.subr.bf16.mxu1 %v6820_v63  ;;  %v6849_v18 = vld [vmem:[%s8797_s8 + $0x770] ss:$8 sps:$4 sm:$0xff]   ;;  %v6852_v20 = vld [vmem:[%s8797_s8 + $0x784] ss:$8 sps:$4 sm:$0xff]   ;;  %v6855_v22 = vld [vmem:[%s8797_s8 + $0x780] ss:$8 sps:$4 sm:$0xff]  }
 0x152   : > { %5575 = vmatprep.subr.bf16.mxu0 %v6822_v0  ;;  %v6856_v23 = vld [vmem:[%s8797_s8 + $0x94] ss:$8 sps:$4 sm:$0xff]   ;;  %v6860_v25 = vld [vmem:[%s8797_s8 + $0x90] ss:$8 sps:$4 sm:$0xff]   ;;  %v6862_v27 = vld [vmem:[%s8797_s8 + $0xa4] ss:$8 sps:$4 sm:$0xff]  }
 0x153   : > { %v6858_v24 = vld [vmem:[%s8797_s8 + $0x794] ss:$8 sps:$4 sm:$0xff]   ;;  %v6861_v26 = vld [vmem:[%s8797_s8 + $0x790] ss:$8 sps:$4 sm:$0xff]   ;;  %v6864_v28 = vld [vmem:[%s8797_s8 + $0x7a4] ss:$8 sps:$4 sm:$0xff]  }
 0x154   : > { %5275 = vmatpush1.bf16.msra.mxu1 %v6824_v1  ;;  %v6866_v29 = vld [vmem:[%s8797_s8 + $0xa0] ss:$8 sps:$4 sm:$0xff]   ;;  %v6868_v31 = vld [vmem:[%s8797_s8 + $0xb4] ss:$8 sps:$4 sm:$0xff]   ;;  %v6872_v33 = vld [vmem:[%s8797_s8 + $0xb0] ss:$8 sps:$4 sm:$0xff]  }
 0x155   : > { %5576 = vmatpush1.bf16.msra.mxu0 %v6825_v2  ;;  %5276 = vmatprep.subr.bf16.mxu1 %v6826_v3  ;;  %v6867_v30 = vld [vmem:[%s8797_s8 + $0x7a0] ss:$8 sps:$4 sm:$0xff]   ;;  %v6870_v32 = vld [vmem:[%s8797_s8 + $0x7b4] ss:$8 sps:$4 sm:$0xff]   ;;  %v6873_v34 = vld [vmem:[%s8797_s8 + $0x7b0] ss:$8 sps:$4 sm:$0xff]  }
 0x156   : > { %5577 = vmatprep.subr.bf16.mxu0 %v6828_v4  ;;  %v6900_v35 = vld [vmem:[%s8795_s6 + $0x4] ss:$116 sps:$4 sm:$0xff]   ;;  %v6874_v36 = vld [vmem:[%s8797_s8 + $0xc4] ss:$8 sps:$4 sm:$0xff]   ;;  %p6642_p6 = scmp.ne.s32.totalorder %s7611_s21, 2 }
 0x157   : > { %v6876_v37 = vld [vmem:[%s8797_s8 + $0x7c4] ss:$8 sps:$4 sm:$0xff]   ;;  %5300 = vmatprep.mubr.bf16.mxu1 %v6900_v35  ;;  %v6878_v39 = vld [vmem:[%s8797_s8 + $0xc0] ss:$8 sps:$4 sm:$0xff]   ;;  %v6880_v41 = vld [vmem:[%s8797_s8 + $0xd4] ss:$8 sps:$4 sm:$0xff]  }
 0x158   : > { %5277 = vmatpush1.bf16.msra.mxu1 %v6830_v5  ;;  %v6906_v38 = vld [vmem:[%s8795_s6 + $0x3c] ss:$116 sps:$4 sm:$0xff]   ;;  %v6884_v43 = vld [vmem:[%s8797_s8 + $0xd0] ss:$8 sps:$4 sm:$0xff]  }
 0x159   : > { %5578 = vmatpush1.bf16.msra.mxu0 %v6831_v6  ;;  %5278 = vmatprep.subr.bf16.mxu1 %v6832_v7  ;;  %v6879_v40 = vld [vmem:[%s8797_s8 + $0x7c0] ss:$8 sps:$4 sm:$0xff]   ;;  %v6882_v42 = vld [vmem:[%s8797_s8 + $0x7d4] ss:$8 sps:$4 sm:$0xff]   ;;  %v6885_v44 = vld [vmem:[%s8797_s8 + $0x7d0] ss:$8 sps:$4 sm:$0xff]  }
 0x15a   : > { %5579 = vmatprep.subr.bf16.mxu0 %v6834_v8  ;;  %5601 = vmatprep.mubr.bf16.mxu0 %v6906_v38  ;;  %v6886_v45 = vld [vmem:[%s8797_s8 + $0xe4] ss:$8 sps:$4 sm:$0xff]   ;;  %v6890_v47 = vld [vmem:[%s8797_s8 + $0xe0] ss:$8 sps:$4 sm:$0xff]   ;;  %v6892_v49 = vld [vmem:[%s8797_s8 + $0xf4] ss:$8 sps:$4 sm:$0xff]  }
 0x15b   : > { %v6888_v46 = vld [vmem:[%s8797_s8 + $0x7e4] ss:$8 sps:$4 sm:$0xff]   ;;  %v6891_v48 = vld [vmem:[%s8797_s8 + $0x7e0] ss:$8 sps:$4 sm:$0xff]   ;;  %v6894_v50 = vld [vmem:[%s8797_s8 + $0x7f4] ss:$8 sps:$4 sm:$0xff]  }
 0x15c   : > { %5279 = vmatpush1.bf16.msra.mxu1 %v6836_v9  ;;  %v6896_v51 = vld [vmem:[%s8797_s8 + $0xf0] ss:$8 sps:$4 sm:$0xff]   ;;  %v6903_v53 = vld [vmem:[%s8797_s8 + $0x104] ss:$8 sps:$4 sm:$0xff]   ;;  %v6901_v56 = vld [vmem:[%s8797_s8 + $0x100] ss:$8 sps:$4 sm:$0xff]  }
 0x15d   : > { %5580 = vmatpush1.bf16.msra.mxu0 %v6837_v10  ;;  %5280 = vmatprep.subr.bf16.mxu1 %v6838_v11  ;;  %v6897_v52 = vld [vmem:[%s8797_s8 + $0x7f0] ss:$8 sps:$4 sm:$0xff]   ;;  %v6909_v54 = vld [vmem:[%s8797_s8 + $0x804] ss:$8 sps:$4 sm:$0xff]   ;;  %v6907_v58 = vld [vmem:[%s8797_s8 + $0x800] ss:$8 sps:$4 sm:$0xff]  }
 0x15e   : > { %5581 = vmatprep.subr.bf16.mxu0 %v6840_v12  ;;  %v6898_v55 = vld [vmem:[%s8795_s6] ss:$116 sps:$4 sm:$0xff]   ;;  %v6904_v57 = vld [vmem:[%s8795_s6 + $0x38] ss:$116 sps:$4 sm:$0xff]  }
 0x15f   : > { %v6912_v59 = vld [vmem:[%s8797_s8 + $0x114] ss:$8 sps:$4 sm:$0xff]   ;;  %v6910_v61 = vld [vmem:[%s8797_s8 + $0x110] ss:$8 sps:$4 sm:$0xff]   ;;  %v6918_v63 = vld [vmem:[%s8797_s8 + $0x124] ss:$8 sps:$4 sm:$0xff]  }
 0x160   : > { %5281 = vmatpush1.bf16.msra.mxu1 %v6842_v13  ;;  %v6915_v60 = vld [vmem:[%s8797_s8 + $0x814] ss:$8 sps:$4 sm:$0xff]   ;;  %v6913_v62 = vld [vmem:[%s8797_s8 + $0x810] ss:$8 sps:$4 sm:$0xff]   ;;  %v6921_v0 = vld [vmem:[%s8797_s8 + $0x824] ss:$8 sps:$4 sm:$0xff]  }
 0x161   : > { %5582 = vmatpush1.bf16.msra.mxu0 %v6843_v14  ;;  %5282 = vmatprep.subr.bf16.mxu1 %v6844_v15  ;;  %v6916_v1 = vld [vmem:[%s8797_s8 + $0x120] ss:$8 sps:$4 sm:$0xff]   ;;  %v6924_v3 = vld [vmem:[%s8797_s8 + $0x134] ss:$8 sps:$4 sm:$0xff]   ;;  %v6922_v5 = vld [vmem:[%s8797_s8 + $0x130] ss:$8 sps:$4 sm:$0xff]  }
 0x162   : > { %5583 = vmatprep.subr.bf16.mxu0 %v6846_v16  ;;  %v6919_v2 = vld [vmem:[%s8797_s8 + $0x820] ss:$8 sps:$4 sm:$0xff]   ;;  %v6927_v4 = vld [vmem:[%s8797_s8 + $0x834] ss:$8 sps:$4 sm:$0xff]   ;;  %v6925_v6 = vld [vmem:[%s8797_s8 + $0x830] ss:$8 sps:$4 sm:$0xff]  }
 0x163   : > { %v6930_v7 = vld [vmem:[%s8797_s8 + $0x144] ss:$8 sps:$4 sm:$0xff]   ;;  %v6928_v9 = vld [vmem:[%s8797_s8 + $0x140] ss:$8 sps:$4 sm:$0xff]   ;;  %v6936_v11 = vld [vmem:[%s8797_s8 + $0x154] ss:$8 sps:$4 sm:$0xff]  }
 0x164   : > { %5283 = vmatpush1.bf16.msra.mxu1 %v6848_v17  ;;  %v6933_v8 = vld [vmem:[%s8797_s8 + $0x844] ss:$8 sps:$4 sm:$0xff]   ;;  %v6931_v10 = vld [vmem:[%s8797_s8 + $0x840] ss:$8 sps:$4 sm:$0xff]   ;;  %v6939_v12 = vld [vmem:[%s8797_s8 + $0x854] ss:$8 sps:$4 sm:$0xff]  }
 0x165   : > { %5584 = vmatpush1.bf16.msra.mxu0 %v6849_v18  ;;  %5284 = vmatprep.subr.bf16.mxu1 %v6850_v19  ;;  %v6934_v13 = vld [vmem:[%s8797_s8 + $0x150] ss:$8 sps:$4 sm:$0xff]   ;;  %v6942_v15 = vld [vmem:[%s8797_s8 + $0x164] ss:$8 sps:$4 sm:$0xff]   ;;  %v6940_v17 = vld [vmem:[%s8797_s8 + $0x160] ss:$8 sps:$4 sm:$0xff]  }
 0x166   : > { %5585 = vmatprep.subr.bf16.mxu0 %v6852_v20  ;;  %v6937_v14 = vld [vmem:[%s8797_s8 + $0x850] ss:$8 sps:$4 sm:$0xff]   ;;  %v6945_v16 = vld [vmem:[%s8797_s8 + $0x864] ss:$8 sps:$4 sm:$0xff]   ;;  %v6943_v18 = vld [vmem:[%s8797_s8 + $0x860] ss:$8 sps:$4 sm:$0xff]  }
 0x167   : > { %v6948_v19 = vld [vmem:[%s8797_s8 + $0x174] ss:$8 sps:$4 sm:$0xff]   ;;  %v6964_v35 = vld [vmem:[%s8797_s8 + $0x1a0] ss:$8 sps:$4 sm:$0xff]  }
 0x168   : > { %5285 = vmatpush1.bf16.msra.mxu1 %v6854_v21  ;;  %v6951_v20 = vld [vmem:[%s8797_s8 + $0x874] ss:$8 sps:$4 sm:$0xff]  }
 0x169   : > { %5586 = vmatpush1.bf16.msra.mxu0 %v6855_v22  ;;  %5286 = vmatprep.subr.bf16.mxu1 %v6856_v23  ;;  %v7002_v21 = vld [vmem:[%s8795_s6 + $0xc] ss:$116 sps:$4 sm:$0xff]  }
 0x16a   : > { %5587 = vmatprep.subr.bf16.mxu0 %v6858_v24  ;;  %v6946_v22 = vld [vmem:[%s8797_s8 + $0x170] ss:$8 sps:$4 sm:$0xff]   ;;  %v6975_v38 = vld [vmem:[%s8797_s8 + $0x8b4] ss:$8 sps:$4 sm:$0xff]  }
 0x16b   : > { %v6949_v23 = vld [vmem:[%s8797_s8 + $0x870] ss:$8 sps:$4 sm:$0xff]  }
 0x16c   : > { %5287 = vmatpush1.bf16.msra.mxu1 %v6860_v25  ;;  %v7008_v24 = vld [vmem:[%s8795_s6 + $0x44] ss:$116 sps:$4 sm:$0xff]   ;;  %v6954_v25 = vld [vmem:[%s8797_s8 + $0x184] ss:$8 sps:$4 sm:$0xff]  }
 0x16d   : > { %5588 = vmatpush1.bf16.msra.mxu0 %v6861_v26  ;;  %5288 = vmatprep.subr.bf16.mxu1 %v6862_v27  ;;  %v6957_v26 = vld [vmem:[%s8797_s8 + $0x884] ss:$8 sps:$4 sm:$0xff]   ;;  %v6952_v27 = vld [vmem:[%s8797_s8 + $0x180] ss:$8 sps:$4 sm:$0xff]  }
 0x16e   : > { %5589 = vmatprep.subr.bf16.mxu0 %v6864_v28  ;;  %v6955_v28 = vld [vmem:[%s8797_s8 + $0x880] ss:$8 sps:$4 sm:$0xff]  }
 0x170   : > { %5289 = vmatpush1.bf16.msra.mxu1 %v6866_v29  ;;  %v6960_v29 = vld [vmem:[%s8797_s8 + $0x194] ss:$8 sps:$4 sm:$0xff]  }
 0x171   : > { %5590 = vmatpush1.bf16.msra.mxu0 %v6867_v30  ;;  %5290 = vmatprep.subr.bf16.mxu1 %v6868_v31  ;;  %v6963_v30 = vld [vmem:[%s8797_s8 + $0x894] ss:$8 sps:$4 sm:$0xff]   ;;  %v6958_v31 = vld [vmem:[%s8797_s8 + $0x190] ss:$8 sps:$4 sm:$0xff]  }
 0x172   : > { %5591 = vmatprep.subr.bf16.mxu0 %v6870_v32  ;;  %v6961_v32 = vld [vmem:[%s8797_s8 + $0x890] ss:$8 sps:$4 sm:$0xff]  }
 0x174   : > { %5291 = vmatpush1.bf16.msra.mxu1 %v6872_v33  ;;  %v6966_v33 = vld [vmem:[%s8797_s8 + $0x1a4] ss:$8 sps:$4 sm:$0xff]  }
 0x175   : > { %5592 = vmatpush1.bf16.msra.mxu0 %v6873_v34  ;;  %5292 = vmatprep.subr.bf16.mxu1 %v6874_v36  ;;  %v6969_v34 = vld [vmem:[%s8797_s8 + $0x8a4] ss:$8 sps:$4 sm:$0xff]   ;;  %v6967_v36 = vld [vmem:[%s8797_s8 + $0x8a0] ss:$8 sps:$4 sm:$0xff]  }
 0x176   : > { %5593 = vmatprep.subr.bf16.mxu0 %v6876_v37  ;;  %v6972_v37 = vld [vmem:[%s8797_s8 + $0x1b4] ss:$8 sps:$4 sm:$0xff]  }
 0x178   : > { %5293 = vmatpush1.bf16.msra.mxu1 %v6878_v39  ;;  %v6970_v39 = vld [vmem:[%s8797_s8 + $0x1b0] ss:$8 sps:$4 sm:$0xff]  }
 0x179   : > { %5594 = vmatpush1.bf16.msra.mxu0 %v6879_v40  ;;  %5294 = vmatprep.subr.bf16.mxu1 %v6880_v41  ;;  %v6973_v40 = vld [vmem:[%s8797_s8 + $0x8b0] ss:$8 sps:$4 sm:$0xff]   ;;  %v6978_v41 = vld [vmem:[%s8797_s8 + $0x1c4] ss:$8 sps:$4 sm:$0xff]  }
 0x17a   : > { %5595 = vmatprep.subr.bf16.mxu0 %v6882_v42  ;;  %v6981_v42 = vld [vmem:[%s8797_s8 + $0x8c4] ss:$8 sps:$4 sm:$0xff]  }
 0x17c   : > { %5295 = vmatpush1.bf16.msra.mxu1 %v6884_v43  ;;  %v6976_v43 = vld [vmem:[%s8797_s8 + $0x1c0] ss:$8 sps:$4 sm:$0xff]  }
 0x17d   : > { %5596 = vmatpush1.bf16.msra.mxu0 %v6885_v44  ;;  %5296 = vmatprep.subr.bf16.mxu1 %v6886_v45  ;;  %v6979_v44 = vld [vmem:[%s8797_s8 + $0x8c0] ss:$8 sps:$4 sm:$0xff]   ;;  %v6984_v45 = vld [vmem:[%s8797_s8 + $0x1d4] ss:$8 sps:$4 sm:$0xff]  }
 0x17e   : > { %5597 = vmatprep.subr.bf16.mxu0 %v6888_v46  ;;  %v6987_v46 = vld [vmem:[%s8797_s8 + $0x8d4] ss:$8 sps:$4 sm:$0xff]  }
 0x180   : > { %5297 = vmatpush1.bf16.msra.mxu1 %v6890_v47  ;;  %v6982_v47 = vld [vmem:[%s8797_s8 + $0x1d0] ss:$8 sps:$4 sm:$0xff]  }
 0x181   : > { %5598 = vmatpush1.bf16.msra.mxu0 %v6891_v48  ;;  %5298 = vmatprep.subr.bf16.mxu1 %v6892_v49  ;;  %v6985_v48 = vld [vmem:[%s8797_s8 + $0x8d0] ss:$8 sps:$4 sm:$0xff]   ;;  %v6990_v49 = vld [vmem:[%s8797_s8 + $0x1e4] ss:$8 sps:$4 sm:$0xff]  }
 0x182   : > { %5599 = vmatprep.subr.bf16.mxu0 %v6894_v50  ;;  %v6993_v50 = vld [vmem:[%s8797_s8 + $0x8e4] ss:$8 sps:$4 sm:$0xff]  }
 0x184   : > { %5299 = vmatpush1.bf16.msra.mxu1 %v6896_v51  ;;  %v6988_v51 = vld [vmem:[%s8797_s8 + $0x1e0] ss:$8 sps:$4 sm:$0xff]  }
 0x185   : > { %5600 = vmatpush1.bf16.msra.mxu0 %v6897_v52  ;;  %5311 = vmatprep.subr.bf16.mxu1 %v6903_v53  ;;  %v6991_v52 = vld [vmem:[%s8797_s8 + $0x8e0] ss:$8 sps:$4 sm:$0xff]   ;;  %v6996_v53 = vld [vmem:[%s8797_s8 + $0x1f4] ss:$8 sps:$4 sm:$0xff]  }
 0x186   : > { %5612 = vmatprep.subr.bf16.mxu0 %v6909_v54  ;;  %v6999_v54 = vld [vmem:[%s8797_s8 + $0x8f4] ss:$8 sps:$4 sm:$0xff]  }
 0x187   : > { %5301 = vmatmul.mubr.bf16.vlgmr.msra.gmra.mrb[0].mxu1 %v6898_v55  ;;  %v6994_v55 = vld [vmem:[%s8797_s8 + $0x1f0] ss:$8 sps:$4 sm:$0xff]  }
 0x188   : > { %5602 = vmatmul.mubr.bf16.vlgmr.msra.gmra.mrb[0].mxu0 %v6904_v57  ;;  %5312 = vmatpush1.bf16.msra.mxu1 %v6901_v56  ;;  %v6997_v56 = vld [vmem:[%s8797_s8 + $0x8f0] ss:$8 sps:$4 sm:$0xff]   ;;  %v7005_v57 = vld [vmem:[%s8797_s8 + $0x204] ss:$8 sps:$4 sm:$0xff]  }
 0x189   : > { %5613 = vmatpush1.bf16.msra.mxu0 %v6907_v58  ;;  %5313 = vmatprep.subr.bf16.mxu1 %v6912_v59  ;;  %v7011_v58 = vld [vmem:[%s8797_s8 + $0x904] ss:$8 sps:$4 sm:$0xff]  }
 0x18a   : > { %5614 = vmatprep.subr.bf16.mxu0 %v6915_v60  ;;  %5343 = vmatprep.mubr.bf16.mxu1 %v7002_v21  ;;  %v7000_v59 = vld [vmem:[%s8795_s6 + $0x8] ss:$116 sps:$4 sm:$0xff]  }
 0x18b   : > { %5644 = vmatprep.mubr.bf16.mxu0 %v7008_v24  ;;  %v7003_v60 = vld [vmem:[%s8797_s8 + $0x200] ss:$8 sps:$4 sm:$0xff]   ;;  %v7044_v21 = vld [vmem:[%s8797_s8 + $0x264] ss:$8 sps:$4 sm:$0xff]  }
 0x18c   : > { %5314 = vmatpush1.bf16.msra.mxu1 %v6910_v61  ;;  %v7006_v61 = vld [vmem:[%s8795_s6 + $0x40] ss:$116 sps:$4 sm:$0xff]   ;;  %v7045_v24 = vld [vmem:[%s8797_s8 + $0x960] ss:$8 sps:$4 sm:$0xff]  }
 0x18d   : > { %5615 = vmatpush1.bf16.msra.mxu0 %v6913_v62  ;;  %5315 = vmatprep.subr.bf16.mxu1 %v6918_v63  ;;  %v7009_v62 = vld [vmem:[%s8797_s8 + $0x900] ss:$8 sps:$4 sm:$0xff]   ;;  %v7014_v63 = vld [vmem:[%s8797_s8 + $0x214] ss:$8 sps:$4 sm:$0xff]  }
 0x18e   : > { %5616 = vmatprep.subr.bf16.mxu0 %v6921_v0  ;;  %v7017_v0 = vld [vmem:[%s8797_s8 + $0x914] ss:$8 sps:$4 sm:$0xff]  }
 0x190   : > { %5316 = vmatpush1.bf16.msra.mxu1 %v6916_v1  ;;  %v7012_v1 = vld [vmem:[%s8797_s8 + $0x210] ss:$8 sps:$4 sm:$0xff]  }
 0x191   : > { %5617 = vmatpush1.bf16.msra.mxu0 %v6919_v2  ;;  %5317 = vmatprep.subr.bf16.mxu1 %v6924_v3  ;;  %v7015_v2 = vld [vmem:[%s8797_s8 + $0x910] ss:$8 sps:$4 sm:$0xff]   ;;  %v7020_v3 = vld [vmem:[%s8797_s8 + $0x224] ss:$8 sps:$4 sm:$0xff]  }
 0x192   : > { %5618 = vmatprep.subr.bf16.mxu0 %v6927_v4  ;;  %v7023_v4 = vld [vmem:[%s8797_s8 + $0x924] ss:$8 sps:$4 sm:$0xff]  }
 0x194   : > { %5318 = vmatpush1.bf16.msra.mxu1 %v6922_v5  ;;  %v7018_v5 = vld [vmem:[%s8797_s8 + $0x220] ss:$8 sps:$4 sm:$0xff]  }
 0x195   : > { %5619 = vmatpush1.bf16.msra.mxu0 %v6925_v6  ;;  %5319 = vmatprep.subr.bf16.mxu1 %v6930_v7  ;;  %v7104_v6 = vld [vmem:[%s8795_s6 + $0x14] ss:$116 sps:$4 sm:$0xff]  }
 0x196   : > { %5620 = vmatprep.subr.bf16.mxu0 %v6933_v8  ;;  %v7021_v7 = vld [vmem:[%s8797_s8 + $0x920] ss:$8 sps:$4 sm:$0xff]   ;;  %v7026_v8 = vld [vmem:[%s8797_s8 + $0x234] ss:$8 sps:$4 sm:$0xff]  }
 0x198   : > { %5320 = vmatpush1.bf16.msra.mxu1 %v6928_v9  ;;  %v7029_v9 = vld [vmem:[%s8797_s8 + $0x934] ss:$8 sps:$4 sm:$0xff]  }
 0x199   : > { %5621 = vmatpush1.bf16.msra.mxu0 %v6931_v10  ;;  %5321 = vmatprep.subr.bf16.mxu1 %v6936_v11  ;;  %v7110_v10 = vld [vmem:[%s8795_s6 + $0x4c] ss:$116 sps:$4 sm:$0xff]  }
 0x19a   : > { %5622 = vmatprep.subr.bf16.mxu0 %v6939_v12  ;;  %v7024_v11 = vld [vmem:[%s8797_s8 + $0x230] ss:$8 sps:$4 sm:$0xff]  }
 0x19b   : > { %v7027_v12 = vld [vmem:[%s8797_s8 + $0x930] ss:$8 sps:$4 sm:$0xff]  }
 0x19c   : > { %5322 = vmatpush1.bf16.msra.mxu1 %v6934_v13  ;;  %v7032_v13 = vld [vmem:[%s8797_s8 + $0x244] ss:$8 sps:$4 sm:$0xff]  }
 0x19d   : > { %5623 = vmatpush1.bf16.msra.mxu0 %v6937_v14  ;;  %5323 = vmatprep.subr.bf16.mxu1 %v6942_v15  ;;  %v7035_v14 = vld [vmem:[%s8797_s8 + $0x944] ss:$8 sps:$4 sm:$0xff]   ;;  %v7030_v15 = vld [vmem:[%s8797_s8 + $0x240] ss:$8 sps:$4 sm:$0xff]  }
 0x19e   : > { %5624 = vmatprep.subr.bf16.mxu0 %v6945_v16  ;;  %v7033_v16 = vld [vmem:[%s8797_s8 + $0x940] ss:$8 sps:$4 sm:$0xff]  }
 0x1a0   : > { %5324 = vmatpush1.bf16.msra.mxu1 %v6940_v17  ;;  %v7038_v17 = vld [vmem:[%s8797_s8 + $0x254] ss:$8 sps:$4 sm:$0xff]  }
 0x1a1   : > { %5625 = vmatpush1.bf16.msra.mxu0 %v6943_v18  ;;  %5325 = vmatprep.subr.bf16.mxu1 %v6948_v19  ;;  %v7041_v18 = vld [vmem:[%s8797_s8 + $0x954] ss:$8 sps:$4 sm:$0xff]   ;;  %v7036_v19 = vld [vmem:[%s8797_s8 + $0x250] ss:$8 sps:$4 sm:$0xff]  }
 0x1a2   : > { %5626 = vmatprep.subr.bf16.mxu0 %v6951_v20  ;;  %v7039_v20 = vld [vmem:[%s8797_s8 + $0x950] ss:$8 sps:$4 sm:$0xff]  }
 0x1a4   : > { %5326 = vmatpush1.bf16.msra.mxu1 %v6946_v22  ;;  %v7047_v22 = vld [vmem:[%s8797_s8 + $0x964] ss:$8 sps:$4 sm:$0xff]  }
 0x1a5   : > { %5627 = vmatpush1.bf16.msra.mxu0 %v6949_v23  ;;  %5327 = vmatprep.subr.bf16.mxu1 %v6954_v25  ;;  %v7042_v23 = vld [vmem:[%s8797_s8 + $0x260] ss:$8 sps:$4 sm:$0xff]   ;;  %v7050_v25 = vld [vmem:[%s8797_s8 + $0x274] ss:$8 sps:$4 sm:$0xff]  }
 0x1a6   : > { %5628 = vmatprep.subr.bf16.mxu0 %v6957_v26  ;;  %v7053_v26 = vld [vmem:[%s8797_s8 + $0x974] ss:$8 sps:$4 sm:$0xff]  }
 0x1a8   : > { %5328 = vmatpush1.bf16.msra.mxu1 %v6952_v27  ;;  %v7048_v27 = vld [vmem:[%s8797_s8 + $0x270] ss:$8 sps:$4 sm:$0xff]  }
 0x1a9   : > { %5629 = vmatpush1.bf16.msra.mxu0 %v6955_v28  ;;  %5329 = vmatprep.subr.bf16.mxu1 %v6960_v29  ;;  %v7051_v28 = vld [vmem:[%s8797_s8 + $0x970] ss:$8 sps:$4 sm:$0xff]   ;;  %v7056_v29 = vld [vmem:[%s8797_s8 + $0x284] ss:$8 sps:$4 sm:$0xff]  }
 0x1aa   : > { %5630 = vmatprep.subr.bf16.mxu0 %v6963_v30  ;;  %v7059_v30 = vld [vmem:[%s8797_s8 + $0x984] ss:$8 sps:$4 sm:$0xff]  }
 0x1ac   : > { %5330 = vmatpush1.bf16.msra.mxu1 %v6958_v31  ;;  %v7054_v31 = vld [vmem:[%s8797_s8 + $0x280] ss:$8 sps:$4 sm:$0xff]  }
 0x1ad   : > { %5631 = vmatpush1.bf16.msra.mxu0 %v6961_v32  ;;  %5331 = vmatprep.subr.bf16.mxu1 %v6966_v33  ;;  %v7057_v32 = vld [vmem:[%s8797_s8 + $0x980] ss:$8 sps:$4 sm:$0xff]   ;;  %v7062_v33 = vld [vmem:[%s8797_s8 + $0x294] ss:$8 sps:$4 sm:$0xff]  }
 0x1ae   : > { %5632 = vmatprep.subr.bf16.mxu0 %v6969_v34  ;;  %v7065_v34 = vld [vmem:[%s8797_s8 + $0x994] ss:$8 sps:$4 sm:$0xff]  }
 0x1b0   : > { %5332 = vmatpush1.bf16.msra.mxu1 %v6964_v35  ;;  %v7060_v35 = vld [vmem:[%s8797_s8 + $0x290] ss:$8 sps:$4 sm:$0xff]  }
 0x1b1   : > { %5633 = vmatpush1.bf16.msra.mxu0 %v6967_v36  ;;  %5333 = vmatprep.subr.bf16.mxu1 %v6972_v37  ;;  %v7063_v36 = vld [vmem:[%s8797_s8 + $0x990] ss:$8 sps:$4 sm:$0xff]   ;;  %v7068_v37 = vld [vmem:[%s8797_s8 + $0x2a4] ss:$8 sps:$4 sm:$0xff]  }
 0x1b2   : > { %5634 = vmatprep.subr.bf16.mxu0 %v6975_v38  ;;  %v7071_v38 = vld [vmem:[%s8797_s8 + $0x9a4] ss:$8 sps:$4 sm:$0xff]  }
 0x1b4   : > { %5334 = vmatpush1.bf16.msra.mxu1 %v6970_v39  ;;  %v7066_v39 = vld [vmem:[%s8797_s8 + $0x2a0] ss:$8 sps:$4 sm:$0xff]  }
 0x1b5   : > { %5635 = vmatpush1.bf16.msra.mxu0 %v6973_v40  ;;  %5335 = vmatprep.subr.bf16.mxu1 %v6978_v41  ;;  %v7069_v40 = vld [vmem:[%s8797_s8 + $0x9a0] ss:$8 sps:$4 sm:$0xff]   ;;  %v7074_v41 = vld [vmem:[%s8797_s8 + $0x2b4] ss:$8 sps:$4 sm:$0xff]  }
 0x1b6   : > { %5636 = vmatprep.subr.bf16.mxu0 %v6981_v42  ;;  %v7077_v42 = vld [vmem:[%s8797_s8 + $0x9b4] ss:$8 sps:$4 sm:$0xff]  }
 0x1b8   : > { %5336 = vmatpush1.bf16.msra.mxu1 %v6976_v43  ;;  %v7072_v43 = vld [vmem:[%s8797_s8 + $0x2b0] ss:$8 sps:$4 sm:$0xff]  }
 0x1b9   : > { %5637 = vmatpush1.bf16.msra.mxu0 %v6979_v44  ;;  %5337 = vmatprep.subr.bf16.mxu1 %v6984_v45  ;;  %v7075_v44 = vld [vmem:[%s8797_s8 + $0x9b0] ss:$8 sps:$4 sm:$0xff]   ;;  %v7080_v45 = vld [vmem:[%s8797_s8 + $0x2c4] ss:$8 sps:$4 sm:$0xff]  }
 0x1ba   : > { %5638 = vmatprep.subr.bf16.mxu0 %v6987_v46  ;;  %v7083_v46 = vld [vmem:[%s8797_s8 + $0x9c4] ss:$8 sps:$4 sm:$0xff]  }
 0x1bc   : > { %5338 = vmatpush1.bf16.msra.mxu1 %v6982_v47  ;;  %v7078_v47 = vld [vmem:[%s8797_s8 + $0x2c0] ss:$8 sps:$4 sm:$0xff]  }
 0x1bd   : > { %5639 = vmatpush1.bf16.msra.mxu0 %v6985_v48  ;;  %5339 = vmatprep.subr.bf16.mxu1 %v6990_v49  ;;  %v7081_v48 = vld [vmem:[%s8797_s8 + $0x9c0] ss:$8 sps:$4 sm:$0xff]   ;;  %v7086_v49 = vld [vmem:[%s8797_s8 + $0x2d4] ss:$8 sps:$4 sm:$0xff]  }
 0x1be   : > { %5640 = vmatprep.subr.bf16.mxu0 %v6993_v50  ;;  %v7089_v50 = vld [vmem:[%s8797_s8 + $0x9d4] ss:$8 sps:$4 sm:$0xff]  }
 0x1c0   : > { %5340 = vmatpush1.bf16.msra.mxu1 %v6988_v51  ;;  %v7084_v51 = vld [vmem:[%s8797_s8 + $0x2d0] ss:$8 sps:$4 sm:$0xff]  }
 0x1c1   : > { %5641 = vmatpush1.bf16.msra.mxu0 %v6991_v52  ;;  %5341 = vmatprep.subr.bf16.mxu1 %v6996_v53  ;;  %v7087_v52 = vld [vmem:[%s8797_s8 + $0x9d0] ss:$8 sps:$4 sm:$0xff]   ;;  %v7092_v53 = vld [vmem:[%s8797_s8 + $0x2e4] ss:$8 sps:$4 sm:$0xff]  }
 0x1c2   : > { %5642 = vmatprep.subr.bf16.mxu0 %v6999_v54  ;;  %v7095_v54 = vld [vmem:[%s8797_s8 + $0x9e4] ss:$8 sps:$4 sm:$0xff]  }
 0x1c4   : > { %5342 = vmatpush1.bf16.msra.mxu1 %v6994_v55  ;;  %v7090_v55 = vld [vmem:[%s8797_s8 + $0x2e0] ss:$8 sps:$4 sm:$0xff]  }
 0x1c5   : > { %5643 = vmatpush1.bf16.msra.mxu0 %v6997_v56  ;;  %5354 = vmatprep.subr.bf16.mxu1 %v7005_v57  ;;  %v7093_v56 = vld [vmem:[%s8797_s8 + $0x9e0] ss:$8 sps:$4 sm:$0xff]   ;;  %v7098_v57 = vld [vmem:[%s8797_s8 + $0x2f4] ss:$8 sps:$4 sm:$0xff]  }
 0x1c6   : > { %5655 = vmatprep.subr.bf16.mxu0 %v7011_v58  ;;  %v7101_v58 = vld [vmem:[%s8797_s8 + $0x9f4] ss:$8 sps:$4 sm:$0xff]  }
 0x1c7   : > { %5344 = vmatmul.mubr.bf16.vlgmr.msra.gmra.mrb[0].mxu1 %v7000_v59  ;;  %v7096_v59 = vld [vmem:[%s8797_s8 + $0x2f0] ss:$8 sps:$4 sm:$0xff]  }
 0x1c8   : > { %5645 = vmatmul.mubr.bf16.vlgmr.msra.gmra.mrb[0].mxu0 %v7006_v61  ;;  %5355 = vmatpush1.bf16.msra.mxu1 %v7003_v60  ;;  %v7099_v60 = vld [vmem:[%s8797_s8 + $0x9f0] ss:$8 sps:$4 sm:$0xff]   ;;  %v7107_v61 = vld [vmem:[%s8797_s8 + $0x304] ss:$8 sps:$4 sm:$0xff]  }
 0x1c9   : > { %5656 = vmatpush1.bf16.msra.mxu0 %v7009_v62  ;;  %5356 = vmatprep.subr.bf16.mxu1 %v7014_v63  ;;  %v7113_v62 = vld [vmem:[%s8797_s8 + $0xa04] ss:$8 sps:$4 sm:$0xff]   ;;  %v7102_v63 = vld [vmem:[%s8795_s6 + $0x10] ss:$116 sps:$4 sm:$0xff]  }
 0x1ca   : > { %5657 = vmatprep.subr.bf16.mxu0 %v7017_v0  ;;  %5386 = vmatprep.mubr.bf16.mxu1 %v7104_v6  ;;  %v7105_v0 = vld [vmem:[%s8797_s8 + $0x300] ss:$8 sps:$4 sm:$0xff]  }
 0x1cb   : > { %5687 = vmatprep.mubr.bf16.mxu0 %v7110_v10  ;;  %v7212_v6 = vld [vmem:[%s8795_s6 + $0x54] ss:$116 sps:$4 sm:$0xff]  }
 0x1cc   : > { %5357 = vmatpush1.bf16.msra.mxu1 %v7012_v1  ;;  %v7108_v1 = vld [vmem:[%s8795_s6 + $0x48] ss:$116 sps:$4 sm:$0xff]  }
 0x1cd   : > { %5658 = vmatpush1.bf16.msra.mxu0 %v7015_v2  ;;  %5358 = vmatprep.subr.bf16.mxu1 %v7020_v3  ;;  %v7111_v2 = vld [vmem:[%s8797_s8 + $0xa00] ss:$8 sps:$4 sm:$0xff]   ;;  %v7116_v3 = vld [vmem:[%s8797_s8 + $0x314] ss:$8 sps:$4 sm:$0xff]   ;;  %v7125_v10 = vld [vmem:[%s8797_s8 + $0xa24] ss:$8 sps:$4 sm:$0xff]  }
 0x1ce   : > { %5659 = vmatprep.subr.bf16.mxu0 %v7023_v4  ;;  %v7119_v4 = vld [vmem:[%s8797_s8 + $0xa14] ss:$8 sps:$4 sm:$0xff]  }
 0x1d0   : > { %5359 = vmatpush1.bf16.msra.mxu1 %v7018_v5  ;;  %v7206_v5 = vld [vmem:[%s8795_s6 + $0x1c] ss:$116 sps:$4 sm:$0xff]  }
 0x1d1   : > { %5660 = vmatpush1.bf16.msra.mxu0 %v7021_v7  ;;  %5360 = vmatprep.subr.bf16.mxu1 %v7026_v8  ;;  %v7114_v7 = vld [vmem:[%s8797_s8 + $0x310] ss:$8 sps:$4 sm:$0xff]  }
 0x1d2   : > { %5661 = vmatprep.subr.bf16.mxu0 %v7029_v9  ;;  %v7117_v8 = vld [vmem:[%s8797_s8 + $0xa10] ss:$8 sps:$4 sm:$0xff]   ;;  %v7122_v9 = vld [vmem:[%s8797_s8 + $0x324] ss:$8 sps:$4 sm:$0xff]  }
 0x1d4   : > { %5361 = vmatpush1.bf16.msra.mxu1 %v7024_v11  ;;  %v7120_v11 = vld [vmem:[%s8797_s8 + $0x320] ss:$8 sps:$4 sm:$0xff]  }
 0x1d5   : > { %5662 = vmatpush1.bf16.msra.mxu0 %v7027_v12  ;;  %5362 = vmatprep.subr.bf16.mxu1 %v7032_v13  ;;  %v7123_v12 = vld [vmem:[%s8797_s8 + $0xa20] ss:$8 sps:$4 sm:$0xff]   ;;  %v7128_v13 = vld [vmem:[%s8797_s8 + $0x334] ss:$8 sps:$4 sm:$0xff]  }
 0x1d6   : > { %5663 = vmatprep.subr.bf16.mxu0 %v7035_v14  ;;  %v7131_v14 = vld [vmem:[%s8797_s8 + $0xa34] ss:$8 sps:$4 sm:$0xff]  }
 0x1d8   : > { %5363 = vmatpush1.bf16.msra.mxu1 %v7030_v15  ;;  %v7126_v15 = vld [vmem:[%s8797_s8 + $0x330] ss:$8 sps:$4 sm:$0xff]  }
 0x1d9   : > { %5664 = vmatpush1.bf16.msra.mxu0 %v7033_v16  ;;  %5364 = vmatprep.subr.bf16.mxu1 %v7038_v17  ;;  %v7129_v16 = vld [vmem:[%s8797_s8 + $0xa30] ss:$8 sps:$4 sm:$0xff]   ;;  %v7134_v17 = vld [vmem:[%s8797_s8 + $0x344] ss:$8 sps:$4 sm:$0xff]  }
 0x1da   : > { %5665 = vmatprep.subr.bf16.mxu0 %v7041_v18  ;;  %v7137_v18 = vld [vmem:[%s8797_s8 + $0xa44] ss:$8 sps:$4 sm:$0xff]  }
 0x1dc   : > { %5365 = vmatpush1.bf16.msra.mxu1 %v7036_v19  ;;  %v7132_v19 = vld [vmem:[%s8797_s8 + $0x340] ss:$8 sps:$4 sm:$0xff]  }
 0x1dd   : > { %5666 = vmatpush1.bf16.msra.mxu0 %v7039_v20  ;;  %5366 = vmatprep.subr.bf16.mxu1 %v7044_v21  ;;  %v7135_v20 = vld [vmem:[%s8797_s8 + $0xa40] ss:$8 sps:$4 sm:$0xff]   ;;  %v7140_v21 = vld [vmem:[%s8797_s8 + $0x354] ss:$8 sps:$4 sm:$0xff]  }
 0x1de   : > { %5667 = vmatprep.subr.bf16.mxu0 %v7047_v22  ;;  %v7143_v22 = vld [vmem:[%s8797_s8 + $0xa54] ss:$8 sps:$4 sm:$0xff]  }
 0x1e0   : > { %5367 = vmatpush1.bf16.msra.mxu1 %v7042_v23  ;;  %v7138_v23 = vld [vmem:[%s8797_s8 + $0x350] ss:$8 sps:$4 sm:$0xff]  }
 0x1e1   : > { %5668 = vmatpush1.bf16.msra.mxu0 %v7045_v24  ;;  %5368 = vmatprep.subr.bf16.mxu1 %v7050_v25  ;;  %v7141_v24 = vld [vmem:[%s8797_s8 + $0xa50] ss:$8 sps:$4 sm:$0xff]   ;;  %v7146_v25 = vld [vmem:[%s8797_s8 + $0x364] ss:$8 sps:$4 sm:$0xff]  }
 0x1e2   : > { %5669 = vmatprep.subr.bf16.mxu0 %v7053_v26  ;;  %v7149_v26 = vld [vmem:[%s8797_s8 + $0xa64] ss:$8 sps:$4 sm:$0xff]  }
 0x1e4   : > { %5369 = vmatpush1.bf16.msra.mxu1 %v7048_v27  ;;  %v7144_v27 = vld [vmem:[%s8797_s8 + $0x360] ss:$8 sps:$4 sm:$0xff]  }
 0x1e5   : > { %5670 = vmatpush1.bf16.msra.mxu0 %v7051_v28  ;;  %5370 = vmatprep.subr.bf16.mxu1 %v7056_v29  ;;  %v7147_v28 = vld [vmem:[%s8797_s8 + $0xa60] ss:$8 sps:$4 sm:$0xff]   ;;  %v7152_v29 = vld [vmem:[%s8797_s8 + $0x374] ss:$8 sps:$4 sm:$0xff]  }
 0x1e6   : > { %5671 = vmatprep.subr.bf16.mxu0 %v7059_v30  ;;  %v7155_v30 = vld [vmem:[%s8797_s8 + $0xa74] ss:$8 sps:$4 sm:$0xff]  }
 0x1e8   : > { %5371 = vmatpush1.bf16.msra.mxu1 %v7054_v31  ;;  %v7150_v31 = vld [vmem:[%s8797_s8 + $0x370] ss:$8 sps:$4 sm:$0xff]  }
 0x1e9   : > { %5672 = vmatpush1.bf16.msra.mxu0 %v7057_v32  ;;  %5372 = vmatprep.subr.bf16.mxu1 %v7062_v33  ;;  %v7153_v32 = vld [vmem:[%s8797_s8 + $0xa70] ss:$8 sps:$4 sm:$0xff]   ;;  %v7158_v33 = vld [vmem:[%s8797_s8 + $0x384] ss:$8 sps:$4 sm:$0xff]  }
 0x1ea   : > { %5673 = vmatprep.subr.bf16.mxu0 %v7065_v34  ;;  %v7161_v34 = vld [vmem:[%s8797_s8 + $0xa84] ss:$8 sps:$4 sm:$0xff]  }
 0x1ec   : > { %5373 = vmatpush1.bf16.msra.mxu1 %v7060_v35  ;;  %v7156_v35 = vld [vmem:[%s8797_s8 + $0x380] ss:$8 sps:$4 sm:$0xff]  }
 0x1ed   : > { %5674 = vmatpush1.bf16.msra.mxu0 %v7063_v36  ;;  %5374 = vmatprep.subr.bf16.mxu1 %v7068_v37  ;;  %v7159_v36 = vld [vmem:[%s8797_s8 + $0xa80] ss:$8 sps:$4 sm:$0xff]   ;;  %v7164_v37 = vld [vmem:[%s8797_s8 + $0x394] ss:$8 sps:$4 sm:$0xff]  }
 0x1ee   : > { %5675 = vmatprep.subr.bf16.mxu0 %v7071_v38  ;;  %v7167_v38 = vld [vmem:[%s8797_s8 + $0xa94] ss:$8 sps:$4 sm:$0xff]  }
 0x1f0   : > { %5375 = vmatpush1.bf16.msra.mxu1 %v7066_v39  ;;  %v7162_v39 = vld [vmem:[%s8797_s8 + $0x390] ss:$8 sps:$4 sm:$0xff]  }
 0x1f1   : > { %5676 = vmatpush1.bf16.msra.mxu0 %v7069_v40  ;;  %5376 = vmatprep.subr.bf16.mxu1 %v7074_v41  ;;  %v7165_v40 = vld [vmem:[%s8797_s8 + $0xa90] ss:$8 sps:$4 sm:$0xff]   ;;  %v7170_v41 = vld [vmem:[%s8797_s8 + $0x3a4] ss:$8 sps:$4 sm:$0xff]  }
 0x1f2   : > { %5677 = vmatprep.subr.bf16.mxu0 %v7077_v42  ;;  %v7173_v42 = vld [vmem:[%s8797_s8 + $0xaa4] ss:$8 sps:$4 sm:$0xff]  }
 0x1f4   : > { %5377 = vmatpush1.bf16.msra.mxu1 %v7072_v43  ;;  %v7168_v43 = vld [vmem:[%s8797_s8 + $0x3a0] ss:$8 sps:$4 sm:$0xff]  }
 0x1f5   : > { %5678 = vmatpush1.bf16.msra.mxu0 %v7075_v44  ;;  %5378 = vmatprep.subr.bf16.mxu1 %v7080_v45  ;;  %v7171_v44 = vld [vmem:[%s8797_s8 + $0xaa0] ss:$8 sps:$4 sm:$0xff]   ;;  %v7176_v45 = vld [vmem:[%s8797_s8 + $0x3b4] ss:$8 sps:$4 sm:$0xff]  }
 0x1f6   : > { %5679 = vmatprep.subr.bf16.mxu0 %v7083_v46  ;;  %v7179_v46 = vld [vmem:[%s8797_s8 + $0xab4] ss:$8 sps:$4 sm:$0xff]  }
 0x1f8   : > { %5379 = vmatpush1.bf16.msra.mxu1 %v7078_v47  ;;  %v7174_v47 = vld [vmem:[%s8797_s8 + $0x3b0] ss:$8 sps:$4 sm:$0xff]  }
 0x1f9   : > { %5680 = vmatpush1.bf16.msra.mxu0 %v7081_v48  ;;  %5380 = vmatprep.subr.bf16.mxu1 %v7086_v49  ;;  %v7177_v48 = vld [vmem:[%s8797_s8 + $0xab0] ss:$8 sps:$4 sm:$0xff]   ;;  %v7182_v49 = vld [vmem:[%s8797_s8 + $0x3c4] ss:$8 sps:$4 sm:$0xff]  }
 0x1fa   : > { %5681 = vmatprep.subr.bf16.mxu0 %v7089_v50  ;;  %v7185_v50 = vld [vmem:[%s8797_s8 + $0xac4] ss:$8 sps:$4 sm:$0xff]  }
 0x1fc   : > { %5381 = vmatpush1.bf16.msra.mxu1 %v7084_v51  ;;  %v7180_v51 = vld [vmem:[%s8797_s8 + $0x3c0] ss:$8 sps:$4 sm:$0xff]  }
 0x1fd   : > { %5682 = vmatpush1.bf16.msra.mxu0 %v7087_v52  ;;  %5382 = vmatprep.subr.bf16.mxu1 %v7092_v53  ;;  %v7183_v52 = vld [vmem:[%s8797_s8 + $0xac0] ss:$8 sps:$4 sm:$0xff]   ;;  %v7188_v53 = vld [vmem:[%s8797_s8 + $0x3d4] ss:$8 sps:$4 sm:$0xff]  }
 0x1fe   : > { %5683 = vmatprep.subr.bf16.mxu0 %v7095_v54  ;;  %v7191_v54 = vld [vmem:[%s8797_s8 + $0xad4] ss:$8 sps:$4 sm:$0xff]  }
 0x200   : > { %5383 = vmatpush1.bf16.msra.mxu1 %v7090_v55  ;;  %v7186_v55 = vld [vmem:[%s8797_s8 + $0x3d0] ss:$8 sps:$4 sm:$0xff]  }
 0x201   : > { %5684 = vmatpush1.bf16.msra.mxu0 %v7093_v56  ;;  %5384 = vmatprep.subr.bf16.mxu1 %v7098_v57  ;;  %v7189_v56 = vld [vmem:[%s8797_s8 + $0xad0] ss:$8 sps:$4 sm:$0xff]   ;;  %v7194_v57 = vld [vmem:[%s8797_s8 + $0x3e4] ss:$8 sps:$4 sm:$0xff]  }
 0x202   : > { %5685 = vmatprep.subr.bf16.mxu0 %v7101_v58  ;;  %v7197_v58 = vld [vmem:[%s8797_s8 + $0xae4] ss:$8 sps:$4 sm:$0xff]  }
 0x204   : > { %5385 = vmatpush1.bf16.msra.mxu1 %v7096_v59  ;;  %v7192_v59 = vld [vmem:[%s8797_s8 + $0x3e0] ss:$8 sps:$4 sm:$0xff]  }
 0x205   : > { %5686 = vmatpush1.bf16.msra.mxu0 %v7099_v60  ;;  %5397 = vmatprep.subr.bf16.mxu1 %v7107_v61  ;;  %v7195_v60 = vld [vmem:[%s8797_s8 + $0xae0] ss:$8 sps:$4 sm:$0xff]   ;;  %v7200_v61 = vld [vmem:[%s8797_s8 + $0x3f4] ss:$8 sps:$4 sm:$0xff]  }
 0x206   : > { %5698 = vmatprep.subr.bf16.mxu0 %v7113_v62  ;;  %v7203_v62 = vld [vmem:[%s8797_s8 + $0xaf4] ss:$8 sps:$4 sm:$0xff]  }
 0x207   : > { %5387 = vmatmul.mubr.bf16.vlgmr.msra.gmra.mrb[0].mxu1 %v7102_v63  ;;  %v7198_v63 = vld [vmem:[%s8797_s8 + $0x3f0] ss:$8 sps:$4 sm:$0xff]  }
 0x208   : > { %5688 = vmatmul.mubr.bf16.vlgmr.msra.gmra.mrb[0].mxu0 %v7108_v1  ;;  %5398 = vmatpush1.bf16.msra.mxu1 %v7105_v0  ;;  %v7201_v0 = vld [vmem:[%s8797_s8 + $0xaf0] ss:$8 sps:$4 sm:$0xff]   ;;  %v7209_v1 = vld [vmem:[%s8797_s8 + $0x404] ss:$8 sps:$4 sm:$0xff]  }
 0x209   : > { %5699 = vmatpush1.bf16.msra.mxu0 %v7111_v2  ;;  %5399 = vmatprep.subr.bf16.mxu1 %v7116_v3  ;;  %v7215_v2 = vld [vmem:[%s8797_s8 + $0xb04] ss:$8 sps:$4 sm:$0xff]  }
 0x20a   : > { %5700 = vmatprep.subr.bf16.mxu0 %v7119_v4  ;;  %5429 = vmatprep.mubr.bf16.mxu1 %v7206_v5  ;;  %v7204_v3 = vld [vmem:[%s8795_s6 + $0x18] ss:$116 sps:$4 sm:$0xff]   ;;  %v7210_v5 = vld [vmem:[%s8795_s6 + $0x50] ss:$116 sps:$4 sm:$0xff]  }
 0x20b   : > { %5730 = vmatprep.mubr.bf16.mxu0 %v7212_v6  ;;  %v7207_v4 = vld [vmem:[%s8797_s8 + $0x400] ss:$8 sps:$4 sm:$0xff]  }
 0x20c   : > { %5400 = vmatpush1.bf16.msra.mxu1 %v7114_v7  ;;  %v7213_v6 = vld [vmem:[%s8797_s8 + $0xb00] ss:$8 sps:$4 sm:$0xff]   ;;  %v7218_v7 = vld [vmem:[%s8797_s8 + $0x414] ss:$8 sps:$4 sm:$0xff]  }
 0x20d   : > { %5701 = vmatpush1.bf16.msra.mxu0 %v7117_v8  ;;  %5401 = vmatprep.subr.bf16.mxu1 %v7122_v9  ;;  %v7221_v8 = vld [vmem:[%s8797_s8 + $0xb14] ss:$8 sps:$4 sm:$0xff]  }
 0x20e   : > { %5702 = vmatprep.subr.bf16.mxu0 %v7125_v10  ;;  %v7308_v9 = vld [vmem:[%s8795_s6 + $0x24] ss:$116 sps:$4 sm:$0xff]   ;;  %v7314_v10 = vld [vmem:[%s8795_s6 + $0x5c] ss:$116 sps:$4 sm:$0xff]  }
 0x210   : > { %5402 = vmatpush1.bf16.msra.mxu1 %v7120_v11  ;;  %v7216_v11 = vld [vmem:[%s8797_s8 + $0x410] ss:$8 sps:$4 sm:$0xff]  }
 0x211   : > { %5703 = vmatpush1.bf16.msra.mxu0 %v7123_v12  ;;  %5403 = vmatprep.subr.bf16.mxu1 %v7128_v13  ;;  %v7219_v12 = vld [vmem:[%s8797_s8 + $0xb10] ss:$8 sps:$4 sm:$0xff]   ;;  %v7224_v13 = vld [vmem:[%s8797_s8 + $0x424] ss:$8 sps:$4 sm:$0xff]  }
 0x212   : > { %5704 = vmatprep.subr.bf16.mxu0 %v7131_v14  ;;  %v7227_v14 = vld [vmem:[%s8797_s8 + $0xb24] ss:$8 sps:$4 sm:$0xff]  }
 0x214   : > { %5404 = vmatpush1.bf16.msra.mxu1 %v7126_v15  ;;  %v7222_v15 = vld [vmem:[%s8797_s8 + $0x420] ss:$8 sps:$4 sm:$0xff]  }
 0x215   : > { %5705 = vmatpush1.bf16.msra.mxu0 %v7129_v16  ;;  %5405 = vmatprep.subr.bf16.mxu1 %v7134_v17  ;;  %v7225_v16 = vld [vmem:[%s8797_s8 + $0xb20] ss:$8 sps:$4 sm:$0xff]   ;;  %v7230_v17 = vld [vmem:[%s8797_s8 + $0x434] ss:$8 sps:$4 sm:$0xff]  }
 0x216   : > { %5706 = vmatprep.subr.bf16.mxu0 %v7137_v18  ;;  %v7233_v18 = vld [vmem:[%s8797_s8 + $0xb34] ss:$8 sps:$4 sm:$0xff]  }
 0x218   : > { %5406 = vmatpush1.bf16.msra.mxu1 %v7132_v19  ;;  %v7228_v19 = vld [vmem:[%s8797_s8 + $0x430] ss:$8 sps:$4 sm:$0xff]  }
 0x219   : > { %5707 = vmatpush1.bf16.msra.mxu0 %v7135_v20  ;;  %5407 = vmatprep.subr.bf16.mxu1 %v7140_v21  ;;  %v7231_v20 = vld [vmem:[%s8797_s8 + $0xb30] ss:$8 sps:$4 sm:$0xff]   ;;  %v7236_v21 = vld [vmem:[%s8797_s8 + $0x444] ss:$8 sps:$4 sm:$0xff]  }
 0x21a   : > { %5708 = vmatprep.subr.bf16.mxu0 %v7143_v22  ;;  %v7239_v22 = vld [vmem:[%s8797_s8 + $0xb44] ss:$8 sps:$4 sm:$0xff]  }
 0x21c   : > { %5408 = vmatpush1.bf16.msra.mxu1 %v7138_v23  ;;  %v7234_v23 = vld [vmem:[%s8797_s8 + $0x440] ss:$8 sps:$4 sm:$0xff]  }
 0x21d   : > { %5709 = vmatpush1.bf16.msra.mxu0 %v7141_v24  ;;  %5409 = vmatprep.subr.bf16.mxu1 %v7146_v25  ;;  %v7237_v24 = vld [vmem:[%s8797_s8 + $0xb40] ss:$8 sps:$4 sm:$0xff]   ;;  %v7242_v25 = vld [vmem:[%s8797_s8 + $0x454] ss:$8 sps:$4 sm:$0xff]  }
 0x21e   : > { %5710 = vmatprep.subr.bf16.mxu0 %v7149_v26  ;;  %v7245_v26 = vld [vmem:[%s8797_s8 + $0xb54] ss:$8 sps:$4 sm:$0xff]  }
 0x220   : > { %5410 = vmatpush1.bf16.msra.mxu1 %v7144_v27  ;;  %v7240_v27 = vld [vmem:[%s8797_s8 + $0x450] ss:$8 sps:$4 sm:$0xff]  }
 0x221   : > { %5711 = vmatpush1.bf16.msra.mxu0 %v7147_v28  ;;  %5411 = vmatprep.subr.bf16.mxu1 %v7152_v29  ;;  %v7243_v28 = vld [vmem:[%s8797_s8 + $0xb50] ss:$8 sps:$4 sm:$0xff]   ;;  %v7248_v29 = vld [vmem:[%s8797_s8 + $0x464] ss:$8 sps:$4 sm:$0xff]  }
 0x222   : > { %5712 = vmatprep.subr.bf16.mxu0 %v7155_v30  ;;  %v7251_v30 = vld [vmem:[%s8797_s8 + $0xb64] ss:$8 sps:$4 sm:$0xff]  }
 0x224   : > { %5412 = vmatpush1.bf16.msra.mxu1 %v7150_v31  ;;  %v7246_v31 = vld [vmem:[%s8797_s8 + $0x460] ss:$8 sps:$4 sm:$0xff]  }
 0x225   : > { %5713 = vmatpush1.bf16.msra.mxu0 %v7153_v32  ;;  %5413 = vmatprep.subr.bf16.mxu1 %v7158_v33  ;;  %v7249_v32 = vld [vmem:[%s8797_s8 + $0xb60] ss:$8 sps:$4 sm:$0xff]   ;;  %v7254_v33 = vld [vmem:[%s8797_s8 + $0x474] ss:$8 sps:$4 sm:$0xff]  }
 0x226   : > { %5714 = vmatprep.subr.bf16.mxu0 %v7161_v34  ;;  %v7257_v34 = vld [vmem:[%s8797_s8 + $0xb74] ss:$8 sps:$4 sm:$0xff]  }
 0x228   : > { %5414 = vmatpush1.bf16.msra.mxu1 %v7156_v35  ;;  %v7252_v35 = vld [vmem:[%s8797_s8 + $0x470] ss:$8 sps:$4 sm:$0xff]  }
 0x229   : > { %5715 = vmatpush1.bf16.msra.mxu0 %v7159_v36  ;;  %5415 = vmatprep.subr.bf16.mxu1 %v7164_v37  ;;  %v7255_v36 = vld [vmem:[%s8797_s8 + $0xb70] ss:$8 sps:$4 sm:$0xff]   ;;  %v7260_v37 = vld [vmem:[%s8797_s8 + $0x484] ss:$8 sps:$4 sm:$0xff]  }
 0x22a   : > { %5716 = vmatprep.subr.bf16.mxu0 %v7167_v38  ;;  %v7263_v38 = vld [vmem:[%s8797_s8 + $0xb84] ss:$8 sps:$4 sm:$0xff]  }
 0x22c   : > { %5416 = vmatpush1.bf16.msra.mxu1 %v7162_v39  ;;  %v7258_v39 = vld [vmem:[%s8797_s8 + $0x480] ss:$8 sps:$4 sm:$0xff]  }
 0x22d   : > { %5717 = vmatpush1.bf16.msra.mxu0 %v7165_v40  ;;  %5417 = vmatprep.subr.bf16.mxu1 %v7170_v41  ;;  %v7261_v40 = vld [vmem:[%s8797_s8 + $0xb80] ss:$8 sps:$4 sm:$0xff]   ;;  %v7266_v41 = vld [vmem:[%s8797_s8 + $0x494] ss:$8 sps:$4 sm:$0xff]  }
 0x22e   : > { %5718 = vmatprep.subr.bf16.mxu0 %v7173_v42  ;;  %v7269_v42 = vld [vmem:[%s8797_s8 + $0xb94] ss:$8 sps:$4 sm:$0xff]  }
 0x230   : > { %5418 = vmatpush1.bf16.msra.mxu1 %v7168_v43  ;;  %v7264_v43 = vld [vmem:[%s8797_s8 + $0x490] ss:$8 sps:$4 sm:$0xff]  }
 0x231   : > { %5719 = vmatpush1.bf16.msra.mxu0 %v7171_v44  ;;  %5419 = vmatprep.subr.bf16.mxu1 %v7176_v45  ;;  %v7267_v44 = vld [vmem:[%s8797_s8 + $0xb90] ss:$8 sps:$4 sm:$0xff]   ;;  %v7272_v45 = vld [vmem:[%s8797_s8 + $0x4a4] ss:$8 sps:$4 sm:$0xff]  }
 0x232   : > { %5720 = vmatprep.subr.bf16.mxu0 %v7179_v46  ;;  %v7275_v46 = vld [vmem:[%s8797_s8 + $0xba4] ss:$8 sps:$4 sm:$0xff]  }
 0x234   : > { %5420 = vmatpush1.bf16.msra.mxu1 %v7174_v47  ;;  %v7270_v47 = vld [vmem:[%s8797_s8 + $0x4a0] ss:$8 sps:$4 sm:$0xff]  }
 0x235   : > { %5721 = vmatpush1.bf16.msra.mxu0 %v7177_v48  ;;  %5421 = vmatprep.subr.bf16.mxu1 %v7182_v49  ;;  %v7273_v48 = vld [vmem:[%s8797_s8 + $0xba0] ss:$8 sps:$4 sm:$0xff]   ;;  %v7278_v49 = vld [vmem:[%s8797_s8 + $0x4b4] ss:$8 sps:$4 sm:$0xff]  }
 0x236   : > { %5722 = vmatprep.subr.bf16.mxu0 %v7185_v50  ;;  %v7281_v50 = vld [vmem:[%s8797_s8 + $0xbb4] ss:$8 sps:$4 sm:$0xff]  }
 0x238   : > { %5422 = vmatpush1.bf16.msra.mxu1 %v7180_v51  ;;  %v7276_v51 = vld [vmem:[%s8797_s8 + $0x4b0] ss:$8 sps:$4 sm:$0xff]  }
 0x239   : > { %5723 = vmatpush1.bf16.msra.mxu0 %v7183_v52  ;;  %5423 = vmatprep.subr.bf16.mxu1 %v7188_v53  ;;  %v7279_v52 = vld [vmem:[%s8797_s8 + $0xbb0] ss:$8 sps:$4 sm:$0xff]   ;;  %v7284_v53 = vld [vmem:[%s8797_s8 + $0x4c4] ss:$8 sps:$4 sm:$0xff]  }
 0x23a   : > { %5724 = vmatprep.subr.bf16.mxu0 %v7191_v54  ;;  %v7287_v54 = vld [vmem:[%s8797_s8 + $0xbc4] ss:$8 sps:$4 sm:$0xff]  }
 0x23c   : > { %5424 = vmatpush1.bf16.msra.mxu1 %v7186_v55  ;;  %v7282_v55 = vld [vmem:[%s8797_s8 + $0x4c0] ss:$8 sps:$4 sm:$0xff]  }
 0x23d   : > { %5725 = vmatpush1.bf16.msra.mxu0 %v7189_v56  ;;  %5425 = vmatprep.subr.bf16.mxu1 %v7194_v57  ;;  %v7285_v56 = vld [vmem:[%s8797_s8 + $0xbc0] ss:$8 sps:$4 sm:$0xff]   ;;  %v7290_v57 = vld [vmem:[%s8797_s8 + $0x4d4] ss:$8 sps:$4 sm:$0xff]  }
 0x23e   : > { %5726 = vmatprep.subr.bf16.mxu0 %v7197_v58  ;;  %v7293_v58 = vld [vmem:[%s8797_s8 + $0xbd4] ss:$8 sps:$4 sm:$0xff]  }
 0x240   : > { %5426 = vmatpush1.bf16.msra.mxu1 %v7192_v59  ;;  %v7288_v59 = vld [vmem:[%s8797_s8 + $0x4d0] ss:$8 sps:$4 sm:$0xff]  }
 0x241   : > { %5727 = vmatpush1.bf16.msra.mxu0 %v7195_v60  ;;  %5427 = vmatprep.subr.bf16.mxu1 %v7200_v61  ;;  %v7291_v60 = vld [vmem:[%s8797_s8 + $0xbd0] ss:$8 sps:$4 sm:$0xff]   ;;  %v7296_v61 = vld [vmem:[%s8797_s8 + $0x4e4] ss:$8 sps:$4 sm:$0xff]  }
 0x242   : > { %5728 = vmatprep.subr.bf16.mxu0 %v7203_v62  ;;  %v7299_v62 = vld [vmem:[%s8797_s8 + $0xbe4] ss:$8 sps:$4 sm:$0xff]  }
 0x244   : > { %5428 = vmatpush1.bf16.msra.mxu1 %v7198_v63  ;;  %v7294_v63 = vld [vmem:[%s8797_s8 + $0x4e0] ss:$8 sps:$4 sm:$0xff]  }
 0x245   : > { %5729 = vmatpush1.bf16.msra.mxu0 %v7201_v0  ;;  %5440 = vmatprep.subr.bf16.mxu1 %v7209_v1  ;;  %v7297_v0 = vld [vmem:[%s8797_s8 + $0xbe0] ss:$8 sps:$4 sm:$0xff]   ;;  %v7302_v1 = vld [vmem:[%s8797_s8 + $0x4f4] ss:$8 sps:$4 sm:$0xff]  }
 0x246   : > { %5741 = vmatprep.subr.bf16.mxu0 %v7215_v2  ;;  %v7305_v2 = vld [vmem:[%s8797_s8 + $0xbf4] ss:$8 sps:$4 sm:$0xff]  }
 0x247   : > { %5430 = vmatmul.mubr.bf16.vlgmr.msra.gmra.mrb[0].mxu1 %v7204_v3  ;;  %v7300_v3 = vld [vmem:[%s8797_s8 + $0x4f0] ss:$8 sps:$4 sm:$0xff]  }
 0x248   : > { %5731 = vmatmul.mubr.bf16.vlgmr.msra.gmra.mrb[0].mxu0 %v7210_v5  ;;  %5441 = vmatpush1.bf16.msra.mxu1 %v7207_v4  ;;  %v7303_v4 = vld [vmem:[%s8797_s8 + $0xbf0] ss:$8 sps:$4 sm:$0xff]   ;;  %v7311_v5 = vld [vmem:[%s8797_s8 + $0x504] ss:$8 sps:$4 sm:$0xff]  }
 0x249   : > { %5742 = vmatpush1.bf16.msra.mxu0 %v7213_v6  ;;  %5442 = vmatprep.subr.bf16.mxu1 %v7218_v7  ;;  %v7306_v6 = vld [vmem:[%s8795_s6 + $0x20] ss:$116 sps:$4 sm:$0xff]   ;;  %v7312_v7 = vld [vmem:[%s8795_s6 + $0x58] ss:$116 sps:$4 sm:$0xff]  }
 0x24a   : > { %5743 = vmatprep.subr.bf16.mxu0 %v7221_v8  ;;  %5472 = vmatprep.mubr.bf16.mxu1 %v7308_v9  ;;  %v7317_v8 = vld [vmem:[%s8797_s8 + $0xc04] ss:$8 sps:$4 sm:$0xff]   ;;  %v7309_v9 = vld [vmem:[%s8797_s8 + $0x500] ss:$8 sps:$4 sm:$0xff]  }
 0x24b   : > { %5773 = vmatprep.mubr.bf16.mxu0 %v7314_v10  ;;  %v7315_v10 = vld [vmem:[%s8797_s8 + $0xc00] ss:$8 sps:$4 sm:$0xff]  }
 0x24c   : > { %5443 = vmatpush1.bf16.msra.mxu1 %v7216_v11  ;;  %v7320_v11 = vld [vmem:[%s8797_s8 + $0x514] ss:$8 sps:$4 sm:$0xff]  }
 0x24d   : > { %5744 = vmatpush1.bf16.msra.mxu0 %v7219_v12  ;;  %5444 = vmatprep.subr.bf16.mxu1 %v7224_v13  ;;  %v7323_v12 = vld [vmem:[%s8797_s8 + $0xc14] ss:$8 sps:$4 sm:$0xff]  }
 0x24e   : > { %5745 = vmatprep.subr.bf16.mxu0 %v7227_v14  ;;  %v7410_v13 = vld [vmem:[%s8795_s6 + $0x2c] ss:$116 sps:$4 sm:$0xff]   ;;  %v7416_v14 = vld [vmem:[%s8795_s6 + $0x64] ss:$116 sps:$4 sm:$0xff]  }
 0x250   : > { %5445 = vmatpush1.bf16.msra.mxu1 %v7222_v15  ;;  %v7318_v15 = vld [vmem:[%s8797_s8 + $0x510] ss:$8 sps:$4 sm:$0xff]  }
 0x251   : > { %5746 = vmatpush1.bf16.msra.mxu0 %v7225_v16  ;;  %5446 = vmatprep.subr.bf16.mxu1 %v7230_v17  ;;  %v7321_v16 = vld [vmem:[%s8797_s8 + $0xc10] ss:$8 sps:$4 sm:$0xff]   ;;  %v7326_v17 = vld [vmem:[%s8797_s8 + $0x524] ss:$8 sps:$4 sm:$0xff]  }
 0x252   : > { %5747 = vmatprep.subr.bf16.mxu0 %v7233_v18  ;;  %v7329_v18 = vld [vmem:[%s8797_s8 + $0xc24] ss:$8 sps:$4 sm:$0xff]  }
 0x254   : > { %5447 = vmatpush1.bf16.msra.mxu1 %v7228_v19  ;;  %v7324_v19 = vld [vmem:[%s8797_s8 + $0x520] ss:$8 sps:$4 sm:$0xff]  }
 0x255   : > { %5748 = vmatpush1.bf16.msra.mxu0 %v7231_v20  ;;  %5448 = vmatprep.subr.bf16.mxu1 %v7236_v21  ;;  %v7327_v20 = vld [vmem:[%s8797_s8 + $0xc20] ss:$8 sps:$4 sm:$0xff]   ;;  %v7332_v21 = vld [vmem:[%s8797_s8 + $0x534] ss:$8 sps:$4 sm:$0xff]  }
 0x256   : > { %5749 = vmatprep.subr.bf16.mxu0 %v7239_v22  ;;  %v7335_v22 = vld [vmem:[%s8797_s8 + $0xc34] ss:$8 sps:$4 sm:$0xff]  }
 0x258   : > { %5449 = vmatpush1.bf16.msra.mxu1 %v7234_v23  ;;  %v7330_v23 = vld [vmem:[%s8797_s8 + $0x530] ss:$8 sps:$4 sm:$0xff]  }
 0x259   : > { %5750 = vmatpush1.bf16.msra.mxu0 %v7237_v24  ;;  %5450 = vmatprep.subr.bf16.mxu1 %v7242_v25  ;;  %v7333_v24 = vld [vmem:[%s8797_s8 + $0xc30] ss:$8 sps:$4 sm:$0xff]   ;;  %v7338_v25 = vld [vmem:[%s8797_s8 + $0x544] ss:$8 sps:$4 sm:$0xff]  }
 0x25a   : > { %5751 = vmatprep.subr.bf16.mxu0 %v7245_v26  ;;  %v7341_v26 = vld [vmem:[%s8797_s8 + $0xc44] ss:$8 sps:$4 sm:$0xff]  }
 0x25c   : > { %5451 = vmatpush1.bf16.msra.mxu1 %v7240_v27  ;;  %v7336_v27 = vld [vmem:[%s8797_s8 + $0x540] ss:$8 sps:$4 sm:$0xff]  }
 0x25d   : > { %5752 = vmatpush1.bf16.msra.mxu0 %v7243_v28  ;;  %5452 = vmatprep.subr.bf16.mxu1 %v7248_v29  ;;  %v7339_v28 = vld [vmem:[%s8797_s8 + $0xc40] ss:$8 sps:$4 sm:$0xff]   ;;  %v7344_v29 = vld [vmem:[%s8797_s8 + $0x554] ss:$8 sps:$4 sm:$0xff]  }
 0x25e   : > { %5753 = vmatprep.subr.bf16.mxu0 %v7251_v30  ;;  %v7347_v30 = vld [vmem:[%s8797_s8 + $0xc54] ss:$8 sps:$4 sm:$0xff]  }
 0x260   : > { %5453 = vmatpush1.bf16.msra.mxu1 %v7246_v31  ;;  %v7342_v31 = vld [vmem:[%s8797_s8 + $0x550] ss:$8 sps:$4 sm:$0xff]  }
 0x261   : > { %5754 = vmatpush1.bf16.msra.mxu0 %v7249_v32  ;;  %5454 = vmatprep.subr.bf16.mxu1 %v7254_v33  ;;  %v7345_v32 = vld [vmem:[%s8797_s8 + $0xc50] ss:$8 sps:$4 sm:$0xff]   ;;  %v7350_v33 = vld [vmem:[%s8797_s8 + $0x564] ss:$8 sps:$4 sm:$0xff]  }
 0x262   : > { %5755 = vmatprep.subr.bf16.mxu0 %v7257_v34  ;;  %v7353_v34 = vld [vmem:[%s8797_s8 + $0xc64] ss:$8 sps:$4 sm:$0xff]  }
 0x264   : > { %5455 = vmatpush1.bf16.msra.mxu1 %v7252_v35  ;;  %v7348_v35 = vld [vmem:[%s8797_s8 + $0x560] ss:$8 sps:$4 sm:$0xff]  }
 0x265   : > { %5756 = vmatpush1.bf16.msra.mxu0 %v7255_v36  ;;  %5456 = vmatprep.subr.bf16.mxu1 %v7260_v37  ;;  %v7351_v36 = vld [vmem:[%s8797_s8 + $0xc60] ss:$8 sps:$4 sm:$0xff]   ;;  %v7356_v37 = vld [vmem:[%s8797_s8 + $0x574] ss:$8 sps:$4 sm:$0xff]  }
 0x266   : > { %5757 = vmatprep.subr.bf16.mxu0 %v7263_v38  ;;  %v7359_v38 = vld [vmem:[%s8797_s8 + $0xc74] ss:$8 sps:$4 sm:$0xff]  }
 0x268   : > { %5457 = vmatpush1.bf16.msra.mxu1 %v7258_v39  ;;  %v7354_v39 = vld [vmem:[%s8797_s8 + $0x570] ss:$8 sps:$4 sm:$0xff]  }
 0x269   : > { %5758 = vmatpush1.bf16.msra.mxu0 %v7261_v40  ;;  %5458 = vmatprep.subr.bf16.mxu1 %v7266_v41  ;;  %v7357_v40 = vld [vmem:[%s8797_s8 + $0xc70] ss:$8 sps:$4 sm:$0xff]   ;;  %v7362_v41 = vld [vmem:[%s8797_s8 + $0x584] ss:$8 sps:$4 sm:$0xff]  }
 0x26a   : > { %5759 = vmatprep.subr.bf16.mxu0 %v7269_v42  ;;  %v7365_v42 = vld [vmem:[%s8797_s8 + $0xc84] ss:$8 sps:$4 sm:$0xff]  }
 0x26c   : > { %5459 = vmatpush1.bf16.msra.mxu1 %v7264_v43  ;;  %v7360_v43 = vld [vmem:[%s8797_s8 + $0x580] ss:$8 sps:$4 sm:$0xff]  }
 0x26d   : > { %5760 = vmatpush1.bf16.msra.mxu0 %v7267_v44  ;;  %5460 = vmatprep.subr.bf16.mxu1 %v7272_v45  ;;  %v7363_v44 = vld [vmem:[%s8797_s8 + $0xc80] ss:$8 sps:$4 sm:$0xff]   ;;  %v7368_v45 = vld [vmem:[%s8797_s8 + $0x594] ss:$8 sps:$4 sm:$0xff]  }
 0x26e   : > { %5761 = vmatprep.subr.bf16.mxu0 %v7275_v46  ;;  %v7371_v46 = vld [vmem:[%s8797_s8 + $0xc94] ss:$8 sps:$4 sm:$0xff]  }
 0x270   : > { %5461 = vmatpush1.bf16.msra.mxu1 %v7270_v47  ;;  %v7366_v47 = vld [vmem:[%s8797_s8 + $0x590] ss:$8 sps:$4 sm:$0xff]  }
 0x271   : > { %5762 = vmatpush1.bf16.msra.mxu0 %v7273_v48  ;;  %5462 = vmatprep.subr.bf16.mxu1 %v7278_v49  ;;  %v7369_v48 = vld [vmem:[%s8797_s8 + $0xc90] ss:$8 sps:$4 sm:$0xff]   ;;  %v7374_v49 = vld [vmem:[%s8797_s8 + $0x5a4] ss:$8 sps:$4 sm:$0xff]  }
 0x272   : > { %5763 = vmatprep.subr.bf16.mxu0 %v7281_v50  ;;  %v7377_v50 = vld [vmem:[%s8797_s8 + $0xca4] ss:$8 sps:$4 sm:$0xff]  }
 0x274   : > { %5463 = vmatpush1.bf16.msra.mxu1 %v7276_v51  ;;  %v7372_v51 = vld [vmem:[%s8797_s8 + $0x5a0] ss:$8 sps:$4 sm:$0xff]  }
 0x275   : > { %5764 = vmatpush1.bf16.msra.mxu0 %v7279_v52  ;;  %5464 = vmatprep.subr.bf16.mxu1 %v7284_v53  ;;  %v7375_v52 = vld [vmem:[%s8797_s8 + $0xca0] ss:$8 sps:$4 sm:$0xff]   ;;  %v7380_v53 = vld [vmem:[%s8797_s8 + $0x5b4] ss:$8 sps:$4 sm:$0xff]  }
 0x276   : > { %5765 = vmatprep.subr.bf16.mxu0 %v7287_v54  ;;  %v7383_v54 = vld [vmem:[%s8797_s8 + $0xcb4] ss:$8 sps:$4 sm:$0xff]  }
 0x278   : > { %5465 = vmatpush1.bf16.msra.mxu1 %v7282_v55  ;;  %v7378_v55 = vld [vmem:[%s8797_s8 + $0x5b0] ss:$8 sps:$4 sm:$0xff]  }
 0x279   : > { %5766 = vmatpush1.bf16.msra.mxu0 %v7285_v56  ;;  %5466 = vmatprep.subr.bf16.mxu1 %v7290_v57  ;;  %v7381_v56 = vld [vmem:[%s8797_s8 + $0xcb0] ss:$8 sps:$4 sm:$0xff]   ;;  %v7386_v57 = vld [vmem:[%s8797_s8 + $0x5c4] ss:$8 sps:$4 sm:$0xff]  }
 0x27a   : > { %5767 = vmatprep.subr.bf16.mxu0 %v7293_v58  ;;  %v7389_v58 = vld [vmem:[%s8797_s8 + $0xcc4] ss:$8 sps:$4 sm:$0xff]  }
 0x27c   : > { %5467 = vmatpush1.bf16.msra.mxu1 %v7288_v59  ;;  %v7384_v59 = vld [vmem:[%s8797_s8 + $0x5c0] ss:$8 sps:$4 sm:$0xff]  }
 0x27d   : > { %5768 = vmatpush1.bf16.msra.mxu0 %v7291_v60  ;;  %5468 = vmatprep.subr.bf16.mxu1 %v7296_v61  ;;  %v7387_v60 = vld [vmem:[%s8797_s8 + $0xcc0] ss:$8 sps:$4 sm:$0xff]   ;;  %v7392_v61 = vld [vmem:[%s8797_s8 + $0x5d4] ss:$8 sps:$4 sm:$0xff]  }
 0x27e   : > { %5769 = vmatprep.subr.bf16.mxu0 %v7299_v62  ;;  %v7395_v62 = vld [vmem:[%s8797_s8 + $0xcd4] ss:$8 sps:$4 sm:$0xff]  }
 0x280   : > { %5469 = vmatpush1.bf16.msra.mxu1 %v7294_v63  ;;  %v7390_v63 = vld [vmem:[%s8797_s8 + $0x5d0] ss:$8 sps:$4 sm:$0xff]  }
 0x281   : > { %5770 = vmatpush1.bf16.msra.mxu0 %v7297_v0  ;;  %5470 = vmatprep.subr.bf16.mxu1 %v7302_v1  ;;  %v7393_v0 = vld [vmem:[%s8797_s8 + $0xcd0] ss:$8 sps:$4 sm:$0xff]   ;;  %v7398_v1 = vld [vmem:[%s8797_s8 + $0x5e4] ss:$8 sps:$4 sm:$0xff]  }
 0x282   : > { %5771 = vmatprep.subr.bf16.mxu0 %v7305_v2  ;;  %v7401_v2 = vld [vmem:[%s8797_s8 + $0xce4] ss:$8 sps:$4 sm:$0xff]  }
 0x284   : > { %5471 = vmatpush1.bf16.msra.mxu1 %v7300_v3  ;;  %v7396_v3 = vld [vmem:[%s8797_s8 + $0x5e0] ss:$8 sps:$4 sm:$0xff]  }
 0x285   : > { %5772 = vmatpush1.bf16.msra.mxu0 %v7303_v4  ;;  %5483 = vmatprep.subr.bf16.mxu1 %v7311_v5  ;;  %v7399_v4 = vld [vmem:[%s8797_s8 + $0xce0] ss:$8 sps:$4 sm:$0xff]   ;;  %v7404_v5 = vld [vmem:[%s8797_s8 + $0x5f4] ss:$8 sps:$4 sm:$0xff]  }
 0x286   : > { %5784 = vmatprep.subr.bf16.mxu0 %v7317_v8  ;;  %v7405_v8 = vld [vmem:[%s8797_s8 + $0xcf0] ss:$8 sps:$4 sm:$0xff]  }
 0x287   : > { %5473 = vmatmul.mubr.bf16.vlgmr.msra.gmra.mrb[0].mxu1 %v7306_v6  ;;  %v7407_v6 = vld [vmem:[%s8797_s8 + $0xcf4] ss:$8 sps:$4 sm:$0xff]  }
 0x288   : > { %5774 = vmatmul.mubr.bf16.vlgmr.msra.gmra.mrb[0].mxu0 %v7312_v7  ;;  %5484 = vmatpush1.bf16.msra.mxu1 %v7309_v9  ;;  %v7402_v7 = vld [vmem:[%s8797_s8 + $0x5f0] ss:$8 sps:$4 sm:$0xff]   ;;  %v7413_v9 = vld [vmem:[%s8797_s8 + $0x604] ss:$8 sps:$4 sm:$0xff]  }
 0x289   : > { %5785 = vmatpush1.bf16.msra.mxu0 %v7315_v10  ;;  %5485 = vmatprep.subr.bf16.mxu1 %v7320_v11  ;;  %v7419_v10 = vld [vmem:[%s8797_s8 + $0xd04] ss:$8 sps:$4 sm:$0xff]  }
 0x28a   : > { %5786 = vmatprep.subr.bf16.mxu0 %v7323_v12  ;;  %5515 = vmatprep.mubr.bf16.mxu1 %v7410_v13  ;;  %v7408_v11 = vld [vmem:[%s8795_s6 + $0x28] ss:$116 sps:$4 sm:$0xff]   ;;  %v7414_v12 = vld [vmem:[%s8795_s6 + $0x60] ss:$116 sps:$4 sm:$0xff]  }
 0x28b   : > { %5816 = vmatprep.mubr.bf16.mxu0 %v7416_v14  ;;  %v7411_v13 = vld [vmem:[%s8797_s8 + $0x600] ss:$8 sps:$4 sm:$0xff]  }
 0x28c   : > { %5486 = vmatpush1.bf16.msra.mxu1 %v7318_v15  ;;  %v7417_v14 = vld [vmem:[%s8797_s8 + $0xd00] ss:$8 sps:$4 sm:$0xff]   ;;  %v7422_v15 = vld [vmem:[%s8797_s8 + $0x614] ss:$8 sps:$4 sm:$0xff]  }
 0x28d   : > { %5787 = vmatpush1.bf16.msra.mxu0 %v7321_v16  ;;  %5487 = vmatprep.subr.bf16.mxu1 %v7326_v17  ;;  %v7425_v16 = vld [vmem:[%s8797_s8 + $0xd14] ss:$8 sps:$4 sm:$0xff]   ;;  %v7512_v17 = vld [vmem:[%s8795_s6 + $0x34] ss:$116 sps:$4 sm:$0xff]  }
 0x28e   : > { %5788 = vmatprep.subr.bf16.mxu0 %v7329_v18  ;;  %v7515_v18 = vld [vmem:[%s8795_s6 + $0x6c] ss:$116 sps:$4 sm:$0xff]  }
 0x290   : > { %5488 = vmatpush1.bf16.msra.mxu1 %v7324_v19  ;;  %v7420_v19 = vld [vmem:[%s8797_s8 + $0x610] ss:$8 sps:$4 sm:$0xff]  }
 0x291   : > { %5789 = vmatpush1.bf16.msra.mxu0 %v7327_v20  ;;  %5489 = vmatprep.subr.bf16.mxu1 %v7332_v21  ;;  %v7423_v20 = vld [vmem:[%s8797_s8 + $0xd10] ss:$8 sps:$4 sm:$0xff]   ;;  %v7428_v21 = vld [vmem:[%s8797_s8 + $0x624] ss:$8 sps:$4 sm:$0xff]  }
 0x292   : > { %5790 = vmatprep.subr.bf16.mxu0 %v7335_v22  ;;  %v7431_v22 = vld [vmem:[%s8797_s8 + $0xd24] ss:$8 sps:$4 sm:$0xff]  }
 0x294   : > { %5490 = vmatpush1.bf16.msra.mxu1 %v7330_v23  ;;  %v7426_v23 = vld [vmem:[%s8797_s8 + $0x620] ss:$8 sps:$4 sm:$0xff]  }
 0x295   : > { %5791 = vmatpush1.bf16.msra.mxu0 %v7333_v24  ;;  %5491 = vmatprep.subr.bf16.mxu1 %v7338_v25  ;;  %v7429_v24 = vld [vmem:[%s8797_s8 + $0xd20] ss:$8 sps:$4 sm:$0xff]   ;;  %v7434_v25 = vld [vmem:[%s8797_s8 + $0x634] ss:$8 sps:$4 sm:$0xff]  }
 0x296   : > { %5792 = vmatprep.subr.bf16.mxu0 %v7341_v26  ;;  %v7437_v26 = vld [vmem:[%s8797_s8 + $0xd34] ss:$8 sps:$4 sm:$0xff]  }
 0x298   : > { %5492 = vmatpush1.bf16.msra.mxu1 %v7336_v27  ;;  %v7432_v27 = vld [vmem:[%s8797_s8 + $0x630] ss:$8 sps:$4 sm:$0xff]  }
 0x299   : > { %5793 = vmatpush1.bf16.msra.mxu0 %v7339_v28  ;;  %5493 = vmatprep.subr.bf16.mxu1 %v7344_v29  ;;  %v7435_v28 = vld [vmem:[%s8797_s8 + $0xd30] ss:$8 sps:$4 sm:$0xff]   ;;  %v7440_v29 = vld [vmem:[%s8797_s8 + $0x644] ss:$8 sps:$4 sm:$0xff]  }
 0x29a   : > { %5794 = vmatprep.subr.bf16.mxu0 %v7347_v30  ;;  %v7443_v30 = vld [vmem:[%s8797_s8 + $0xd44] ss:$8 sps:$4 sm:$0xff]  }
 0x29c   : > { %5494 = vmatpush1.bf16.msra.mxu1 %v7342_v31  ;;  %v7438_v31 = vld [vmem:[%s8797_s8 + $0x640] ss:$8 sps:$4 sm:$0xff]  }
 0x29d   : > { %5795 = vmatpush1.bf16.msra.mxu0 %v7345_v32  ;;  %5495 = vmatprep.subr.bf16.mxu1 %v7350_v33  ;;  %v7441_v32 = vld [vmem:[%s8797_s8 + $0xd40] ss:$8 sps:$4 sm:$0xff]   ;;  %v7446_v33 = vld [vmem:[%s8797_s8 + $0x654] ss:$8 sps:$4 sm:$0xff]  }
 0x29e   : > { %5796 = vmatprep.subr.bf16.mxu0 %v7353_v34  ;;  %v7449_v34 = vld [vmem:[%s8797_s8 + $0xd54] ss:$8 sps:$4 sm:$0xff]  }
 0x2a0   : > { %5496 = vmatpush1.bf16.msra.mxu1 %v7348_v35  ;;  %v7444_v35 = vld [vmem:[%s8797_s8 + $0x650] ss:$8 sps:$4 sm:$0xff]  }
 0x2a1   : > { %5797 = vmatpush1.bf16.msra.mxu0 %v7351_v36  ;;  %5497 = vmatprep.subr.bf16.mxu1 %v7356_v37  ;;  %v7447_v36 = vld [vmem:[%s8797_s8 + $0xd50] ss:$8 sps:$4 sm:$0xff]   ;;  %v7452_v37 = vld [vmem:[%s8797_s8 + $0x664] ss:$8 sps:$4 sm:$0xff]  }
 0x2a2   : > { %5798 = vmatprep.subr.bf16.mxu0 %v7359_v38  ;;  %v7455_v38 = vld [vmem:[%s8797_s8 + $0xd64] ss:$8 sps:$4 sm:$0xff]  }
 0x2a4   : > { %5498 = vmatpush1.bf16.msra.mxu1 %v7354_v39  ;;  %v7450_v39 = vld [vmem:[%s8797_s8 + $0x660] ss:$8 sps:$4 sm:$0xff]  }
 0x2a5   : > { %5799 = vmatpush1.bf16.msra.mxu0 %v7357_v40  ;;  %5499 = vmatprep.subr.bf16.mxu1 %v7362_v41  ;;  %v7453_v40 = vld [vmem:[%s8797_s8 + $0xd60] ss:$8 sps:$4 sm:$0xff]   ;;  %v7458_v41 = vld [vmem:[%s8797_s8 + $0x674] ss:$8 sps:$4 sm:$0xff]  }
 0x2a6   : > { %5800 = vmatprep.subr.bf16.mxu0 %v7365_v42  ;;  %v7461_v42 = vld [vmem:[%s8797_s8 + $0xd74] ss:$8 sps:$4 sm:$0xff]  }
 0x2a8   : > { %5500 = vmatpush1.bf16.msra.mxu1 %v7360_v43  ;;  %v7456_v43 = vld [vmem:[%s8797_s8 + $0x670] ss:$8 sps:$4 sm:$0xff]  }
 0x2a9   : > { %5801 = vmatpush1.bf16.msra.mxu0 %v7363_v44  ;;  %5501 = vmatprep.subr.bf16.mxu1 %v7368_v45  ;;  %v7459_v44 = vld [vmem:[%s8797_s8 + $0xd70] ss:$8 sps:$4 sm:$0xff]   ;;  %v7464_v45 = vld [vmem:[%s8797_s8 + $0x684] ss:$8 sps:$4 sm:$0xff]  }
 0x2aa   : > { %5802 = vmatprep.subr.bf16.mxu0 %v7371_v46  ;;  %v7467_v46 = vld [vmem:[%s8797_s8 + $0xd84] ss:$8 sps:$4 sm:$0xff]  }
 0x2ac   : > { %5502 = vmatpush1.bf16.msra.mxu1 %v7366_v47  ;;  %v7462_v47 = vld [vmem:[%s8797_s8 + $0x680] ss:$8 sps:$4 sm:$0xff]  }
 0x2ad   : > { %5803 = vmatpush1.bf16.msra.mxu0 %v7369_v48  ;;  %5503 = vmatprep.subr.bf16.mxu1 %v7374_v49  ;;  %v7465_v48 = vld [vmem:[%s8797_s8 + $0xd80] ss:$8 sps:$4 sm:$0xff]   ;;  %v7470_v49 = vld [vmem:[%s8797_s8 + $0x694] ss:$8 sps:$4 sm:$0xff]  }
 0x2ae   : > { %5804 = vmatprep.subr.bf16.mxu0 %v7377_v50  ;;  %v7473_v50 = vld [vmem:[%s8797_s8 + $0xd94] ss:$8 sps:$4 sm:$0xff]  }
 0x2b0   : > { %5504 = vmatpush1.bf16.msra.mxu1 %v7372_v51  ;;  %v7468_v51 = vld [vmem:[%s8797_s8 + $0x690] ss:$8 sps:$4 sm:$0xff]  }
 0x2b1   : > { %5805 = vmatpush1.bf16.msra.mxu0 %v7375_v52  ;;  %5505 = vmatprep.subr.bf16.mxu1 %v7380_v53  ;;  %v7471_v52 = vld [vmem:[%s8797_s8 + $0xd90] ss:$8 sps:$4 sm:$0xff]   ;;  %v7476_v53 = vld [vmem:[%s8797_s8 + $0x6a4] ss:$8 sps:$4 sm:$0xff]  }
 0x2b2   : > { %5806 = vmatprep.subr.bf16.mxu0 %v7383_v54  ;;  %v7479_v54 = vld [vmem:[%s8797_s8 + $0xda4] ss:$8 sps:$4 sm:$0xff]  }
 0x2b4   : > { %5506 = vmatpush1.bf16.msra.mxu1 %v7378_v55  ;;  %v7474_v55 = vld [vmem:[%s8797_s8 + $0x6a0] ss:$8 sps:$4 sm:$0xff]  }
 0x2b5   : > { %5807 = vmatpush1.bf16.msra.mxu0 %v7381_v56  ;;  %5507 = vmatprep.subr.bf16.mxu1 %v7386_v57  ;;  %v7477_v56 = vld [vmem:[%s8797_s8 + $0xda0] ss:$8 sps:$4 sm:$0xff]   ;;  %v7482_v57 = vld [vmem:[%s8797_s8 + $0x6b4] ss:$8 sps:$4 sm:$0xff]  }
 0x2b6   : > { %5808 = vmatprep.subr.bf16.mxu0 %v7389_v58  ;;  %v7485_v58 = vld [vmem:[%s8797_s8 + $0xdb4] ss:$8 sps:$4 sm:$0xff]  }
 0x2b8   : > { %5508 = vmatpush1.bf16.msra.mxu1 %v7384_v59  ;;  %v7480_v59 = vld [vmem:[%s8797_s8 + $0x6b0] ss:$8 sps:$4 sm:$0xff]  }
 0x2b9   : > { %5809 = vmatpush1.bf16.msra.mxu0 %v7387_v60  ;;  %5509 = vmatprep.subr.bf16.mxu1 %v7392_v61  ;;  %v7483_v60 = vld [vmem:[%s8797_s8 + $0xdb0] ss:$8 sps:$4 sm:$0xff]   ;;  %v7488_v61 = vld [vmem:[%s8797_s8 + $0x6c4] ss:$8 sps:$4 sm:$0xff]  }
 0x2ba   : > { %5810 = vmatprep.subr.bf16.mxu0 %v7395_v62  ;;  %v7491_v62 = vld [vmem:[%s8797_s8 + $0xdc4] ss:$8 sps:$4 sm:$0xff]  }
 0x2bc   : > { %5510 = vmatpush1.bf16.msra.mxu1 %v7390_v63  ;;  %v7486_v63 = vld [vmem:[%s8797_s8 + $0x6c0] ss:$8 sps:$4 sm:$0xff]  }
 0x2bd   : > { %5811 = vmatpush1.bf16.msra.mxu0 %v7393_v0  ;;  %5511 = vmatprep.subr.bf16.mxu1 %v7398_v1  ;;  %v7489_v0 = vld [vmem:[%s8797_s8 + $0xdc0] ss:$8 sps:$4 sm:$0xff]   ;;  %v7494_v1 = vld [vmem:[%s8797_s8 + $0x6d4] ss:$8 sps:$4 sm:$0xff]  }
 0x2be   : > { %5812 = vmatprep.subr.bf16.mxu0 %v7401_v2  ;;  %v7497_v2 = vld [vmem:[%s8797_s8 + $0xdd4] ss:$8 sps:$4 sm:$0xff]  }
 0x2c0   : > { %5512 = vmatpush1.bf16.msra.mxu1 %v7396_v3  ;;  %v7492_v3 = vld [vmem:[%s8797_s8 + $0x6d0] ss:$8 sps:$4 sm:$0xff]  }
 0x2c1   : > { %5813 = vmatpush1.bf16.msra.mxu0 %v7399_v4  ;;  %5513 = vmatprep.subr.bf16.mxu1 %v7404_v5  ;;  %v7495_v4 = vld [vmem:[%s8797_s8 + $0xdd0] ss:$8 sps:$4 sm:$0xff]   ;;  %v7500_v5 = vld [vmem:[%s8797_s8 + $0x6e4] ss:$8 sps:$4 sm:$0xff]  }
 0x2c2   : > { %5814 = vmatprep.subr.bf16.mxu0 %v7407_v6  ;;  %v7503_v6 = vld [vmem:[%s8797_s8 + $0xde4] ss:$8 sps:$4 sm:$0xff]  }
 0x2c4   : > { %5514 = vmatpush1.bf16.msra.mxu1 %v7402_v7  ;;  %v7498_v7 = vld [vmem:[%s8797_s8 + $0x6e0] ss:$8 sps:$4 sm:$0xff]  }
 0x2c5   : > { %5815 = vmatpush1.bf16.msra.mxu0 %v7405_v8  ;;  %5526 = vmatprep.subr.bf16.mxu1 %v7413_v9  ;;  %v7501_v8 = vld [vmem:[%s8797_s8 + $0xde0] ss:$8 sps:$4 sm:$0xff]   ;;  %v7506_v9 = vld [vmem:[%s8797_s8 + $0x6f4] ss:$8 sps:$4 sm:$0xff]  }
 0x2c6   : > { %5827 = vmatprep.subr.bf16.mxu0 %v7419_v10  ;;  %v7509_v10 = vld [vmem:[%s8797_s8 + $0xdf4] ss:$8 sps:$4 sm:$0xff]  }
 0x2c7   : > { %5516 = vmatmul.mubr.bf16.vlgmr.msra.gmra.mrb[0].mxu1 %v7408_v11  ;;  %v7504_v11 = vld [vmem:[%s8797_s8 + $0x6f0] ss:$8 sps:$4 sm:$0xff]  }
 0x2c8   : > { %5817 = vmatmul.mubr.bf16.vlgmr.msra.gmra.mrb[0].mxu0 %v7414_v12  ;;  %5527 = vmatpush1.bf16.msra.mxu1 %v7411_v13  ;;  %v7507_v12 = vld [vmem:[%s8797_s8 + $0xdf0] ss:$8 sps:$4 sm:$0xff]   ;;  %v7518_v13 = vld [vmem:[%s8797_s8 + $0xe04] ss:$8 sps:$4 sm:$0xff]  }
 0x2c9   : > { %5828 = vmatpush1.bf16.msra.mxu0 %v7417_v14  ;;  %5528 = vmatprep.subr.bf16.mxu1 %v7422_v15  ;;  %v7510_v14 = vld [vmem:[%s8795_s6 + $0x30] ss:$116 sps:$4 sm:$0xff]   ;;  %v7513_v15 = vld [vmem:[%s8795_s6 + $0x68] ss:$116 sps:$4 sm:$0xff]  }
 0x2ca   : > { %5829 = vmatprep.subr.bf16.mxu0 %v7425_v16  ;;  %5558 = vmatprep.mubr.bf16.mxu1 %v7512_v17  ;;  %v7516_v16 = vld [vmem:[%s8797_s8 + $0xe00] ss:$8 sps:$4 sm:$0xff]   ;;  %v7521_v17 = vld [vmem:[%s8797_s8 + $0xe14] ss:$8 sps:$4 sm:$0xff]  }
 0x2cb   : > { %5859 = vmatprep.mubr.bf16.mxu0 %v7515_v18  ;;  %v7519_v18 = vld [vmem:[%s8797_s8 + $0xe10] ss:$8 sps:$4 sm:$0xff]  }
 0x2cc   : > { %5529 = vmatpush1.bf16.msra.mxu1 %v7420_v19  ;;  %v7630_v19 = vmov 0  }
 0x2cd   : > { %5830 = vmatpush1.bf16.msra.mxu0 %v7423_v20  ;;  %5530 = vmatprep.subr.bf16.mxu1 %v7428_v21  ;;  %v7524_v20 = vld [vmem:[%s8797_s8 + $0xe24] ss:$8 sps:$4 sm:$0xff]   ;;  %v7522_v21 = vld [vmem:[%s8797_s8 + $0xe20] ss:$8 sps:$4 sm:$0xff]  }
 0x2ce   : > { %5831 = vmatprep.subr.bf16.mxu0 %v7431_v22  ;;  %v7527_v22 = vld [vmem:[%s8797_s8 + $0xe34] ss:$8 sps:$4 sm:$0xff]  }
 0x2d0   : > { %5531 = vmatpush1.bf16.msra.mxu1 %v7426_v23  ;;  %v7525_v23 = vld [vmem:[%s8797_s8 + $0xe30] ss:$8 sps:$4 sm:$0xff]  }
 0x2d1   : > { %5832 = vmatpush1.bf16.msra.mxu0 %v7429_v24  ;;  %5532 = vmatprep.subr.bf16.mxu1 %v7434_v25  ;;  %v7530_v24 = vld [vmem:[%s8797_s8 + $0xe44] ss:$8 sps:$4 sm:$0xff]   ;;  %v7528_v25 = vld [vmem:[%s8797_s8 + $0xe40] ss:$8 sps:$4 sm:$0xff]  }
 0x2d2   : > { %5833 = vmatprep.subr.bf16.mxu0 %v7437_v26  ;;  %v7533_v26 = vld [vmem:[%s8797_s8 + $0xe54] ss:$8 sps:$4 sm:$0xff]  }
 0x2d4   : > { %5533 = vmatpush1.bf16.msra.mxu1 %v7432_v27  ;;  %v7531_v27 = vld [vmem:[%s8797_s8 + $0xe50] ss:$8 sps:$4 sm:$0xff]  }
 0x2d5   : > { %5834 = vmatpush1.bf16.msra.mxu0 %v7435_v28  ;;  %5534 = vmatprep.subr.bf16.mxu1 %v7440_v29  ;;  %v7536_v28 = vld [vmem:[%s8797_s8 + $0xe64] ss:$8 sps:$4 sm:$0xff]   ;;  %v7534_v29 = vld [vmem:[%s8797_s8 + $0xe60] ss:$8 sps:$4 sm:$0xff]  }
 0x2d6   : > { %5835 = vmatprep.subr.bf16.mxu0 %v7443_v30  ;;  %v7539_v30 = vld [vmem:[%s8797_s8 + $0xe74] ss:$8 sps:$4 sm:$0xff]  }
 0x2d8   : > { %5535 = vmatpush1.bf16.msra.mxu1 %v7438_v31  ;;  %v7537_v31 = vld [vmem:[%s8797_s8 + $0xe70] ss:$8 sps:$4 sm:$0xff]  }
 0x2d9   : > { %5836 = vmatpush1.bf16.msra.mxu0 %v7441_v32  ;;  %5536 = vmatprep.subr.bf16.mxu1 %v7446_v33  ;;  %v7540_v32 = vld [vmem:[%s8795_s6 + $0x70] ss:$116 sps:$4 sm:$0xff]  }
 0x2da   : > { %5837 = vmatprep.subr.bf16.mxu0 %v7449_v34 }
 0x2dc   : > { %5537 = vmatpush1.bf16.msra.mxu1 %v7444_v35 }
 0x2dd   : > { %5838 = vmatpush1.bf16.msra.mxu0 %v7447_v36  ;;  %5538 = vmatprep.subr.bf16.mxu1 %v7452_v37  ;;  %v2304_v37 = vld [vmem:[%s8801_s17] sm:$0xff] }
 0x2de   : > { %5839 = vmatprep.subr.bf16.mxu0 %v7455_v38 }
 0x2e0   : > { %5539 = vmatpush1.bf16.msra.mxu1 %v7450_v39 }
 0x2e1   : > { %5840 = vmatpush1.bf16.msra.mxu0 %v7453_v40  ;;  %5540 = vmatprep.subr.bf16.mxu1 %v7458_v41  ;;  %v2305_v40 = vld [vmem:[%s8801_s17 + $0x8] sm:$0xff] }
 0x2e2   : > { %5841 = vmatprep.subr.bf16.mxu0 %v7461_v42 }
 0x2e4   : > { %5541 = vmatpush1.bf16.msra.mxu1 %v7456_v43  ;;  %v2306_v43 = vld [vmem:[%s8801_s17 + $0x10] sm:$0xff] }
 0x2e5   : > { %5842 = vmatpush1.bf16.msra.mxu0 %v7459_v44  ;;  %5542 = vmatprep.subr.bf16.mxu1 %v7464_v45 }
 0x2e6   : > { %5843 = vmatprep.subr.bf16.mxu0 %v7467_v46 }
 0x2e8   : > { %5543 = vmatpush1.bf16.msra.mxu1 %v7462_v47  ;;  %v2307_v47 = vld [vmem:[%s8801_s17 + $0x18] sm:$0xff] }
 0x2e9   : > { %5844 = vmatpush1.bf16.msra.mxu0 %v7465_v48  ;;  %5544 = vmatprep.subr.bf16.mxu1 %v7470_v49 }
 0x2ea   : > { %5845 = vmatprep.subr.bf16.mxu0 %v7473_v50 }
 0x2ec   : > { %5545 = vmatpush1.bf16.msra.mxu1 %v7468_v51 }
 0x2ed   : > { %5846 = vmatpush1.bf16.msra.mxu0 %v7471_v52  ;;  %5546 = vmatprep.subr.bf16.mxu1 %v7476_v53  ;;  %v5931_v53 = vlaneseq (!%p6642_p6) }
 0x2ee   : > { %5847 = vmatprep.subr.bf16.mxu0 %v7479_v54 }
 0x2ef   : > { %v5932_v54 = vshrl.u32 (!%p6642_p6), %v5931_v53, 7 }
 0x2f0   : > { %5547 = vmatpush1.bf16.msra.mxu1 %v7474_v55  ;;  %v5929_v55 = vld [vmem:[%s2289_s30] sm:$0x3] (!%p6642_p6) }
 0x2f1   : > { %5848 = vmatpush1.bf16.msra.mxu0 %v7477_v56  ;;  %5548 = vmatprep.subr.bf16.mxu1 %v7482_v57  ;;  %v5933_v57 = vsub.s32 (!%p6642_p6), 0, %v5932_v54 }
 0x2f2   : > { %5849 = vmatprep.subr.bf16.mxu0 %v7485_v58  ;;  %v5937_v58 = vsub.s32 (!%p6642_p6), 1, %v5932_v54 }
 0x2f4   : > { %5549 = vmatpush1.bf16.msra.mxu1 %v7480_v59 }
 0x2f5   : > { %5850 = vmatpush1.bf16.msra.mxu0 %v7483_v60  ;;  %5550 = vmatprep.subr.bf16.mxu1 %v7488_v61 }
 0x2f6   : > { %5851 = vmatprep.subr.bf16.mxu0 %v7491_v62  ;;  %v5934_v62 = vrot.slane (!%p6642_p6), %v5929_v55, %v5933_v57 }
 0x2f8   : > { %5551 = vmatpush1.bf16.msra.mxu1 %v7486_v63  ;;  %v5938_v63 = vrot.slane (!%p6642_p6), %v5929_v55, %v5937_v58 }
 0x2f9   : > { %5852 = vmatpush1.bf16.msra.mxu0 %v7489_v0  ;;  %5552 = vmatprep.subr.bf16.mxu1 %v7494_v1  ;;  %v5949_v1 = vld [vmem:[%s8799_s1] sm:$0xff] (!%p6642_p6) }
 0x2fa   : > { %5853 = vmatprep.subr.bf16.mxu0 %v7497_v2 }
 0x2fc   : > { %5553 = vmatpush1.bf16.msra.mxu1 %v7492_v3 }
 0x2fd   : > { %5854 = vmatpush1.bf16.msra.mxu0 %v7495_v4  ;;  %5554 = vmatprep.subr.bf16.mxu1 %v7500_v5  ;;  %v5950_v5 = vld [vmem:[%s8799_s1 + $0x8] sm:$0xff] (!%p6642_p6) }
 0x2fe   : > { %5855 = vmatprep.subr.bf16.mxu0 %v7503_v6  ;;  %v5951_v6 = vld [vmem:[%s8799_s1 + $0x10] sm:$0xff] (!%p6642_p6) }
 0x300   : > { %5555 = vmatpush1.bf16.msra.mxu1 %v7498_v7  ;;  %v5952_v7 = vld [vmem:[%s8799_s1 + $0x18] sm:$0xff] (!%p6642_p6) }
 0x301   : > { %5856 = vmatpush1.bf16.msra.mxu0 %v7501_v8  ;;  %5556 = vmatprep.subr.bf16.mxu1 %v7506_v9 }
 0x302   : > { %5857 = vmatprep.subr.bf16.mxu0 %v7509_v10 }
 0x304   : > { %5557 = vmatpush1.bf16.msra.mxu1 %v7504_v11 }
 0x305   : > { %5858 = vmatpush1.bf16.msra.mxu0 %v7507_v12 }
 0x306   : > { %5870 = vmatprep.subr.bf16.mxu0 %v7518_v13 }
 0x307   : > { %5559 = vmatmul.mubr.bf16.vlgmr.msra.gmra.mrb[0].mxu1 %v7510_v14 }
 0x308   : > { %5860 = vmatmul.mubr.bf16.vlgmr.msra.gmra.mrb[0].mxu0 %v7513_v15 }
 0x309   : > { %5871 = vmatpush1.bf16.msra.mxu0 %v7516_v16  ;;  %5902 = vmatprep.mubr.bf16.mxu0 %v7630_v19 }
 0x30a   : > { %5872 = vmatprep.subr.bf16.mxu0 %v7521_v17 }
 0x30d   : > { %5873 = vmatpush1.bf16.msra.mxu0 %v7519_v18 }
 0x30e   : > { %5874 = vmatprep.subr.bf16.mxu0 %v7524_v20 }
 0x311   : > { %5875 = vmatpush1.bf16.msra.mxu0 %v7522_v21 }
 0x312   : > { %5876 = vmatprep.subr.bf16.mxu0 %v7527_v22 }
 0x315   : > { %5877 = vmatpush1.bf16.msra.mxu0 %v7525_v23 }
 0x316   : > { %5878 = vmatprep.subr.bf16.mxu0 %v7530_v24 }
 0x319   : > { %5879 = vmatpush1.bf16.msra.mxu0 %v7528_v25 }
 0x31a   : > { %5880 = vmatprep.subr.bf16.mxu0 %v7533_v26 }
 0x31d   : > { %5881 = vmatpush1.bf16.msra.mxu0 %v7531_v27 }
 0x31e   : > { %5882 = vmatprep.subr.bf16.mxu0 %v7536_v28 }
 0x321   : > { %5883 = vmatpush1.bf16.msra.mxu0 %v7534_v29 }
 0x322   : > { %5884 = vmatprep.subr.bf16.mxu0 %v7539_v30 }
 0x325   : > { %5885 = vmatpush1.bf16.msra.mxu0 %v7537_v31 }
 0x328   : > { %5903 = vmatmul.mubr.bf16.vlgmr.msra.gmra.mrb[0].mxu0 %v7540_v32 }
 0x3da   : > { %v5560_v33 = vpop.f32.mrb[0].mxu1 }
 0x3db   : > { %v5562_v34 = vpop.f32.mrb[1].mxu1 }
 0x3dc   : > { %v5564_v35 = vpop.f32.mrb[2].mxu1 }
 0x3dd   : > { %v5566_v36 = vpop.f32.mrb[3].mxu1 }
 0x3fb   : > { %v5904_v38 = vpop.f32.mrb[0].mxu0 }
 0x3fc   : > { %v6652_v39 = vadd.f32 %v5904_v38, %v5560_v33  ;;  %v5906_v41 = vpop.f32.mrb[1].mxu0 }
 0x3fd   : > { %v6653_v42 = vadd.f32 %v5906_v41, %v5562_v34  ;;  %v5908_v44 = vpop.f32.mrb[2].mxu0  ;;  %5924 = sbr.rel (%p6642_p6) target bundleno = 1042 (0x412), region = 131 }
 0x3fe   : > { %v5913_v45 = vadd.f32 %v6652_v39, %v2304_v37  ;;  %v6654_v46 = vadd.f32 %v5908_v44, %v5564_v35  ;;  %v5910_v48 = vpop.f32.mrb[3].mxu0 }
 0x3ff   : > { %v5914_v49 = vadd.f32 %v6653_v42, %v2305_v40  ;;  %v6655_v50 = vadd.f32 %v5910_v48, %v5566_v36 }
 0x400   : > { %5917 = vst [vmem:[%s8801_s17] sm:$0xff] %v5913_v45  ;;  %v5915_v51 = vadd.f32 %v6654_v46, %v2306_v43 }
 0x401   : > { %5918 = vst [vmem:[%s8801_s17 + $0x8] sm:$0xff] %v5914_v49  ;;  %v5916_v52 = vadd.f32 %v6655_v50, %v2307_v47 }
 0x402   : > { %5919 = vst [vmem:[%s8801_s17 + $0x10] sm:$0xff] %v5915_v51 }
 0x403   : > { %5920 = vst [vmem:[%s8801_s17 + $0x18] sm:$0xff] %v5916_v52 }
 0x407   : > { %v5925_v56 = vld [vmem:[%s8801_s17] sm:$0xff] }
 0x408   : > { %v5926_v59 = vld [vmem:[%s8801_s17 + $0x8] sm:$0xff]  ;;  %v5941_v0 = vadd.f32 %v5934_v62, %v5925_v56 }
 0x409   : > { %v5927_v60 = vld [vmem:[%s8801_s17 + $0x10] sm:$0xff]  ;;  %v5942_v2 = vadd.f32 %v5938_v63, %v5926_v59 }
 0x40a   : > { %v5928_v61 = vld [vmem:[%s8801_s17 + $0x18] sm:$0xff]  ;;  %v5943_v3 = vadd.f32 %v5934_v62, %v5927_v60  ;;  %v5945_v8 = vmax.f32 %v5941_v0, 0.0 }
 0x40b   : > { %v5944_v4 = vadd.f32 %v5938_v63, %v5928_v61  ;;  %v5946_v9 = vmax.f32 %v5942_v2, 0.0 }
 0x40c   : > { %v5947_v10 = vmax.f32 %v5943_v3, 0.0  ;;  %v5953_v12 = vmul.f32 %v5949_v1, %v5945_v8 }
 0x40d   : > { %v5948_v11 = vmax.f32 %v5944_v4, 0.0  ;;  %v5954_v13 = vmul.f32 %v5950_v5, %v5946_v9 }
 0x40e   : > { %v5955_v14 = vmul.f32 %v5951_v6, %v5947_v10  ;;  %5957 = vst [vmem:[%s8801_s17] sm:$0xff] %v5953_v12 }
 0x40f   : > { %v5956_v15 = vmul.f32 %v5952_v7, %v5948_v11  ;;  %5958 = vst [vmem:[%s8801_s17 + $0x8] sm:$0xff] %v5954_v13 }
 0x410   : > { %5959 = vst [vmem:[%s8801_s17 + $0x10] sm:$0xff] %v5955_v14 }
 0x411   : > { %5960 = vst [vmem:[%s8801_s17 + $0x18] sm:$0xff] %v5956_v15 }
 0x412 PF: > { %5967 = sbr.rel (!%p7760_p13) target bundleno = 1050 (0x41a), region = 135  ;;  %s6651_s1 = sshll.u32 (%p7760_p13), %s7615_s22, 4 }
 0x413   : > { %s5973_s9 = scalar_lea.vmem (%p7760_p13), %s9374_s4, %s6651_s1 }
 0x415   : > { %v5986_v16 = vld [vmem:[%s8801_s17] sm:$0xff] (%p7760_p13) }
 0x416   : > { %v5988_v17 = vld [vmem:[%s8801_s17 + $0x8] sm:$0xff] (%p7760_p13)  ;;  %5987 = vst [vmem:[%s5973_s9] sm:$0xff] (%p7760_p13), %v5986_v16 }
 0x417   : > { %v5990_v18 = vld [vmem:[%s8801_s17 + $0x10] sm:$0xff] (%p7760_p13)  ;;  %5989 = vst [vmem:[%s5973_s9 + $0x8] sm:$0xff] (%p7760_p13), %v5988_v17 }
 0x418   : > { %v5992_v19 = vld [vmem:[%s8801_s17 + $0x18] sm:$0xff] (%p7760_p13)  ;;  %5991 = vst [vmem:[%s5973_s9 + $0x20] sm:$0xff] (%p7760_p13), %v5990_v18 }
 0x419   : > { %5993 = vst [vmem:[%s5973_s9 + $0x28] sm:$0xff] %v5992_v19 }
 0x41a PF: > { %s14_s25 = sadd.s32 1, %s7627_s25   ;;  %s9387_s29 = sld [smem:[#allocation6_spill]] }
 0x41b   : > { %p11_p7 = scmp.ge.s32.totalorder %s14_s25, 8   ;;  %s9388_s11 = sld [smem:[#allocation7_spill]] }
 0x41c   : > { %s9389_s15 = smov %s7591_s16  ;;  %s9390_s16 = smov %s7752_s13 }
 0x41d   : > { %s9391_s17 = smov %s7599_s18  ;;  %s9392_s18 = smov %s7749_s12 }
 0x41e   : > { %s9393_s19 = smov %s7607_s20  ;;  %s9394_s20 = smov %s7733_s7 }
 0x41f   : > { %s9395_s21 = smov %s7619_s23  ;;  %s9396_s22 = smov %s7623_s24 }
 0x420   : > { %s9397_s23 = smov %s9387_s29  ;;  %13 = sbr.rel (!%p11_p7) target bundleno = 9 (0x9), region = 214 }
 0x421   : > { %s9398_s24 = smov %s9388_s11 }

</bundles_post_ra>
